<compile_context>
chip_gen: v7x
topology: tpu7x:2x2x1
jax: 0.10.0
libtpu: 0.0.40
codegen_flags: <defaults>
</compile_context>

<pallas_src>
from functools import partial

import jax
import jax.numpy as jnp
from jax.experimental import pallas as pl
from jax.experimental.pallas import tpu as pltpu


_MXU_DTYPE = jnp.bfloat16  # MXU operand dtype (accumulation stays f32)


# --------------------------------------------------------------------------- #
# small in-kernel helpers (all f32 / VPU unless noted)
# --------------------------------------------------------------------------- #
def _layernorm(x, g, b, eps=1e-5):
    mu = jnp.mean(x, axis=-1, keepdims=True)
    var = jnp.mean((x - mu) ** 2, axis=-1, keepdims=True)
    return (x - mu) * jax.lax.rsqrt(var + eps) * g + b


def _gelu_tanh(x):
    # tanh-approx GELU: the transcendental runs in the EUP slot (free relative to VALU).
    # TODO(synk): PyTorch nn.GELU() defaults to the exact erf form; tanh approximation
    # deviates by up to ~1e-3 in value.
    c = 0.7978845608028654  # sqrt(2/pi)
    return 0.5 * x * (1.0 + jnp.tanh(c * (x + 0.044715 * x * x * x)))


def _small_matmul(x, w):
    # (N, Cin) @ (Cin, Cout) for tiny Cin (2/4): unrolled rank-1 accumulate on the VPU.
    cin = x.shape[-1]
    acc = x[:, 0:1] * w[0:1, :]
    for c in range(1, cin):
        acc = acc + x[:, c:c + 1] * w[c:c + 1, :]
    return acc


def _mxu_dot(x, w):
    return jnp.dot(x.astype(_MXU_DTYPE), w.astype(_MXU_DTYPE),
                   preferred_element_type=jnp.float32)


def _matmul_any(x, w):
    return _small_matmul(x, w) if x.shape[-1] <= 8 else _mxu_dot(x, w)


def _sub_normalize(a, b):
    e = a - b
    nrm = jnp.sqrt(jnp.sum(e * e, axis=-1, keepdims=True))
    return e / (nrm + 1e-7)


# --------------------------------------------------------------------------- #
# the fused kernel: one program per (batch, Q-tile, camera)
#   camera axis is the innermost "arbitrary" (reduction) axis; per-head running
#   softmax state (m, l, acc) lives in VMEM scratch and persists across cameras.
# --------------------------------------------------------------------------- #
def _make_fused_kernel(scale, heads, dim_head):
    def kernel(d_ref, c_ref, f_ref, x_ref, wr_ref,
               emb_ref, bn_ref, fw_ref, ln_ref, qw_ref, qb_ref,
               pw_ref, w1_ref, b1_ref, w2_ref, vec_ref,
               o_ref, m_scr, l_scr, acc_scr):
        ni = pl.program_id(2)
        n_cam = pl.num_programs(2)

        # ---- init the online-softmax accumulators at the first camera -------
        @pl.when(ni == 0)
        def _():
            m_scr[...] = jnp.full(m_scr.shape, -jnp.inf, jnp.float32)
            l_scr[...] = jnp.zeros(l_scr.shape, jnp.float32)
            acc_scr[...] = jnp.zeros(acc_scr.shape, jnp.float32)

        # ---- camera-center embedding (1x1 conv on the 4-vec) ----------------
        cvec = c_ref[0, 0]                                   # (1, 4)
        c_embed = _small_matmul(cvec, emb_ref[0:4, :])       # (1, dim)

        # ---- image-plane direction embedding --------------------------------
        drows = d_ref[0, 0]                                  # (K, 4)
        d_embed = _small_matmul(drows, emb_ref[4:8, :])      # (K, dim)
        img_embed = _sub_normalize(d_embed, c_embed)         # (K, dim)

        # ---- BEV positional embedding (this Q tile) --------------------------
        world = wr_ref[0]                                    # (QB, 2)
        w_embed = _small_matmul(world, emb_ref[8:10, :]) + emb_ref[10:11, :]
        bev_embed = _sub_normalize(w_embed, c_embed)         # (QB, dim)
        q_in = bev_embed + x_ref[0]                          # (QB, dim)

        # ---- feature projections: folded BN (inference) + ReLU + 1x1 conv ---
        # TODO(synk): BatchNorm2d folded with running stats (inference mode);
        # PyTorch training-mode batch statistics are not reproduced.
        feat = f_ref[0, 0]                                   # (K, feat_dim)
        fp = jnp.maximum(feat * bn_ref[0:1, :] + bn_ref[1:2, :], 0.0)
        fl = jnp.maximum(feat * bn_ref[2:3, :] + bn_ref[3:4, :], 0.0)
        k_in = img_embed + _matmul_any(fp, fw_ref[0])        # (K, dim)
        val_in = _matmul_any(fl, fw_ref[1])                  # (K, dim)

        # ---- LayerNorm + Q/K/V linears (lane-dense, head-packed) ------------
        qn = _layernorm(q_in, ln_ref[0:1, :], ln_ref[1:2, :])
        kn = _layernorm(k_in, ln_ref[2:3, :], ln_ref[3:4, :])
        vn = _layernorm(val_in, ln_ref[4:5, :], ln_ref[5:6, :])

        # attention scale folded into q:  scale * (q . k) == (scale*q) . k
        q_i = ((_mxu_dot(qn, qw_ref[0]) + qb_ref[0]) * scale).astype(_MXU_DTYPE)
        k_i = (_mxu_dot(kn, qw_ref[1]) + qb_ref[1]).astype(_MXU_DTYPE)
        v_i = (_mxu_dot(vn, qw_ref[2]) + qb_ref[2]).astype(_MXU_DTYPE)

        # ---- online softmax over cameras (joint over n*K keys), per head ----
        m_old = m_scr[...]                                   # (QB, heads)
        l_old = l_scr[...]                                   # (QB, heads)
        acc_old = acc_scr[...]                               # (QB, inner)

        new_m, new_l, new_acc = [], [], []
        for h in range(heads):
            lo = h * dim_head
            s = jax.lax.dot_general(                          # (QB, K) f32
                q_i[:, lo:lo + dim_head], k_i[:, lo:lo + dim_head],
                (((1,), (1,)), ((), ())), preferred_element_type=jnp.float32)
            m_h = jnp.maximum(m_old[:, h:h + 1], jnp.max(s, axis=-1, keepdims=True))
            alpha = jnp.exp(m_old[:, h:h + 1] - m_h)
            p = jnp.exp(s - m_h)
            pv = jnp.dot(p.astype(_MXU_DTYPE), v_i[:, lo:lo + dim_head],
                         preferred_element_type=jnp.float32)
            new_m.append(m_h)
            new_l.append(alpha * l_old[:, h:h + 1] + jnp.sum(p, axis=-1, keepdims=True))
            new_acc.append(alpha * acc_old[:, lo:lo + dim_head] + pv)

        # concatenate per-head pieces in registers -> single full-lane stores
        l_new = jnp.concatenate(new_l, axis=-1)              # (QB, heads)
        acc_new = jnp.concatenate(new_acc, axis=-1)          # (QB, inner)
        m_scr[...] = jnp.concatenate(new_m, axis=-1)
        l_scr[...] = l_new
        acc_scr[...] = acc_new

        # ---- last camera: normalize + proj + skip + prenorm + MLP + postnorm
        @pl.when(ni == n_cam - 1)
        def _():
            # EUP approximate reciprocal (~1e-3 relative error, inference-grade).
            inv_l = pl.reciprocal(l_new, approx=True)        # (QB, heads)
            a = jnp.concatenate(
                [acc_new[:, h * dim_head:(h + 1) * dim_head] * inv_l[:, h:h + 1]
                 for h in range(heads)], axis=-1)            # (QB, inner)
            z = _mxu_dot(a, pw_ref[...]) + vec_ref[0:1, :]
            z = z + x_ref[0]                                 # skip connection
            z = _layernorm(z, vec_ref[1:2, :], vec_ref[2:3, :])
            hid = _gelu_tanh(_mxu_dot(z, w1_ref[...]) + b1_ref[...])
            z = z + _mxu_dot(hid, w2_ref[...]) + vec_ref[3:4, :]
            z = _layernorm(z, vec_ref[4:5, :], vec_ref[5:6, :])
            o_ref[0] = z

    return kernel


# --------------------------------------------------------------------------- #
# geometry helper (tiny glue, plain JAX)
# --------------------------------------------------------------------------- #
def generate_grid(height, width):
    xs = jnp.linspace(0.0, 1.0, width)
    ys = jnp.linspace(0.0, 1.0, height)
    gx, gy = jnp.meshgrid(xs, ys, indexing='xy')             # (h, w) each
    indices = jnp.stack([gx, gy], axis=0)                    # (2, h, w)
    indices = jnp.concatenate([indices, jnp.ones((1, height, width))], axis=0)
    return indices[None].astype(jnp.float32)                 # (1, 3, h, w)


def _pick_q_block(Q):
    if Q <= 256:
        return Q
    for cand in (256, 128, 64, 32, 16, 8):
        if Q % cand == 0:
            return cand
    return Q


def _vmem_limit_bytes():
    # ~75% of physical VMEM, capped at 100 MiB:  ~96 MiB on v5e/v6e, ~48 MiB on v7x.
    try:
        cap = int(pltpu.get_tpu_info().vmem_capacity_bytes)
    except Exception:
        cap = 64 * 1024 * 1024
    return int(min(cap * 3 // 4, 100 * 1024 * 1024))


# --------------------------------------------------------------------------- #
# full CrossViewAttention forward (a single pallas_call)
# --------------------------------------------------------------------------- #
def cross_view_attention(params, x, bev_grid, feature, I_inv, E_inv,
                         heads, dim_head):
    b, n, feat_dim, h, w = feature.shape
    dim = x.shape[1]
    H, W = x.shape[2], x.shape[3]
    Q, K = H * W, h * w
    inner = heads * dim_head
    scale = dim_head ** -0.5

    # ---- tiny camera geometry (negligible work, stays in plain JAX) ---------
    pixel_flat = params['image_plane'].reshape(1, 1, 3, K)
    cam = jnp.matmul(I_inv, pixel_flat)                      # (b, n, 3, K)
    cam = jnp.concatenate([cam, jnp.ones((b, n, 1, K), jnp.float32)], axis=2)
    d = jnp.matmul(E_inv, cam)                               # (b, n, 4, K)
    d_rows = d.transpose(0, 1, 3, 2)                         # (b, n, K, 4)
    c_vec = E_inv[..., -1][:, :, None, :]                    # (b, n, 1, 4)
    feat_rows = feature.transpose(0, 1, 3, 4, 2).reshape(b, n, K, feat_dim)
    x_rows = x.transpose(0, 2, 3, 1).reshape(b, Q, dim)      # 'b d H W -> b (H W) d'
    world_rows = bev_grid[:2].reshape(2, Q).T.reshape(1, Q, 2)

    # ---- packed weights ------------------------------------------------------
    fp_scale = params['fproj_bn_g'] * jax.lax.rsqrt(params['fproj_bn_v'] + 1e-5)
    fp_shift = params['fproj_bn_b'] - params['fproj_bn_m'] * fp_scale
    fl_scale = params['flin_bn_g'] * jax.lax.rsqrt(params['flin_bn_v'] + 1e-5)
    fl_shift = params['flin_bn_b'] - params['flin_bn_m'] * fl_scale
    bn_pack = jnp.stack([fp_scale, fp_shift, fl_scale, fl_shift], axis=0)   # (4, fd)

    emb_pack = jnp.concatenate(
        [params['cam_w'], params['img_w'], params['bev_w'],
         params['bev_b'].reshape(1, dim)], axis=0)                          # (11, dim)
    fw_pack = jnp.stack([params['fproj_w'], params['flin_w']], axis=0)      # (2, fd, dim)
    ln_pack = jnp.stack([params['q_ln_g'], params['q_ln_b'],
                         params['k_ln_g'], params['k_ln_b'],
                         params['v_ln_g'], params['v_ln_b']], axis=0)       # (6, dim)
    qkv_w = jnp.stack([params['q_w'], params['k_w'], params['v_w']], axis=0)
    qkv_b = jnp.stack([params['q_b'], params['k_b'], params['v_b']],
                      axis=0).reshape(3, 1, inner)
    vec_pack = jnp.stack([params['proj_b'], params['pre_g'], params['pre_b'],
                          params['mlp_b2'], params['post_g'], params['post_b']],
                         axis=0)                                            # (6, dim)

    qb = _pick_q_block(Q)
    nq = Q // qb
    # NOTE: camera-side work (img_embed, key/val projections) is recomputed per Q tile;
    # at demo/production CVT shapes nq is 1-5 and this is cheaper than an extra HBM trip.
    grid = (b, nq, n)

    z = pl.pallas_call(
        _make_fused_kernel(scale, heads, dim_head),
        out_shape=jax.ShapeDtypeStruct((b, Q, dim), jnp.float32),
        grid=grid,
        in_specs=[
            pl.BlockSpec((1, 1, K, 4), lambda bi, qi, ni: (bi, ni, 0, 0)),          # d_rows
            pl.BlockSpec((1, 1, 1, 4), lambda bi, qi, ni: (bi, ni, 0, 0)),          # c_vec
            pl.BlockSpec((1, 1, K, feat_dim), lambda bi, qi, ni: (bi, ni, 0, 0)),   # feat
            pl.BlockSpec((1, qb, dim), lambda bi, qi, ni: (bi, qi, 0)),             # x_rows
            pl.BlockSpec((1, qb, 2), lambda bi, qi, ni: (0, qi, 0)),                # world
            pl.BlockSpec((11, dim), lambda bi, qi, ni: (0, 0)),                     # emb_pack
            pl.BlockSpec((4, feat_dim), lambda bi, qi, ni: (0, 0)),                 # bn_pack
            pl.BlockSpec((2, feat_dim, dim), lambda bi, qi, ni: (0, 0, 0)),         # fw_pack
            pl.BlockSpec((6, dim), lambda bi, qi, ni: (0, 0)),                      # ln_pack
            pl.BlockSpec((3, dim, inner), lambda bi, qi, ni: (0, 0, 0)),            # qkv_w
            pl.BlockSpec((3, 1, inner), lambda bi, qi, ni: (0, 0, 0)),              # qkv_b
            pl.BlockSpec((inner, dim), lambda bi, qi, ni: (0, 0)),                  # proj_w
            pl.BlockSpec((dim, 2 * dim), lambda bi, qi, ni: (0, 0)),                # mlp_w1
            pl.BlockSpec((1, 2 * dim), lambda bi, qi, ni: (0, 0)),                  # mlp_b1
            pl.BlockSpec((2 * dim, dim), lambda bi, qi, ni: (0, 0)),                # mlp_w2
            pl.BlockSpec((6, dim), lambda bi, qi, ni: (0, 0)),                      # vec_pack
        ],
        out_specs=pl.BlockSpec((1, qb, dim), lambda bi, qi, ni: (bi, qi, 0)),
        scratch_shapes=[pltpu.VMEM((qb, heads), jnp.float32),     # running row-max (m)
                        pltpu.VMEM((qb, heads), jnp.float32),     # running denom (l)
                        pltpu.VMEM((qb, inner), jnp.float32)],    # running PV accumulator
        compiler_params=pltpu.CompilerParams(
            dimension_semantics=("parallel", "parallel", "arbitrary"),
            vmem_limit_bytes=_vmem_limit_bytes()),
    )(d_rows, c_vec, feat_rows, x_rows, world_rows,
      emb_pack, bn_pack, fw_pack, ln_pack, qkv_w, qkv_b,
      params['proj_w'], params['mlp_w1'], params['mlp_b1'].reshape(1, 2 * dim),
      params['mlp_w2'], vec_pack)

    return z.reshape(b, H, W, dim).transpose(0, 3, 1, 2)     # 'b (H W) d -> b d H W'


# --------------------------------------------------------------------------- #
# deterministic parameter construction
# --------------------------------------------------------------------------- #
def make_params(key, feat_dim, dim, heads, dim_head, feat_h, feat_w,
                image_height, image_width):
    def nrm(k, shape, s=0.1):
        return s * jax.random.normal(k, shape, jnp.float32)

    ks = iter(jax.random.split(key, 32))
    p = {}
    p['cam_w'] = nrm(next(ks), (4, dim))
    p['img_w'] = nrm(next(ks), (4, dim))
    p['bev_w'] = nrm(next(ks), (2, dim))
    p['bev_b'] = nrm(next(ks), (dim,))
    for name in ('fproj', 'flin'):
        p[f'{name}_bn_g'] = 1.0 + nrm(next(ks), (feat_dim,))
        p[f'{name}_bn_b'] = nrm(next(ks), (feat_dim,))
        p[f'{name}_bn_m'] = nrm(next(ks), (feat_dim,))
        p[f'{name}_bn_v'] = 1.0 + jnp.abs(nrm(next(ks), (feat_dim,)))
        p[f'{name}_w'] = nrm(next(ks), (feat_dim, dim))
    inner = heads * dim_head
    for name in ('q', 'k', 'v'):
        p[f'{name}_ln_g'] = jnp.ones((dim,), jnp.float32)
        p[f'{name}_ln_b'] = jnp.zeros((dim,), jnp.float32)
        p[f'{name}_w'] = nrm(next(ks), (dim, inner))
        p[f'{name}_b'] = nrm(next(ks), (inner,))
    p['proj_w'] = nrm(next(ks), (inner, dim))
    p['proj_b'] = nrm(next(ks), (dim,))
    p['pre_g'] = jnp.ones((dim,), jnp.float32)
    p['pre_b'] = jnp.zeros((dim,), jnp.float32)
    p['mlp_w1'] = nrm(next(ks), (dim, 2 * dim))
    p['mlp_b1'] = nrm(next(ks), (2 * dim,))
    p['mlp_w2'] = nrm(next(ks), (2 * dim, dim))
    p['mlp_b2'] = nrm(next(ks), (dim,))
    p['post_g'] = jnp.ones((dim,), jnp.float32)
    p['post_b'] = jnp.zeros((dim,), jnp.float32)

    plane = generate_grid(feat_h, feat_w)                    # (1, 3, h, w)
    plane = plane.at[:, 0].multiply(float(image_width))
    plane = plane.at[:, 1].multiply(float(image_height))
    p['image_plane'] = plane[None]                           # (1, 1, 3, h, w)
    return p


# --------------------------------------------------------------------------- #
if __name__ == "__main__":
    b, n = 2, 2                   # batch*time, cameras
    feat_dim = 16                 # input image-feature channels
    dim = 128                     # BEV / attention dim (lane-dense output stores)
    heads, dim_head = 4, 32       # module defaults -> inner = 128
    feat_h, feat_w = 8, 8         # image feature spatial  (K = 64)
    H, W = 8, 8                   # BEV spatial            (Q = 64)
    image_height, image_width = 64, 64

    key = jax.random.PRNGKey(0)
    kp, kx, kf, ki, ke = jax.random.split(key, 5)

    params = make_params(kp, feat_dim, dim, heads, dim_head,
                         feat_h, feat_w, image_height, image_width)

    x = 0.1 * jax.random.normal(kx, (b, dim, H, W), jnp.float32)
    feature = 0.1 * jax.random.normal(kf, (b, n, feat_dim, feat_h, feat_w), jnp.float32)
    I_inv = jnp.eye(3, dtype=jnp.float32)[None, None] + \
        0.01 * jax.random.normal(ki, (b, n, 3, 3), jnp.float32)
    E_inv = jnp.eye(4, dtype=jnp.float32)[None, None] + \
        0.01 * jax.random.normal(ke, (b, n, 4, 4), jnp.float32)

    # BEVEmbedding.grid stand-in: world coordinates, shape (3, H, W); only [:2] used.
    gx, gy = jnp.meshgrid(jnp.linspace(-10.0, 10.0, W),
                          jnp.linspace(-10.0, 10.0, H), indexing='xy')
    bev_grid = jnp.stack([gx, gy, jnp.ones_like(gx)], axis=0).astype(jnp.float32)

    fwd = jax.jit(partial(cross_view_attention, heads=heads, dim_head=dim_head))
    out = fwd(params, x, bev_grid, feature, I_inv, E_inv)
    out = jax.block_until_ready(out)
    assert out.shape == (b, dim, H, W), out.shape
    assert bool(jnp.all(jnp.isfinite(out)))
    print("KERNEL_OK")
</pallas_src>

<mosaic_0001>
module attributes {stable_mosaic.version = 11 : i64} {
  func.func @kernel(%arg0: i32, %arg1: i32, %arg2: i32, %arg3: memref<1x1x64x4xf32, #tpu.memory_space<vmem>>, %arg4: memref<1x1x1x4xf32, #tpu.memory_space<vmem>>, %arg5: memref<1x1x64x16xf32, #tpu.memory_space<vmem>>, %arg6: memref<1x64x128xf32, #tpu.memory_space<vmem>>, %arg7: memref<1x64x2xf32, #tpu.memory_space<vmem>>, %arg8: memref<11x128xf32, #tpu.memory_space<vmem>>, %arg9: memref<4x16xf32, #tpu.memory_space<vmem>>, %arg10: memref<2x16x128xf32, #tpu.memory_space<vmem>>, %arg11: memref<6x128xf32, #tpu.memory_space<vmem>>, %arg12: memref<3x128x128xf32, #tpu.memory_space<vmem>>, %arg13: memref<3x1x128xf32, #tpu.memory_space<vmem>>, %arg14: memref<128x128xf32, #tpu.memory_space<vmem>>, %arg15: memref<128x256xf32, #tpu.memory_space<vmem>>, %arg16: memref<1x256xf32, #tpu.memory_space<vmem>>, %arg17: memref<256x128xf32, #tpu.memory_space<vmem>>, %arg18: memref<6x128xf32, #tpu.memory_space<vmem>>, %arg19: memref<1x64x128xf32, #tpu.memory_space<vmem>>, %arg20: memref<64x4xf32, #tpu.memory_space<vmem>>, %arg21: memref<64x4xf32, #tpu.memory_space<vmem>>, %arg22: memref<64x128xf32, #tpu.memory_space<vmem>>) attributes {dimension_semantics = [#tpu.dimension_semantics<parallel>, #tpu.dimension_semantics<parallel>, #tpu.dimension_semantics<arbitrary>], iteration_bounds = array<i64: 2, 1, 2>, scalar_prefetch = 0 : i64, scratch_operands = 3 : i64, tpu.core_type = #tpu.core_type<tc>, window_params = [{transform_indices = @transform_0, window_bounds = array<i64: 1, 1, 64, 4>}, {transform_indices = @transform_1, window_bounds = array<i64: 1, 1, 1, 4>}, {transform_indices = @transform_2, window_bounds = array<i64: 1, 1, 64, 16>}, {transform_indices = @transform_3, window_bounds = array<i64: 1, 64, 128>}, {transform_indices = @transform_4, window_bounds = array<i64: 1, 64, 2>}, {pipeline_mode = #tpu.pipeline_mode<synchronous>, transform_indices = @transform_5, window_bounds = array<i64: 11, 128>}, {pipeline_mode = #tpu.pipeline_mode<synchronous>, transform_indices = @transform_6, window_bounds = array<i64: 4, 16>}, {pipeline_mode = #tpu.pipeline_mode<synchronous>, transform_indices = @transform_7, window_bounds = array<i64: 2, 16, 128>}, {pipeline_mode = #tpu.pipeline_mode<synchronous>, transform_indices = @transform_8, window_bounds = array<i64: 6, 128>}, {pipeline_mode = #tpu.pipeline_mode<synchronous>, transform_indices = @transform_9, window_bounds = array<i64: 3, 128, 128>}, {pipeline_mode = #tpu.pipeline_mode<synchronous>, transform_indices = @transform_10, window_bounds = array<i64: 3, 1, 128>}, {pipeline_mode = #tpu.pipeline_mode<synchronous>, transform_indices = @transform_11, window_bounds = array<i64: 128, 128>}, {pipeline_mode = #tpu.pipeline_mode<synchronous>, transform_indices = @transform_12, window_bounds = array<i64: 128, 256>}, {pipeline_mode = #tpu.pipeline_mode<synchronous>, transform_indices = @transform_13, window_bounds = array<i64: 1, 256>}, {pipeline_mode = #tpu.pipeline_mode<synchronous>, transform_indices = @transform_14, window_bounds = array<i64: 256, 128>}, {pipeline_mode = #tpu.pipeline_mode<synchronous>, transform_indices = @transform_15, window_bounds = array<i64: 6, 128>}, {transform_indices = @transform_16, window_bounds = array<i64: 1, 64, 128>}]} {
    %c0_i32 = arith.constant 0 : i32
    %0 = arith.cmpi eq, %arg2, %c0_i32 : i32
    %1 = arith.extui %0 : i1 to i32
    %c0_i32_0 = arith.constant 0 : i32
    %2 = arith.cmpi ne, %1, %c0_i32_0 : i32
    scf.if %2 {
      %cst_118 = arith.constant 0xFF800000 : f32
      %336 = vector.broadcast %cst_118 : f32 to vector<64x4xf32>
      %c0_119 = arith.constant 0 : index
      %c0_120 = arith.constant 0 : index
      %337 = vector.load %arg20[%c0_119, %c0_120] : memref<64x4xf32, #tpu.memory_space<vmem>>, vector<64x4xf32>
      tpu.vector_store %arg20[%c0_119, %c0_120], %336 {strides = array<i32>} : memref<64x4xf32, #tpu.memory_space<vmem>>, vector<64x4xf32>,
      %cst_121 = arith.constant 0.000000e+00 : f32
      %338 = vector.broadcast %cst_121 : f32 to vector<64x4xf32>
      %c0_122 = arith.constant 0 : index
      %c0_123 = arith.constant 0 : index
      %339 = vector.load %arg21[%c0_122, %c0_123] : memref<64x4xf32, #tpu.memory_space<vmem>>, vector<64x4xf32>
      tpu.vector_store %arg21[%c0_122, %c0_123], %338 {strides = array<i32>} : memref<64x4xf32, #tpu.memory_space<vmem>>, vector<64x4xf32>,
      %cst_124 = arith.constant 0.000000e+00 : f32
      %340 = vector.broadcast %cst_124 : f32 to vector<64x128xf32>
      %c0_125 = arith.constant 0 : index
      %c0_126 = arith.constant 0 : index
      %341 = vector.load %arg22[%c0_125, %c0_126] : memref<64x128xf32, #tpu.memory_space<vmem>>, vector<64x128xf32>
      tpu.vector_store %arg22[%c0_125, %c0_126], %340 {strides = array<i32>} : memref<64x128xf32, #tpu.memory_space<vmem>>, vector<64x128xf32>,
    } else {
    }
    %c0 = arith.constant 0 : index
    %c0_1 = arith.constant 0 : index
    %c0_2 = arith.constant 0 : index
    %c0_3 = arith.constant 0 : index
    %3 = vector.load %arg4[%c0, %c0_1, %c0_2, %c0_3] : memref<1x1x1x4xf32, #tpu.memory_space<vmem>>, vector<1x1x1x4xf32>
    %4 = vector.shape_cast %3 : vector<1x1x1x4xf32> to vector<1x4xf32>
    %c0_4 = arith.constant 0 : index
    %c0_5 = arith.constant 0 : index
    %5 = vector.load %arg8[%c0_4, %c0_5] : memref<11x128xf32, #tpu.memory_space<vmem>>, vector<4x128xf32>
    %6 = vector.extract_strided_slice %4 {offsets = [0, 0], sizes = [1, 1], strides = [1, 1]} : vector<1x4xf32> to vector<1x1xf32>
    %7 = vector.extract_strided_slice %5 {offsets = [0, 0], sizes = [1, 128], strides = [1, 1]} : vector<4x128xf32> to vector<1x128xf32>
    %8 = vector.broadcast %6 : vector<1x1xf32> to vector<1x128xf32>
    %9 = arith.mulf %8, %7 : vector<1x128xf32>
    %10 = vector.extract_strided_slice %4 {offsets = [0, 1], sizes = [1, 1], strides = [1, 1]} : vector<1x4xf32> to vector<1x1xf32>
    %11 = vector.extract_strided_slice %5 {offsets = [1, 0], sizes = [1, 128], strides = [1, 1]} : vector<4x128xf32> to vector<1x128xf32>
    %12 = vector.broadcast %10 : vector<1x1xf32> to vector<1x128xf32>
    %13 = arith.mulf %12, %11 : vector<1x128xf32>
    %14 = arith.addf %9, %13 : vector<1x128xf32>
    %15 = vector.extract_strided_slice %4 {offsets = [0, 2], sizes = [1, 1], strides = [1, 1]} : vector<1x4xf32> to vector<1x1xf32>
    %16 = vector.extract_strided_slice %5 {offsets = [2, 0], sizes = [1, 128], strides = [1, 1]} : vector<4x128xf32> to vector<1x128xf32>
    %17 = vector.broadcast %15 : vector<1x1xf32> to vector<1x128xf32>
    %18 = arith.mulf %17, %16 : vector<1x128xf32>
    %19 = arith.addf %14, %18 : vector<1x128xf32>
    %20 = vector.extract_strided_slice %4 {offsets = [0, 3], sizes = [1, 1], strides = [1, 1]} : vector<1x4xf32> to vector<1x1xf32>
    %21 = vector.extract_strided_slice %5 {offsets = [3, 0], sizes = [1, 128], strides = [1, 1]} : vector<4x128xf32> to vector<1x128xf32>
    %22 = vector.broadcast %20 : vector<1x1xf32> to vector<1x128xf32>
    %23 = arith.mulf %22, %21 : vector<1x128xf32>
    %24 = arith.addf %19, %23 : vector<1x128xf32>
    %c0_6 = arith.constant 0 : index
    %c0_7 = arith.constant 0 : index
    %c0_8 = arith.constant 0 : index
    %c0_9 = arith.constant 0 : index
    %25 = vector.load %arg3[%c0_6, %c0_7, %c0_8, %c0_9] : memref<1x1x64x4xf32, #tpu.memory_space<vmem>>, vector<1x1x64x4xf32>
    %26 = vector.shape_cast %25 : vector<1x1x64x4xf32> to vector<64x4xf32>
    %c4 = arith.constant 4 : index
    %c0_10 = arith.constant 0 : index
    %27 = vector.load %arg8[%c4, %c0_10] : memref<11x128xf32, #tpu.memory_space<vmem>>, vector<4x128xf32>
    %28 = vector.extract_strided_slice %26 {offsets = [0, 0], sizes = [64, 1], strides = [1, 1]} : vector<64x4xf32> to vector<64x1xf32>
    %29 = vector.extract_strided_slice %27 {offsets = [0, 0], sizes = [1, 128], strides = [1, 1]} : vector<4x128xf32> to vector<1x128xf32>
    %30 = vector.broadcast %28 : vector<64x1xf32> to vector<64x128xf32>
    %31 = vector.broadcast %29 : vector<1x128xf32> to vector<64x128xf32>
    %32 = arith.mulf %30, %31 : vector<64x128xf32>
    %33 = vector.extract_strided_slice %26 {offsets = [0, 1], sizes = [64, 1], strides = [1, 1]} : vector<64x4xf32> to vector<64x1xf32>
    %34 = vector.extract_strided_slice %27 {offsets = [1, 0], sizes = [1, 128], strides = [1, 1]} : vector<4x128xf32> to vector<1x128xf32>
    %35 = vector.broadcast %33 : vector<64x1xf32> to vector<64x128xf32>
    %36 = vector.broadcast %34 : vector<1x128xf32> to vector<64x128xf32>
    %37 = arith.mulf %35, %36 : vector<64x128xf32>
    %38 = arith.addf %32, %37 : vector<64x128xf32>
    %39 = vector.extract_strided_slice %26 {offsets = [0, 2], sizes = [64, 1], strides = [1, 1]} : vector<64x4xf32> to vector<64x1xf32>
    %40 = vector.extract_strided_slice %27 {offsets = [2, 0], sizes = [1, 128], strides = [1, 1]} : vector<4x128xf32> to vector<1x128xf32>
    %41 = vector.broadcast %39 : vector<64x1xf32> to vector<64x128xf32>
    %42 = vector.broadcast %40 : vector<1x128xf32> to vector<64x128xf32>
    %43 = arith.mulf %41, %42 : vector<64x128xf32>
    %44 = arith.addf %38, %43 : vector<64x128xf32>
    %45 = vector.extract_strided_slice %26 {offsets = [0, 3], sizes = [64, 1], strides = [1, 1]} : vector<64x4xf32> to vector<64x1xf32>
    %46 = vector.extract_strided_slice %27 {offsets = [3, 0], sizes = [1, 128], strides = [1, 1]} : vector<4x128xf32> to vector<1x128xf32>
    %47 = vector.broadcast %45 : vector<64x1xf32> to vector<64x128xf32>
    %48 = vector.broadcast %46 : vector<1x128xf32> to vector<64x128xf32>
    %49 = arith.mulf %47, %48 : vector<64x128xf32>
    %50 = arith.addf %44, %49 : vector<64x128xf32>
    %51 = vector.broadcast %24 : vector<1x128xf32> to vector<64x128xf32>
    %52 = arith.subf %50, %51 : vector<64x128xf32>
    %53 = arith.mulf %52, %52 : vector<64x128xf32>
    %cst = arith.constant dense<0.000000e+00> : vector<64xf32>
    %54 = vector.multi_reduction <add>, %53, %cst [1] : vector<64x128xf32> to vector<64xf32>
    %55 = vector.shape_cast %54 : vector<64xf32> to vector<64x1xf32>
    %56 = math.sqrt %55 : vector<64x1xf32>
    %cst_11 = arith.constant 1.000000e-07 : f32
    %57 = vector.broadcast %cst_11 : f32 to vector<64x1xf32>
    %58 = arith.addf %56, %57 : vector<64x1xf32>
    %59 = vector.broadcast %58 : vector<64x1xf32> to vector<64x128xf32>
    %60 = arith.divf %52, %59 : vector<64x128xf32>
    %c0_12 = arith.constant 0 : index
    %c0_13 = arith.constant 0 : index
    %c0_14 = arith.constant 0 : index
    %61 = vector.load %arg7[%c0_12, %c0_13, %c0_14] : memref<1x64x2xf32, #tpu.memory_space<vmem>>, vector<1x64x2xf32>
    %62 = vector.shape_cast %61 : vector<1x64x2xf32> to vector<64x2xf32>
    %c8 = arith.constant 8 : index
    %c0_15 = arith.constant 0 : index
    %63 = vector.load %arg8[%c8, %c0_15] : memref<11x128xf32, #tpu.memory_space<vmem>>, vector<2x128xf32>
    %64 = vector.extract_strided_slice %62 {offsets = [0, 0], sizes = [64, 1], strides = [1, 1]} : vector<64x2xf32> to vector<64x1xf32>
    %65 = vector.extract_strided_slice %63 {offsets = [0, 0], sizes = [1, 128], strides = [1, 1]} : vector<2x128xf32> to vector<1x128xf32>
    %66 = vector.broadcast %64 : vector<64x1xf32> to vector<64x128xf32>
    %67 = vector.broadcast %65 : vector<1x128xf32> to vector<64x128xf32>
    %68 = arith.mulf %66, %67 : vector<64x128xf32>
    %69 = vector.extract_strided_slice %62 {offsets = [0, 1], sizes = [64, 1], strides = [1, 1]} : vector<64x2xf32> to vector<64x1xf32>
    %70 = vector.extract_strided_slice %63 {offsets = [1, 0], sizes = [1, 128], strides = [1, 1]} : vector<2x128xf32> to vector<1x128xf32>
    %71 = vector.broadcast %69 : vector<64x1xf32> to vector<64x128xf32>
    %72 = vector.broadcast %70 : vector<1x128xf32> to vector<64x128xf32>
    %73 = arith.mulf %71, %72 : vector<64x128xf32>
    %74 = arith.addf %68, %73 : vector<64x128xf32>
    %c10 = arith.constant 10 : index
    %c0_16 = arith.constant 0 : index
    %75 = vector.load %arg8[%c10, %c0_16] : memref<11x128xf32, #tpu.memory_space<vmem>>, vector<1x128xf32>
    %76 = vector.broadcast %75 : vector<1x128xf32> to vector<64x128xf32>
    %77 = arith.addf %74, %76 : vector<64x128xf32>
    %78 = vector.broadcast %24 : vector<1x128xf32> to vector<64x128xf32>
    %79 = arith.subf %77, %78 : vector<64x128xf32>
    %80 = arith.mulf %79, %79 : vector<64x128xf32>
    %cst_17 = arith.constant dense<0.000000e+00> : vector<64xf32>
    %81 = vector.multi_reduction <add>, %80, %cst_17 [1] : vector<64x128xf32> to vector<64xf32>
    %82 = vector.shape_cast %81 : vector<64xf32> to vector<64x1xf32>
    %83 = math.sqrt %82 : vector<64x1xf32>
    %cst_18 = arith.constant 1.000000e-07 : f32
    %84 = vector.broadcast %cst_18 : f32 to vector<64x1xf32>
    %85 = arith.addf %83, %84 : vector<64x1xf32>
    %86 = vector.broadcast %85 : vector<64x1xf32> to vector<64x128xf32>
    %87 = arith.divf %79, %86 : vector<64x128xf32>
    %c0_19 = arith.constant 0 : index
    %c0_20 = arith.constant 0 : index
    %c0_21 = arith.constant 0 : index
    %88 = vector.load %arg6[%c0_19, %c0_20, %c0_21] : memref<1x64x128xf32, #tpu.memory_space<vmem>>, vector<1x64x128xf32>
    %89 = vector.shape_cast %88 : vector<1x64x128xf32> to vector<64x128xf32>
    %90 = arith.addf %87, %89 : vector<64x128xf32>
    %c0_22 = arith.constant 0 : index
    %c0_23 = arith.constant 0 : index
    %c0_24 = arith.constant 0 : index
    %c0_25 = arith.constant 0 : index
    %91 = vector.load %arg5[%c0_22, %c0_23, %c0_24, %c0_25] : memref<1x1x64x16xf32, #tpu.memory_space<vmem>>, vector<1x1x64x16xf32>
    %92 = vector.shape_cast %91 : vector<1x1x64x16xf32> to vector<64x16xf32>
    %c0_26 = arith.constant 0 : index
    %c0_27 = arith.constant 0 : index
    %93 = vector.load %arg9[%c0_26, %c0_27] : memref<4x16xf32, #tpu.memory_space<vmem>>, vector<1x16xf32>
    %94 = vector.broadcast %93 : vector<1x16xf32> to vector<64x16xf32>
    %95 = arith.mulf %92, %94 : vector<64x16xf32>
    %c1 = arith.constant 1 : index
    %c0_28 = arith.constant 0 : index
    %96 = vector.load %arg9[%c1, %c0_28] : memref<4x16xf32, #tpu.memory_space<vmem>>, vector<1x16xf32>
    %97 = vector.broadcast %96 : vector<1x16xf32> to vector<64x16xf32>
    %98 = arith.addf %95, %97 : vector<64x16xf32>
    %cst_29 = arith.constant 0.000000e+00 : f32
    %99 = vector.broadcast %cst_29 : f32 to vector<64x16xf32>
    %100 = arith.maximumf %98, %99 : vector<64x16xf32>
    %c2 = arith.constant 2 : index
    %c0_30 = arith.constant 0 : index
    %101 = vector.load %arg9[%c2, %c0_30] : memref<4x16xf32, #tpu.memory_space<vmem>>, vector<1x16xf32>
    %102 = vector.broadcast %101 : vector<1x16xf32> to vector<64x16xf32>
    %103 = arith.mulf %92, %102 : vector<64x16xf32>
    %c3 = arith.constant 3 : index
    %c0_31 = arith.constant 0 : index
    %104 = vector.load %arg9[%c3, %c0_31] : memref<4x16xf32, #tpu.memory_space<vmem>>, vector<1x16xf32>
    %105 = vector.broadcast %104 : vector<1x16xf32> to vector<64x16xf32>
    %106 = arith.addf %103, %105 : vector<64x16xf32>
    %cst_32 = arith.constant 0.000000e+00 : f32
    %107 = vector.broadcast %cst_32 : f32 to vector<64x16xf32>
    %108 = arith.maximumf %106, %107 : vector<64x16xf32>
    %c0_33 = arith.constant 0 : index
    %c0_34 = arith.constant 0 : index
    %c0_35 = arith.constant 0 : index
    %109 = vector.load %arg10[%c0_33, %c0_34, %c0_35] : memref<2x16x128xf32, #tpu.memory_space<vmem>>, vector<1x16x128xf32>
    %110 = vector.shape_cast %109 : vector<1x16x128xf32> to vector<16x128xf32>
    %111 = arith.truncf %100 : vector<64x16xf32> to vector<64x16xbf16>
    %112 = arith.truncf %110 : vector<16x128xf32> to vector<16x128xbf16>
    %cst_36 = arith.constant dense<0.000000e+00> : vector<64x128xf32>
    %113 = tpu.matmul %111, %112, %cst_36 {dimension_numbers = #tpu.dot_dimension_numbers<[1], [0], [0], [1], [0, 0, 1, 1], [], []>} : vector<64x16xbf16>, vector<16x128xbf16>, vector<64x128xf32> -> vector<64x128xf32>
    %114 = arith.addf %60, %113 : vector<64x128xf32>
    %c1_37 = arith.constant 1 : index
    %c0_38 = arith.constant 0 : index
    %c0_39 = arith.constant 0 : index
    %115 = vector.load %arg10[%c1_37, %c0_38, %c0_39] : memref<2x16x128xf32, #tpu.memory_space<vmem>>, vector<1x16x128xf32>
    %116 = vector.shape_cast %115 : vector<1x16x128xf32> to vector<16x128xf32>
    %117 = arith.truncf %108 : vector<64x16xf32> to vector<64x16xbf16>
    %118 = arith.truncf %116 : vector<16x128xf32> to vector<16x128xbf16>
    %cst_40 = arith.constant dense<0.000000e+00> : vector<64x128xf32>
    %119 = tpu.matmul %117, %118, %cst_40 {dimension_numbers = #tpu.dot_dimension_numbers<[1], [0], [0], [1], [0, 0, 1, 1], [], []>} : vector<64x16xbf16>, vector<16x128xbf16>, vector<64x128xf32> -> vector<64x128xf32>
    %c0_41 = arith.constant 0 : index
    %c0_42 = arith.constant 0 : index
    %120 = vector.load %arg11[%c0_41, %c0_42] : memref<6x128xf32, #tpu.memory_space<vmem>>, vector<1x128xf32>
    %c1_43 = arith.constant 1 : index
    %c0_44 = arith.constant 0 : index
    %121 = vector.load %arg11[%c1_43, %c0_44] : memref<6x128xf32, #tpu.memory_space<vmem>>, vector<1x128xf32>
    %cst_45 = arith.constant dense<0.000000e+00> : vector<64xf32>
    %122 = vector.multi_reduction <add>, %90, %cst_45 [1] : vector<64x128xf32> to vector<64xf32>
    %123 = vector.shape_cast %122 : vector<64xf32> to vector<64x1xf32>
    %cst_46 = arith.constant 1.280000e+02 : f32
    %124 = vector.broadcast %cst_46 : f32 to vector<64x1xf32>
    %125 = arith.divf %123, %124 : vector<64x1xf32>
    %126 = vector.broadcast %125 : vector<64x1xf32> to vector<64x128xf32>
    %127 = arith.subf %90, %126 : vector<64x128xf32>
    %128 = arith.mulf %127, %127 : vector<64x128xf32>
    %cst_47 = arith.constant dense<0.000000e+00> : vector<64xf32>
    %129 = vector.multi_reduction <add>, %128, %cst_47 [1] : vector<64x128xf32> to vector<64xf32>
    %130 = vector.shape_cast %129 : vector<64xf32> to vector<64x1xf32>
    %cst_48 = arith.constant 1.280000e+02 : f32
    %131 = vector.broadcast %cst_48 : f32 to vector<64x1xf32>
    %132 = arith.divf %130, %131 : vector<64x1xf32>
    %133 = vector.broadcast %125 : vector<64x1xf32> to vector<64x128xf32>
    %134 = arith.subf %90, %133 : vector<64x128xf32>
    %cst_49 = arith.constant 9.99999974E-6 : f32
    %135 = vector.broadcast %cst_49 : f32 to vector<64x1xf32>
    %136 = arith.addf %132, %135 : vector<64x1xf32>
    %137 = math.rsqrt %136 : vector<64x1xf32>
    %138 = vector.broadcast %137 : vector<64x1xf32> to vector<64x128xf32>
    %139 = arith.mulf %134, %138 : vector<64x128xf32>
    %140 = vector.broadcast %120 : vector<1x128xf32> to vector<64x128xf32>
    %141 = arith.mulf %139, %140 : vector<64x128xf32>
    %142 = vector.broadcast %121 : vector<1x128xf32> to vector<64x128xf32>
    %143 = arith.addf %141, %142 : vector<64x128xf32>
    %c2_50 = arith.constant 2 : index
    %c0_51 = arith.constant 0 : index
    %144 = vector.load %arg11[%c2_50, %c0_51] : memref<6x128xf32, #tpu.memory_space<vmem>>, vector<1x128xf32>
    %c3_52 = arith.constant 3 : index
    %c0_53 = arith.constant 0 : index
    %145 = vector.load %arg11[%c3_52, %c0_53] : memref<6x128xf32, #tpu.memory_space<vmem>>, vector<1x128xf32>
    %cst_54 = arith.constant dense<0.000000e+00> : vector<64xf32>
    %146 = vector.multi_reduction <add>, %114, %cst_54 [1] : vector<64x128xf32> to vector<64xf32>
    %147 = vector.shape_cast %146 : vector<64xf32> to vector<64x1xf32>
    %cst_55 = arith.constant 1.280000e+02 : f32
    %148 = vector.broadcast %cst_55 : f32 to vector<64x1xf32>
    %149 = arith.divf %147, %148 : vector<64x1xf32>
    %150 = vector.broadcast %149 : vector<64x1xf32> to vector<64x128xf32>
    %151 = arith.subf %114, %150 : vector<64x128xf32>
    %152 = arith.mulf %151, %151 : vector<64x128xf32>
    %cst_56 = arith.constant dense<0.000000e+00> : vector<64xf32>
    %153 = vector.multi_reduction <add>, %152, %cst_56 [1] : vector<64x128xf32> to vector<64xf32>
    %154 = vector.shape_cast %153 : vector<64xf32> to vector<64x1xf32>
    %cst_57 = arith.constant 1.280000e+02 : f32
    %155 = vector.broadcast %cst_57 : f32 to vector<64x1xf32>
    %156 = arith.divf %154, %155 : vector<64x1xf32>
    %157 = vector.broadcast %149 : vector<64x1xf32> to vector<64x128xf32>
    %158 = arith.subf %114, %157 : vector<64x128xf32>
    %cst_58 = arith.constant 9.99999974E-6 : f32
    %159 = vector.broadcast %cst_58 : f32 to vector<64x1xf32>
    %160 = arith.addf %156, %159 : vector<64x1xf32>
    %161 = math.rsqrt %160 : vector<64x1xf32>
    %162 = vector.broadcast %161 : vector<64x1xf32> to vector<64x128xf32>
    %163 = arith.mulf %158, %162 : vector<64x128xf32>
    %164 = vector.broadcast %144 : vector<1x128xf32> to vector<64x128xf32>
    %165 = arith.mulf %163, %164 : vector<64x128xf32>
    %166 = vector.broadcast %145 : vector<1x128xf32> to vector<64x128xf32>
    %167 = arith.addf %165, %166 : vector<64x128xf32>
    %c4_59 = arith.constant 4 : index
    %c0_60 = arith.constant 0 : index
    %168 = vector.load %arg11[%c4_59, %c0_60] : memref<6x128xf32, #tpu.memory_space<vmem>>, vector<1x128xf32>
    %c5 = arith.constant 5 : index
    %c0_61 = arith.constant 0 : index
    %169 = vector.load %arg11[%c5, %c0_61] : memref<6x128xf32, #tpu.memory_space<vmem>>, vector<1x128xf32>
    %cst_62 = arith.constant dense<0.000000e+00> : vector<64xf32>
    %170 = vector.multi_reduction <add>, %119, %cst_62 [1] : vector<64x128xf32> to vector<64xf32>
    %171 = vector.shape_cast %170 : vector<64xf32> to vector<64x1xf32>
    %cst_63 = arith.constant 1.280000e+02 : f32
    %172 = vector.broadcast %cst_63 : f32 to vector<64x1xf32>
    %173 = arith.divf %171, %172 : vector<64x1xf32>
    %174 = vector.broadcast %173 : vector<64x1xf32> to vector<64x128xf32>
    %175 = arith.subf %119, %174 : vector<64x128xf32>
    %176 = arith.mulf %175, %175 : vector<64x128xf32>
    %cst_64 = arith.constant dense<0.000000e+00> : vector<64xf32>
    %177 = vector.multi_reduction <add>, %176, %cst_64 [1] : vector<64x128xf32> to vector<64xf32>
    %178 = vector.shape_cast %177 : vector<64xf32> to vector<64x1xf32>
    %cst_65 = arith.constant 1.280000e+02 : f32
    %179 = vector.broadcast %cst_65 : f32 to vector<64x1xf32>
    %180 = arith.divf %178, %179 : vector<64x1xf32>
    %181 = vector.broadcast %173 : vector<64x1xf32> to vector<64x128xf32>
    %182 = arith.subf %119, %181 : vector<64x128xf32>
    %cst_66 = arith.constant 9.99999974E-6 : f32
    %183 = vector.broadcast %cst_66 : f32 to vector<64x1xf32>
    %184 = arith.addf %180, %183 : vector<64x1xf32>
    %185 = math.rsqrt %184 : vector<64x1xf32>
    %186 = vector.broadcast %185 : vector<64x1xf32> to vector<64x128xf32>
    %187 = arith.mulf %182, %186 : vector<64x128xf32>
    %188 = vector.broadcast %168 : vector<1x128xf32> to vector<64x128xf32>
    %189 = arith.mulf %187, %188 : vector<64x128xf32>
    %190 = vector.broadcast %169 : vector<1x128xf32> to vector<64x128xf32>
    %191 = arith.addf %189, %190 : vector<64x128xf32>
    %c0_67 = arith.constant 0 : index
    %c0_68 = arith.constant 0 : index
    %c0_69 = arith.constant 0 : index
    %192 = vector.load %arg12[%c0_67, %c0_68, %c0_69] : memref<3x128x128xf32, #tpu.memory_space<vmem>>, vector<1x128x128xf32>
    %193 = vector.shape_cast %192 : vector<1x128x128xf32> to vector<128x128xf32>
    %194 = arith.truncf %143 : vector<64x128xf32> to vector<64x128xbf16>
    %195 = arith.truncf %193 : vector<128x128xf32> to vector<128x128xbf16>
    %cst_70 = arith.constant dense<0.000000e+00> : vector<64x128xf32>
    %196 = tpu.matmul %194, %195, %cst_70 {dimension_numbers = #tpu.dot_dimension_numbers<[1], [0], [0], [1], [0, 0, 1, 1], [], []>} : vector<64x128xbf16>, vector<128x128xbf16>, vector<64x128xf32> -> vector<64x128xf32>
    %c0_71 = arith.constant 0 : index
    %c0_72 = arith.constant 0 : index
    %c0_73 = arith.constant 0 : index
    %197 = vector.load %arg13[%c0_71, %c0_72, %c0_73] : memref<3x1x128xf32, #tpu.memory_space<vmem>>, vector<1x1x128xf32>
    %198 = vector.shape_cast %197 : vector<1x1x128xf32> to vector<1x128xf32>
    %199 = vector.broadcast %198 : vector<1x128xf32> to vector<64x128xf32>
    %200 = arith.addf %196, %199 : vector<64x128xf32>
    %cst_74 = arith.constant 0.176776692 : f32
    %201 = vector.broadcast %cst_74 : f32 to vector<64x128xf32>
    %202 = arith.mulf %200, %201 : vector<64x128xf32>
    %203 = arith.truncf %202 : vector<64x128xf32> to vector<64x128xbf16>
    %c1_75 = arith.constant 1 : index
    %c0_76 = arith.constant 0 : index
    %c0_77 = arith.constant 0 : index
    %204 = vector.load %arg12[%c1_75, %c0_76, %c0_77] : memref<3x128x128xf32, #tpu.memory_space<vmem>>, vector<1x128x128xf32>
    %205 = vector.shape_cast %204 : vector<1x128x128xf32> to vector<128x128xf32>
    %206 = arith.truncf %167 : vector<64x128xf32> to vector<64x128xbf16>
    %207 = arith.truncf %205 : vector<128x128xf32> to vector<128x128xbf16>
    %cst_78 = arith.constant dense<0.000000e+00> : vector<64x128xf32>
    %208 = tpu.matmul %206, %207, %cst_78 {dimension_numbers = #tpu.dot_dimension_numbers<[1], [0], [0], [1], [0, 0, 1, 1], [], []>} : vector<64x128xbf16>, vector<128x128xbf16>, vector<64x128xf32> -> vector<64x128xf32>
    %c1_79 = arith.constant 1 : index
    %c0_80 = arith.constant 0 : index
    %c0_81 = arith.constant 0 : index
    %209 = vector.load %arg13[%c1_79, %c0_80, %c0_81] : memref<3x1x128xf32, #tpu.memory_space<vmem>>, vector<1x1x128xf32>
    %210 = vector.shape_cast %209 : vector<1x1x128xf32> to vector<1x128xf32>
    %211 = vector.broadcast %210 : vector<1x128xf32> to vector<64x128xf32>
    %212 = arith.addf %208, %211 : vector<64x128xf32>
    %213 = arith.truncf %212 : vector<64x128xf32> to vector<64x128xbf16>
    %c2_82 = arith.constant 2 : index
    %c0_83 = arith.constant 0 : index
    %c0_84 = arith.constant 0 : index
    %214 = vector.load %arg12[%c2_82, %c0_83, %c0_84] : memref<3x128x128xf32, #tpu.memory_space<vmem>>, vector<1x128x128xf32>
    %215 = vector.shape_cast %214 : vector<1x128x128xf32> to vector<128x128xf32>
    %216 = arith.truncf %191 : vector<64x128xf32> to vector<64x128xbf16>
    %217 = arith.truncf %215 : vector<128x128xf32> to vector<128x128xbf16>
    %cst_85 = arith.constant dense<0.000000e+00> : vector<64x128xf32>
    %218 = tpu.matmul %216, %217, %cst_85 {dimension_numbers = #tpu.dot_dimension_numbers<[1], [0], [0], [1], [0, 0, 1, 1], [], []>} : vector<64x128xbf16>, vector<128x128xbf16>, vector<64x128xf32> -> vector<64x128xf32>
    %c2_86 = arith.constant 2 : index
    %c0_87 = arith.constant 0 : index
    %c0_88 = arith.constant 0 : index
    %219 = vector.load %arg13[%c2_86, %c0_87, %c0_88] : memref<3x1x128xf32, #tpu.memory_space<vmem>>, vector<1x1x128xf32>
    %220 = vector.shape_cast %219 : vector<1x1x128xf32> to vector<1x128xf32>
    %221 = vector.broadcast %220 : vector<1x128xf32> to vector<64x128xf32>
    %222 = arith.addf %218, %221 : vector<64x128xf32>
    %223 = arith.truncf %222 : vector<64x128xf32> to vector<64x128xbf16>
    %c0_89 = arith.constant 0 : index
    %c0_90 = arith.constant 0 : index
    %224 = vector.load %arg20[%c0_89, %c0_90] : memref<64x4xf32, #tpu.memory_space<vmem>>, vector<64x4xf32>
    %c0_91 = arith.constant 0 : index
    %c0_92 = arith.constant 0 : index
    %225 = vector.load %arg21[%c0_91, %c0_92] : memref<64x4xf32, #tpu.memory_space<vmem>>, vector<64x4xf32>
    %c0_93 = arith.constant 0 : index
    %c0_94 = arith.constant 0 : index
    %226 = vector.load %arg22[%c0_93, %c0_94] : memref<64x128xf32, #tpu.memory_space<vmem>>, vector<64x128xf32>
    %227 = vector.extract_strided_slice %203 {offsets = [0, 0], sizes = [64, 32], strides = [1, 1]} : vector<64x128xbf16> to vector<64x32xbf16>
    %228 = vector.extract_strided_slice %213 {offsets = [0, 0], sizes = [64, 32], strides = [1, 1]} : vector<64x128xbf16> to vector<64x32xbf16>
    %cst_95 = arith.constant dense<0.000000e+00> : vector<64x64xf32>
    %229 = tpu.matmul %227, %228, %cst_95 {dimension_numbers = #tpu.dot_dimension_numbers<[1], [1], [0], [0], [0, 0, 1, 0], [], []>} : vector<64x32xbf16>, vector<64x32xbf16>, vector<64x64xf32> -> vector<64x64xf32>
    %230 = vector.extract_strided_slice %224 {offsets = [0, 0], sizes = [64, 1], strides = [1, 1]} : vector<64x4xf32> to vector<64x1xf32>
    %cst_96 = arith.constant dense<0xFF800000> : vector<64xf32>
    %231 = vector.multi_reduction <maximumf>, %229, %cst_96 [1] : vector<64x64xf32> to vector<64xf32>
    %232 = vector.shape_cast %231 : vector<64xf32> to vector<64x1xf32>
    %233 = arith.maximumf %230, %232 : vector<64x1xf32>
    %234 = vector.extract_strided_slice %224 {offsets = [0, 0], sizes = [64, 1], strides = [1, 1]} : vector<64x4xf32> to vector<64x1xf32>
    %235 = arith.subf %234, %233 : vector<64x1xf32>
    %236 = math.exp %235 : vector<64x1xf32>
    %237 = vector.broadcast %233 : vector<64x1xf32> to vector<64x64xf32>
    %238 = arith.subf %229, %237 : vector<64x64xf32>
    %239 = math.exp %238 : vector<64x64xf32>
    %240 = arith.truncf %239 : vector<64x64xf32> to vector<64x64xbf16>
    %241 = vector.extract_strided_slice %223 {offsets = [0, 0], sizes = [64, 32], strides = [1, 1]} : vector<64x128xbf16> to vector<64x32xbf16>
    %cst_97 = arith.constant dense<0.000000e+00> : vector<64x32xf32>
    %242 = tpu.matmul %240, %241, %cst_97 {dimension_numbers = #tpu.dot_dimension_numbers<[1], [0], [0], [1], [0, 0, 1, 1], [], []>} : vector<64x64xbf16>, vector<64x32xbf16>, vector<64x32xf32> -> vector<64x32xf32>
    %243 = vector.extract_strided_slice %225 {offsets = [0, 0], sizes = [64, 1], strides = [1, 1]} : vector<64x4xf32> to vector<64x1xf32>
    %244 = arith.mulf %236, %243 : vector<64x1xf32>
    %cst_98 = arith.constant dense<0.000000e+00> : vector<64xf32>
    %245 = vector.multi_reduction <add>, %239, %cst_98 [1] : vector<64x64xf32> to vector<64xf32>
    %246 = vector.shape_cast %245 : vector<64xf32> to vector<64x1xf32>
    %247 = arith.addf %244, %246 : vector<64x1xf32>
    %248 = vector.extract_strided_slice %226 {offsets = [0, 0], sizes = [64, 32], strides = [1, 1]} : vector<64x128xf32> to vector<64x32xf32>
    %249 = vector.broadcast %236 : vector<64x1xf32> to vector<64x32xf32>
    %250 = arith.mulf %249, %248 : vector<64x32xf32>
    %251 = arith.addf %250, %242 : vector<64x32xf32>
    %252 = vector.extract_strided_slice %203 {offsets = [0, 32], sizes = [64, 32], strides = [1, 1]} : vector<64x128xbf16> to vector<64x32xbf16>
    %253 = vector.extract_strided_slice %213 {offsets = [0, 32], sizes = [64, 32], strides = [1, 1]} : vector<64x128xbf16> to vector<64x32xbf16>
    %cst_99 = arith.constant dense<0.000000e+00> : vector<64x64xf32>
    %254 = tpu.matmul %252, %253, %cst_99 {dimension_numbers = #tpu.dot_dimension_numbers<[1], [1], [0], [0], [0, 0, 1, 0], [], []>} : vector<64x32xbf16>, vector<64x32xbf16>, vector<64x64xf32> -> vector<64x64xf32>
    %255 = vector.extract_strided_slice %224 {offsets = [0, 1], sizes = [64, 1], strides = [1, 1]} : vector<64x4xf32> to vector<64x1xf32>
    %cst_100 = arith.constant dense<0xFF800000> : vector<64xf32>
    %256 = vector.multi_reduction <maximumf>, %254, %cst_100 [1] : vector<64x64xf32> to vector<64xf32>
    %257 = vector.shape_cast %256 : vector<64xf32> to vector<64x1xf32>
    %258 = arith.maximumf %255, %257 : vector<64x1xf32>
    %259 = vector.extract_strided_slice %224 {offsets = [0, 1], sizes = [64, 1], strides = [1, 1]} : vector<64x4xf32> to vector<64x1xf32>
    %260 = arith.subf %259, %258 : vector<64x1xf32>
    %261 = math.exp %260 : vector<64x1xf32>
    %262 = vector.broadcast %258 : vector<64x1xf32> to vector<64x64xf32>
    %263 = arith.subf %254, %262 : vector<64x64xf32>
    %264 = math.exp %263 : vector<64x64xf32>
    %265 = arith.truncf %264 : vector<64x64xf32> to vector<64x64xbf16>
    %266 = vector.extract_strided_slice %223 {offsets = [0, 32], sizes = [64, 32], strides = [1, 1]} : vector<64x128xbf16> to vector<64x32xbf16>
    %cst_101 = arith.constant dense<0.000000e+00> : vector<64x32xf32>
    %267 = tpu.matmul %265, %266, %cst_101 {dimension_numbers = #tpu.dot_dimension_numbers<[1], [0], [0], [1], [0, 0, 1, 1], [], []>} : vector<64x64xbf16>, vector<64x32xbf16>, vector<64x32xf32> -> vector<64x32xf32>
    %268 = vector.extract_strided_slice %225 {offsets = [0, 1], sizes = [64, 1], strides = [1, 1]} : vector<64x4xf32> to vector<64x1xf32>
    %269 = arith.mulf %261, %268 : vector<64x1xf32>
    %cst_102 = arith.constant dense<0.000000e+00> : vector<64xf32>
    %270 = vector.multi_reduction <add>, %264, %cst_102 [1] : vector<64x64xf32> to vector<64xf32>
    %271 = vector.shape_cast %270 : vector<64xf32> to vector<64x1xf32>
    %272 = arith.addf %269, %271 : vector<64x1xf32>
    %273 = vector.extract_strided_slice %226 {offsets = [0, 32], sizes = [64, 32], strides = [1, 1]} : vector<64x128xf32> to vector<64x32xf32>
    %274 = vector.broadcast %261 : vector<64x1xf32> to vector<64x32xf32>
    %275 = arith.mulf %274, %273 : vector<64x32xf32>
    %276 = arith.addf %275, %267 : vector<64x32xf32>
    %277 = vector.extract_strided_slice %203 {offsets = [0, 64], sizes = [64, 32], strides = [1, 1]} : vector<64x128xbf16> to vector<64x32xbf16>
    %278 = vector.extract_strided_slice %213 {offsets = [0, 64], sizes = [64, 32], strides = [1, 1]} : vector<64x128xbf16> to vector<64x32xbf16>
    %cst_103 = arith.constant dense<0.000000e+00> : vector<64x64xf32>
    %279 = tpu.matmul %277, %278, %cst_103 {dimension_numbers = #tpu.dot_dimension_numbers<[1], [1], [0], [0], [0, 0, 1, 0], [], []>} : vector<64x32xbf16>, vector<64x32xbf16>, vector<64x64xf32> -> vector<64x64xf32>
    %280 = vector.extract_strided_slice %224 {offsets = [0, 2], sizes = [64, 1], strides = [1, 1]} : vector<64x4xf32> to vector<64x1xf32>
    %cst_104 = arith.constant dense<0xFF800000> : vector<64xf32>
    %281 = vector.multi_reduction <maximumf>, %279, %cst_104 [1] : vector<64x64xf32> to vector<64xf32>
    %282 = vector.shape_cast %281 : vector<64xf32> to vector<64x1xf32>
    %283 = arith.maximumf %280, %282 : vector<64x1xf32>
    %284 = vector.extract_strided_slice %224 {offsets = [0, 2], sizes = [64, 1], strides = [1, 1]} : vector<64x4xf32> to vector<64x1xf32>
    %285 = arith.subf %284, %283 : vector<64x1xf32>
    %286 = math.exp %285 : vector<64x1xf32>
    %287 = vector.broadcast %283 : vector<64x1xf32> to vector<64x64xf32>
    %288 = arith.subf %279, %287 : vector<64x64xf32>
    %289 = math.exp %288 : vector<64x64xf32>
    %290 = arith.truncf %289 : vector<64x64xf32> to vector<64x64xbf16>
    %291 = vector.extract_strided_slice %223 {offsets = [0, 64], sizes = [64, 32], strides = [1, 1]} : vector<64x128xbf16> to vector<64x32xbf16>
    %cst_105 = arith.constant dense<0.000000e+00> : vector<64x32xf32>
    %292 = tpu.matmul %290, %291, %cst_105 {dimension_numbers = #tpu.dot_dimension_numbers<[1], [0], [0], [1], [0, 0, 1, 1], [], []>} : vector<64x64xbf16>, vector<64x32xbf16>, vector<64x32xf32> -> vector<64x32xf32>
    %293 = vector.extract_strided_slice %225 {offsets = [0, 2], sizes = [64, 1], strides = [1, 1]} : vector<64x4xf32> to vector<64x1xf32>
    %294 = arith.mulf %286, %293 : vector<64x1xf32>
    %cst_106 = arith.constant dense<0.000000e+00> : vector<64xf32>
    %295 = vector.multi_reduction <add>, %289, %cst_106 [1] : vector<64x64xf32> to vector<64xf32>
    %296 = vector.shape_cast %295 : vector<64xf32> to vector<64x1xf32>
    %297 = arith.addf %294, %296 : vector<64x1xf32>
    %298 = vector.extract_strided_slice %226 {offsets = [0, 64], sizes = [64, 32], strides = [1, 1]} : vector<64x128xf32> to vector<64x32xf32>
    %299 = vector.broadcast %286 : vector<64x1xf32> to vector<64x32xf32>
    %300 = arith.mulf %299, %298 : vector<64x32xf32>
    %301 = arith.addf %300, %292 : vector<64x32xf32>
    %302 = vector.extract_strided_slice %203 {offsets = [0, 96], sizes = [64, 32], strides = [1, 1]} : vector<64x128xbf16> to vector<64x32xbf16>
    %303 = vector.extract_strided_slice %213 {offsets = [0, 96], sizes = [64, 32], strides = [1, 1]} : vector<64x128xbf16> to vector<64x32xbf16>
    %cst_107 = arith.constant dense<0.000000e+00> : vector<64x64xf32>
    %304 = tpu.matmul %302, %303, %cst_107 {dimension_numbers = #tpu.dot_dimension_numbers<[1], [1], [0], [0], [0, 0, 1, 0], [], []>} : vector<64x32xbf16>, vector<64x32xbf16>, vector<64x64xf32> -> vector<64x64xf32>
    %305 = vector.extract_strided_slice %224 {offsets = [0, 3], sizes = [64, 1], strides = [1, 1]} : vector<64x4xf32> to vector<64x1xf32>
    %cst_108 = arith.constant dense<0xFF800000> : vector<64xf32>
    %306 = vector.multi_reduction <maximumf>, %304, %cst_108 [1] : vector<64x64xf32> to vector<64xf32>
    %307 = vector.shape_cast %306 : vector<64xf32> to vector<64x1xf32>
    %308 = arith.maximumf %305, %307 : vector<64x1xf32>
    %309 = vector.extract_strided_slice %224 {offsets = [0, 3], sizes = [64, 1], strides = [1, 1]} : vector<64x4xf32> to vector<64x1xf32>
    %310 = arith.subf %309, %308 : vector<64x1xf32>
    %311 = math.exp %310 : vector<64x1xf32>
    %312 = vector.broadcast %308 : vector<64x1xf32> to vector<64x64xf32>
    %313 = arith.subf %304, %312 : vector<64x64xf32>
    %314 = math.exp %313 : vector<64x64xf32>
    %315 = arith.truncf %314 : vector<64x64xf32> to vector<64x64xbf16>
    %316 = vector.extract_strided_slice %223 {offsets = [0, 96], sizes = [64, 32], strides = [1, 1]} : vector<64x128xbf16> to vector<64x32xbf16>
    %cst_109 = arith.constant dense<0.000000e+00> : vector<64x32xf32>
    %317 = tpu.matmul %315, %316, %cst_109 {dimension_numbers = #tpu.dot_dimension_numbers<[1], [0], [0], [1], [0, 0, 1, 1], [], []>} : vector<64x64xbf16>, vector<64x32xbf16>, vector<64x32xf32> -> vector<64x32xf32>
    %318 = vector.extract_strided_slice %225 {offsets = [0, 3], sizes = [64, 1], strides = [1, 1]} : vector<64x4xf32> to vector<64x1xf32>
    %319 = arith.mulf %311, %318 : vector<64x1xf32>
    %cst_110 = arith.constant dense<0.000000e+00> : vector<64xf32>
    %320 = vector.multi_reduction <add>, %314, %cst_110 [1] : vector<64x64xf32> to vector<64xf32>
    %321 = vector.shape_cast %320 : vector<64xf32> to vector<64x1xf32>
    %322 = arith.addf %319, %321 : vector<64x1xf32>
    %323 = vector.extract_strided_slice %226 {offsets = [0, 96], sizes = [64, 32], strides = [1, 1]} : vector<64x128xf32> to vector<64x32xf32>
    %324 = vector.broadcast %311 : vector<64x1xf32> to vector<64x32xf32>
    %325 = arith.mulf %324, %323 : vector<64x32xf32>
    %326 = arith.addf %325, %317 : vector<64x32xf32>
    %327 = tpu.concatenate %247, %272, %297, %322 in 1 : vector<64x1xf32>, vector<64x1xf32>, vector<64x1xf32>, vector<64x1xf32> -> vector<64x4xf32>
    %328 = tpu.concatenate %251, %276, %301, %326 in 1 : vector<64x32xf32>, vector<64x32xf32>, vector<64x32xf32>, vector<64x32xf32> -> vector<64x128xf32>
    %329 = tpu.concatenate %233, %258, %283, %308 in 1 : vector<64x1xf32>, vector<64x1xf32>, vector<64x1xf32>, vector<64x1xf32> -> vector<64x4xf32>
    %c0_111 = arith.constant 0 : index
    %c0_112 = arith.constant 0 : index
    %330 = vector.load %arg20[%c0_111, %c0_112] : memref<64x4xf32, #tpu.memory_space<vmem>>, vector<64x4xf32>
    tpu.vector_store %arg20[%c0_111, %c0_112], %329 {strides = array<i32>} : memref<64x4xf32, #tpu.memory_space<vmem>>, vector<64x4xf32>,
    %c0_113 = arith.constant 0 : index
    %c0_114 = arith.constant 0 : index
    %331 = vector.load %arg21[%c0_113, %c0_114] : memref<64x4xf32, #tpu.memory_space<vmem>>, vector<64x4xf32>
    tpu.vector_store %arg21[%c0_113, %c0_114], %327 {strides = array<i32>} : memref<64x4xf32, #tpu.memory_space<vmem>>, vector<64x4xf32>,
    %c0_115 = arith.constant 0 : index
    %c0_116 = arith.constant 0 : index
    %332 = vector.load %arg22[%c0_115, %c0_116] : memref<64x128xf32, #tpu.memory_space<vmem>>, vector<64x128xf32>
    tpu.vector_store %arg22[%c0_115, %c0_116], %328 {strides = array<i32>} : memref<64x128xf32, #tpu.memory_space<vmem>>, vector<64x128xf32>,
    %c1_i32 = arith.constant 1 : i32
    %333 = arith.cmpi eq, %arg2, %c1_i32 : i32
    %334 = arith.extui %333 : i1 to i32
    %c0_i32_117 = arith.constant 0 : i32
    %335 = arith.cmpi ne, %334, %c0_i32_117 : i32
    scf.if %335 {
      %336 = tpu.reciprocal %327 {approx = true} : vector<64x4xf32> -> vector<64x4xf32>
      %337 = vector.extract_strided_slice %328 {offsets = [0, 0], sizes = [64, 32], strides = [1, 1]} : vector<64x128xf32> to vector<64x32xf32>
      %338 = vector.extract_strided_slice %336 {offsets = [0, 0], sizes = [64, 1], strides = [1, 1]} : vector<64x4xf32> to vector<64x1xf32>
      %339 = vector.broadcast %338 : vector<64x1xf32> to vector<64x32xf32>
      %340 = arith.mulf %337, %339 : vector<64x32xf32>
      %341 = vector.extract_strided_slice %328 {offsets = [0, 32], sizes = [64, 32], strides = [1, 1]} : vector<64x128xf32> to vector<64x32xf32>
      %342 = vector.extract_strided_slice %336 {offsets = [0, 1], sizes = [64, 1], strides = [1, 1]} : vector<64x4xf32> to vector<64x1xf32>
      %343 = vector.broadcast %342 : vector<64x1xf32> to vector<64x32xf32>
      %344 = arith.mulf %341, %343 : vector<64x32xf32>
      %345 = vector.extract_strided_slice %328 {offsets = [0, 64], sizes = [64, 32], strides = [1, 1]} : vector<64x128xf32> to vector<64x32xf32>
      %346 = vector.extract_strided_slice %336 {offsets = [0, 2], sizes = [64, 1], strides = [1, 1]} : vector<64x4xf32> to vector<64x1xf32>
      %347 = vector.broadcast %346 : vector<64x1xf32> to vector<64x32xf32>
      %348 = arith.mulf %345, %347 : vector<64x32xf32>
      %349 = vector.extract_strided_slice %328 {offsets = [0, 96], sizes = [64, 32], strides = [1, 1]} : vector<64x128xf32> to vector<64x32xf32>
      %350 = vector.extract_strided_slice %336 {offsets = [0, 3], sizes = [64, 1], strides = [1, 1]} : vector<64x4xf32> to vector<64x1xf32>
      %351 = vector.broadcast %350 : vector<64x1xf32> to vector<64x32xf32>
      %352 = arith.mulf %349, %351 : vector<64x32xf32>
      %353 = tpu.concatenate %340, %344, %348, %352 in 1 : vector<64x32xf32>, vector<64x32xf32>, vector<64x32xf32>, vector<64x32xf32> -> vector<64x128xf32>
      %c0_118 = arith.constant 0 : index
      %c0_119 = arith.constant 0 : index
      %354 = vector.load %arg14[%c0_118, %c0_119] : memref<128x128xf32, #tpu.memory_space<vmem>>, vector<128x128xf32>
      %355 = arith.truncf %353 : vector<64x128xf32> to vector<64x128xbf16>
      %356 = arith.truncf %354 : vector<128x128xf32> to vector<128x128xbf16>
      %cst_120 = arith.constant dense<0.000000e+00> : vector<64x128xf32>
      %357 = tpu.matmul %355, %356, %cst_120 {dimension_numbers = #tpu.dot_dimension_numbers<[1], [0], [0], [1], [0, 0, 1, 1], [], []>} : vector<64x128xbf16>, vector<128x128xbf16>, vector<64x128xf32> -> vector<64x128xf32>
      %c0_121 = arith.constant 0 : index
      %c0_122 = arith.constant 0 : index
      %358 = vector.load %arg18[%c0_121, %c0_122] : memref<6x128xf32, #tpu.memory_space<vmem>>, vector<1x128xf32>
      %359 = vector.broadcast %358 : vector<1x128xf32> to vector<64x128xf32>
      %360 = arith.addf %357, %359 : vector<64x128xf32>
      %c0_123 = arith.constant 0 : index
      %c0_124 = arith.constant 0 : index
      %c0_125 = arith.constant 0 : index
      %361 = vector.load %arg6[%c0_123, %c0_124, %c0_125] : memref<1x64x128xf32, #tpu.memory_space<vmem>>, vector<1x64x128xf32>
      %362 = vector.shape_cast %361 : vector<1x64x128xf32> to vector<64x128xf32>
      %363 = arith.addf %360, %362 : vector<64x128xf32>
      %c1_126 = arith.constant 1 : index
      %c0_127 = arith.constant 0 : index
      %364 = vector.load %arg18[%c1_126, %c0_127] : memref<6x128xf32, #tpu.memory_space<vmem>>, vector<1x128xf32>
      %c2_128 = arith.constant 2 : index
      %c0_129 = arith.constant 0 : index
      %365 = vector.load %arg18[%c2_128, %c0_129] : memref<6x128xf32, #tpu.memory_space<vmem>>, vector<1x128xf32>
      %cst_130 = arith.constant dense<0.000000e+00> : vector<64xf32>
      %366 = vector.multi_reduction <add>, %363, %cst_130 [1] : vector<64x128xf32> to vector<64xf32>
      %367 = vector.shape_cast %366 : vector<64xf32> to vector<64x1xf32>
      %cst_131 = arith.constant 1.280000e+02 : f32
      %368 = vector.broadcast %cst_131 : f32 to vector<64x1xf32>
      %369 = arith.divf %367, %368 : vector<64x1xf32>
      %370 = vector.broadcast %369 : vector<64x1xf32> to vector<64x128xf32>
      %371 = arith.subf %363, %370 : vector<64x128xf32>
      %372 = arith.mulf %371, %371 : vector<64x128xf32>
      %cst_132 = arith.constant dense<0.000000e+00> : vector<64xf32>
      %373 = vector.multi_reduction <add>, %372, %cst_132 [1] : vector<64x128xf32> to vector<64xf32>
      %374 = vector.shape_cast %373 : vector<64xf32> to vector<64x1xf32>
      %cst_133 = arith.constant 1.280000e+02 : f32
      %375 = vector.broadcast %cst_133 : f32 to vector<64x1xf32>
      %376 = arith.divf %374, %375 : vector<64x1xf32>
      %377 = vector.broadcast %369 : vector<64x1xf32> to vector<64x128xf32>
      %378 = arith.subf %363, %377 : vector<64x128xf32>
      %cst_134 = arith.constant 9.99999974E-6 : f32
      %379 = vector.broadcast %cst_134 : f32 to vector<64x1xf32>
      %380 = arith.addf %376, %379 : vector<64x1xf32>
      %381 = math.rsqrt %380 : vector<64x1xf32>
      %382 = vector.broadcast %381 : vector<64x1xf32> to vector<64x128xf32>
      %383 = arith.mulf %378, %382 : vector<64x128xf32>
      %384 = vector.broadcast %364 : vector<1x128xf32> to vector<64x128xf32>
      %385 = arith.mulf %383, %384 : vector<64x128xf32>
      %386 = vector.broadcast %365 : vector<1x128xf32> to vector<64x128xf32>
      %387 = arith.addf %385, %386 : vector<64x128xf32>
      %c0_135 = arith.constant 0 : index
      %c0_136 = arith.constant 0 : index
      %388 = vector.load %arg15[%c0_135, %c0_136] : memref<128x256xf32, #tpu.memory_space<vmem>>, vector<128x256xf32>
      %389 = arith.truncf %387 : vector<64x128xf32> to vector<64x128xbf16>
      %390 = arith.truncf %388 : vector<128x256xf32> to vector<128x256xbf16>
      %cst_137 = arith.constant dense<0.000000e+00> : vector<64x256xf32>
      %391 = tpu.matmul %389, %390, %cst_137 {dimension_numbers = #tpu.dot_dimension_numbers<[1], [0], [0], [1], [0, 0, 1, 1], [], []>} : vector<64x128xbf16>, vector<128x256xbf16>, vector<64x256xf32> -> vector<64x256xf32>
      %c0_138 = arith.constant 0 : index
      %c0_139 = arith.constant 0 : index
      %392 = vector.load %arg16[%c0_138, %c0_139] : memref<1x256xf32, #tpu.memory_space<vmem>>, vector<1x256xf32>
      %393 = vector.broadcast %392 : vector<1x256xf32> to vector<64x256xf32>
      %394 = arith.addf %391, %393 : vector<64x256xf32>
      %cst_140 = arith.constant 5.000000e-01 : f32
      %395 = vector.broadcast %cst_140 : f32 to vector<64x256xf32>
      %396 = arith.mulf %395, %394 : vector<64x256xf32>
      %cst_141 = arith.constant 4.471500e-02 : f32
      %397 = vector.broadcast %cst_141 : f32 to vector<64x256xf32>
      %398 = arith.mulf %397, %394 : vector<64x256xf32>
      %399 = arith.mulf %398, %394 : vector<64x256xf32>
      %400 = arith.mulf %399, %394 : vector<64x256xf32>
      %401 = arith.addf %394, %400 : vector<64x256xf32>
      %cst_142 = arith.constant 0.797884583 : f32
      %402 = vector.broadcast %cst_142 : f32 to vector<64x256xf32>
      %403 = arith.mulf %402, %401 : vector<64x256xf32>
      %404 = math.tanh %403 : vector<64x256xf32>
      %cst_143 = arith.constant 1.000000e+00 : f32
      %405 = vector.broadcast %cst_143 : f32 to vector<64x256xf32>
      %406 = arith.addf %405, %404 : vector<64x256xf32>
      %407 = arith.mulf %396, %406 : vector<64x256xf32>
      %c0_144 = arith.constant 0 : index
      %c0_145 = arith.constant 0 : index
      %408 = vector.load %arg17[%c0_144, %c0_145] : memref<256x128xf32, #tpu.memory_space<vmem>>, vector<256x128xf32>
      %409 = arith.truncf %407 : vector<64x256xf32> to vector<64x256xbf16>
      %410 = arith.truncf %408 : vector<256x128xf32> to vector<256x128xbf16>
      %cst_146 = arith.constant dense<0.000000e+00> : vector<64x128xf32>
      %411 = tpu.matmul %409, %410, %cst_146 {dimension_numbers = #tpu.dot_dimension_numbers<[1], [0], [0], [1], [0, 0, 1, 1], [], []>} : vector<64x256xbf16>, vector<256x128xbf16>, vector<64x128xf32> -> vector<64x128xf32>
      %412 = arith.addf %387, %411 : vector<64x128xf32>
      %c3_147 = arith.constant 3 : index
      %c0_148 = arith.constant 0 : index
      %413 = vector.load %arg18[%c3_147, %c0_148] : memref<6x128xf32, #tpu.memory_space<vmem>>, vector<1x128xf32>
      %414 = vector.broadcast %413 : vector<1x128xf32> to vector<64x128xf32>
      %415 = arith.addf %412, %414 : vector<64x128xf32>
      %c4_149 = arith.constant 4 : index
      %c0_150 = arith.constant 0 : index
      %416 = vector.load %arg18[%c4_149, %c0_150] : memref<6x128xf32, #tpu.memory_space<vmem>>, vector<1x128xf32>
      %c5_151 = arith.constant 5 : index
      %c0_152 = arith.constant 0 : index
      %417 = vector.load %arg18[%c5_151, %c0_152] : memref<6x128xf32, #tpu.memory_space<vmem>>, vector<1x128xf32>
      %cst_153 = arith.constant dense<0.000000e+00> : vector<64xf32>
      %418 = vector.multi_reduction <add>, %415, %cst_153 [1] : vector<64x128xf32> to vector<64xf32>
      %419 = vector.shape_cast %418 : vector<64xf32> to vector<64x1xf32>
      %cst_154 = arith.constant 1.280000e+02 : f32
      %420 = vector.broadcast %cst_154 : f32 to vector<64x1xf32>
      %421 = arith.divf %419, %420 : vector<64x1xf32>
      %422 = vector.broadcast %421 : vector<64x1xf32> to vector<64x128xf32>
      %423 = arith.subf %415, %422 : vector<64x128xf32>
      %424 = arith.mulf %423, %423 : vector<64x128xf32>
      %cst_155 = arith.constant dense<0.000000e+00> : vector<64xf32>
      %425 = vector.multi_reduction <add>, %424, %cst_155 [1] : vector<64x128xf32> to vector<64xf32>
      %426 = vector.shape_cast %425 : vector<64xf32> to vector<64x1xf32>
      %cst_156 = arith.constant 1.280000e+02 : f32
      %427 = vector.broadcast %cst_156 : f32 to vector<64x1xf32>
      %428 = arith.divf %426, %427 : vector<64x1xf32>
      %429 = vector.broadcast %421 : vector<64x1xf32> to vector<64x128xf32>
      %430 = arith.subf %415, %429 : vector<64x128xf32>
      %cst_157 = arith.constant 9.99999974E-6 : f32
      %431 = vector.broadcast %cst_157 : f32 to vector<64x1xf32>
      %432 = arith.addf %428, %431 : vector<64x1xf32>
      %433 = math.rsqrt %432 : vector<64x1xf32>
      %434 = vector.broadcast %433 : vector<64x1xf32> to vector<64x128xf32>
      %435 = arith.mulf %430, %434 : vector<64x128xf32>
      %436 = vector.broadcast %416 : vector<1x128xf32> to vector<64x128xf32>
      %437 = arith.mulf %435, %436 : vector<64x128xf32>
      %438 = vector.broadcast %417 : vector<1x128xf32> to vector<64x128xf32>
      %439 = arith.addf %437, %438 : vector<64x128xf32>
      %c0_158 = arith.constant 0 : index
      %c0_159 = arith.constant 0 : index
      %c0_160 = arith.constant 0 : index
      %440 = vector.load %arg19[%c0_158, %c0_159, %c0_160] : memref<1x64x128xf32, #tpu.memory_space<vmem>>, vector<1x64x128xf32>
      %441 = vector.shape_cast %440 : vector<1x64x128xf32> to vector<64x128xf32>
      %442 = vector.shape_cast %439 : vector<64x128xf32> to vector<1x64x128xf32>
      tpu.vector_store %arg19[%c0_158, %c0_159, %c0_160], %442 {strides = array<i32>} : memref<1x64x128xf32, #tpu.memory_space<vmem>>, vector<1x64x128xf32>,
    } else {
    }
    return
  }
  func.func @transform_0(%arg0: i32, %arg1: i32, %arg2: i32) -> (i32, i32, i32, i32) {
    %c0_i32 = arith.constant 0 : i32
    %c0_i32_0 = arith.constant 0 : i32
    %c0_i32_1 = arith.constant 0 : i32
    return %arg0, %arg2, %c0_i32, %c0_i32_0 : i32, i32, i32, i32
  }
  func.func @transform_1(%arg0: i32, %arg1: i32, %arg2: i32) -> (i32, i32, i32, i32) {
    %c0_i32 = arith.constant 0 : i32
    %c0_i32_0 = arith.constant 0 : i32
    %c0_i32_1 = arith.constant 0 : i32
    return %arg0, %arg2, %c0_i32, %c0_i32_0 : i32, i32, i32, i32
  }
  func.func @transform_2(%arg0: i32, %arg1: i32, %arg2: i32) -> (i32, i32, i32, i32) {
    %c0_i32 = arith.constant 0 : i32
    %c0_i32_0 = arith.constant 0 : i32
    %c0_i32_1 = arith.constant 0 : i32
    return %arg0, %arg2, %c0_i32, %c0_i32_0 : i32, i32, i32, i32
  }
  func.func @transform_3(%arg0: i32, %arg1: i32, %arg2: i32) -> (i32, i32, i32) {
    %c0_i32 = arith.constant 0 : i32
    %c0_i32_0 = arith.constant 0 : i32
    return %arg0, %arg1, %c0_i32 : i32, i32, i32
  }
  func.func @transform_4(%arg0: i32, %arg1: i32, %arg2: i32) -> (i32, i32, i32) {
    %c0_i32 = arith.constant 0 : i32
    %c0_i32_0 = arith.constant 0 : i32
    %c0_i32_1 = arith.constant 0 : i32
    return %c0_i32, %arg1, %c0_i32_0 : i32, i32, i32
  }
  func.func @transform_5(%arg0: i32, %arg1: i32, %arg2: i32) -> (i32, i32) {
    %c0_i32 = arith.constant 0 : i32
    %c0_i32_0 = arith.constant 0 : i32
    %c0_i32_1 = arith.constant 0 : i32
    return %c0_i32, %c0_i32_0 : i32, i32
  }
  func.func @transform_6(%arg0: i32, %arg1: i32, %arg2: i32) -> (i32, i32) {
    %c0_i32 = arith.constant 0 : i32
    %c0_i32_0 = arith.constant 0 : i32
    %c0_i32_1 = arith.constant 0 : i32
    return %c0_i32, %c0_i32_0 : i32, i32
  }
  func.func @transform_7(%arg0: i32, %arg1: i32, %arg2: i32) -> (i32, i32, i32) {
    %c0_i32 = arith.constant 0 : i32
    %c0_i32_0 = arith.constant 0 : i32
    %c0_i32_1 = arith.constant 0 : i32
    %c0_i32_2 = arith.constant 0 : i32
    return %c0_i32, %c0_i32_0, %c0_i32_1 : i32, i32, i32
  }
  func.func @transform_8(%arg0: i32, %arg1: i32, %arg2: i32) -> (i32, i32) {
    %c0_i32 = arith.constant 0 : i32
    %c0_i32_0 = arith.constant 0 : i32
    %c0_i32_1 = arith.constant 0 : i32
    return %c0_i32, %c0_i32_0 : i32, i32
  }
  func.func @transform_9(%arg0: i32, %arg1: i32, %arg2: i32) -> (i32, i32, i32) {
    %c0_i32 = arith.constant 0 : i32
    %c0_i32_0 = arith.constant 0 : i32
    %c0_i32_1 = arith.constant 0 : i32
    %c0_i32_2 = arith.constant 0 : i32
    return %c0_i32, %c0_i32_0, %c0_i32_1 : i32, i32, i32
  }
  func.func @transform_10(%arg0: i32, %arg1: i32, %arg2: i32) -> (i32, i32, i32) {
    %c0_i32 = arith.constant 0 : i32
    %c0_i32_0 = arith.constant 0 : i32
    %c0_i32_1 = arith.constant 0 : i32
    %c0_i32_2 = arith.constant 0 : i32
    return %c0_i32, %c0_i32_0, %c0_i32_1 : i32, i32, i32
  }
  func.func @transform_11(%arg0: i32, %arg1: i32, %arg2: i32) -> (i32, i32) {
    %c0_i32 = arith.constant 0 : i32
    %c0_i32_0 = arith.constant 0 : i32
    %c0_i32_1 = arith.constant 0 : i32
    return %c0_i32, %c0_i32_0 : i32, i32
  }
  func.func @transform_12(%arg0: i32, %arg1: i32, %arg2: i32) -> (i32, i32) {
    %c0_i32 = arith.constant 0 : i32
    %c0_i32_0 = arith.constant 0 : i32
    %c0_i32_1 = arith.constant 0 : i32
    return %c0_i32, %c0_i32_0 : i32, i32
  }
  func.func @transform_13(%arg0: i32, %arg1: i32, %arg2: i32) -> (i32, i32) {
    %c0_i32 = arith.constant 0 : i32
    %c0_i32_0 = arith.constant 0 : i32
    %c0_i32_1 = arith.constant 0 : i32
    return %c0_i32, %c0_i32_0 : i32, i32
  }
  func.func @transform_14(%arg0: i32, %arg1: i32, %arg2: i32) -> (i32, i32) {
    %c0_i32 = arith.constant 0 : i32
    %c0_i32_0 = arith.constant 0 : i32
    %c0_i32_1 = arith.constant 0 : i32
    return %c0_i32, %c0_i32_0 : i32, i32
  }
  func.func @transform_15(%arg0: i32, %arg1: i32, %arg2: i32) -> (i32, i32) {
    %c0_i32 = arith.constant 0 : i32
    %c0_i32_0 = arith.constant 0 : i32
    %c0_i32_1 = arith.constant 0 : i32
    return %c0_i32, %c0_i32_0 : i32, i32
  }
  func.func @transform_16(%arg0: i32, %arg1: i32, %arg2: i32) -> (i32, i32, i32) {
    %c0_i32 = arith.constant 0 : i32
    %c0_i32_0 = arith.constant 0 : i32
    return %arg0, %arg1, %c0_i32 : i32, i32, i32
  }
}

</mosaic_0001>

<bundles_post_ra>
// kernel: cross_view_attention.1
= control target key start
LH: loop header
LB: loop body
LE: loop exit
PB: predicated region body
PF: predicated region fallthrough
CT: control target
= control target key end

     0   :  { %s9449_s0 = inlined_call_operand.vmem [shape: f32[2,2,64,4], index: 0, kind: input, shape index: {}]   ;;  %s9450_s1 = inlined_call_operand.vmem [shape: f32[2,2,1,4], index: 1, kind: input, shape index: {}]   ;;  %s9451_s2 = inlined_call_operand.vmem [shape: f32[2,2,64,16], index: 2, kind: input, shape index: {}]   ;;  %s9452_s3 = inlined_call_operand.vmem [shape: f32[2,64,128], index: 3, kind: input, shape index: {}]   ;;  %s9453_s4 = inlined_call_operand.vmem [shape: f32[1,64,2], index: 4, kind: input, shape index: {}]   ;;  %s9454_s5 = inlined_call_operand.vmem [shape: f32[11,128], index: 5, kind: input, shape index: {}]   ;;  %s9455_s6 = inlined_call_operand.vmem [shape: f32[4,16], index: 6, kind: input, shape index: {}]   ;;  %s9456_s7 = inlined_call_operand.vmem [shape: f32[2,16,128], index: 7, kind: input, shape index: {}]   ;;  %s9457_s8 = inlined_call_operand.vmem [shape: f32[6,128], index: 8, kind: input, shape index: {}]   ;;  %s9458_s9 = inlined_call_operand.vmem [shape: f32[3,128,128], index: 9, kind: input, shape index: {}]   ;;  %s9459_s10 = inlined_call_operand.vmem [shape: f32[3,1,128], index: 10, kind: input, shape index: {}]   ;;  %s9460_s11 = inlined_call_operand.vmem [shape: f32[128,128], index: 11, kind: input, shape index: {}]   ;;  %s9461_s12 = inlined_call_operand.vmem [shape: f32[128,256], index: 12, kind: input, shape index: {}]   ;;  %s9462_s13 = inlined_call_operand.vmem [shape: f32[1,256], index: 13, kind: input, shape index: {}]   ;;  %s9463_s14 = inlined_call_operand.vmem [shape: f32[256,128], index: 14, kind: input, shape index: {}]   ;;  %s9464_s15 = inlined_call_operand.vmem [shape: f32[6,128], index: 15, kind: input, shape index: {}]   ;;  %s9465_s16 = inlined_call_operand.hbm [shape: f32[2,64,128], index: 16, kind: output, shape index: {}]  }
   0x1   :  { %9516 = sst [smem:[#allocation65_spill]] %s9449_s0 }
   0x2   :  { %9517 = sst [smem:[#allocation66_spill]] %s9460_s11 }
   0x3   :  { %9518 = sst [smem:[#allocation67_spill]] %s9461_s12 }
   0x4   :  { %9519 = sst [smem:[#allocation68_spill]] %s9462_s13 }
   0x5   :  { %9520 = sst [smem:[#allocation69_spill]] %s9463_s14 }
   0x6   :  { %9521 = sst [smem:[#allocation70_spill]] %s9464_s15 }
   0x7   :  { %9522 = sst [smem:[#allocation71_spill]] %s9465_s16 }
   0x8   :  { %21 = vsyncpa [#allocation6], 0 }
   0x9   :  { %23 = vsyncpa [#allocation6 + $0x1], 0  ;;  %s6514_s21 = smov 0   ;;  %s6516_s22 = smov 0  }
   0xa   :  { %s6518_s23 = smov 0   ;;  %s6520_s24 = smov 0  }
   0xb   :  { %s6522_s25 = smov 0   ;;  %s6524_s26 = smov 0  }
   0xc   :  { %s6526_s27 = smov 0   ;;  %s6528_s28 = smov 0  }
   0xd LB: > { %9523 = sst [smem:[#allocation8_spill]] %s6383_s21  ;;  %s5278_s29 = sadd.s32 4294967295, %s6411_s28   ;;  %s6411_s28 = sphi %s6528_s28, %s29_s28   ;;  %s6407_s27 = sphi %s6526_s27, %s9682_s27   ;;  %s6403_s26 = sphi %s6524_s26, %s9681_s26   ;;  %s6399_s25 = sphi %s6522_s25, %s9680_s25   ;;  %s6395_s24 = sphi %s6520_s24, %s9679_s24   ;;  %s6391_s23 = sphi %s6518_s23, %s9678_s23   ;;  %s6387_s22 = sphi %s6516_s22, %s9677_s22   ;;  %s6383_s21 = sphi %s6514_s21, %s9676_s21  }
   0xe   : > { %9524 = sst [smem:[#allocation9_spill]] %s6387_s22  ;;  %s5279_s30 = sadd.s32 4294967294, %s6411_s28  }
   0xf   : > { %9525 = sst [smem:[#allocation10_spill]] %s6391_s23  ;;  %s41_s0 = sadd.s32 1, %s6403_s26 }
  0x10   : > { %9526 = sst [smem:[#allocation11_spill]] %s6399_s25  ;;  %p42_p0 = scmp.ge.s32.totalorder %s41_s0, 2 }
  0x11   : > { %9527 = sst [smem:[#allocation12_spill]] %s6403_s26  ;;  %s48_s17 = sadd.s32 1, %s6407_s27 }
  0x12   : > { %9528 = sst [smem:[#allocation13_spill]] %s6407_s27  ;;  %p436_p1 = scmp.ne.s32.totalorder %s6391_s23, %s6387_s22 }
  0x13   : > { %9529 = sst [smem:[#allocation14_spill]] %s6411_s28  ;;  %p437_p2 = scmp.eq.s32.totalorder %s5278_s29, 3 }
  0x14   : > { %s9684_s0 = smov (%p42_p0, %s41_s0), 0  ;;  %s9686_s17 = smov (!%p42_p0, %s48_s17), %s6407_s27 }
  0x15   : > { %9530 = sst [smem:[#allocation15_spill]] %s9684_s0  ;;  %p6563_p3 = por %p437_p2, %p436_p1 }
  0x16   : > { %p442_p4 = scmp.ne.s32.totalorder %s6387_s22, %s6383_s21  ;;  %p50_p5 = scmp.ge.s32.totalorder %s9686_s17, 2 }
  0x17   : > { %s9531_s18 = scalar_select %p6563_p3, 1, 0 }
  0x18   : > { %p443_p6 = scmp.eq.s32.totalorder %s5279_s30, 3  ;;  %p5283_p7 = scmp.ge.s32.totalorder %s6411_s28, 1 }
  0x19   : > { %9532 = sst [smem:[#allocation16_spill]] %s9531_s18  ;;  %p550_p8 = scmp.lt.s32.totalorder %s6411_s28, 5 }
  0x1a   : > { %s9688_s17 = smov (%p50_p5, %s9686_s17), 0  ;;  %p6573_p9 = por %p443_p6, %p442_p4 }
  0x1b   : > { %9533 = sst [smem:[#allocation17_spill]] %s9688_s17  ;;  %p551_p10 = pnand %p5283_p7, %p550_p8 }
  0x1c   : > { %s9534_s19 = scalar_select %p6573_p9, 1, 0 }
  0x1d   : > { %s421_s20 = ssub.s32 %s6407_s27, %s9688_s17  ;;  %s426_s29 = sadd.s32 1, %s6391_s23 }
  0x1e   : > { %9535 = sst [smem:[#allocation18_spill]] %s9534_s19  ;;  %p424_p11 = scmp.eq.s32.totalorder %s421_s20, 0 }
  0x1f   : > { %554 = sbr.rel (%p551_p10) target bundleno = 4789 (0x12b5), region = 84 }
  0x20   : > { %s6581_s0 = scalar_select %p424_p11, %s6391_s23, %s426_s29  }
  0x22   : > { %9536 = sst [smem:[#allocation19_spill]] %s6581_s0 }
  0x26   : > { %s9480_s30 = sand.u32 1, %s6387_s22   ;;  %p634_p12 = scmp.lt.s32.totalorder %s6399_s25, 1 }
  0x27   : > { %s5284_s26 = sshll.u32 %s9480_s30, 6  ;;  %p636_p13 = scmp.lt.s32.totalorder %s6395_s24, 1 }
  0x28   : > { %s635_s21 = scalar_select %p634_p12, %s6399_s25, 1 }
  0x29   : > { %s637_s19 = scalar_select %p636_p13, %s6395_s24, 1 }
  0x2a   : > { %s5286_s28 = sshll.u32 %s635_s21, 4  ;;  %s5288_s17 = sshll.u32 %s635_s21, 1 }
  0x2b   : > { %s5285_s27 = sshll.u32 %s637_s19, 3  ;;  %s6590_s20 = sadd.s32 %s5288_s17, %s637_s19 }
  0x2c   : > { %s640_s29 = sadd.s32 %s5286_s28, %s5285_s27  ;;  %s649_s16 = scalar_lea.vmem %s9450_s1, %s6590_s20 }
  0x2d   : > { %s5287_s18 = sshll.u32 %s640_s29, 3  ;;  %s5397_s13 = sshll.u32 %s635_s21, 6 }
  0x2e   : > { %s9537_s22 = sld [smem:[#allocation65_spill]]  ;;  %s6604_s11 = scalar_lea.vmem %s9451_s2, %s5287_s18 }
  0x2f   : > { %s6609_s27 = scalar_lea.vmem %s9452_s3, %s5397_s13  ;;  %s6611_s28 = scalar_lea.vmem [#allocation5], %s5284_s26 }
  0x30   : > { %p5294_p0 = scmp.ne.s32.totalorder %s6395_s24, 0 }
  0x31   : > { %vm681_vm0 = vcmask (!%p5294_p0), 31744   ;;  %v6413_v0 = vmov (!%p5294_p0), -inf   ;;  %v6414_v1 = vmov (!%p5294_p0), 0.0  }
  0x32   : > { %680 = sbr.rel (%p5294_p0) target bundleno = 62 (0x3e), region = 88  ;;  %682 = vst.msk [vmem:[#allocation2] sm:$0xff] (!%p5294_p0), %vm681_vm0, %v6413_v0  ;;  %683 = vst.msk [vmem:[#allocation2 + $0x8] sm:$0xff] (!%p5294_p0), %vm681_vm0, %v6413_v0 }
  0x33   : > { %684 = vst.msk [vmem:[#allocation2 + $0x10] sm:$0xff] (!%p5294_p0), %vm681_vm0, %v6413_v0  ;;  %685 = vst.msk [vmem:[#allocation2 + $0x18] sm:$0xff] (!%p5294_p0), %vm681_vm0, %v6413_v0 }
  0x34   : > { %s6599_s30 = scalar_lea.vmem %s9537_s22, %s5287_s18  ;;  %686 = vst.msk [vmem:[#allocation2 + $0x20] sm:$0xff] (!%p5294_p0), %vm681_vm0, %v6413_v0  ;;  %687 = vst.msk [vmem:[#allocation2 + $0x28] sm:$0xff] (!%p5294_p0), %vm681_vm0, %v6413_v0 }
  0x35   : > { %688 = vst.msk [vmem:[#allocation2 + $0x30] sm:$0xff] (!%p5294_p0), %vm681_vm0, %v6413_v0  ;;  %689 = vst.msk [vmem:[#allocation2 + $0x38] sm:$0xff] (!%p5294_p0), %vm681_vm0, %v6413_v0 }
  0x36   : > { %690 = vst.msk [vmem:[#allocation3] sm:$0xff] (!%p5294_p0), %vm681_vm0, %v6414_v1  ;;  %691 = vst.msk [vmem:[#allocation3 + $0x8] sm:$0xff] (!%p5294_p0), %vm681_vm0, %v6414_v1 }
  0x37   : > { %692 = vst.msk [vmem:[#allocation3 + $0x10] sm:$0xff] (!%p5294_p0), %vm681_vm0, %v6414_v1  ;;  %693 = vst.msk [vmem:[#allocation3 + $0x18] sm:$0xff] (!%p5294_p0), %vm681_vm0, %v6414_v1 }
  0x38   : > { %694 = vst.msk [vmem:[#allocation3 + $0x20] sm:$0xff] (!%p5294_p0), %vm681_vm0, %v6414_v1  ;;  %695 = vst.msk [vmem:[#allocation3 + $0x28] sm:$0xff] (!%p5294_p0), %vm681_vm0, %v6414_v1 }
  0x39   : > { %696 = vst.msk [vmem:[#allocation3 + $0x30] sm:$0xff] %vm681_vm0, %v6414_v1  ;;  %697 = vst.msk [vmem:[#allocation3 + $0x38] sm:$0xff] %vm681_vm0, %v6414_v1 }
  0x3a   : > { %698 = vst [vmem:[#allocation4] sm:$0xff] %v6414_v1  ;;  %699 = vst [vmem:[#allocation4 + $0x8] sm:$0xff] %v6414_v1 }
  0x3b   : > { %700 = vst [vmem:[#allocation4 + $0x10] sm:$0xff] %v6414_v1  ;;  %701 = vst [vmem:[#allocation4 + $0x18] sm:$0xff] %v6414_v1 }
  0x3c   : > { %702 = vst [vmem:[#allocation4 + $0x20] sm:$0xff] %v6414_v1  ;;  %703 = vst [vmem:[#allocation4 + $0x28] sm:$0xff] %v6414_v1 }
  0x3d   : > { %704 = vst [vmem:[#allocation4 + $0x30] sm:$0xff] %v6414_v1  ;;  %705 = vst [vmem:[#allocation4 + $0x38] sm:$0xff] %v6414_v1 }
  0x3e PF: > { %v706_v2 = vld [vmem:[%s649_s16] sm:$0x1]  ;;  %v9490_v3 = vmov 2   ;;  %v9488_v4 = vmov 0   ;;  %v6638_v5 = vld [vmem:[%s6599_s30 + $0x8] sm:$0xff]  ;;  %v9484_v6 = vmov 3  }
  0x3f   : > { %5924 = vset.pattern.permute.xlu1 %v9490_v3  ;;  %5923 = vset.pattern.permute.xlu0 %v9488_v4  ;;  %v1420_v7 = vld [vmem:[%s9456_s7] sm:$0xff]  ;;  %v1421_v8 = vld [vmem:[%s9456_s7 + $0x8] sm:$0xff]  ;;  %v6665_v16 = vld [vmem:[%s6604_s11 + $0x10] sm:$0xff]  ;;  %v9486_v21 = vmov 1   ;;  %vm1427_vm1 = vcmask 130048   ;;  %s6419_s26 = smov 96  }
  0x40   : > { %732 = vperm.xlu1 %5924, %v706_v2   ;;  %710 = vperm.xlu0 %5923, %v706_v2   ;;  %v6649_v9 = vld [vmem:[%s6604_s11] sm:$0xff]  ;;  %v1426_v10 = vpack.c.bf16 %v1421_v8, %v1420_v7  ;;  %v6652_v11 = vld [vmem:[%s6604_s11 + $0x8] sm:$0xff]  ;;  %v6668_v17 = vld [vmem:[%s6604_s11 + $0x18] sm:$0xff]  ;;  %s6420_s19 = smov 64   ;;  %s6421_s12 = smov 32  }
  0x41   : > { %v5296_v12 = vld [vmem:[%s9455_s6] ss:$0 sm:$0xff]  ;;  %v6660_v13 = vld [vmem:[%s9455_s6 + $0x1] ss:$0 sm:$0xff]  ;;  %v759_v32 = vld [vmem:[%s6599_s30 + $0x10] sm:$0xff]  ;;  %p5385_p1 = scmp.ne.s32.totalorder %s6395_s24, 1 }
  0x42   : > { %v1357_v14 = vmul.f32 %v5296_v12, %v6649_v9  ;;  %v1358_v15 = vmul.f32 %v5296_v12, %v6652_v11  ;;  %v757_v18 = vld [vmem:[%s6599_s30] sm:$0xff]  ;;  %5561 = vmatprep.subr.bf16.mxu0 %v1426_v10  ;;  %v1359_v19 = vmul.f32 %v5296_v12, %v6665_v16  ;;  %v1360_v20 = vmul.f32 %v5296_v12, %v6668_v17  ;;  %v6685_v33 = vld [vmem:[%s6599_s30 + $0x28] sm:$0xff]  ;;  %v760_v34 = vld [vmem:[%s6599_s30 + $0x18] sm:$0xff]  ;;  %s9660_s13 = sld [smem:[#allocation66_spill]] (!%p5385_p1)  ;;  %s9664_s15 = sld [smem:[#allocation69_spill]] (!%p5385_p1) }
  0x43   : > { %5562 = vmatpush3.bf16.msra.mxu0 %v1426_v10  ;;  %v6691_v35 = vld [vmem:[%s6599_s30 + $0x30] sm:$0xff]  ;;  %v761_v36 = vld [vmem:[%s6599_s30 + $0x20] sm:$0xff]  ;;  %v1349_v38 = vld [vmem:[%s6604_s11 + $0x28] sm:$0xff]  ;;  %v713_v10 = vlaneseq  ;;  %s9665_s16 = sld [smem:[#allocation68_spill]] (!%p5385_p1) }
  0x44   : > { %5925 = vset.pattern.permute.xlu1 %v9484_v6  ;;  %773 = vperm.xlu0 %5923, %v6638_v5   ;;  %v1370_v22 = vadd.f32 %v6660_v13, %v1357_v14  ;;  %v1371_v23 = vadd.f32 %v6660_v13, %v1358_v15  ;;  %v1372_v24 = vadd.f32 %v6660_v13, %v1359_v19  ;;  %v1348_v37 = vld [vmem:[%s6604_s11 + $0x20] sm:$0xff]  ;;  %v1350_v41 = vld [vmem:[%s6604_s11 + $0x30] sm:$0xff]  ;;  %v1351_v42 = vld [vmem:[%s6604_s11 + $0x38] sm:$0xff] }
  0x45   : > { %745 = vperm.xlu1 %5925, %v706_v2   ;;  %v1373_v25 = vadd.f32 %v6660_v13, %v1360_v20  ;;  %v1361_v39 = vmul.f32 %v5296_v12, %v1348_v37  ;;  %v1362_v40 = vmul.f32 %v5296_v12, %v1349_v38  ;;  %v764_v43 = vld [vmem:[%s6599_s30 + $0x38] sm:$0xff]  ;;  %v1363_v44 = vmul.f32 %v5296_v12, %v1350_v41  ;;  %v1090_v56 = vld [vmem:[%s9453_s4] sm:$0xff]  ;;  %v1091_v57 = vld [vmem:[%s9453_s4 + $0x8] sm:$0xff] }
  0x46   : > { %v1378_v26 = vmax.f32 %v1370_v22, 0.0  ;;  %v1379_v27 = vmax.f32 %v1371_v23, 0.0  ;;  %v1380_v28 = vmax.f32 %v1372_v24, 0.0  ;;  %v1364_v45 = vmul.f32 %v5296_v12, %v1351_v42  ;;  %v1092_v58 = vld [vmem:[%s9453_s4 + $0x10] sm:$0xff]  ;;  %v1095_v59 = vld [vmem:[%s9453_s4 + $0x28] sm:$0xff]  ;;  %v1094_v61 = vld [vmem:[%s9453_s4 + $0x20] sm:$0xff] }
  0x47   : > { %v1381_v29 = vmax.f32 %v1373_v25, 0.0  ;;  %v1374_v46 = vadd.f32 %v6660_v13, %v1361_v39  ;;  %v1375_v47 = vadd.f32 %v6660_v13, %v1362_v40  ;;  %v1376_v48 = vadd.f32 %v6660_v13, %v1363_v44  ;;  %v1096_v60 = vld [vmem:[%s9453_s4 + $0x30] sm:$0xff]  ;;  %v1093_v62 = vld [vmem:[%s9453_s4 + $0x18] sm:$0xff]  ;;  %v707_v24 = vld [vmem:[%s9454_s5] sm:$0xf] }
  0x48   : > { %5927 = vset.pattern.permute.xlu0 %v9486_v21  ;;  %v1422_v30 = vpack.c.bf16 %v1379_v27, %v1378_v26  ;;  %v1377_v49 = vadd.f32 %v6660_v13, %v1364_v45  ;;  %v1097_v8 = vld [vmem:[%s9453_s4 + $0x38] sm:$0xff]  ;;  %v714_v14 = vshrl.u32 %v713_v10, 7 }
  0x49   : > { %5926 = vset.pattern.permute.xlu1 %v9488_v4  ;;  %719 = vperm.xlu0 %5927, %v706_v2   ;;  %v1423_v31 = vpack.c.bf16 %v1381_v29, %v1380_v28  ;;  %v1382_v50 = vmax.f32 %v1374_v46, 0.0  ;;  %v1383_v51 = vmax.f32 %v1375_v47, 0.0  ;;  %v1384_v52 = vmax.f32 %v1376_v48, 0.0 }
  0x4a   : > { %768 = vperm.xlu1 %5926, %v757_v18   ;;  %5563 = vmatprep.mubr.msk.bf16.mxu0 %vm1427_vm1, %v1422_v30  ;;  %v1385_v53 = vmax.f32 %v1377_v49, 0.0  ;;  %v904_v37 = vsub.s32 2, %v714_v14  ;;  %v956_v46 = vsub.s32 3, %v714_v14 }
  0x4b   : > { %5564 = vmatmul.mubr.msk.bf16.vlgmr.msra.gmra.mrb[0].mxu0 %vm1427_vm1, %v1423_v31  ;;  %v1424_v54 = vpack.c.bf16 %v1383_v51, %v1382_v50 }
  0x4c   : > { %v1425_v55 = vpack.c.bf16 %v1385_v53, %v1384_v52 }
  0x4d   : > { %823 = vperm.xlu0 %5927, %v6638_v5   ;;  %5567 = vmatprep.mubr.msk.bf16.mxu0 %vm1427_vm1, %v1424_v54 }
  0x4e   : > { %5928 = vset.pattern.permute.xlu1 %v9486_v21 }
  0x4f   : > { %819 = vperm.xlu1 %5928, %v757_v18  }
  0x51   : > { %827 = vperm.xlu0 %5927, %v759_v32  }
  0x53   : > { %5929 = vset.pattern.permute.xlu1 %v9488_v4  ;;  %5568 = vmatmul.mubr.msk.bf16.gmra.mrb[4].mxu0 %vm1427_vm1, %v1425_v55 }
  0x54   : > { %778 = vperm.xlu1 %5929, %v759_v32  }
  0x55   : > { %839 = vperm.xlu0 %5927, %v6685_v33  }
  0x58   : > { %783 = vperm.xlu1 %5929, %v760_v34  }
  0x59   : > { %843 = vperm.xlu0 %5927, %v6691_v35  }
  0x5c   : > { %5930 = vset.pattern.permute.xlu1 %v9486_v21 }
  0x5d   : > { %831 = vperm.xlu1 %5930, %v760_v34   ;;  %5936 = vset.pattern.permute.xlu0 %v9490_v3 }
  0x5e   : > { %871 = vperm.xlu0 %5936, %v757_v18  }
  0x61   : > { %5931 = vset.pattern.permute.xlu1 %v9490_v3 }
  0x62   : > { %875 = vperm.xlu1 %5931, %v6638_v5   ;;  %883 = vperm.xlu0 %5936, %v760_v34  }
  0x66   : > { %879 = vperm.xlu1 %5931, %v759_v32   ;;  %887 = vperm.xlu0 %5936, %v761_v36  }
  0x6a   : > { %5932 = vset.pattern.permute.xlu1 %v9484_v6  ;;  %899 = vperm.xlu0 %5936, %v764_v43  }
  0x6b   : > { %923 = vperm.xlu1 %5932, %v757_v18   ;;  %v6760_v18 = vsub.s32 0, %v714_v14 }
  0x6d   : > { %9538 = vst [vmem:[#allocation20_spill] sm:$0xff] %v6760_v18 }
  0x6e   : > { %5939 = vset.pattern.permute.xlu0 %v9484_v6 }
  0x6f   : > { %931 = vperm.xlu1 %5932, %v759_v32   ;;  %927 = vperm.xlu0 %5939, %v6638_v5   ;;  %v6773_v32 = vsub.s32 1, %v714_v14 }
  0x71   : > { %9539 = vst [vmem:[#allocation21_spill] sm:$0xff] %v6773_v32 }
  0x73   : > { %935 = vperm.xlu1 %5932, %v760_v34   ;;  %943 = vperm.xlu0 %5939, %v6685_v33  }
  0x77   : > { %5933 = vset.pattern.permute.xlu1 %v9488_v4  ;;  %5941 = vset.pattern.permute.xlu0 %v9488_v4 }
  0x78   : > { %793 = vperm.xlu1 %5933, %v6685_v33   ;;  %788 = vperm.xlu0 %5941, %v761_v36  }
  0x7c   : > { %5934 = vset.pattern.permute.xlu1 %v9486_v21  ;;  %1101 = vperm.xlu0 %5941, %v1090_v56  }
  0x7d   : > { %835 = vperm.xlu1 %5934, %v761_v36  }
  0x80   : > { %5944 = vset.pattern.permute.xlu0 %v9486_v21 }
  0x81   : > { %5935 = vset.pattern.permute.xlu1 %v9488_v4  ;;  %1156 = vperm.xlu0 %5944, %v1091_v57  }
  0x82   : > { %798 = vperm.xlu1 %5935, %v6691_v35  }
  0x85   : > { %1160 = vperm.xlu0 %5944, %v1092_v58  }
  0x86   : > { %803 = vperm.xlu1 %5935, %v764_v43  }
  0x89   : > { %1172 = vperm.xlu0 %5944, %v1095_v59  }
  0x8a   : > { %5937 = vset.pattern.permute.xlu1 %v9486_v21 }
  0x8b   : > { %847 = vperm.xlu1 %5937, %v764_v43  }
  0x8d   : > { %1176 = vperm.xlu0 %5944, %v1096_v60  }
  0x8f   : > { %5938 = vset.pattern.permute.xlu1 %v9490_v3 }
  0x90   : > { %891 = vperm.xlu1 %5938, %v6685_v33  }
  0x91   : > { %5950 = vset.pattern.permute.xlu0 %v9488_v4 }
  0x92   : > { %1121 = vperm.xlu0 %5950, %v1094_v61  }
  0x94   : > { %895 = vperm.xlu1 %5938, %v6691_v35  }
  0x98   : > { %5940 = vset.pattern.permute.xlu1 %v9484_v6 }
  0x99   : > { %939 = vperm.xlu1 %5940, %v761_v36   ;;  %v765_v36 = vld [vmem:[%s9454_s5 + $0x4] sm:$0xf] }
  0x9a   : > { %v6780_v39 = vrot.slane %v765_v36, %v6773_v32  ;;  %v6783_v42 = vrot.slane %v765_v36, %v6760_v18  ;;  %v6785_v45 = vrot.slane %v765_v36, %v904_v37 }
  0x9d   : > { %947 = vperm.xlu1 %5940, %v6691_v35  }
  0xa1   : > { %951 = vperm.xlu1 %5940, %v764_v43  }
  0xa5   : > { %5942 = vset.pattern.permute.xlu1 %v9488_v4 }
  0xa6   : > { %1106 = vperm.xlu1 %5942, %v1091_v57  }
  0xaa   : > { %5943 = vset.pattern.permute.xlu1 %v9486_v21 }
  0xab   : > { %1152 = vperm.xlu1 %5943, %v1090_v56   ;;  %v6794_v56 = vrot.slane %v765_v36, %v956_v46 }
  0xaf   : > { %5945 = vset.pattern.permute.xlu1 %v9488_v4 }
  0xb0   : > { %1111 = vperm.xlu1 %5945, %v1092_v58  }
  0xb4   : > { %1116 = vperm.xlu1 %5945, %v1093_v62  }
  0xb8   : > { %5946 = vset.pattern.permute.xlu1 %v9486_v21 }
  0xb9   : > { %1164 = vperm.xlu1 %5946, %v1093_v62  }
  0xbd   : > { %5947 = vset.pattern.permute.xlu1 %v9488_v4 }
  0xbe   : > { %1126 = vperm.xlu1 %5947, %v1095_v59  }
  0xbf   : > { %v733_v63 = vpop.permute.xlu1 %732  ;;  %v711_v0 = vpop.permute.xlu0 %710 }
  0xc0   : > { %v716_v26 = vrot.slane %v711_v0, %v6760_v18  ;;  %v738_v28 = vrot.slane %v733_v63, %v6760_v18 }
  0xc2   : > { %5948 = vset.pattern.permute.xlu1 %v9486_v21  ;;  %v717_v30 = vmul.f32 %v716_v26, %v707_v24  ;;  %v739_v34 = vmul.f32 %v738_v28, %v707_v24 }
  0xc3   : > { %1168 = vperm.xlu1 %5948, %v1094_v61   ;;  %v774_v1 = vpop.permute.xlu0 %773 }
  0xc4   : > { %v746_v2 = vpop.permute.xlu1 %745  ;;  %v741_v43 = vrot.slane %v739_v34, 2  ;;  %v811_v51 = vmul.f32 %v6783_v42, %v774_v1 }
  0xc5   : > { %v751_v35 = vrot.slane %v746_v2, %v6760_v18 }
  0xc7   : > { %5949 = vset.pattern.permute.xlu1 %v9488_v4  ;;  %v752_v44 = vmul.f32 %v751_v35, %v707_v24 }
  0xc8   : > { %1131 = vperm.xlu1 %5949, %v1096_v60   ;;  %v720_v5 = vpop.permute.xlu0 %719 }
  0xc9   : > { %v769_v7 = vpop.permute.xlu1 %768  ;;  %v725_v22 = vrot.slane %v720_v5, %v6760_v18  ;;  %v754_v53 = vrot.slane %v752_v44, 3 }
  0xca   : > { %v810_v54 = vmul.f32 %v6783_v42, %v769_v7 }
  0xcb   : > { %v726_v27 = vmul.f32 %v725_v22, %v707_v24 }
  0xcc   : > { %1136 = vperm.xlu1 %5949, %v1097_v8   ;;  %v824_v12 = vpop.permute.xlu0 %823 }
  0xcd   : > { %v728_v31 = vrot.slane %v726_v27, 1  ;;  %v855_v52 = vmul.f32 %v6780_v39, %v824_v12 }
  0xce   : > { %v820_v13 = vpop.permute.xlu1 %819 }
  0xcf   : > { %v730_v38 = vadd.f32 %v728_v31, %v717_v30  ;;  %v854_v48 = vmul.f32 %v6780_v39, %v820_v13  ;;  %v863_v62 = vadd.f32 %v855_v52, %v811_v51 }
  0xd0   : > { %5951 = vset.pattern.permute.xlu1 %v9486_v21  ;;  %v828_v15 = vpop.permute.xlu0 %827 }
  0xd1   : > { %1180 = vperm.xlu1 %5951, %v1097_v8   ;;  %v743_v47 = vadd.f32 %v741_v43, %v730_v38  ;;  %v862_v58 = vadd.f32 %v854_v48, %v810_v54  ;;  %v856_v59 = vmul.f32 %v6780_v39, %v828_v15 }
  0xd3   : > { %v779_v19 = vpop.permute.xlu1 %778  ;;  %v756_v57 = vadd.f32 %v754_v53, %v743_v47 }
  0xd4   : > { %v6762_v20 = vpop.permute.xlu0 %839  ;;  %v812_v60 = vmul.f32 %v6783_v42, %v779_v19 }
  0xd5   : > { %5952 = vset.pattern.permute.xlu1 %v9488_v4  ;;  %v6804_v7 = vrot.slane %v756_v57, %v6760_v18  ;;  %v859_v53 = vmul.f32 %v6780_v39, %v6762_v20 }
  0xd6   : > { %v864_v8 = vadd.f32 %v856_v59, %v812_v60 }
  0xd7   : > { %v784_v23 = vpop.permute.xlu1 %783 }
  0xd8   : > { %v6769_v25 = vpop.permute.xlu0 %843  ;;  %v813_v13 = vmul.f32 %v6783_v42, %v784_v23 }
  0xdc   : > { %v832_v29 = vpop.permute.xlu1 %831 }
  0xdd   : > { %v872_v33 = vpop.permute.xlu0 %871  ;;  %v857_v10 = vmul.f32 %v6780_v39, %v832_v29 }
  0xde   : > { %v906_v55 = vmul.f32 %v6785_v45, %v872_v33 }
  0xdf   : > { %v865_v30 = vadd.f32 %v857_v10, %v813_v13 }
  0xe0   : > { %v914_v1 = vadd.f32 %v906_v55, %v862_v58 }
  0xe1   : > { %v876_v40 = vpop.permute.xlu1 %875  ;;  %v884_v41 = vpop.permute.xlu0 %883 }
  0xe2   : > { %v907_v63 = vmul.f32 %v6785_v45, %v876_v40  ;;  %v909_v15 = vmul.f32 %v6785_v45, %v884_v41 }
  0xe4   : > { %v915_v14 = vadd.f32 %v907_v63, %v863_v62  ;;  %v917_v34 = vadd.f32 %v909_v15, %v865_v30 }
  0xe5   : > { %v880_v49 = vpop.permute.xlu1 %879  ;;  %v6788_v50 = vpop.permute.xlu0 %887 }
  0xe6   : > { %v908_v2 = vmul.f32 %v6785_v45, %v880_v49 }
  0xe8   : > { %v916_v24 = vadd.f32 %v908_v2, %v864_v8 }
  0xe9   : > { %v6798_v61 = vpop.permute.xlu0 %899 }
  0xea   : > { %v924_v0 = vpop.permute.xlu1 %923 }
  0xeb   : > { %v958_v5 = vmul.f32 %v6794_v56, %v924_v0 }
  0xed   : > { %v966_v12 = vadd.f32 %v958_v5, %v914_v1  ;;  %v910_v5 = vmul.f32 %v6785_v45, %v6788_v50 }
  0xee   : > { %v932_v19 = vpop.permute.xlu1 %931  ;;  %v928_v22 = vpop.permute.xlu0 %927 }
  0xef   : > { %v960_v26 = vmul.f32 %v6794_v56, %v932_v19  ;;  %v959_v27 = vmul.f32 %v6794_v56, %v928_v22  ;;  %v6812_v28 = vsub.f32 %v966_v12, %v6804_v7  ;;  %v860_v12 = vmul.f32 %v6780_v39, %v6769_v25 }
  0xf0   : > { %v913_v25 = vmul.f32 %v6785_v45, %v6798_v61 }
  0xf1   : > { %v968_v31 = vadd.f32 %v960_v26, %v916_v24  ;;  %v967_v33 = vadd.f32 %v959_v27, %v915_v14  ;;  %v986_v29 = vmul.f32 %v6812_v28, %v6812_v28 }
  0xf2   : > { %v936_v23 = vpop.permute.xlu1 %935  ;;  %v944_v51 = vpop.permute.xlu0 %943 }
  0xf3   : > { %v961_v35 = vmul.f32 %v6794_v56, %v936_v23  ;;  %994 = vadd.xlane.f32.xlu0 %v986_v29  ;;  %v6818_v36 = vsub.f32 %v968_v31, %v6804_v7  ;;  %v6821_v37 = vsub.f32 %v967_v33, %v6804_v7  ;;  %v963_v59 = vmul.f32 %v6794_v56, %v944_v51 }
  0xf5   : > { %v969_v38 = vadd.f32 %v961_v35, %v917_v34  ;;  %v988_v40 = vmul.f32 %v6818_v36, %v6818_v36  ;;  %v987_v41 = vmul.f32 %v6821_v37, %v6821_v37  ;;  %v1098_v34 = vld [vmem:[%s9454_s5 + $0x8] sm:$0x3] }
  0xf7   : > { %v794_v43 = vpop.permute.xlu1 %793  ;;  %998 = vadd.xlane.f32.xlu0 %v988_v40  ;;  %996 = vadd.xlane.f32.xlu1 %v987_v41  ;;  %v6828_v44 = vsub.f32 %v969_v38, %v6804_v7  ;;  %v789_v55 = vpop.permute.xlu0 %788  ;;  %v6865_v40 = vrot.slane %v1098_v34, %v6773_v32 }
  0xf8   : > { %v815_v54 = vmul.f32 %v6783_v42, %v794_v43  ;;  %v814_v63 = vmul.f32 %v6783_v42, %v789_v55 }
  0xf9   : > { %v989_v46 = vmul.f32 %v6828_v44, %v6828_v44 }
  0xfa   : > { %v867_v58 = vadd.f32 %v859_v53, %v815_v54 }
  0xfb   : > { %1000 = vadd.xlane.f32.xlu0 %v989_v46  ;;  %v1102_v30 = vpop.permute.xlu0 %1101  ;;  %v6872_v46 = vrot.slane %v1098_v34, %v6760_v18 }
  0xfc   : > { %v836_v47 = vpop.permute.xlu1 %835 }
  0xfd   : > { %v858_v62 = vmul.f32 %v6780_v39, %v836_v47 }
  0xff   : > { %v866_v20 = vadd.f32 %v858_v62, %v814_v63  ;;  %v1143_v62 = vmul.f32 %v6872_v46, %v1102_v30 }
 0x100   : > { %v1157_v43 = vpop.permute.xlu0 %1156 }
 0x101   : > { %v799_v48 = vpop.permute.xlu1 %798  ;;  %v918_v22 = vadd.f32 %v910_v5, %v866_v20 }
 0x102   : > { %v816_v10 = vmul.f32 %v6783_v42, %v799_v48 }
 0x104   : > { %v868_v24 = vadd.f32 %v860_v12, %v816_v10  ;;  %v1161_v20 = vpop.permute.xlu0 %1160 }
 0x105   : > { %v804_v49 = vpop.permute.xlu1 %803  ;;  %v1189_v10 = vmul.f32 %v6865_v40, %v1161_v20 }
 0x106   : > { %v817_v26 = vmul.f32 %v6783_v42, %v804_v49 }
 0x10a   : > { %v848_v52 = vpop.permute.xlu1 %847 }
 0x10b   : > { %v861_v15 = vmul.f32 %v6780_v39, %v848_v52  ;;  %v1188_v52 = vmul.f32 %v6865_v40, %v1157_v43 }
 0x10d   : > { %v869_v33 = vadd.f32 %v861_v15, %v817_v26  ;;  %v1173_v26 = vpop.permute.xlu0 %1172 }
 0x10f   : > { %v892_v57 = vpop.permute.xlu1 %891 }
 0x110   : > { %v911_v60 = vmul.f32 %v6785_v45, %v892_v57 }
 0x112   : > { %v919_v0 = vadd.f32 %v911_v60, %v867_v58 }
 0x113   : > { %v896_v1 = vpop.permute.xlu1 %895 }
 0x114   : > { %v971_v2 = vadd.f32 %v963_v59, %v919_v0  ;;  %v912_v19 = vmul.f32 %v6785_v45, %v896_v1  ;;  %v921_v45 = vadd.f32 %v913_v25, %v869_v33  ;;  %v6894_v59 = vld [vmem:[%s9454_s5 + $0xa] ss:$0 sm:$0xff] }
 0x116   : > { %v6842_v8 = vsub.f32 %v971_v2, %v6804_v7  ;;  %v920_v29 = vadd.f32 %v912_v19, %v868_v24 }
 0x118   : > { %v940_v13 = vpop.permute.xlu1 %939  ;;  %v991_v14 = vmul.f32 %v6842_v8, %v6842_v8 }
 0x119   : > { %v962_v50 = vmul.f32 %v6794_v56, %v940_v13 }
 0x11a   : > { %1004 = vadd.xlane.f32.xlu0 %v991_v14 }
 0x11b   : > { %v970_v27 = vadd.f32 %v962_v50, %v918_v22 }
 0x11c   : > { %v948_v31 = vpop.permute.xlu1 %947 }
 0x11d   : > { %v964_v23 = vmul.f32 %v6794_v56, %v948_v31  ;;  %v6857_v39 = vsub.f32 %v970_v27, %v6804_v7 }
 0x11e   : > { %v6874_v47 = vpop.f32.mrb[0].mxu0 }
 0x11f   : > { %v972_v35 = vadd.f32 %v964_v23, %v920_v29  ;;  %v990_v42 = vmul.f32 %v6857_v39, %v6857_v39  ;;  %v6878_v51 = vpop.f32.mrb[1].mxu0  ;;  %v1177_v23 = vpop.permute.xlu0 %1176 }
 0x120   : > { %v952_v38 = vpop.permute.xlu1 %951  ;;  %v6881_v53 = vpop.f32.mrb[2].mxu0 }
 0x121   : > { %v965_v61 = vmul.f32 %v6794_v56, %v952_v38  ;;  %1002 = vadd.xlane.f32.xlu1 %v990_v42  ;;  %v6869_v41 = vsub.f32 %v972_v35, %v6804_v7  ;;  %v6886_v55 = vpop.f32.mrb[3].mxu0  ;;  %v1192_v38 = vmul.f32 %v6865_v40, %v1173_v26 }
 0x123   : > { %v973_v48 = vadd.f32 %v965_v61, %v921_v45  ;;  %v992_v49 = vmul.f32 %v6869_v41, %v6869_v41  ;;  %v1122_v61 = vpop.permute.xlu0 %1121 }
 0x125   : > { %v1107_v56 = vpop.permute.xlu1 %1106  ;;  %1006 = vadd.xlane.f32.xlu1 %v992_v49  ;;  %v6884_v54 = vsub.f32 %v973_v48, %v6804_v7  ;;  %v1147_v49 = vmul.f32 %v6872_v46, %v1122_v61 }
 0x126   : > { %v1144_v57 = vmul.f32 %v6872_v46, %v1107_v56 }
 0x127   : > { %v993_v58 = vmul.f32 %v6884_v54, %v6884_v54 }
 0x128   : > { %v1196_v60 = vadd.f32 %v1188_v52, %v1144_v57 }
 0x129   : > { %1008 = vadd.xlane.f32.xlu0 %v993_v58 }
 0x12a   : > { %v1153_v63 = vpop.permute.xlu1 %1152  ;;  %v1209_v0 = vadd.f32 %v6894_v59, %v1196_v60  ;;  %v6931_v60 = vpop.f32.mrb[4].mxu0 }
 0x12b   : > { %v1187_v1 = vmul.f32 %v6865_v40, %v1153_v63  ;;  %v6936_v63 = vpop.f32.mrb[5].mxu0 }
 0x12c   : > { %v6900_v2 = vsub.f32 %v1209_v0, %v6804_v7 }
 0x12d   : > { %v1195_v5 = vadd.f32 %v1187_v1, %v1143_v62  ;;  %v6938_v1 = vpop.f32.mrb[6].mxu0 }
 0x12e   : > { %v1225_v12 = vmul.f32 %v6900_v2, %v6900_v2  ;;  %v6942_v20 = vpop.f32.mrb[7].mxu0 }
 0x12f   : > { %v1112_v13 = vpop.permute.xlu1 %1111  ;;  %v1208_v14 = vadd.f32 %v6894_v59, %v1195_v5 }
 0x130   : > { %v1145_v15 = vmul.f32 %v6872_v46, %v1112_v13  ;;  %1234 = vadd.xlane.f32.xlu0 %v1225_v12  ;;  %v1193_v13 = vmul.f32 %v6865_v40, %v1177_v23 }
 0x131   : > { %v6908_v19 = vsub.f32 %v1208_v14, %v6804_v7 }
 0x132   : > { %v1197_v22 = vadd.f32 %v1189_v10, %v1145_v15 }
 0x133   : > { %v1117_v50 = vpop.permute.xlu1 %1116  ;;  %v1224_v24 = vmul.f32 %v6908_v19, %v6908_v19 }
 0x134   : > { %v1210_v27 = vadd.f32 %v6894_v59, %v1197_v22  ;;  %v1146_v33 = vmul.f32 %v6872_v46, %v1117_v50 }
 0x135   : > { %1232 = vadd.xlane.f32.xlu1 %v1224_v24 }
 0x136   : > { %v6914_v30 = vsub.f32 %v1210_v27, %v6804_v7 }
 0x138   : > { %v1165_v25 = vpop.permute.xlu1 %1164  ;;  %v1226_v31 = vmul.f32 %v6914_v30, %v6914_v30 }
 0x139   : > { %v1190_v29 = vmul.f32 %v6865_v40, %v1165_v25 }
 0x13a   : > { %1236 = vadd.xlane.f32.xlu1 %v1226_v31 }
 0x13b   : > { %v1198_v34 = vadd.f32 %v1190_v29, %v1146_v33 }
 0x13d   : > { %v1127_v35 = vpop.permute.xlu1 %1126  ;;  %v1211_v42 = vadd.f32 %v6894_v59, %v1198_v34 }
 0x13e   : > { %v1148_v45 = vmul.f32 %v6872_v46, %v1127_v35 }
 0x13f   : > { %v6924_v43 = vsub.f32 %v1211_v42, %v6804_v7 }
 0x140   : > { %v1200_v48 = vadd.f32 %v1192_v38, %v1148_v45 }
 0x141   : > { %v1227_v52 = vmul.f32 %v6924_v43, %v6924_v43 }
 0x142   : > { %v1169_v56 = vpop.permute.xlu1 %1168  ;;  %v1213_v57 = vadd.f32 %v6894_v59, %v1200_v48  ;;  %v6975_v48 = vld [vmem:[%s9455_s6 + $0x2] ss:$0 sm:$0xff] }
 0x143   : > { %v1191_v58 = vmul.f32 %v6865_v40, %v1169_v56  ;;  %1238 = vadd.xlane.f32.xlu0 %v1227_v52  ;;  %v1391_v56 = vmul.f32 %v6975_v48, %v6649_v9 }
 0x144   : > { %v6934_v62 = vsub.f32 %v1213_v57, %v6804_v7  ;;  %v1392_v57 = vmul.f32 %v6975_v48, %v6652_v11 }
 0x145   : > { %v1199_v0 = vadd.f32 %v1191_v58, %v1147_v49  ;;  %v6980_v49 = vld [vmem:[%s9455_s6 + $0x3] ss:$0 sm:$0xff]  ;;  %v1393_v58 = vmul.f32 %v6975_v48, %v6665_v16 }
 0x146   : > { %v1229_v5 = vmul.f32 %v6934_v62, %v6934_v62 }
 0x147   : > { %v1132_v10 = vpop.permute.xlu1 %1131  ;;  %v1212_v12 = vadd.f32 %v6894_v59, %v1199_v0  ;;  %v1394_v0 = vmul.f32 %v6975_v48, %v6668_v17  ;;  %v1406_v9 = vadd.f32 %v6980_v49, %v1393_v58 }
 0x148   : > { %v1149_v14 = vmul.f32 %v6872_v46, %v1132_v10  ;;  %1242 = vadd.xlane.f32.xlu0 %v1229_v5 }
 0x149   : > { %v6948_v15 = vsub.f32 %v1212_v12, %v6804_v7  ;;  %v1404_v12 = vadd.f32 %v6980_v49, %v1391_v56 }
 0x14a   : > { %v1201_v22 = vadd.f32 %v1193_v13, %v1149_v14  ;;  %v1405_v13 = vadd.f32 %v6980_v49, %v1392_v57  ;;  %v1407_v14 = vadd.f32 %v6980_v49, %v1394_v0 }
 0x14b   : > { %v1137_v50 = vpop.permute.xlu1 %1136  ;;  %v1228_v24 = vmul.f32 %v6948_v15, %v6948_v15 }
 0x14c   : > { %v1214_v26 = vadd.f32 %v6894_v59, %v1201_v22  ;;  %v1150_v25 = vmul.f32 %v6872_v46, %v1137_v50  ;;  %v1412_v50 = vmax.f32 %v1404_v12, 0.0  ;;  %v1413_v17 = vmax.f32 %v1405_v13, 0.0 }
 0x14d   : > { %1240 = vadd.xlane.f32.xlu1 %v1228_v24  ;;  %v1414_v24 = vmax.f32 %v1406_v9, 0.0 }
 0x14e   : > { %v6954_v27 = vsub.f32 %v1214_v26, %v6804_v7 }
 0x150   : > { %v1181_v31 = vpop.permute.xlu1 %1180  ;;  %v1230_v33 = vmul.f32 %v6954_v27, %v6954_v27 }
 0x151   : > { %v1194_v29 = vmul.f32 %v6865_v40, %v1181_v31  ;;  %v5304_v40 = vld [vmem:[%s9456_s7 + $0x10] sm:$0xff] }
 0x152   : > { %1244 = vadd.xlane.f32.xlu1 %v1230_v33  ;;  %v1415_v33 = vmax.f32 %v1407_v14, 0.0 }
 0x153   : > { %v1202_v23 = vadd.f32 %v1194_v29, %v1150_v25 }
 0x155   : > { %v1215_v34 = vadd.f32 %v6894_v59, %v1202_v23 }
 0x157   : > { %v6962_v35 = vsub.f32 %v1215_v34, %v6804_v7  ;;  %v5305_v7 = vld [vmem:[%s9456_s7 + $0x18] sm:$0xff]  ;;  %v1516_v34 = vpack.c.bf16 %v1413_v17, %v1412_v50 }
 0x158   : > { %v1520_v59 = vpack.c.bf16 %v5305_v7, %v5304_v40  ;;  %v1517_v7 = vpack.c.bf16 %v1415_v33, %v1414_v24 }
 0x159   : > { %v1231_v42 = vmul.f32 %v6962_v35, %v6962_v35  ;;  %5573 = vmatprep.mubr.msk.bf16.mxu1 %vm1427_vm1, %v1516_v34 }
 0x15a   : > { %5571 = vmatprep.subr.bf16.mxu1 %v1520_v59 }
 0x15b   : > { %1246 = vadd.xlane.f32.xlu0 %v1231_v42  ;;  %5572 = vmatpush3.bf16.msra.mxu1 %v1520_v59 }
 0x15e   : > { %5574 = vmatmul.mubr.msk.bf16.vlgmr.msra.gmra.mrb[0].mxu1 %vm1427_vm1, %v1517_v7 }
 0x180   : > { %v995_v38 = vpop.xlane.xlu0 %994 }
 0x181   : > { %5966 = vrsqrt.f32 %v995_v38  ;;  %vm1012_vm2 = vcmp.eq.f32.partialorder %v995_v38, inf  ;;  %v1015_v10 = vand.u32 2147483648, %v995_v38  ;;  %vm1014_vm3 = vcmp.eq.f32.partialorder %v995_v38, 0.0 }
 0x184   : > { %v997_v46 = vpop.xlane.xlu1 %996  ;;  %v999_v45 = vpop.xlane.xlu0 %998 }
 0x185   : > { %5968 = vrsqrt.f32 %v997_v46  ;;  %vm1019_vm4 = vcmp.eq.f32.partialorder %v997_v46, inf  ;;  %vm1021_vm5 = vcmp.eq.f32.partialorder %v997_v46, 0.0  ;;  %v1022_v29 = vand.u32 2147483648, %v997_v46 }
 0x186   : > { %5970 = vrsqrt.f32 %v999_v45  ;;  %vm1026_vm6 = vcmp.eq.f32.partialorder %v999_v45, inf  ;;  %v1029_v40 = vand.u32 2147483648, %v999_v45  ;;  %vm1028_vm7 = vcmp.eq.f32.partialorder %v999_v45, 0.0 }
 0x188   : > { %v1001_v61 = vpop.xlane.xlu0 %1000 }
 0x189   : > { %5972 = vrsqrt.f32 %v1001_v61  ;;  %vm1033_vm8 = vcmp.eq.f32.partialorder %v1001_v61, inf  ;;  %v1036_v0 = vand.u32 2147483648, %v1001_v61  ;;  %vm1035_vm9 = vcmp.eq.f32.partialorder %v1001_v61, 0.0 }
 0x18b   : > { %v5967_v52 = vpop.eup %5966 }
 0x18c   : > { %v1011_v5 = vmul.f32 %v5967_v52, %v995_v38 }
 0x18e   : > { %v1013_v11 = vsel %vm1012_vm2, %v995_v38, %v1011_v5 }
 0x18f   : > { %v5969_v16 = vpop.eup %5968  ;;  %v1016_v22 = vsel %vm1014_vm3, %v1015_v10, %v1013_v11 }
 0x190   : > { %v5971_v26 = vpop.eup %5970  ;;  %v1018_v25 = vmul.f32 %v5969_v16, %v997_v46  ;;  %v1066_v31 = vadd.f32 1e-07, %v1016_v22 }
 0x191   : > { %v1025_v23 = vmul.f32 %v5971_v26, %v999_v45 }
 0x192   : > { %v1020_v42 = vsel %vm1019_vm4, %v997_v46, %v1018_v25  ;;  %5974 = vrcp.f32 %v1066_v31 }
 0x193   : > { %v5973_v38 = vpop.eup %5972  ;;  %v1027_v59 = vsel %vm1026_vm6, %v999_v45, %v1025_v23  ;;  %v1023_v52 = vsel %vm1021_vm5, %v1022_v29, %v1020_v42 }
 0x194   : > { %v1032_v56 = vmul.f32 %v5973_v38, %v1001_v61  ;;  %v1030_v57 = vsel %vm1028_vm7, %v1029_v40, %v1027_v59  ;;  %v1067_v58 = vadd.f32 1e-07, %v1023_v52 }
 0x195   : > { %v1068_v5 = vadd.f32 1e-07, %v1030_v57 }
 0x196   : > { %v1034_v10 = vsel %vm1033_vm8, %v1001_v61, %v1032_v56  ;;  %5976 = vrcp.f32 %v1067_v58 }
 0x197   : > { %5978 = vrcp.f32 %v1068_v5  ;;  %v1037_v46 = vsel %vm1035_vm9, %v1036_v0, %v1034_v10 }
 0x198   : > { %v1069_v12 = vadd.f32 1e-07, %v1037_v46 }
 0x19a   : > { %5980 = vrcp.f32 %v1069_v12 }
 0x19c   : > { %v5975_v13 = vpop.eup %5974 }
 0x19d   : > { %v1075_v45 = vmul.f32 %v5975_v13, %v6812_v28 }
 0x19f   : > { %v6998_v9 = vadd.f32 %v6878_v51, %v1075_v45 }
 0x1a0   : > { %v5977_v14 = vpop.eup %5976 }
 0x1a1   : > { %v5979_v11 = vpop.eup %5978  ;;  %1715 = vadd.xlane.f32.xlu1 %v6998_v9  ;;  %v1077_v16 = vmul.f32 %v5977_v14, %v6821_v37 }
 0x1a2   : > { %v1079_v22 = vmul.f32 %v5979_v11, %v6818_v36 }
 0x1a3   : > { %v7004_v61 = vadd.f32 %v6886_v55, %v1077_v16 }
 0x1a4   : > { %v5981_v50 = vpop.eup %5980  ;;  %v7007_v17 = vadd.f32 %v6874_v47, %v1079_v22 }
 0x1a5   : > { %v1081_v28 = vmul.f32 %v5981_v50, %v6828_v44  ;;  %1717 = vadd.xlane.f32.xlu0 %v7004_v61 }
 0x1a6   : > { %1719 = vadd.xlane.f32.xlu1 %v7007_v17 }
 0x1a7   : > { %v7013_v51 = vadd.f32 %v6881_v53, %v1081_v28  ;;  %v1005_v24 = vpop.xlane.xlu0 %1004 }
 0x1a8   : > { %5982 = vrsqrt.f32 %v1005_v24  ;;  %vm1047_vm10 = vcmp.eq.f32.partialorder %v1005_v24, inf  ;;  %v1050_v47 = vand.u32 2147483648, %v1005_v24  ;;  %vm1049_vm11 = vcmp.eq.f32.partialorder %v1005_v24, 0.0 }
 0x1a9   : > { %1721 = vadd.xlane.f32.xlu0 %v7013_v51 }
 0x1ae   : > { %v1003_v36 = vpop.xlane.xlu1 %1002 }
 0x1af   : > { %5984 = vrsqrt.f32 %v1003_v36  ;;  %vm1040_vm12 = vcmp.eq.f32.partialorder %v1003_v36, inf  ;;  %v1043_v23 = vand.u32 2147483648, %v1003_v36  ;;  %vm1042_vm13 = vcmp.eq.f32.partialorder %v1003_v36, 0.0 }
 0x1b2   : > { %v5983_v37 = vpop.eup %5982  ;;  %v1007_v55 = vpop.xlane.xlu1 %1006 }
 0x1b3   : > { %v1046_v26 = vmul.f32 %v5983_v37, %v1005_v24  ;;  %5986 = vrsqrt.f32 %v1007_v55  ;;  %vm1054_vm14 = vcmp.eq.f32.partialorder %v1007_v55, inf  ;;  %v1057_v59 = vand.u32 2147483648, %v1007_v55 }
 0x1b4   : > { %vm1056_vm15 = vcmp.eq.f32.partialorder %v1007_v55, 0.0 }
 0x1b5   : > { %v1048_v44 = vsel %vm1047_vm10, %v1005_v24, %v1046_v26 }
 0x1b6   : > { %v1009_v25 = vpop.xlane.xlu0 %1008  ;;  %v1051_v31 = vsel %vm1049_vm11, %v1050_v47, %v1048_v44 }
 0x1b7   : > { %5988 = vrsqrt.f32 %v1009_v25  ;;  %v1071_v33 = vadd.f32 1e-07, %v1051_v31  ;;  %vm1061_vm0 = vcmp.eq.f32.partialorder %v1009_v25, inf  ;;  %v1064_v46 = vand.u32 2147483648, %v1009_v25 }
 0x1b8   : > { %vm1063_vm2 = vcmp.eq.f32.partialorder %v1009_v25, 0.0 }
 0x1b9   : > { %v5985_v53 = vpop.eup %5984  ;;  %5990 = vrcp.f32 %v1071_v33 }
 0x1ba   : > { %v1039_v29 = vmul.f32 %v5985_v53, %v1003_v36 }
 0x1bc   : > { %v1041_v34 = vsel %vm1040_vm12, %v1003_v36, %v1039_v29 }
 0x1bd   : > { %v5987_v42 = vpop.eup %5986  ;;  %v1235_v40 = vpop.xlane.xlu0 %1234  ;;  %v1044_v7 = vsel %vm1042_vm13, %v1043_v23, %v1041_v34 }
 0x1be   : > { %v1053_v38 = vmul.f32 %v5987_v42, %v1007_v55  ;;  %5992 = vrsqrt.f32 %v1235_v40  ;;  %v1070_v52 = vadd.f32 1e-07, %v1044_v7  ;;  %vm1257_vm3 = vcmp.eq.f32.partialorder %v1235_v40, inf }
 0x1bf   : > { %v1260_v24 = vand.u32 2147483648, %v1235_v40  ;;  %vm1259_vm4 = vcmp.eq.f32.partialorder %v1235_v40, 0.0 }
 0x1c0   : > { %v1055_v56 = vsel %vm1054_vm14, %v1007_v55, %v1053_v38  ;;  %5994 = vrcp.f32 %v1070_v52 }
 0x1c1   : > { %v5989_v57 = vpop.eup %5988  ;;  %v1058_v58 = vsel %vm1056_vm15, %v1057_v59, %v1055_v56 }
 0x1c2   : > { %v1060_v0 = vmul.f32 %v5989_v57, %v1009_v25  ;;  %v1072_v5 = vadd.f32 1e-07, %v1058_v58  ;;  %v1233_v10 = vpop.xlane.xlu1 %1232  ;;  %v1329_v57 = vld [vmem:[%s6609_s27 + $0x8] sm:$0xff] }
 0x1c3   : > { %5996 = vrsqrt.f32 %v1233_v10  ;;  %v5991_v12 = vpop.eup %5990  ;;  %vm1250_vm5 = vcmp.eq.f32.partialorder %v1233_v10, inf  ;;  %v1253_v53 = vand.u32 2147483648, %v1233_v10  ;;  %vm1252_vm6 = vcmp.eq.f32.partialorder %v1233_v10, 0.0 }
 0x1c4   : > { %v1062_v13 = vsel %vm1061_vm0, %v1009_v25, %v1060_v0  ;;  %5998 = vrcp.f32 %v1072_v5  ;;  %v1085_v14 = vmul.f32 %v5991_v12, %v6842_v8 }
 0x1c5   : > { %v1065_v45 = vsel %vm1063_vm2, %v1064_v46, %v1062_v13 }
 0x1c6   : > { %v1073_v11 = vadd.f32 1e-07, %v1065_v45  ;;  %v7018_v16 = vadd.f32 %v6942_v20, %v1085_v14 }
 0x1c7   : > { %v1237_v22 = vpop.xlane.xlu1 %1236 }
 0x1c8   : > { %v5993_v50 = vpop.eup %5992  ;;  %6000 = vrcp.f32 %v1073_v11  ;;  %1725 = vadd.xlane.f32.xlu0 %v7018_v16  ;;  %vm1264_vm7 = vcmp.eq.f32.partialorder %v1237_v22, inf  ;;  %v1267_v38 = vand.u32 2147483648, %v1237_v22  ;;  %vm1266_vm8 = vcmp.eq.f32.partialorder %v1237_v22, 0.0 }
 0x1c9   : > { %v1256_v28 = vmul.f32 %v5993_v50, %v1235_v40  ;;  %6002 = vrsqrt.f32 %v1237_v22 }
 0x1ca   : > { %v5995_v36 = vpop.eup %5994 }
 0x1cb   : > { %v1258_v37 = vsel %vm1257_vm3, %v1235_v40, %v1256_v28  ;;  %v1083_v55 = vmul.f32 %v5995_v36, %v6857_v39 }
 0x1cc   : > { %v1261_v26 = vsel %vm1259_vm4, %v1260_v24, %v1258_v37  ;;  %vm2379_vm4 = vcmask 523264  }
 0x1cd   : > { %v5997_v8 = vpop.eup %5996  ;;  %v1305_v47 = vadd.f32 1e-07, %v1261_v26  ;;  %v7023_v25 = vadd.f32 %v6936_v63, %v1083_v55  ;;  %v1330_v26 = vld [vmem:[%s6609_s27 + $0x10] sm:$0xff] }
 0x1ce   : > { %v5999_v44 = vpop.eup %5998  ;;  %v1249_v20 = vmul.f32 %v5997_v8, %v1233_v10 }
 0x1cf   : > { %v1087_v31 = vmul.f32 %v5999_v44, %v6869_v41  ;;  %6004 = vrcp.f32 %v1305_v47  ;;  %1723 = vadd.xlane.f32.xlu1 %v7023_v25 }
 0x1d0   : > { %v1251_v33 = vsel %vm1250_vm5, %v1233_v10, %v1249_v20  ;;  %v1239_v29 = vpop.xlane.xlu0 %1238  ;;  %vm4036_vm5 = vcmask 15360  }
 0x1d1   : > { %v7028_v23 = vadd.f32 %v6931_v60, %v1087_v31  ;;  %6006 = vrsqrt.f32 %v1239_v29  ;;  %v1254_v34 = vsel %vm1252_vm6, %v1253_v53, %v1251_v33  ;;  %vm1271_vm9 = vcmp.eq.f32.partialorder %v1239_v29, inf }
 0x1d2   : > { %v6001_v39 = vpop.eup %6000  ;;  %v1304_v40 = vadd.f32 1e-07, %v1254_v34  ;;  %v1274_v46 = vand.u32 2147483648, %v1239_v29  ;;  %vm1273_vm10 = vcmp.eq.f32.partialorder %v1239_v29, 0.0  ;;  %vm4027_vm6 = vcmask 7168  }
 0x1d3   : > { %v6003_v42 = vpop.eup %6002  ;;  %v1089_v63 = vmul.f32 %v6001_v39, %v6884_v54  ;;  %1727 = vadd.xlane.f32.xlu1 %v7028_v23 }
 0x1d4   : > { %v1263_v41 = vmul.f32 %v6003_v42, %v1237_v22  ;;  %6008 = vrcp.f32 %v1304_v40 }
 0x1d5   : > { %v7033_v7 = vadd.f32 %v6938_v1, %v1089_v63  ;;  %v1243_v59 = vpop.xlane.xlu0 %1242 }
 0x1d6   : > { %v1265_v60 = vsel %vm1264_vm7, %v1237_v22, %v1263_v41  ;;  %6010 = vrsqrt.f32 %v1243_v59  ;;  %vm1285_vm11 = vcmp.eq.f32.partialorder %v1243_v59, inf  ;;  %v1288_v24 = vand.u32 2147483648, %v1243_v59 }
 0x1d7   : > { %1729 = vadd.xlane.f32.xlu0 %v7033_v7  ;;  %v1268_v52 = vsel %vm1266_vm8, %v1267_v38, %v1265_v60  ;;  %vm1287_vm12 = vcmp.eq.f32.partialorder %v1243_v59, 0.0  ;;  %v1331_v38 = vld [vmem:[%s6609_s27 + $0x18] sm:$0xff]  ;;  %vm4045_vm7 = vcmask 23552   ;;  %vm4103_vm8 = vcmask 31744  }
 0x1d8   : > { %v1306_v56 = vadd.f32 1e-07, %v1268_v52 }
 0x1d9   : > { %v6005_v54 = vpop.eup %6004 }
 0x1da   : > { %v1241_v58 = vpop.xlane.xlu1 %1240  ;;  %v1315_v0 = vmul.f32 %v6005_v54, %v6900_v2  ;;  %6012 = vrcp.f32 %v1306_v56  ;;  %v1328_v2 = vld [vmem:[%s6609_s27] sm:$0xff] }
 0x1db   : > { %v6007_v1 = vpop.eup %6006  ;;  %6014 = vrsqrt.f32 %v1241_v58  ;;  %vm1278_vm13 = vcmp.eq.f32.partialorder %v1241_v58, inf  ;;  %v1281_v53 = vand.u32 2147483648, %v1241_v58  ;;  %vm1280_vm14 = vcmp.eq.f32.partialorder %v1241_v58, 0.0 }
 0x1dc   : > { %v1270_v5 = vmul.f32 %v6007_v1, %v1239_v29  ;;  %v7038_v10 = vadd.f32 %v1329_v57, %v1315_v0  ;;  %v1333_v57 = vld [vmem:[%s6609_s27 + $0x28] sm:$0xff] }
 0x1de   : > { %v1272_v12 = vsel %vm1271_vm9, %v1239_v29, %v1270_v5  ;;  %1602 = vadd.xlane.f32.xlu0 %v7038_v10  ;;  %v6009_v13 = vpop.eup %6008  ;;  %vm4070_vm9 = vcmask 785408  }
 0x1df   : > { %v1245_v45 = vpop.xlane.xlu1 %1244  ;;  %v1275_v14 = vsel %vm1273_vm10, %v1274_v46, %v1272_v12  ;;  %v1313_v50 = vmul.f32 %v6009_v13, %v6908_v19  ;;  %v6206_v46 = vld [vmem:[%s6604_s11 + $0x20] sm:$0xff]  ;;  %v6207_v12 = vld [vmem:[%s6604_s11 + $0x28] sm:$0xff] }
 0x1e0   : > { %v6011_v11 = vpop.eup %6010  ;;  %6016 = vrsqrt.f32 %v1245_v45  ;;  %v1307_v28 = vadd.f32 1e-07, %v1275_v14  ;;  %vm1292_vm15 = vcmp.eq.f32.partialorder %v1245_v45, inf  ;;  %vm1294_vm0 = vcmp.eq.f32.partialorder %v1245_v45, 0.0  ;;  %v6208_v14 = vld [vmem:[%s6604_s11 + $0x30] sm:$0xff] }
 0x1e1   : > { %v1284_v22 = vmul.f32 %v6011_v11, %v1243_v59  ;;  %v7043_v37 = vadd.f32 %v1328_v2, %v1313_v50  ;;  %v1396_v13 = vmul.f32 %v6207_v12, %v6975_v48  ;;  %v1397_v11 = vmul.f32 %v6208_v14, %v6975_v48  ;;  %v6209_v2 = vld [vmem:[%s6604_s11 + $0x38] sm:$0xff] }
 0x1e2   : > { %6018 = vrcp.f32 %v1307_v28 }
 0x1e3   : > { %v1286_v36 = vsel %vm1285_vm11, %v1243_v59, %v1284_v22  ;;  %1600 = vadd.xlane.f32.xlu1 %v7043_v37  ;;  %v1398_v22 = vmul.f32 %v6209_v2, %v6975_v48  ;;  %v1409_v28 = vadd.f32 %v6980_v49, %v1396_v13 }
 0x1e4   : > { %v6013_v55 = vpop.eup %6012  ;;  %v1289_v8 = vsel %vm1287_vm12, %v1288_v24, %v1286_v36  ;;  %v1332_v36 = vld [vmem:[%s6609_s27 + $0x20] sm:$0xff] }
 0x1e5   : > { %v6015_v47 = vpop.eup %6014  ;;  %v1317_v44 = vmul.f32 %v6013_v55, %v6914_v30  ;;  %v1309_v20 = vadd.f32 1e-07, %v1289_v8  ;;  %v1295_v30 = vand.u32 2147483648, %v1245_v45  ;;  %v1411_v8 = vadd.f32 %v6980_v49, %v1398_v22  ;;  %v5322_v22 = vld [vmem:[%s9458_s9 + $0xa8] sm:$0xff] }
 0x1e6   : > { %v1277_v31 = vmul.f32 %v6015_v47, %v1241_v58 }
 0x1e7   : > { %v7048_v19 = vadd.f32 %v1330_v26, %v1317_v44  ;;  %6020 = vrcp.f32 %v1309_v20  ;;  %v1410_v26 = vadd.f32 %v6980_v49, %v1397_v11  ;;  %v1417_v20 = vmax.f32 %v1409_v28, 0.0  ;;  %v5320_v11 = vld [vmem:[%s9458_s9 + $0x98] sm:$0xff] }
 0x1e8   : > { %v1279_v33 = vsel %vm1278_vm13, %v1241_v58, %v1277_v31  ;;  %v1247_v29 = vpop.xlane.xlu0 %1246  ;;  %v5324_v28 = vld [vmem:[%s9458_s9 + $0xb8] sm:$0xff] }
 0x1e9   : > { %1604 = vadd.xlane.f32.xlu1 %v7048_v19  ;;  %6022 = vrsqrt.f32 %v1247_v29  ;;  %v1282_v34 = vsel %vm1280_vm14, %v1281_v53, %v1279_v33  ;;  %vm1299_vm2 = vcmp.eq.f32.partialorder %v1247_v29, inf  ;;  %vm1301_vm3 = vcmp.eq.f32.partialorder %v1247_v29, 0.0 }
 0x1ea   : > { %v6017_v39 = vpop.eup %6016  ;;  %v1308_v63 = vadd.f32 1e-07, %v1282_v34  ;;  %v1418_v31 = vmax.f32 %v1410_v26, 0.0  ;;  %v1419_v33 = vmax.f32 %v1411_v8, 0.0  ;;  %v1334_v34 = vld [vmem:[%s6609_s27 + $0x30] sm:$0xff] }
 0x1eb   : > { %v1291_v42 = vmul.f32 %v6017_v39, %v1245_v45  ;;  %v5327_v8 = vld [vmem:[%s9458_s9 + $0xd0] sm:$0xff] }
 0x1ec   : > { %v6019_v40 = vpop.eup %6018  ;;  %6024 = vrcp.f32 %v1308_v63 }
 0x1ed   : > { %v1293_v41 = vsel %vm1292_vm15, %v1245_v45, %v1291_v42  ;;  %v1319_v59 = vmul.f32 %v6019_v40, %v6924_v43  ;;  %v1395_v43 = vmul.f32 %v6206_v46, %v6975_v48  ;;  %v1302_v45 = vand.u32 2147483648, %v1247_v29 }
 0x1ee   : > { %v1296_v60 = vsel %vm1294_vm0, %v1295_v30, %v1293_v41  ;;  %v1519_v42 = vpack.c.bf16 %v1419_v33, %v1418_v31  ;;  %v1335_v30 = vld [vmem:[%s6609_s27 + $0x38] sm:$0xff]  ;;  %v5329_v33 = vld [vmem:[%s9458_s9 + $0xe0] sm:$0xff] }
 0x1ef   : > { %v1310_v52 = vadd.f32 1e-07, %v1296_v60  ;;  %v7053_v56 = vadd.f32 %v1331_v38, %v1319_v59  ;;  %v1408_v50 = vadd.f32 %v6980_v49, %v1395_v43  ;;  %v5318_v38 = vld [vmem:[%s9458_s9 + $0x88] sm:$0xff] }
 0x1f1   : > { %v6021_v54 = vpop.eup %6020  ;;  %6026 = vrcp.f32 %v1310_v52  ;;  %1606 = vadd.xlane.f32.xlu0 %v7053_v56  ;;  %v1416_v48 = vmax.f32 %v1408_v50, 0.0  ;;  %v5323_v50 = vld [vmem:[%s9458_s9 + $0xb0] sm:$0xff] }
 0x1f2   : > { %v1323_v58 = vmul.f32 %v6021_v54, %v6934_v62 }
 0x1f3   : > { %v6023_v0 = vpop.eup %6022 }
 0x1f4   : > { %v1298_v1 = vmul.f32 %v6023_v0, %v1247_v29  ;;  %v7058_v5 = vadd.f32 %v1333_v57, %v1323_v58 }
 0x1f6   : > { %v1300_v62 = vsel %vm1299_vm2, %v1247_v29, %v1298_v1  ;;  %1610 = vadd.xlane.f32.xlu0 %v7058_v5  ;;  %v6025_v24 = vpop.eup %6024  ;;  %v1518_v29 = vpack.c.bf16 %v1417_v20, %v1416_v48 }
 0x1f7   : > { %v1303_v55 = vsel %vm1301_vm3, %v1302_v45, %v1300_v62  ;;  %v1321_v47 = vmul.f32 %v6025_v24, %v6948_v15  ;;  %v2077_v24 = vpack.c.bf16 %v5324_v28, %v5323_v50 }
 0x1f8   : > { %v1311_v44 = vadd.f32 1e-07, %v1303_v55  ;;  %5577 = vmatprep.mubr.msk.bf16.mxu1 %vm1427_vm1, %v1518_v29  ;;  %v5326_v55 = vld [vmem:[%s9458_s9 + $0xc8] sm:$0xff] }
 0x1f9   : > { %v7075_v53 = vadd.f32 %v1332_v36, %v1321_v47  ;;  %5578 = vmatmul.mubr.msk.bf16.gmra.mrb[4].mxu1 %vm1427_vm1, %v1519_v42  ;;  %v5325_v36 = vld [vmem:[%s9458_s9 + $0xc0] sm:$0xff]  ;;  %v5328_v47 = vld [vmem:[%s9458_s9 + $0xd8] sm:$0xff]  ;;  %v5330_v29 = vld [vmem:[%s9458_s9 + $0xe8] sm:$0xff]  ;;  %vm2289_vm1 = vcmask 261120  }
 0x1fa   : > { %6028 = vrcp.f32 %v1311_v44  ;;  %v2078_v26 = vpack.c.bf16 %v5326_v55, %v5325_v36  ;;  %v2079_v48 = vpack.c.bf16 %v5328_v47, %v5327_v8  ;;  %v5331_v42 = vld [vmem:[%s9458_s9 + $0xf0] sm:$0xff]  ;;  %v1941_v47 = vld [vmem:[%s9458_s9] sm:$0xff] }
 0x1fb   : > { %v6027_v39 = vpop.eup %6026  ;;  %1608 = vadd.xlane.f32.xlu1 %v7075_v53 }
 0x1fc   : > { %v1325_v63 = vmul.f32 %v6027_v39, %v6954_v27  ;;  %v5317_v27 = vld [vmem:[%s9458_s9 + $0x80] sm:$0xff]  ;;  %v2080_v39 = vpack.c.bf16 %v5330_v29, %v5329_v33  ;;  %v1943_v33 = vld [vmem:[%s9458_s9 + $0x10] sm:$0xff]  ;;  %v1944_v29 = vld [vmem:[%s9458_s9 + $0x18] sm:$0xff] }
 0x1fd   : > { %v2074_v59 = vpack.c.bf16 %v5318_v38, %v5317_v27 }
 0x1fe   : > { %v7082_v15 = vadd.f32 %v1334_v34, %v1325_v63 }
 0x1ff   : > { %5605 = vmatprep.subr.bf16.mxu1 %v2074_v59 }
 0x200   : > { %1612 = vadd.xlane.f32.xlu1 %v7082_v15  ;;  %5606 = vmatpush3.bf16.msra.mxu1 %v2074_v59 }
 0x204   : > { %v6029_v49 = vpop.eup %6028 }
 0x205   : > { %v1327_v40 = vmul.f32 %v6029_v49, %v6962_v35 }
 0x207   : > { %v7087_v41 = vadd.f32 %v1335_v30, %v1327_v40 }
 0x209   : > { %1614 = vadd.xlane.f32.xlu0 %v7087_v41 }
 0x22e   : > { %v1716_v60 = vpop.xlane.xlu1 %1715 }
 0x22f   : > { %v1731_v52 = vmul.f32 0.0078125, %v1716_v60 }
 0x231   : > { %v7097_v54 = vsub.f32 %v6998_v9, %v1731_v52 }
 0x232   : > { %v1718_v35 = vpop.xlane.xlu0 %1717 }
 0x233   : > { %v1720_v57 = vpop.xlane.xlu1 %1719  ;;  %v1732_v58 = vmul.f32 0.0078125, %v1718_v35  ;;  %v1747_v0 = vmul.f32 %v7097_v54, %v7097_v54 }
 0x234   : > { %v1733_v1 = vmul.f32 0.0078125, %v1720_v57 }
 0x235   : > { %1755 = vadd.xlane.f32.xlu1 %v1747_v0  ;;  %v7102_v46 = vsub.f32 %v7004_v61, %v1732_v58 }
 0x236   : > { %v1722_v43 = vpop.xlane.xlu0 %1721  ;;  %v7105_v12 = vsub.f32 %v7007_v17, %v1733_v1  ;;  %v5319_v17 = vld [vmem:[%s9458_s9 + $0x90] sm:$0xff] }
 0x237   : > { %v1734_v13 = vmul.f32 0.0078125, %v1722_v43  ;;  %v1748_v9 = vmul.f32 %v7102_v46, %v7102_v46  ;;  %v2075_v2 = vpack.c.bf16 %v5320_v11, %v5319_v17 }
 0x238   : > { %v1749_v45 = vmul.f32 %v7105_v12, %v7105_v12 }
 0x239   : > { %1757 = vadd.xlane.f32.xlu0 %v1748_v9  ;;  %v7112_v14 = vsub.f32 %v7013_v51, %v1734_v13  ;;  %5607 = vmatprep.subr.bf16.mxu1 %v2075_v2  ;;  %v5321_v51 = vld [vmem:[%s9458_s9 + $0xa0] sm:$0xff] }
 0x23a   : > { %1759 = vadd.xlane.f32.xlu1 %v1749_v45  ;;  %5608 = vmatpush3.bf16.msra.mxu1 %v2075_v2  ;;  %v2076_v62 = vpack.c.bf16 %v5322_v22, %v5321_v51  ;;  %v7193_v2 = vpop.f32.mrb[0].mxu1 }
 0x23b   : > { %v1750_v61 = vmul.f32 %v7112_v14, %v7112_v14  ;;  %v7195_v51 = vpop.f32.mrb[1].mxu1 }
 0x23c   : > { %5609 = vmatprep.subr.bf16.mxu1 %v2076_v62  ;;  %v7197_v22 = vpop.f32.mrb[2].mxu1 }
 0x23d   : > { %1761 = vadd.xlane.f32.xlu0 %v1750_v61 }
 0x23e   : > { %5610 = vmatpush3.bf16.msra.mxu1 %v2076_v62 }
 0x23f   : > { %5611 = vmatprep.subr.bf16.mxu1 %v2077_v24 }
 0x242   : > { %5612 = vmatpush3.bf16.msra.mxu1 %v2077_v24 }
 0x243   : > { %5613 = vmatprep.subr.bf16.mxu1 %v2078_v26 }
 0x246   : > { %5614 = vmatpush3.bf16.msra.mxu1 %v2078_v26 }
 0x247   : > { %5615 = vmatprep.subr.bf16.mxu1 %v2079_v48 }
 0x24a   : > { %5616 = vmatpush3.bf16.msra.mxu1 %v2079_v48 }
 0x24b   : > { %5617 = vmatprep.subr.bf16.mxu1 %v2080_v39 }
 0x24e   : > { %5618 = vmatpush3.bf16.msra.mxu1 %v2080_v39 }
 0x255   : > { %v1726_v44 = vpop.xlane.xlu0 %1725 }
 0x256   : > { %v1736_v20 = vmul.f32 0.0078125, %v1726_v44 }
 0x258   : > { %v7147_v31 = vsub.f32 %v7018_v16, %v1736_v20  ;;  %v5332_v16 = vld [vmem:[%s9458_s9 + $0xf8] sm:$0xff] }
 0x259   : > { %v2081_v49 = vpack.c.bf16 %v5332_v16, %v5331_v42  ;;  %v1962_v42 = vpack.c.bf16 %v1944_v29, %v1943_v33 }
 0x25a   : > { %v1752_v34 = vmul.f32 %v7147_v31, %v7147_v31 }
 0x25b   : > { %5619 = vmatprep.subr.bf16.mxu1 %v2081_v49 }
 0x25c   : > { %v1724_v63 = vpop.xlane.xlu1 %1723  ;;  %1765 = vadd.xlane.f32.xlu0 %v1752_v34  ;;  %5620 = vmatpush3.bf16.msra.mxu1 %v2081_v49 }
 0x25d   : > { %v1735_v30 = vmul.f32 0.0078125, %v1724_v63  ;;  %v1946_v63 = vld [vmem:[%s9458_s9 + $0x28] sm:$0xff] }
 0x25f   : > { %v7164_v40 = vsub.f32 %v7023_v25, %v1735_v30 }
 0x260   : > { %v1728_v27 = vpop.xlane.xlu1 %1727 }
 0x261   : > { %v1737_v38 = vmul.f32 0.0078125, %v1728_v27  ;;  %v1751_v59 = vmul.f32 %v7164_v40, %v7164_v40  ;;  %v1948_v27 = vld [vmem:[%s9458_s9 + $0x38] sm:$0xff] }
 0x263   : > { %v7169_v60 = vsub.f32 %v7028_v23, %v1737_v38  ;;  %1763 = vadd.xlane.f32.xlu1 %v1751_v59 }
 0x264   : > { %v1730_v52 = vpop.xlane.xlu0 %1729 }
 0x265   : > { %v1738_v35 = vmul.f32 0.0078125, %v1730_v52  ;;  %v1753_v57 = vmul.f32 %v7169_v60, %v7169_v60 }
 0x267   : > { %v7174_v58 = vsub.f32 %v7033_v7, %v1738_v35  ;;  %1767 = vadd.xlane.f32.xlu1 %v1753_v57  ;;  %v1949_v57 = vld [vmem:[%s9458_s9 + $0x40] sm:$0xff] }
 0x269   : > { %v1754_v25 = vmul.f32 %v7174_v58, %v7174_v58 }
 0x26b   : > { %1769 = vadd.xlane.f32.xlu0 %v1754_v25  ;;  %v1603_v0 = vpop.xlane.xlu0 %1602  ;;  %v1950_v25 = vld [vmem:[%s9458_s9 + $0x48] sm:$0xff] }
 0x26c   : > { %v1618_v1 = vmul.f32 0.0078125, %v1603_v0  ;;  %v1965_v0 = vpack.c.bf16 %v1950_v25, %v1949_v57 }
 0x26e   : > { %v7179_v43 = vsub.f32 %v7038_v10, %v1618_v1 }
 0x270   : > { %v1634_v23 = vmul.f32 %v7179_v43, %v7179_v43  ;;  %v1601_v13 = vpop.xlane.xlu1 %1600 }
 0x271   : > { %v1617_v9 = vmul.f32 0.0078125, %v1601_v13 }
 0x272   : > { %1643 = vadd.xlane.f32.xlu0 %v1634_v23  ;;  %v1952_v23 = vld [vmem:[%s9458_s9 + $0x58] sm:$0xff] }
 0x273   : > { %v7184_v45 = vsub.f32 %v7043_v37, %v1617_v9  ;;  %v7199_v37 = vpop.f32.mrb[3].mxu1  ;;  %v1953_v9 = vld [vmem:[%s9458_s9 + $0x60] sm:$0xff] }
 0x275   : > { %v1633_v17 = vmul.f32 %v7184_v45, %v7184_v45 }
 0x276   : > { %v1605_v7 = vpop.xlane.xlu1 %1604 }
 0x277   : > { %v1619_v61 = vmul.f32 0.0078125, %v1605_v7  ;;  %1641 = vadd.xlane.f32.xlu1 %v1633_v17  ;;  %v1954_v7 = vld [vmem:[%s9458_s9 + $0x68] sm:$0xff]  ;;  %v1955_v17 = vld [vmem:[%s9458_s9 + $0x70] sm:$0xff] }
 0x279   : > { %v7189_v11 = vsub.f32 %v7048_v19, %v1619_v61  ;;  %v1967_v61 = vpack.c.bf16 %v1954_v7, %v1953_v9 }
 0x27b   : > { %v1635_v10 = vmul.f32 %v7189_v11, %v7189_v11 }
 0x27d   : > { %1645 = vadd.xlane.f32.xlu1 %v1635_v10  ;;  %v1956_v10 = vld [vmem:[%s9458_s9 + $0x78] sm:$0xff] }
 0x27e   : > { %v1607_v62 = vpop.xlane.xlu0 %1606 }
 0x27f   : > { %v1620_v50 = vmul.f32 0.0078125, %v1607_v62  ;;  %v1968_v62 = vpack.c.bf16 %v1956_v10, %v1955_v17 }
 0x281   : > { %v7202_v28 = vsub.f32 %v7053_v56, %v1620_v50  ;;  %v1942_v56 = vld [vmem:[%s9458_s9 + $0x8] sm:$0xff] }
 0x282   : > { %v1961_v48 = vpack.c.bf16 %v1942_v56, %v1941_v47 }
 0x283   : > { %v1611_v19 = vpop.xlane.xlu0 %1610  ;;  %v1636_v36 = vmul.f32 %v7202_v28, %v7202_v28 }
 0x284   : > { %v1622_v24 = vmul.f32 0.0078125, %v1611_v19  ;;  %5581 = vmatprep.subr.bf16.mxu0 %v1961_v48 }
 0x285   : > { %1647 = vadd.xlane.f32.xlu0 %v1636_v36  ;;  %5582 = vmatpush3.bf16.msra.mxu0 %v1961_v48 }
 0x286   : > { %v7207_v55 = vsub.f32 %v7058_v5, %v1622_v24  ;;  %5583 = vmatprep.subr.bf16.mxu0 %v1962_v42 }
 0x288   : > { %v1638_v26 = vmul.f32 %v7207_v55, %v7207_v55  ;;  %v1609_v8 = vpop.xlane.xlu1 %1608 }
 0x289   : > { %v1621_v44 = vmul.f32 0.0078125, %v1609_v8  ;;  %5584 = vmatpush3.bf16.msra.mxu0 %v1962_v42 }
 0x28a   : > { %1651 = vadd.xlane.f32.xlu0 %v1638_v26 }
 0x28b   : > { %v7218_v20 = vsub.f32 %v7075_v53, %v1621_v44  ;;  %v1945_v53 = vld [vmem:[%s9458_s9 + $0x20] sm:$0xff] }
 0x28c   : > { %v1963_v30 = vpack.c.bf16 %v1946_v63, %v1945_v53  ;;  %v7289_v63 = vld [vmem:[%s9457_s8 + $0x2] ss:$0 sm:$0xff] }
 0x28d   : > { %v1613_v5 = vpop.xlane.xlu1 %1612  ;;  %v1637_v34 = vmul.f32 %v7218_v20, %v7218_v20 }
 0x28e   : > { %v1623_v39 = vmul.f32 0.0078125, %v1613_v5  ;;  %5585 = vmatprep.subr.bf16.mxu0 %v1963_v30 }
 0x28f   : > { %1649 = vadd.xlane.f32.xlu1 %v1637_v34  ;;  %5586 = vmatpush3.bf16.msra.mxu0 %v1963_v30 }
 0x290   : > { %v7229_v16 = vsub.f32 %v7082_v15, %v1623_v39  ;;  %v1947_v15 = vld [vmem:[%s9458_s9 + $0x30] sm:$0xff] }
 0x291   : > { %v1964_v59 = vpack.c.bf16 %v1948_v27, %v1947_v15 }
 0x292   : > { %v1639_v49 = vmul.f32 %v7229_v16, %v7229_v16 }
 0x293   : > { %5587 = vmatprep.subr.bf16.mxu0 %v1964_v59 }
 0x294   : > { %1653 = vadd.xlane.f32.xlu1 %v1639_v49  ;;  %5588 = vmatpush3.bf16.msra.mxu0 %v1964_v59  ;;  %v5313_v59 = vld [vmem:[%s9457_s8 + $0x3] ss:$0 sm:$0xff] }
 0x295   : > { %5589 = vmatprep.subr.bf16.mxu0 %v1965_v0 }
 0x296   : > { %v1615_v38 = vpop.xlane.xlu0 %1614 }
 0x297   : > { %v1624_v52 = vmul.f32 0.0078125, %v1615_v38 }
 0x298   : > { %1829 = vadd.xlane.f32.xlu1 %v7195_v51  ;;  %5590 = vmatpush3.bf16.msra.mxu0 %v1965_v0 }
 0x299   : > { %v7247_v35 = vsub.f32 %v7087_v41, %v1624_v52  ;;  %v1951_v41 = vld [vmem:[%s9458_s9 + $0x50] sm:$0xff] }
 0x29a   : > { %v1966_v13 = vpack.c.bf16 %v1952_v23, %v1951_v41 }
 0x29b   : > { %v1640_v1 = vmul.f32 %v7247_v35, %v7247_v35 }
 0x29c   : > { %1833 = vadd.xlane.f32.xlu1 %v7193_v2  ;;  %5591 = vmatprep.subr.bf16.mxu0 %v1966_v13 }
 0x29d   : > { %1655 = vadd.xlane.f32.xlu0 %v1640_v1  ;;  %5592 = vmatpush3.bf16.msra.mxu0 %v1966_v13 }
 0x29e   : > { %5593 = vmatprep.subr.bf16.mxu0 %v1967_v61 }
 0x2a1   : > { %1831 = vadd.xlane.f32.xlu0 %v7199_v37  ;;  %5594 = vmatpush3.bf16.msra.mxu0 %v1967_v61 }
 0x2a2   : > { %5595 = vmatprep.subr.bf16.mxu0 %v1968_v62 }
 0x2a5   : > { %1835 = vadd.xlane.f32.xlu0 %v7197_v22  ;;  %5596 = vmatpush3.bf16.msra.mxu0 %v1968_v62 }
 0x2c2   : > { %v1756_v50 = vpop.xlane.xlu1 %1755 }
 0x2c3   : > { %v1771_v19 = vmul.f32 0.0078125, %v1756_v50 }
 0x2c5   : > { %v1779_v24 = vadd.f32 1e-05, %v1771_v19 }
 0x2c6   : > { %v1758_v36 = vpop.xlane.xlu0 %1757 }
 0x2c7   : > { %6030 = vrsqrt.f32 %v1779_v24  ;;  %v1760_v26 = vpop.xlane.xlu1 %1759  ;;  %v1772_v8 = vmul.f32 0.0078125, %v1758_v36 }
 0x2c8   : > { %v1773_v47 = vmul.f32 0.0078125, %v1760_v26 }
 0x2c9   : > { %v1780_v56 = vadd.f32 1e-05, %v1772_v8 }
 0x2ca   : > { %v1781_v44 = vadd.f32 1e-05, %v1773_v47  ;;  %v1762_v48 = vpop.xlane.xlu0 %1761 }
 0x2cb   : > { %6032 = vrsqrt.f32 %v1780_v56  ;;  %v1774_v5 = vmul.f32 0.0078125, %v1762_v48 }
 0x2cc   : > { %6034 = vrsqrt.f32 %v1781_v44  ;;  %v7278_v29 = vpop.f32.mrb[4].mxu1 }
 0x2cd   : > { %v1782_v33 = vadd.f32 1e-05, %v1774_v5  ;;  %v7280_v34 = vpop.f32.mrb[5].mxu1 }
 0x2ce   : > { %v7283_v53 = vpop.f32.mrb[6].mxu1  ;;  %1837 = vadd.xlane.f32.xlu1 %v7280_v34 }
 0x2cf   : > { %6036 = vrsqrt.f32 %v1782_v33  ;;  %v7291_v49 = vpop.f32.mrb[7].mxu1 }
 0x2d0   : > { %1839 = vadd.xlane.f32.xlu0 %v7291_v49 }
 0x2d1   : > { %v6031_v39 = vpop.eup %6030 }
 0x2d2   : > { %v1795_v42 = vmul.f32 %v6031_v39, %v7097_v54  ;;  %1841 = vadd.xlane.f32.xlu1 %v7278_v29 }
 0x2d4   : > { %v1807_v38 = vmul.f32 %v7289_v63, %v1795_v42  ;;  %1843 = vadd.xlane.f32.xlu0 %v7283_v53 }
 0x2d5   : > { %v6033_v30 = vpop.eup %6032 }
 0x2d6   : > { %v6035_v15 = vpop.eup %6034  ;;  %v1796_v27 = vmul.f32 %v6033_v30, %v7102_v46  ;;  %v1819_v46 = vadd.f32 %v5313_v59, %v1807_v38 }
 0x2d7   : > { %v1797_v54 = vmul.f32 %v6035_v15, %v7105_v12 }
 0x2d8   : > { %v1808_v52 = vmul.f32 %v7289_v63, %v1796_v27 }
 0x2d9   : > { %v6037_v57 = vpop.eup %6036  ;;  %v1809_v25 = vmul.f32 %v7289_v63, %v1797_v54 }
 0x2da   : > { %v1798_v0 = vmul.f32 %v6037_v57, %v7112_v14  ;;  %v1820_v1 = vadd.f32 %v5313_v59, %v1808_v52 }
 0x2db   : > { %v1821_v12 = vadd.f32 %v5313_v59, %v1809_v25 }
 0x2dc   : > { %v1810_v41 = vmul.f32 %v7289_v63, %v1798_v0  ;;  %v2070_v23 = vpack.c.bf16 %v1820_v1, %v1819_v46 }
 0x2de   : > { %5621 = vmatprep.mubr.bf16.mxu1 %v2070_v23  ;;  %v1822_v13 = vadd.f32 %v5313_v59, %v1810_v41 }
 0x2e0   : > { %v2071_v9 = vpack.c.bf16 %v1822_v13, %v1821_v12 }
 0x2e2   : > { %5622 = vmatmul.mubr.bf16.vlgmr.msra.gmra.mrb[8].mxu1 %v2071_v9 }
 0x2e9   : > { %v1766_v7 = vpop.xlane.xlu0 %1765 }
 0x2ea   : > { %v1776_v61 = vmul.f32 0.0078125, %v1766_v7 }
 0x2ec   : > { %v1784_v17 = vadd.f32 1e-05, %v1776_v61 }
 0x2ee   : > { %6038 = vrsqrt.f32 %v1784_v17 }
 0x2f0   : > { %v1764_v10 = vpop.xlane.xlu1 %1763 }
 0x2f1   : > { %v1775_v62 = vmul.f32 0.0078125, %v1764_v10 }
 0x2f3   : > { %v1783_v50 = vadd.f32 1e-05, %v1775_v62 }
 0x2f4   : > { %v1768_v19 = vpop.xlane.xlu1 %1767 }
 0x2f5   : > { %6040 = vrsqrt.f32 %v1783_v50  ;;  %v1777_v14 = vmul.f32 0.0078125, %v1768_v19 }
 0x2f7   : > { %v1785_v24 = vadd.f32 1e-05, %v1777_v14 }
 0x2f8   : > { %v1770_v36 = vpop.xlane.xlu0 %1769  ;;  %v6039_v8 = vpop.eup %6038 }
 0x2f9   : > { %v1778_v26 = vmul.f32 0.0078125, %v1770_v36  ;;  %6042 = vrsqrt.f32 %v1785_v24  ;;  %v1800_v56 = vmul.f32 %v6039_v8, %v7147_v31 }
 0x2fb   : > { %v1786_v47 = vadd.f32 1e-05, %v1778_v26  ;;  %v1812_v39 = vmul.f32 %v7289_v63, %v1800_v56 }
 0x2fd   : > { %6044 = vrsqrt.f32 %v1786_v47  ;;  %v1824_v38 = vadd.f32 %v5313_v59, %v1812_v39 }
 0x2ff   : > { %v1644_v44 = vpop.xlane.xlu0 %1643  ;;  %v6041_v48 = vpop.eup %6040 }
 0x300   : > { %v1658_v5 = vmul.f32 0.0078125, %v1644_v44  ;;  %v1799_v33 = vmul.f32 %v6041_v48, %v7164_v40 }
 0x302   : > { %v1666_v42 = vadd.f32 1e-05, %v1658_v5  ;;  %v1811_v30 = vmul.f32 %v7289_v63, %v1799_v33 }
 0x303   : > { %v6043_v15 = vpop.eup %6042 }
 0x304   : > { %6046 = vrsqrt.f32 %v1666_v42  ;;  %v1823_v27 = vadd.f32 %v5313_v59, %v1811_v30  ;;  %v1801_v54 = vmul.f32 %v6043_v15, %v7169_v60  ;;  %v1642_v52 = vpop.xlane.xlu1 %1641 }
 0x305   : > { %v1657_v25 = vmul.f32 0.0078125, %v1642_v52 }
 0x306   : > { %v2072_v31 = vpack.c.bf16 %v1824_v38, %v1823_v27  ;;  %v1813_v46 = vmul.f32 %v7289_v63, %v1801_v54 }
 0x307   : > { %v6045_v57 = vpop.eup %6044  ;;  %v1665_v40 = vadd.f32 1e-05, %v1657_v25 }
 0x308   : > { %v1802_v0 = vmul.f32 %v6045_v57, %v7174_v58  ;;  %5625 = vmatprep.mubr.bf16.mxu1 %v2072_v31  ;;  %v1825_v12 = vadd.f32 %v5313_v59, %v1813_v46  ;;  %v5310_v58 = vld [vmem:[%s9457_s8] ss:$0 sm:$0xff] }
 0x309   : > { %6048 = vrsqrt.f32 %v1665_v40 }
 0x30a   : > { %v1646_v1 = vpop.xlane.xlu1 %1645  ;;  %v1814_v41 = vmul.f32 %v7289_v63, %v1802_v0 }
 0x30b   : > { %v1659_v23 = vmul.f32 0.0078125, %v1646_v1 }
 0x30c   : > { %v1826_v13 = vadd.f32 %v5313_v59, %v1814_v41  ;;  %v5311_v59 = vld [vmem:[%s9457_s8 + $0x1] ss:$0 sm:$0xff] }
 0x30d   : > { %v1667_v9 = vadd.f32 1e-05, %v1659_v23 }
 0x30e   : > { %v2073_v7 = vpack.c.bf16 %v1826_v13, %v1825_v12  ;;  %v6047_v60 = vpop.eup %6046 }
 0x30f   : > { %6050 = vrsqrt.f32 %v1667_v9  ;;  %v1682_v61 = vmul.f32 %v6047_v60, %v7179_v43 }
 0x310   : > { %5626 = vmatmul.mubr.bf16.gmra.mrb[12].mxu1 %v2073_v7 }
 0x311   : > { %v1694_v19 = vmul.f32 %v5310_v58, %v1682_v61 }
 0x312   : > { %v1648_v17 = vpop.xlane.xlu0 %1647 }
 0x313   : > { %v1660_v10 = vmul.f32 0.0078125, %v1648_v17  ;;  %v6049_v62 = vpop.eup %6048  ;;  %v1706_v8 = vadd.f32 %v5311_v59, %v1694_v19 }
 0x314   : > { %v1681_v63 = vmul.f32 %v6049_v62, %v7184_v45 }
 0x315   : > { %v1668_v50 = vadd.f32 1e-05, %v1660_v10 }
 0x316   : > { %v1693_v36 = vmul.f32 %v5310_v58, %v1681_v63  ;;  %v5334_v63 = vld [vmem:[%s9459_s10 + $0x1] ss:$0 sm:$0xff] }
 0x317   : > { %v1652_v14 = vpop.xlane.xlu0 %1651  ;;  %6052 = vrsqrt.f32 %v1668_v50 }
 0x318   : > { %v1662_v24 = vmul.f32 0.0078125, %v1652_v14  ;;  %v1705_v26 = vadd.f32 %v5311_v59, %v1693_v36 }
 0x319   : > { %v6051_v47 = vpop.eup %6050 }
 0x31a   : > { %v1670_v43 = vadd.f32 1e-05, %v1662_v24  ;;  %v1957_v56 = vpack.c.bf16 %v1706_v8, %v1705_v26  ;;  %v1683_v45 = vmul.f32 %v6051_v47, %v7189_v11 }
 0x31c   : > { %6054 = vrsqrt.f32 %v1670_v43  ;;  %v1650_v44 = vpop.xlane.xlu1 %1649  ;;  %5597 = vmatprep.mubr.bf16.mxu0 %v1957_v56  ;;  %v1695_v30 = vmul.f32 %v5310_v58, %v1683_v45 }
 0x31d   : > { %v1661_v48 = vmul.f32 0.0078125, %v1650_v44 }
 0x31e   : > { %v1707_v52 = vadd.f32 %v5311_v59, %v1695_v30 }
 0x31f   : > { %v1669_v5 = vadd.f32 1e-05, %v1661_v48 }
 0x321   : > { %v1654_v33 = vpop.xlane.xlu1 %1653  ;;  %v6053_v39 = vpop.eup %6052  ;;  %6056 = vrsqrt.f32 %v1669_v5 }
 0x322   : > { %v1663_v42 = vmul.f32 0.0078125, %v1654_v33  ;;  %v1684_v15 = vmul.f32 %v6053_v39, %v7202_v28 }
 0x324   : > { %v1696_v27 = vmul.f32 %v5310_v58, %v1684_v15  ;;  %v1671_v38 = vadd.f32 1e-05, %v1663_v42 }
 0x326   : > { %v6055_v54 = vpop.eup %6054  ;;  %v1708_v57 = vadd.f32 %v5311_v59, %v1696_v27  ;;  %6058 = vrsqrt.f32 %v1671_v38  ;;  %v5316_v38 = vld [vmem:[%s9459_s10] ss:$0 sm:$0xff] }
 0x327   : > { %v1686_v31 = vmul.f32 %v6055_v54, %v7207_v55 }
 0x328   : > { %v1958_v25 = vpack.c.bf16 %v1708_v57, %v1707_v52 }
 0x329   : > { %v1698_v41 = vmul.f32 %v5310_v58, %v1686_v31 }
 0x32a   : > { %v1656_v0 = vpop.xlane.xlu0 %1655  ;;  %5598 = vmatmul.mubr.bf16.vlgmr.msra.gmra.mrb[8].mxu0 %v1958_v25 }
 0x32b   : > { %v1664_v11 = vmul.f32 0.0078125, %v1656_v0  ;;  %v6057_v46 = vpop.eup %6056  ;;  %v1710_v12 = vadd.f32 %v5311_v59, %v1698_v41 }
 0x32c   : > { %v1685_v1 = vmul.f32 %v6057_v46, %v7218_v20 }
 0x32d   : > { %v1672_v40 = vadd.f32 1e-05, %v1664_v11 }
 0x32e   : > { %v1697_v23 = vmul.f32 %v5310_v58, %v1685_v1 }
 0x32f   : > { %6060 = vrsqrt.f32 %v1672_v40 }
 0x330   : > { %v1709_v28 = vadd.f32 %v5311_v59, %v1697_v23  ;;  %v6059_v13 = vpop.eup %6058 }
 0x331   : > { %v1687_v7 = vmul.f32 %v6059_v13, %v7229_v16 }
 0x332   : > { %v1959_v9 = vpack.c.bf16 %v1710_v12, %v1709_v28 }
 0x333   : > { %v1699_v61 = vmul.f32 %v5310_v58, %v1687_v7 }
 0x334   : > { %5601 = vmatprep.mubr.bf16.mxu0 %v1959_v9 }
 0x335   : > { %v1711_v10 = vadd.f32 %v5311_v59, %v1699_v61  ;;  %v1830_v61 = vpop.xlane.xlu1 %1829 }
 0x339   : > { %v6061_v60 = vpop.eup %6060 }
 0x33a   : > { %v1688_v55 = vmul.f32 %v6061_v60, %v7247_v35 }
 0x33c   : > { %v1700_v17 = vmul.f32 %v5310_v58, %v1688_v55 }
 0x33e   : > { %v1712_v62 = vadd.f32 %v5311_v59, %v1700_v17 }
 0x340   : > { %v1960_v50 = vpack.c.bf16 %v1712_v62, %v1711_v10 }
 0x342   : > { %5602 = vmatmul.mubr.bf16.gmra.mrb[12].mxu0 %v1960_v50 }
 0x3b5   : > { %v5623_v20 = vpop.f32.mrb[8].mxu1 }
 0x3b6   : > { %v2124_v19 = vpop.f32.mrb[9].mxu1  ;;  %v2133_v24 = vadd.f32 %v5623_v20, %v5334_v63 }
 0x3b7   : > { %v5624_v14 = vpop.f32.mrb[10].mxu1  ;;  %v2125_v16 = vadd.f32 %v5334_v63, %v2124_v19 }
 0x3b8   : > { %v2136_v36 = vadd.f32 %v5624_v14, %v5334_v63  ;;  %v2127_v43 = vpop.f32.mrb[11].mxu1  ;;  %v1832_v14 = vpop.xlane.xlu0 %1831 }
 0x3b9   : > { %v2128_v26 = vadd.f32 %v5334_v63, %v2127_v43 }
 0x3ba   : > { %v7331_v8 = vpack.c.bf16 %v2136_v36, %v2133_v24  ;;  %v1845_v36 = vmul.f32 0.0078125, %v1830_v61 }
 0x3bb   : > { %v7333_v35 = vpack.c.bf16 %v2128_v26, %v2125_v16  ;;  %v1834_v16 = vpop.xlane.xlu1 %1833 }
 0x3bc   : > { %2695 = vrot.lane.b32.xlu0 %v7331_v8, %s6419_s26  ;;  %v2306_v59 = vsel %vm2289_vm1, %v7331_v8, 0  ;;  %v7389_v26 = vsub.f32 %v7195_v51, %v1845_v36 }
 0x3bd   : > { %2693 = vrot.lane.b32.xlu1 %v7333_v35, %s6419_s26  ;;  %5821 = vmatprep.subr.msk.bf16.mxu1 %vm2289_vm1, %v7333_v35  ;;  %v2303_v58 = vsel %vm2289_vm1, %v7333_v35, 0 }
 0x3be   : > { %5654 = vmatpush3.bf16.xpose.msra.mxu1 %v2303_v58  ;;  %v1847_v58 = vmul.f32 0.0078125, %v1834_v16 }
 0x3bf   : > { %5822 = vmatprep.subr.msk.bf16.mxu1 %vm2289_vm1, %v7331_v8 }
 0x3c6   : > { %5656 = vmatpush3.bf16.xpose.msra.mxu1 %v2306_v59  ;;  %v1836_v59 = vpop.xlane.xlu0 %1835 }
 0x3e3   : > { %v5627_v47 = vpop.f32.mrb[12].mxu1 }
 0x3e4   : > { %v2140_v56 = vpop.f32.mrb[13].mxu1  ;;  %v2149_v48 = vadd.f32 %v5627_v47, %v5334_v63  ;;  %v7392_v47 = vsub.f32 %v7193_v2, %v1847_v58 }
 0x3e5   : > { %v5628_v44 = vpop.f32.mrb[14].mxu1  ;;  %v2141_v33 = vadd.f32 %v5334_v63, %v2140_v56  ;;  %v1848_v56 = vmul.f32 0.0078125, %v1836_v59  ;;  %v5347_v59 = vld [vmem:[%s9458_s9 + $0x160] sm:$0xff] }
 0x3e6   : > { %v2152_v45 = vadd.f32 %v5628_v44, %v5334_v63  ;;  %v2143_v5 = vpop.f32.mrb[15].mxu1  ;;  %v1838_v44 = vpop.xlane.xlu1 %1837 }
 0x3e7   : > { %v2144_v39 = vadd.f32 %v5334_v63, %v2143_v5  ;;  %v7397_v5 = vsub.f32 %v7197_v22, %v1848_v56  ;;  %v1846_v22 = vmul.f32 0.0078125, %v1832_v14  ;;  %v5348_v56 = vld [vmem:[%s9458_s9 + $0x168] sm:$0xff] }
 0x3e8   : > { %v7347_v42 = vpack.c.bf16 %v2152_v45, %v2149_v48  ;;  %v1861_v48 = vmul.f32 %v7389_v26, %v7389_v26  ;;  %v1840_v45 = vpop.xlane.xlu0 %1839 }
 0x3e9   : > { %v7349_v30 = vpack.c.bf16 %v2144_v39, %v2141_v33  ;;  %v1863_v33 = vmul.f32 %v7392_v47, %v7392_v47  ;;  %v1864_v2 = vmul.f32 %v7397_v5, %v7397_v5 }
 0x3ea   : > { %v2312_v27 = vsel %vm2289_vm1, %v7347_v42, 0  ;;  %v1842_v51 = vpop.xlane.xlu1 %1841 }
 0x3eb   : > { %2697 = vrot.lane.b32.xlu1 %v7349_v30, %s6419_s26  ;;  %5823 = vmatprep.subr.msk.bf16.mxu1 %vm2289_vm1, %v7349_v30  ;;  %v2309_v15 = vsel %vm2289_vm1, %v7349_v30, 0 }
 0x3ec   : > { %5658 = vmatpush3.bf16.xpose.msra.mxu1 %v2309_v15  ;;  %v1844_v39 = vpop.xlane.xlu0 %1843 }
 0x3ed   : > { %5824 = vmatprep.subr.msk.bf16.mxu1 %vm2289_vm1, %v7347_v42  ;;  %v1852_v16 = vmul.f32 0.0078125, %v1844_v39 }
 0x3ef   : > { %2699 = vrot.lane.b32.xlu1 %v7347_v42, %s6419_s26 }
 0x3f4   : > { %5660 = vmatpush3.bf16.xpose.msra.mxu1 %v2312_v27 }
 0x3fd   : > { %v5599_v54 = vpop.f32.mrb[8].mxu0 }
 0x3fe   : > { %v2019_v52 = vadd.f32 %v5599_v54, %v5316_v38  ;;  %v2010_v57 = vpop.f32.mrb[9].mxu0 }
 0x3ff   : > { %v2011_v25 = vadd.f32 %v5316_v38, %v2010_v57  ;;  %v5600_v31 = vpop.f32.mrb[10].mxu0  ;;  %v1849_v57 = vmul.f32 0.0078125, %v1838_v44  ;;  %v2186_v44 = vpack.c.bf16 %v5348_v56, %v5347_v59 }
 0x400   : > { %v2022_v0 = vadd.f32 %v5600_v31, %v5316_v38  ;;  %v2013_v11 = vpop.f32.mrb[11].mxu0  ;;  %v2043_v40 = vmul.f32 0.17677669, %v2019_v52  ;;  %v7408_v52 = vsub.f32 %v7199_v37, %v1846_v22  ;;  %v1851_v31 = vmul.f32 0.0078125, %v1842_v51  ;;  %v5335_v37 = vld [vmem:[%s9458_s9 + $0x100] sm:$0xff]  ;;  %v5350_v51 = vld [vmem:[%s9458_s9 + $0x178] sm:$0xff] }
 0x401   : > { %v2014_v46 = vadd.f32 %v5316_v38, %v2013_v11  ;;  %v2041_v41 = vmul.f32 0.17677669, %v2011_v25  ;;  %v7411_v25 = vsub.f32 %v7280_v34, %v1849_v57  ;;  %v5336_v34 = vld [vmem:[%s9458_s9 + $0x108] sm:$0xff] }
 0x402   : > { %v2044_v1 = vmul.f32 0.17677669, %v2022_v0  ;;  %v1862_v0 = vmul.f32 %v7408_v52, %v7408_v52  ;;  %v7416_v11 = vsub.f32 %v7278_v29, %v1851_v31  ;;  %v2180_v29 = vpack.c.bf16 %v5336_v34, %v5335_v37 }
 0x403   : > { %v2042_v23 = vmul.f32 0.17677669, %v2014_v46  ;;  %v1865_v46 = vmul.f32 %v7411_v25, %v7411_v25 }
 0x404   : > { %v7366_v28 = vpack.c.bf16 %v2044_v1, %v2043_v40  ;;  %v1867_v40 = vmul.f32 %v7416_v11, %v7416_v11  ;;  %5629 = vmatprep.subr.bf16.mxu0 %v2180_v29  ;;  %v5337_v1 = vld [vmem:[%s9458_s9 + $0x110] sm:$0xff] }
 0x405   : > { %v7368_v12 = vpack.c.bf16 %v2042_v23, %v2041_v41  ;;  %5630 = vmatpush3.bf16.msra.mxu0 %v2180_v29  ;;  %v5338_v41 = vld [vmem:[%s9458_s9 + $0x118] sm:$0xff] }
 0x406   : > { %2683 = vrot.lane.b32.xlu1 %v7366_v28, %s6419_s26  ;;  %v2181_v23 = vpack.c.bf16 %v5338_v41, %v5337_v1 }
 0x407   : > { %2681 = vrot.lane.b32.xlu0 %v7368_v12, %s6419_s26  ;;  %5661 = vmatprep.mubr.msk.bf16.mxu1 %vm2289_vm1, %v7368_v12 }
 0x408   : > { %5662 = vmatmul.mubr.msk.bf16.vlgmr.msra.gmra.mrb[16].mxu1 %vm2289_vm1, %v7366_v28  ;;  %5631 = vmatprep.subr.bf16.mxu0 %v2181_v23 }
 0x409   : > { %5632 = vmatpush3.bf16.msra.mxu0 %v2181_v23 }
 0x415   : > { %v5603_v13 = vpop.f32.mrb[12].mxu0 }
 0x416   : > { %v2035_v9 = vadd.f32 %v5603_v13, %v5316_v38  ;;  %v2026_v7 = vpop.f32.mrb[13].mxu0  ;;  %v5339_v13 = vld [vmem:[%s9458_s9 + $0x120] sm:$0xff] }
 0x417   : > { %v2027_v60 = vadd.f32 %v5316_v38, %v2026_v7  ;;  %v5604_v55 = vpop.f32.mrb[14].mxu0 }
 0x418   : > { %v2038_v17 = vadd.f32 %v5604_v55, %v5316_v38  ;;  %v2029_v10 = vpop.f32.mrb[15].mxu0  ;;  %v2047_v50 = vmul.f32 0.17677669, %v2035_v9  ;;  %v5340_v9 = vld [vmem:[%s9458_s9 + $0x128] sm:$0xff]  ;;  %v5342_v55 = vld [vmem:[%s9458_s9 + $0x138] sm:$0xff] }
 0x419   : > { %v2030_v62 = vadd.f32 %v5316_v38, %v2029_v10  ;;  %v2045_v63 = vmul.f32 0.17677669, %v2027_v60  ;;  %v2182_v7 = vpack.c.bf16 %v5340_v9, %v5339_v13  ;;  %v5341_v60 = vld [vmem:[%s9458_s9 + $0x130] sm:$0xff]  ;;  %v5344_v10 = vld [vmem:[%s9458_s9 + $0x148] sm:$0xff] }
 0x41a   : > { %v2048_v20 = vmul.f32 0.17677669, %v2038_v17  ;;  %v2183_v61 = vpack.c.bf16 %v5342_v55, %v5341_v60  ;;  %v5343_v17 = vld [vmem:[%s9458_s9 + $0x140] sm:$0xff] }
 0x41b   : > { %v2046_v19 = vmul.f32 0.17677669, %v2030_v62  ;;  %5633 = vmatprep.subr.bf16.mxu0 %v2182_v7  ;;  %v2184_v62 = vpack.c.bf16 %v5344_v10, %v5343_v17 }
 0x41c   : > { %v7378_v24 = vpack.c.bf16 %v2048_v20, %v2047_v50  ;;  %5634 = vmatpush3.bf16.msra.mxu0 %v2182_v7  ;;  %v1850_v50 = vmul.f32 0.0078125, %v1840_v45  ;;  %v5345_v20 = vld [vmem:[%s9458_s9 + $0x150] sm:$0xff] }
 0x41d   : > { %v7380_v43 = vpack.c.bf16 %v2046_v19, %v2045_v63  ;;  %5635 = vmatprep.subr.bf16.mxu0 %v2183_v61  ;;  %v5346_v63 = vld [vmem:[%s9458_s9 + $0x158] sm:$0xff] }
 0x41e   : > { %2687 = vrot.lane.b32.xlu1 %v7378_v24, %s6419_s26  ;;  %v2185_v19 = vpack.c.bf16 %v5346_v63, %v5345_v20  ;;  %v7461_v36 = vsub.f32 %v7291_v49, %v1850_v50  ;;  %v7472_v49 = vsub.f32 %v7283_v53, %v1852_v16 }
 0x41f   : > { %5665 = vmatprep.mubr.msk.bf16.mxu1 %vm2289_vm1, %v7380_v43 }
 0x420   : > { %5666 = vmatmul.mubr.msk.bf16.gmra.mrb[20].mxu1 %vm2289_vm1, %v7378_v24  ;;  %5636 = vmatpush3.bf16.msra.mxu0 %v2183_v61  ;;  %v1866_v45 = vmul.f32 %v7461_v36, %v7461_v36  ;;  %v1868_v53 = vmul.f32 %v7472_v49, %v7472_v49  ;;  %v7495_v61 = vld [vmem:[%s9457_s8 + $0x4] ss:$0 sm:$0xff] }
 0x421   : > { %5637 = vmatprep.subr.bf16.mxu0 %v2184_v62 }
 0x424   : > { %5638 = vmatpush3.bf16.msra.mxu0 %v2184_v62 }
 0x425   : > { %5639 = vmatprep.subr.bf16.mxu0 %v2185_v19 }
 0x426   : > { %1869 = vadd.xlane.f32.xlu0 %v1861_v48 }
 0x428   : > { %5640 = vmatpush3.bf16.msra.mxu0 %v2185_v19 }
 0x429   : > { %5641 = vmatprep.subr.bf16.mxu0 %v2186_v44 }
 0x42a   : > { %1873 = vadd.xlane.f32.xlu0 %v1863_v33  ;;  %v5349_v33 = vld [vmem:[%s9458_s9 + $0x170] sm:$0xff] }
 0x42b   : > { %v2187_v39 = vpack.c.bf16 %v5350_v51, %v5349_v33 }
 0x42c   : > { %5642 = vmatpush3.bf16.msra.mxu0 %v2186_v44 }
 0x42d   : > { %5643 = vmatprep.subr.bf16.mxu0 %v2187_v39 }
 0x42e   : > { %1875 = vadd.xlane.f32.xlu0 %v1864_v2  ;;  %v2696_v38 = vpop.permute.xlu0 %2695 }
 0x42f   : > { %v2694_v15 = vpop.permute.xlu1 %2693  ;;  %v2717_v54 = vsel %vm2289_vm1, %v2696_v38, 0 }
 0x430   : > { %5825 = vmatprep.subr.msk.bf16.mxu1 %vm2289_vm1, %v2694_v15  ;;  %v2714_v27 = vsel %vm2289_vm1, %v2694_v15, 0  ;;  %5644 = vmatpush3.bf16.msra.mxu0 %v2187_v39 }
 0x431   : > { %5686 = vmatpush3.bf16.xpose.msra.mxu1 %v2714_v27 }
 0x432   : > { %5826 = vmatprep.subr.msk.bf16.mxu1 %vm2289_vm1, %v2696_v38 }
 0x439   : > { %5688 = vmatpush3.bf16.xpose.msra.mxu1 %v2717_v54 }
 0x442   : > { %1871 = vadd.xlane.f32.xlu1 %v1862_v0 }
 0x444   : > { %2685 = vrot.lane.b32.xlu0 %v7380_v43, %s6419_s26 }
 0x446   : > { %1877 = vadd.xlane.f32.xlu1 %v1865_v46 }
 0x44a   : > { %1881 = vadd.xlane.f32.xlu1 %v1867_v40 }
 0x45d   : > { %v2698_v14 = vpop.permute.xlu1 %2697 }
 0x45e   : > { %5827 = vmatprep.subr.msk.bf16.mxu1 %vm2289_vm1, %v2698_v14  ;;  %v2720_v58 = vsel %vm2289_vm1, %v2698_v14, 0 }
 0x45f   : > { %5690 = vmatpush3.bf16.xpose.msra.mxu1 %v2720_v58  ;;  %v5315_v58 = vld [vmem:[%s9457_s8 + $0x5] ss:$0 sm:$0xff] }
 0x461   : > { %v2700_v48 = vpop.permute.xlu1 %2699 }
 0x462   : > { %5828 = vmatprep.subr.msk.bf16.mxu1 %vm2289_vm1, %v2700_v48  ;;  %v2723_v2 = vsel %vm2289_vm1, %v2700_v48, 0 }
 0x463   : > { %1879 = vadd.xlane.f32.xlu0 %v1866_v45 }
 0x467   : > { %5692 = vmatpush3.bf16.xpose.msra.mxu1 %v2723_v2  ;;  %1883 = vadd.xlane.f32.xlu0 %v1868_v53 }
 0x478   : > { %v2684_v27 = vpop.permute.xlu1 %2683 }
 0x479   : > { %v2682_v15 = vpop.permute.xlu0 %2681 }
 0x47a   : > { %5693 = vmatprep.mubr.msk.bf16.mxu1 %vm2289_vm1, %v2682_v15 }
 0x47b   : > { %5694 = vmatmul.mubr.msk.bf16.vlgmr.msra.gmra.mrb[24].mxu1 %vm2289_vm1, %v2684_v27 }
 0x490   : > { %v2688_v31 = vpop.permute.xlu1 %2687 }
 0x4b3   : > { %v1870_v38 = vpop.xlane.xlu0 %1869 }
 0x4b4   : > { %v1885_v46 = vmul.f32 0.0078125, %v1870_v38 }
 0x4b6   : > { %v1893_v40 = vadd.f32 1e-05, %v1885_v46 }
 0x4b7   : > { %v1874_v22 = vpop.xlane.xlu0 %1873 }
 0x4b8   : > { %v1887_v37 = vmul.f32 0.0078125, %v1874_v22 }
 0x4ba   : > { %v1895_v29 = vadd.f32 1e-05, %v1887_v37 }
 0x4bb   : > { %v1876_v54 = vpop.xlane.xlu0 %1875 }
 0x4bc   : > { %v1888_v0 = vmul.f32 0.0078125, %v1876_v54 }
 0x4be   : > { %v1896_v34 = vadd.f32 1e-05, %v1888_v0 }
 0x4bf   : > { %v2686_v57 = vpop.permute.xlu0 %2685 }
 0x4c0   : > { %5697 = vmatprep.mubr.msk.bf16.mxu1 %vm2289_vm1, %v2686_v57  ;;  %6062 = vrsqrt.f32 %v1896_v34 }
 0x4c1   : > { %5698 = vmatmul.mubr.msk.bf16.gmra.mrb[28].mxu1 %vm2289_vm1, %v2688_v31  ;;  %6064 = vrsqrt.f32 %v1893_v40 }
 0x4c2   : > { %6066 = vrsqrt.f32 %v1895_v29 }
 0x4ca   : > { %v6063_v13 = vpop.eup %6062 }
 0x4cb   : > { %v6065_v9 = vpop.eup %6064  ;;  %v1912_v60 = vmul.f32 %v6063_v13, %v7397_v5 }
 0x4cc   : > { %v6067_v7 = vpop.eup %6066  ;;  %v1909_v55 = vmul.f32 %v6065_v9, %v7389_v26 }
 0x4cd   : > { %v1911_v17 = vmul.f32 %v6067_v7, %v7392_v47  ;;  %v1924_v5 = vmul.f32 %v7495_v61, %v1912_v60 }
 0x4ce   : > { %v1921_v14 = vmul.f32 %v7495_v61, %v1909_v55 }
 0x4cf   : > { %v1872_v1 = vpop.xlane.xlu1 %1871  ;;  %v1923_v47 = vmul.f32 %v7495_v61, %v1911_v17  ;;  %v1936_v44 = vadd.f32 %v5315_v58, %v1924_v5 }
 0x4d0   : > { %v1886_v41 = vmul.f32 0.0078125, %v1872_v1  ;;  %v1933_v48 = vadd.f32 %v5315_v58, %v1921_v14 }
 0x4d1   : > { %v1935_v51 = vadd.f32 %v5315_v58, %v1923_v47 }
 0x4d2   : > { %v1894_v23 = vadd.f32 1e-05, %v1886_v41 }
 0x4d3   : > { %v2177_v53 = vpack.c.bf16 %v1936_v44, %v1935_v51 }
 0x4d4   : > { %6068 = vrsqrt.f32 %v1894_v23 }
 0x4db   : > { %v7498_v10 = vpop.f32.mrb[16].mxu1 }
 0x4dc   : > { %v7500_v62 = vpop.f32.mrb[17].mxu1  ;;  %v2386_v50 = vsel %vm2379_vm4, %v7498_v10, -inf }
 0x4dd   : > { %v7505_v63 = vpop.f32.mrb[18].mxu1  ;;  %2387 = vmax.xlane.f32.xlu1 %v2386_v50  ;;  %v2380_v59 = vsel %vm2379_vm4, %v7500_v62, -inf }
 0x4de   : > { %v6069_v20 = vpop.eup %6068  ;;  %v7507_v26 = vpop.f32.mrb[19].mxu1  ;;  %v2389_v33 = vsel %vm2379_vm4, %v7505_v63, -inf }
 0x4df   : > { %v1910_v19 = vmul.f32 %v6069_v20, %v7408_v52  ;;  %v2383_v16 = vsel %vm2379_vm4, %v7507_v26, -inf  ;;  %v1878_v52 = vpop.xlane.xlu1 %1877 }
 0x4e0   : > { %2384 = vmax.xlane.f32.xlu0 %v2383_v16  ;;  %v1889_v2 = vmul.f32 0.0078125, %v1878_v52 }
 0x4e1   : > { %v1922_v56 = vmul.f32 %v7495_v61, %v1910_v19  ;;  %2381 = vmax.xlane.f32.xlu1 %v2380_v59 }
 0x4e2   : > { %v1897_v27 = vadd.f32 1e-05, %v1889_v2 }
 0x4e3   : > { %v1934_v45 = vadd.f32 %v5315_v58, %v1922_v56  ;;  %v1882_v15 = vpop.xlane.xlu1 %1881 }
 0x4e4   : > { %2390 = vmax.xlane.f32.xlu0 %v2389_v33  ;;  %v1891_v38 = vmul.f32 0.0078125, %v1882_v15  ;;  %6070 = vrsqrt.f32 %v1897_v27 }
 0x4e5   : > { %v2176_v39 = vpack.c.bf16 %v1934_v45, %v1933_v48 }
 0x4e6   : > { %v1899_v22 = vadd.f32 1e-05, %v1891_v38 }
 0x4e7   : > { %5645 = vmatprep.mubr.bf16.mxu0 %v2176_v39 }
 0x4e8   : > { %5646 = vmatmul.mubr.bf16.vlgmr.msra.gmra.mrb[16].mxu0 %v2177_v53  ;;  %6072 = vrsqrt.f32 %v1899_v22 }
 0x4ee   : > { %v6071_v9 = vpop.eup %6070 }
 0x4ef   : > { %v1913_v60 = vmul.f32 %v6071_v9, %v7411_v25  ;;  %v7589_v9 = vld [vmem:[#allocation2 + $0x8] sm:$0xff] }
 0x4f0   : > { %v1880_v54 = vpop.xlane.xlu0 %1879 }
 0x4f1   : > { %v1890_v57 = vmul.f32 0.0078125, %v1880_v54  ;;  %v1925_v20 = vmul.f32 %v7495_v61, %v1913_v60 }
 0x4f2   : > { %v6073_v55 = vpop.eup %6072 }
 0x4f3   : > { %v7522_v31 = vpop.f32.mrb[20].mxu1  ;;  %v1898_v0 = vadd.f32 1e-05, %v1890_v57  ;;  %v1915_v5 = vmul.f32 %v6073_v55, %v7416_v11  ;;  %v1937_v47 = vadd.f32 %v5315_v58, %v1925_v20  ;;  %v7600_v20 = vld [vmem:[#allocation2 + $0x30] sm:$0xff] }
 0x4f4   : > { %v7524_v46 = vpop.f32.mrb[21].mxu1  ;;  %v2398_v37 = vsel %vm2379_vm4, %v7522_v31, -inf  ;;  %v1884_v34 = vpop.xlane.xlu0 %1883 }
 0x4f5   : > { %v7528_v40 = vpop.f32.mrb[22].mxu1  ;;  %2399 = vmax.xlane.f32.xlu1 %v2398_v37  ;;  %6074 = vrsqrt.f32 %v1898_v0  ;;  %v1892_v29 = vmul.f32 0.0078125, %v1884_v34  ;;  %v2392_v13 = vsel %vm2379_vm4, %v7524_v46, -inf  ;;  %v1927_v56 = vmul.f32 %v7495_v61, %v1915_v5  ;;  %v7578_v37 = vld [vmem:[#allocation2] sm:$0xff] }
 0x4f6   : > { %v7530_v1 = vpop.f32.mrb[23].mxu1  ;;  %v2401_v7 = vsel %vm2379_vm4, %v7528_v40, -inf }
 0x4f7   : > { %v2395_v41 = vsel %vm2379_vm4, %v7530_v1, -inf  ;;  %v1900_v23 = vadd.f32 1e-05, %v1892_v29  ;;  %v1939_v52 = vadd.f32 %v5315_v58, %v1927_v56 }
 0x4f8   : > { %2396 = vmax.xlane.f32.xlu0 %v2395_v41 }
 0x4f9   : > { %2393 = vmax.xlane.f32.xlu1 %v2392_v13  ;;  %6076 = vrsqrt.f32 %v1900_v23  ;;  %v7583_v23 = vld [vmem:[#allocation2 + $0x10] sm:$0xff] }
 0x4fc   : > { %2402 = vmax.xlane.f32.xlu0 %v2401_v7  ;;  %v7591_v7 = vld [vmem:[#allocation2 + $0x18] sm:$0xff] }
 0x4ff   : > { %v6075_v17 = vpop.eup %6074 }
 0x500   : > { %v1914_v50 = vmul.f32 %v6075_v17, %v7461_v36 }
 0x502   : > { %v1926_v19 = vmul.f32 %v7495_v61, %v1914_v50 }
 0x503   : > { %v6077_v14 = vpop.eup %6076 }
 0x504   : > { %v1938_v16 = vadd.f32 %v5315_v58, %v1926_v19  ;;  %v1916_v59 = vmul.f32 %v6077_v14, %v7472_v49  ;;  %v7607_v14 = vld [vmem:[#allocation2 + $0x20] sm:$0xff] }
 0x506   : > { %v2178_v44 = vpack.c.bf16 %v1938_v16, %v1937_v47  ;;  %v1928_v25 = vmul.f32 %v7495_v61, %v1916_v59  ;;  %v7614_v59 = vld [vmem:[#allocation2 + $0x38] sm:$0xff] }
 0x508   : > { %5649 = vmatprep.mubr.bf16.mxu0 %v2178_v44  ;;  %v1940_v48 = vadd.f32 %v5315_v58, %v1928_v25  ;;  %v5352_v25 = vld [vmem:[%s9459_s10 + $0x2] ss:$0 sm:$0xff] }
 0x50a   : > { %v2179_v36 = vpack.c.bf16 %v1940_v48, %v1939_v52 }
 0x50c   : > { %5650 = vmatmul.mubr.bf16.gmra.mrb[20].mxu0 %v2179_v36 }
 0x54e   : > { %v7546_v45 = vpop.f32.mrb[24].mxu1 }
 0x54f   : > { %v7548_v11 = vpop.f32.mrb[25].mxu1  ;;  %v2796_v33 = vsel %vm2379_vm4, %v7546_v45, -inf }
 0x550   : > { %2797 = vmax.xlane.f32.xlu1 %v2796_v33  ;;  %v7552_v51 = vpop.f32.mrb[26].mxu1  ;;  %v2790_v58 = vsel %vm2379_vm4, %v7548_v11, -inf }
 0x551   : > { %v7554_v49 = vpop.f32.mrb[27].mxu1  ;;  %v2799_v39 = vsel %vm2379_vm4, %v7552_v51, -inf }
 0x552   : > { %v2793_v61 = vsel %vm2379_vm4, %v7554_v49, -inf }
 0x553   : > { %2794 = vmax.xlane.f32.xlu0 %v2793_v61 }
 0x554   : > { %2791 = vmax.xlane.f32.xlu1 %v2790_v58 }
 0x557   : > { %2800 = vmax.xlane.f32.xlu0 %v2799_v39  ;;  %v7623_v39 = vld [vmem:[#allocation2 + $0x28] sm:$0xff] }
 0x56a   : > { %v2388_v0 = vpop.xlane.xlu1 %2387 }
 0x56b   : > { %v7587_v13 = vmax.f32 %v7583_v23, %v2388_v0 }
 0x56d   : > { %v2385_v29 = vpop.xlane.xlu0 %2384 }
 0x56e   : > { %v2382_v34 = vpop.xlane.xlu1 %2381  ;;  %v7595_v55 = vmax.f32 %v7589_v9, %v2385_v29 }
 0x56f   : > { %v7581_v41 = vmax.f32 %v7578_v37, %v2382_v34 }
 0x571   : > { %v2391_v60 = vpop.xlane.xlu0 %2390 }
 0x572   : > { %v7598_v50 = vmax.f32 %v7591_v7, %v2391_v60 }
 0x582   : > { %v2400_v17 = vpop.xlane.xlu1 %2399 }
 0x583   : > { %v7605_v19 = vmax.f32 %v7600_v20, %v2400_v17 }
 0x585   : > { %v2397_v5 = vpop.xlane.xlu0 %2396 }
 0x586   : > { %v2394_v47 = vpop.xlane.xlu1 %2393  ;;  %v7631_v0 = vmax.f32 %v7623_v39, %v2397_v5 }
 0x587   : > { %v7612_v16 = vmax.f32 %v7607_v14, %v2394_v47 }
 0x589   : > { %v2403_v56 = vpop.xlane.xlu0 %2402 }
 0x58a   : > { %v7621_v36 = vmax.f32 %v7614_v59, %v2403_v56 }
 0x594   : > { %v7562_v53 = vpop.f32.mrb[28].mxu1 }
 0x595   : > { %v7564_v2 = vpop.f32.mrb[29].mxu1  ;;  %v2808_v15 = vsel %vm2379_vm4, %v7562_v53, -inf }
 0x596   : > { %2809 = vmax.xlane.f32.xlu1 %v2808_v15  ;;  %v7568_v27 = vpop.f32.mrb[30].mxu1  ;;  %v2802_v54 = vsel %vm2379_vm4, %v7564_v2, -inf }
 0x597   : > { %v7570_v38 = vpop.f32.mrb[31].mxu1  ;;  %v2811_v22 = vsel %vm2379_vm4, %v7568_v27, -inf }
 0x598   : > { %2812 = vmax.xlane.f32.xlu0 %v2811_v22  ;;  %v2805_v57 = vsel %vm2379_vm4, %v7570_v38, -inf }
 0x59a   : > { %2803 = vmax.xlane.f32.xlu1 %v2802_v54 }
 0x59c   : > { %2806 = vmax.xlane.f32.xlu0 %v2805_v57 }
 0x5ab   : > { %2438 = vperm.xlu1 %5952, %v7581_v41  }
 0x5af   : > { %2448 = vperm.xlu1 %5952, %v7587_v13  }
 0x5b2   : > { %2443 = vperm.xlu0 %5950, %v7595_v55  }
 0x5b3   : > { %2453 = vperm.xlu1 %5952, %v7598_v50  }
 0x5b6   : > { %5953 = vset.pattern.permute.xlu0 %v9486_v21 }
 0x5b7   : > { %2468 = vperm.xlu1 %5952, %v7605_v19  }
 0x5bb   : > { %v5647_v44 = vpop.f32.mrb[16].mxu0  ;;  %2458 = vperm.xlu1 %5952, %v7612_v16  }
 0x5bc   : > { %v2230_v52 = vpop.f32.mrb[17].mxu0  ;;  %v2239_v33 = vadd.f32 %v5647_v44, %v5352_v25 }
 0x5bd   : > { %v5648_v48 = vpop.f32.mrb[18].mxu0  ;;  %v2231_v15 = vadd.f32 %v5352_v25, %v2230_v52 }
 0x5be   : > { %v2242_v61 = vadd.f32 %v5648_v48, %v5352_v25  ;;  %v2233_v58 = vpop.f32.mrb[19].mxu0 }
 0x5bf   : > { %v2234_v22 = vadd.f32 %v5352_v25, %v2233_v58  ;;  %2473 = vperm.xlu1 %5952, %v7621_v36  }
 0x5c0   : > { %v7625_v54 = vpack.c.bf16 %v2242_v61, %v2239_v33 }
 0x5c1   : > { %v7628_v57 = vpack.c.bf16 %v2234_v22, %v2231_v15 }
 0x5c3   : > { %5669 = vmatprep.subr.bf16.mxu0 %v7628_v57  ;;  %2463 = vperm.xlu1 %5952, %v7631_v0  }
 0x5c4   : > { %5670 = vmatpush3.bf16.msra.mxu0 %v7628_v57 }
 0x5c5   : > { %5671 = vmatprep.subr.bf16.mxu0 %v7625_v54 }
 0x5c7   : > { %5954 = vset.pattern.permute.xlu1 %v9486_v21 }
 0x5c8   : > { %5672 = vmatpush3.bf16.msra.mxu0 %v7625_v54 }
 0x5dd   : > { %v2798_v34 = vpop.xlane.xlu1 %2797 }
 0x5de   : > { %v7640_v29 = vmax.f32 %v7583_v23, %v2798_v34 }
 0x5df   : > { %v5651_v60 = vpop.f32.mrb[20].mxu0 }
 0x5e0   : > { %9540 = vst [vmem:[#allocation22_spill] sm:$0xff] %v7640_v29  ;;  %v2246_v17 = vpop.f32.mrb[21].mxu0  ;;  %2858 = vperm.xlu0 %5953, %v7640_v29   ;;  %v2795_v5 = vpop.xlane.xlu0 %2794  ;;  %v2255_v44 = vadd.f32 %v5651_v60, %v5352_v25 }
 0x5e1   : > { %v2792_v47 = vpop.xlane.xlu1 %2791  ;;  %v5652_v56 = vpop.f32.mrb[22].mxu0  ;;  %v2247_v61 = vadd.f32 %v5352_v25, %v2246_v17 }
 0x5e2   : > { %v7644_v52 = vmax.f32 %v7578_v37, %v2792_v47  ;;  %v2258_v48 = vadd.f32 %v5652_v56, %v5352_v25  ;;  %v2249_v33 = vpop.f32.mrb[23].mxu0 }
 0x5e3   : > { %v2250_v58 = vadd.f32 %v5352_v25, %v2249_v33  ;;  %v7663_v25 = vmax.f32 %v7589_v9, %v2795_v5 }
 0x5e4   : > { %9541 = vst [vmem:[#allocation23_spill] sm:$0xff] %v7644_v52  ;;  %v7646_v15 = vpack.c.bf16 %v2258_v48, %v2255_v44  ;;  %2920 = vrot.lane.b32.xlu0 %v7625_v54, %s6419_s26  ;;  %2848 = vperm.xlu1 %5954, %v7644_v52   ;;  %v2801_v22 = vpop.xlane.xlu0 %2800 }
 0x5e5   : > { %v7651_v34 = vpack.c.bf16 %v2250_v58, %v2247_v61  ;;  %v7654_v6 = vmax.f32 %v7591_v7, %v2801_v22  ;;  %9543 = vst [vmem:[#allocation25_spill] sm:$0xff] %v7663_v25 }
 0x5e7   : > { %9542 = vst [vmem:[#allocation24_spill] sm:$0xff] %v7654_v6  ;;  %5673 = vmatprep.subr.bf16.mxu0 %v7651_v34 }
 0x5e8   : > { %5674 = vmatpush3.bf16.msra.mxu0 %v7651_v34  ;;  %2924 = vrot.lane.b32.xlu0 %v7646_v15, %s6419_s26 }
 0x5e9   : > { %2863 = vperm.xlu1 %5954, %v7654_v6   ;;  %5675 = vmatprep.subr.bf16.mxu0 %v7646_v15 }
 0x5ec   : > { %5676 = vmatpush3.bf16.msra.mxu0 %v7646_v15 }
 0x5ed   : > { %2853 = vperm.xlu1 %5954, %v7663_v25  }
 0x5f1   : > { %2918 = vrot.lane.b32.xlu1 %v7628_v57, %s6419_s26 }
 0x5f5   : > { %2922 = vrot.lane.b32.xlu1 %v7651_v34, %s6419_s26 }
 0x623   : > { %v2810_v60 = vpop.xlane.xlu1 %2809 }
 0x624   : > { %v7672_v17 = vmax.f32 %v7600_v20, %v2810_v60 }
 0x625   : > { %v2813_v47 = vpop.xlane.xlu0 %2812 }
 0x626   : > { %2878 = vperm.xlu1 %5954, %v7672_v17   ;;  %v7687_v58 = vmax.f32 %v7614_v59, %v2813_v47 }
 0x627   : > { %v2804_v56 = vpop.xlane.xlu1 %2803 }
 0x628   : > { %v7676_v5 = vmax.f32 %v7607_v14, %v2804_v56 }
 0x629   : > { %v2807_v44 = vpop.xlane.xlu0 %2806 }
 0x62a   : > { %9544 = vst [vmem:[#allocation26_spill] sm:$0xff] %v7676_v5  ;;  %2868 = vperm.xlu1 %5954, %v7676_v5   ;;  %v7680_v48 = vmax.f32 %v7623_v39, %v2807_v44 }
 0x62b   : > { %v2439_v33 = vpop.permute.xlu1 %2438 }
 0x62c   : > { %9545 = vst [vmem:[#allocation27_spill] sm:$0xff] %v7680_v48  ;;  %v2476_v61 = vsub.f32 %v7500_v62, %v2439_v33  ;;  %2873 = vperm.xlu0 %5953, %v7680_v48  }
 0x62e   : > { %3143 = vrot.lane.b32.xlu1 %v7333_v35, %s6420_s19  ;;  %v2484_v56 = vmul.f32 1.442695, %v2476_v61 }
 0x62f   : > { %v2449_v22 = vpop.permute.xlu1 %2448  ;;  %5956 = vset.pattern.permute.xlu1 %v9490_v3 }
 0x630   : > { %v2478_v60 = vsub.f32 %v7498_v10, %v2449_v22  ;;  %2883 = vperm.xlu0 %5953, %v7687_v58   ;;  %6078 = vpow2.f32 %v2484_v56 }
 0x631   : > { %v2444_v44 = vpop.permute.xlu0 %2443 }
 0x632   : > { %v2477_v62 = vsub.f32 %v7507_v26, %v2444_v44  ;;  %3147 = vrot.lane.b32.xlu1 %v7349_v30, %s6420_s19  ;;  %v2488_v33 = vmul.f32 1.442695, %v2478_v60 }
 0x633   : > { %v2454_v21 = vpop.permute.xlu1 %2453 }
 0x634   : > { %v2486_v4 = vmul.f32 1.442695, %v2477_v62  ;;  %v2479_v47 = vsub.f32 %v7505_v63, %v2454_v21  ;;  %3145 = vrot.lane.b32.xlu0 %v7331_v8, %s6420_s19 }
 0x635   : > { %5955 = vset.pattern.permute.xlu0 %v9490_v3 }
 0x636   : > { %6080 = vpow2.f32 %v2486_v4  ;;  %v2490_v10 = vmul.f32 1.442695, %v2479_v47  ;;  %3135 = vrot.lane.b32.xlu1 %v7368_v12, %s6420_s19 }
 0x637   : > { %6082 = vpow2.f32 %v2488_v33  ;;  %v2469_v26 = vpop.permute.xlu1 %2468 }
 0x638   : > { %6084 = vpow2.f32 %v2490_v10  ;;  %3149 = vrot.lane.b32.xlu0 %v7347_v42, %s6420_s19  ;;  %v2482_v21 = vsub.f32 %v7522_v31, %v2469_v26 }
 0x63a   : > { %3139 = vrot.lane.b32.xlu1 %v7380_v43, %s6420_s19  ;;  %v7708_v4 = vpop.eup %6078  ;;  %v2496_v61 = vmul.f32 1.442695, %v2482_v21 }
 0x63b   : > { %v2459_v63 = vpop.permute.xlu1 %2458 }
 0x63c   : > { %3137 = vrot.lane.b32.xlu0 %v7366_v28, %s6420_s19  ;;  %v2480_v22 = vsub.f32 %v7524_v46, %v2459_v63  ;;  %6086 = vpow2.f32 %v2496_v61 }
 0x63e   : > { %v2492_v46 = vmul.f32 1.442695, %v2480_v22 }
 0x63f   : > { %v2474_v60 = vpop.permute.xlu1 %2473 }
 0x640   : > { %v7711_v56 = vpop.eup %6080  ;;  %v2483_v44 = vsub.f32 %v7528_v40, %v2474_v60  ;;  %3141 = vrot.lane.b32.xlu0 %v7378_v24, %s6420_s19 }
 0x641   : > { %v7714_v62 = vpop.eup %6082  ;;  %v2500_v31 = vpack.c.bf16 %v7711_v56, %v7708_v4 }
 0x642   : > { %v7720_v33 = vpop.eup %6084  ;;  %v2498_v47 = vmul.f32 1.442695, %v2483_v44 }
 0x643   : > { %v2501_v10 = vpack.c.bf16 %v7720_v33, %v7714_v62  ;;  %v2464_v26 = vpop.permute.xlu1 %2463  ;;  %5677 = vmatprep.mubr.msk.bf16.mxu0 %vm2379_vm4, %v2500_v31 }
 0x644   : > { %6088 = vpow2.f32 %v2498_v47  ;;  %v2481_v40 = vsub.f32 %v7530_v1, %v2464_v26 }
 0x645   : > { %5678 = vmatmul.mubr.msk.bf16.vlgmr.msra.gmra.mrb[24].mxu0 %vm2379_vm4, %v2501_v10  ;;  %6090 = vpow2.f32 %v2492_v46 }
 0x646   : > { %v2494_v21 = vmul.f32 1.442695, %v2481_v40  ;;  %v7727_v63 = vpop.eup %6086 }
 0x647   : > { %9546 = vst [vmem:[#allocation28_spill] sm:$0xff] %v7727_v63 }
 0x648   : > { %6092 = vpow2.f32 %v2494_v21 }
 0x64e   : > { %v7729_v60 = vpop.eup %6088 }
 0x64f   : > { %v2503_v44 = vpack.c.bf16 %v7729_v60, %v7727_v63  ;;  %v7733_v61 = vpop.eup %6090 }
 0x650   : > { %9547 = vst [vmem:[#allocation29_spill] sm:$0xff] %v7733_v61 }
 0x652   : > { %v7735_v22 = vpop.eup %6092 }
 0x653   : > { %v2502_v31 = vpack.c.bf16 %v7735_v22, %v7733_v61 }
 0x655   : > { %5681 = vmatprep.mubr.msk.bf16.mxu0 %vm2379_vm4, %v2502_v31 }
 0x656   : > { %5682 = vmatmul.mubr.msk.bf16.gmra.mrb[28].mxu0 %vm2379_vm4, %v2503_v44 }
 0x65f   : > { %v2859_v1 = vpop.permute.xlu0 %2858 }
 0x660   : > { %v2888_v10 = vsub.f32 %v7546_v45, %v2859_v1 }
 0x662   : > { %v2898_v46 = vmul.f32 1.442695, %v2888_v10 }
 0x663   : > { %v2849_v47 = vpop.permute.xlu1 %2848  ;;  %v2921_v61 = vpop.permute.xlu0 %2920 }
 0x664   : > { %v2886_v26 = vsub.f32 %v7548_v11, %v2849_v47  ;;  %6094 = vpow2.f32 %v2898_v46 }
 0x666   : > { %v2894_v32 = vmul.f32 1.442695, %v2886_v26 }
 0x668   : > { %v2864_v40 = vpop.permute.xlu1 %2863 }
 0x669   : > { %v2889_v21 = vsub.f32 %v7552_v51, %v2864_v40 }
 0x66b   : > { %v2900_v3 = vmul.f32 1.442695, %v2889_v21 }
 0x66c   : > { %v2854_v18 = vpop.permute.xlu1 %2853 }
 0x66d   : > { %6096 = vpow2.f32 %v2900_v3  ;;  %v2887_v63 = vsub.f32 %v7554_v49, %v2854_v18  ;;  %v2925_v18 = vpop.permute.xlu0 %2924 }
 0x66e   : > { %6098 = vpow2.f32 %v2894_v32  ;;  %v7745_v45 = vpop.eup %6094 }
 0x66f   : > { %v2896_v31 = vmul.f32 1.442695, %v2887_v63 }
 0x670   : > { %v2919_v44 = vpop.permute.xlu1 %2918 }
 0x671   : > { %6100 = vpow2.f32 %v2896_v31  ;;  %5701 = vmatprep.subr.bf16.mxu0 %v2919_v44 }
 0x672   : > { %5702 = vmatpush3.bf16.msra.mxu0 %v2919_v44 }
 0x673   : > { %5703 = vmatprep.subr.bf16.mxu0 %v2921_v61 }
 0x674   : > { %v2923_v11 = vpop.permute.xlu1 %2922 }
 0x676   : > { %5704 = vmatpush3.bf16.msra.mxu0 %v2921_v61 }
 0x677   : > { %v7747_v51 = vpop.eup %6096  ;;  %5705 = vmatprep.subr.bf16.mxu0 %v2923_v11 }
 0x678   : > { %v2911_v3 = vpack.c.bf16 %v7747_v51, %v7745_v45  ;;  %v7751_v1 = vpop.eup %6098 }
 0x67a   : > { %5706 = vmatpush3.bf16.msra.mxu0 %v2923_v11 }
 0x67b   : > { %v7753_v32 = vpop.eup %6100  ;;  %5707 = vmatprep.subr.bf16.mxu0 %v2925_v18 }
 0x67c   : > { %v2910_v49 = vpack.c.bf16 %v7753_v32, %v7751_v1 }
 0x67e   : > { %5708 = vmatpush3.bf16.msra.mxu0 %v2925_v18  ;;  %5709 = vmatprep.mubr.msk.bf16.mxu0 %vm2379_vm4, %v2910_v49 }
 0x681   : > { %5710 = vmatmul.mubr.msk.bf16.vlgmr.msra.gmra.mrb[32].mxu0 %vm2379_vm4, %v2911_v3 }
 0x6a5   : > { %v2879_v63 = vpop.permute.xlu1 %2878 }
 0x6a6   : > { %v2892_v10 = vsub.f32 %v7562_v53, %v2879_v63 }
 0x6a8   : > { %v2906_v11 = vmul.f32 1.442695, %v2892_v10 }
 0x6a9   : > { %v2869_v61 = vpop.permute.xlu1 %2868 }
 0x6aa   : > { %v2890_v47 = vsub.f32 %v7564_v2, %v2869_v61 }
 0x6ab   : > { %v2874_v26 = vpop.permute.xlu0 %2873 }
 0x6ac   : > { %v2902_v46 = vmul.f32 1.442695, %v2890_v47  ;;  %v2891_v40 = vsub.f32 %v7570_v38, %v2874_v26 }
 0x6ad   : > { %v3144_v21 = vpop.permute.xlu1 %3143 }
 0x6ae   : > { %5829 = vmatprep.subr.msk.bf16.mxu0 %vm2289_vm1, %v3144_v21  ;;  %v3164_v31 = vsel %vm2289_vm1, %v3144_v21, 0  ;;  %v2904_v44 = vmul.f32 1.442695, %v2891_v40  ;;  %6102 = vpow2.f32 %v2902_v46 }
 0x6af   : > { %5718 = vmatpush3.bf16.xpose.msra.mxu0 %v3164_v31  ;;  %v2884_v3 = vpop.permute.xlu0 %2883 }
 0x6b0   : > { %6104 = vpow2.f32 %v2904_v44  ;;  %v2893_v18 = vsub.f32 %v7568_v27, %v2884_v3 }
 0x6b1   : > { %6106 = vpow2.f32 %v2906_v11  ;;  %v3148_v49 = vpop.permute.xlu1 %3147 }
 0x6b2   : > { %v2908_v2 = vmul.f32 1.442695, %v2893_v18  ;;  %v3170_v10 = vsel %vm2289_vm1, %v3148_v49, 0 }
 0x6b3   : > { %v3146_v53 = vpop.permute.xlu0 %3145 }
 0x6b4   : > { %6108 = vpow2.f32 %v2908_v2  ;;  %5830 = vmatprep.subr.msk.bf16.mxu0 %vm2289_vm1, %v3146_v53  ;;  %v3167_v38 = vsel %vm2289_vm1, %v3146_v53, 0 }
 0x6b5   : > { %v3136_v21 = vpop.permute.xlu1 %3135 }
 0x6b7   : > { %5720 = vmatpush3.bf16.xpose.msra.mxu0 %v3167_v38  ;;  %v3150_v26 = vpop.permute.xlu0 %3149 }
 0x6b8   : > { %5831 = vmatprep.subr.msk.bf16.mxu0 %vm2289_vm1, %v3148_v49  ;;  %v7768_v63 = vpop.eup %6102  ;;  %v3173_v31 = vsel %vm2289_vm1, %v3150_v26, 0 }
 0x6b9   : > { %9548 = vst [vmem:[#allocation30_spill] sm:$0xff] %v7768_v63  ;;  %v3140_v11 = vpop.permute.xlu1 %3139 }
 0x6ba   : > { %v7770_v61 = vpop.eup %6104 }
 0x6bb   : > { %v2912_v47 = vpack.c.bf16 %v7770_v61, %v7768_v63  ;;  %v7774_v27 = vpop.eup %6106  ;;  %v3138_v44 = vpop.permute.xlu0 %3137 }
 0x6bc   : > { %9549 = vst [vmem:[#allocation31_spill] sm:$0xff] %v7774_v27 }
 0x6bd   : > { %5713 = vmatprep.mubr.msk.bf16.mxu0 %vm2379_vm4, %v2912_v47 }
 0x6be   : > { %v7778_v46 = vpop.eup %6108 }
 0x6bf   : > { %9550 = vst [vmem:[#allocation32_spill] sm:$0xff] %v7778_v46  ;;  %5722 = vmatpush3.bf16.xpose.msra.mxu0 %v3170_v10  ;;  %v2913_v40 = vpack.c.bf16 %v7778_v46, %v7774_v27  ;;  %v3142_v3 = vpop.permute.xlu0 %3141  ;;  %v4079_v27 = vsel %vm4027_vm6, %v7581_v41, %v7644_v52 }
 0x6c0   : > { %5832 = vmatprep.subr.msk.bf16.mxu0 %vm2289_vm1, %v3150_v26 }
 0x6c1   : > { %5714 = vmatmul.mubr.msk.bf16.gmra.mrb[36].mxu0 %vm2379_vm4, %v2913_v40 }
 0x6c2   : > { %5725 = vmatprep.mubr.msk.bf16.mxu0 %vm2289_vm1, %v3136_v21 }
 0x6c7   : > { %5724 = vmatpush3.bf16.xpose.msra.mxu0 %v3173_v31 }
 0x6ce   : > { %5726 = vmatmul.mubr.msk.bf16.vlgmr.msra.gmra.mrb[40].mxu0 %vm2289_vm1, %v3138_v44 }
 0x6cf   : > { %5729 = vmatprep.mubr.msk.bf16.mxu0 %vm2289_vm1, %v3140_v11 }
 0x6d6   : > { %5730 = vmatmul.mubr.msk.bf16.gmra.mrb[44].mxu0 %vm2289_vm1, %v3142_v3 }
 0x718   : > { %v7789_v18 = vpop.f32.mrb[24].mxu0 }
 0x719   : > { %9551 = vst [vmem:[#allocation33_spill] sm:$0xff] %v7789_v18  ;;  %v7791_v2 = vpop.f32.mrb[25].mxu0 }
 0x71a   : > { %9552 = vst [vmem:[#allocation34_spill] sm:$0xff] %v7791_v2  ;;  %v7793_v53 = vpop.f32.mrb[26].mxu0 }
 0x71b   : > { %9553 = vst [vmem:[#allocation35_spill] sm:$0xff] %v7793_v53  ;;  %v7795_v38 = vpop.f32.mrb[27].mxu0 }
 0x729   : > { %v7797_v49 = vpop.f32.mrb[28].mxu0 }
 0x72a   : > { %9554 = vst [vmem:[#allocation36_spill] sm:$0xff] %v7797_v49  ;;  %v7799_v47 = vpop.f32.mrb[29].mxu0 }
 0x72b   : > { %9555 = vst [vmem:[#allocation37_spill] sm:$0xff] %v7799_v47  ;;  %v7801_v10 = vpop.f32.mrb[30].mxu0 }
 0x72c   : > { %9556 = vst [vmem:[#allocation38_spill] sm:$0xff] %v7801_v10  ;;  %v7803_v26 = vpop.f32.mrb[31].mxu0 }
 0x72d   : > { %9557 = vst [vmem:[#allocation39_spill] sm:$0xff] %v7803_v26 }
 0x754   : > { %v7805_v40 = vpop.f32.mrb[32].mxu0 }
 0x755   : > { %9558 = vst [vmem:[#allocation40_spill] sm:$0xff] %v7805_v40  ;;  %v7807_v21 = vpop.f32.mrb[33].mxu0 }
 0x756   : > { %9559 = vst [vmem:[#allocation41_spill] sm:$0xff] %v7807_v21  ;;  %v7809_v31 = vpop.f32.mrb[34].mxu0 }
 0x757   : > { %9560 = vst [vmem:[#allocation42_spill] sm:$0xff] %v7809_v31  ;;  %v7811_v44 = vpop.f32.mrb[35].mxu0 }
 0x758   : > { %9561 = vst [vmem:[#allocation43_spill] sm:$0xff] %v7811_v44 }
 0x794   : > { %v7813_v11 = vpop.f32.mrb[36].mxu0 }
 0x795   : > { %9562 = vst [vmem:[#allocation44_spill] sm:$0xff] %v7813_v11  ;;  %v7815_v3 = vpop.f32.mrb[37].mxu0 }
 0x796   : > { %9563 = vst [vmem:[#allocation45_spill] sm:$0xff] %v7815_v3  ;;  %v7817_v18 = vpop.f32.mrb[38].mxu0 }
 0x797   : > { %9564 = vst [vmem:[#allocation46_spill] sm:$0xff] %v7817_v18  ;;  %v7819_v2 = vpop.f32.mrb[39].mxu0 }
 0x798   : > { %9565 = vst [vmem:[#allocation47_spill] sm:$0xff] %v7819_v2 }
 0x7a1   : > { %v7821_v47 = vpop.f32.mrb[40].mxu0 }
 0x7a2   : > { %v7823_v10 = vpop.f32.mrb[41].mxu0  ;;  %v3246_v46 = vsel %vm2379_vm4, %v7821_v47, -inf }
 0x7a3   : > { %v7825_v26 = vpop.f32.mrb[42].mxu0  ;;  %v3240_v53 = vsel %vm2379_vm4, %v7823_v10, -inf }
 0x7a4   : > { %3241 = vmax.xlane.f32.xlu1 %v3240_v53  ;;  %v7829_v40 = vpop.f32.mrb[43].mxu0  ;;  %v3249_v3 = vsel %vm2379_vm4, %v7825_v26, -inf }
 0x7a5   : > { %v3243_v11 = vsel %vm2379_vm4, %v7829_v40, -inf }
 0x7a6   : > { %3244 = vmax.xlane.f32.xlu0 %v3243_v11 }
 0x7a8   : > { %3250 = vmax.xlane.f32.xlu1 %v3249_v3 }
 0x7a9   : > { %v7835_v21 = vpop.f32.mrb[44].mxu0 }
 0x7aa   : > { %3247 = vmax.xlane.f32.xlu0 %v3246_v46  ;;  %v7839_v18 = vpop.f32.mrb[45].mxu0  ;;  %v3258_v3 = vsel %vm2379_vm4, %v7835_v21, -inf }
 0x7ab   : > { %v7841_v49 = vpop.f32.mrb[46].mxu0  ;;  %v3252_v2 = vsel %vm2379_vm4, %v7839_v18, -inf }
 0x7ac   : > { %v7843_v53 = vpop.f32.mrb[47].mxu0  ;;  %v3261_v46 = vsel %vm2379_vm4, %v7841_v49, -inf }
 0x7ad   : > { %v3255_v11 = vsel %vm2379_vm4, %v7843_v53, -inf }
 0x7ae   : > { %3253 = vmax.xlane.f32.xlu0 %v3252_v2  ;;  %3256 = vmax.xlane.f32.xlu1 %v3255_v11 }
 0x7b2   : > { %3259 = vmax.xlane.f32.xlu0 %v3258_v3  ;;  %3262 = vmax.xlane.f32.xlu1 %v3261_v46  ;;  %v4080_v3 = vsel %vm4027_vm6, %v7595_v55, %v7663_v25 }
 0x831   : > { %v3242_v31 = vpop.xlane.xlu1 %3241 }
 0x832   : > { %v7854_v44 = vmax.f32 %v7578_v37, %v3242_v31 }
 0x833   : > { %v3245_v2 = vpop.xlane.xlu0 %3244 }
 0x834   : > { %9566 = vst [vmem:[#allocation48_spill] sm:$0xff] %v7854_v44  ;;  %v7861_v11 = vsel %vm4036_vm5, %v4079_v27, %v7854_v44  ;;  %v7864_v63 = vmax.f32 %v7589_v9, %v3245_v2  ;;  %3298 = vperm.xlu0 %5955, %v7854_v44   ;;  %v4082_v27 = vsel %vm4027_vm6, %v7598_v50, %v7654_v6 }
 0x835   : > { %9567 = vst [vmem:[#allocation49_spill] sm:$0xff] %v7861_v11  ;;  %v3251_v31 = vpop.xlane.xlu1 %3250 }
 0x836   : > { %v7872_v46 = vsel %vm4036_vm5, %v4080_v3, %v7864_v63  ;;  %v7875_v52 = vmax.f32 %v7591_v7, %v3251_v31  ;;  %v4081_v3 = vsel %vm4027_vm6, %v7587_v13, %v7640_v29  ;;  %v4084_v29 = vsel %vm4027_vm6, %v7631_v0, %v7680_v48 }
 0x837   : > { %9568 = vst [vmem:[#allocation50_spill] sm:$0xff] %v7872_v46  ;;  %v3248_v2 = vpop.xlane.xlu0 %3247  ;;  %v4086_v48 = vsel %vm4027_vm6, %v7621_v36, %v7687_v58 }
 0x838   : > { %v7882_v44 = vsel %vm4036_vm5, %v4082_v27, %v7875_v52  ;;  %v7885_v11 = vmax.f32 %v7583_v23, %v3248_v2  ;;  %v4083_v2 = vsel %vm4027_vm6, %v7612_v16, %v7676_v5 }
 0x839   : > { %9569 = vst [vmem:[#allocation51_spill] sm:$0xff] %v7882_v44 }
 0x83a   : > { %9570 = vst [vmem:[#allocation52_spill] sm:$0xff] %v7885_v11  ;;  %v7892_v31 = vsel %vm4036_vm5, %v4081_v3, %v7885_v11  ;;  %3308 = vperm.xlu1 %5956, %v7885_v11  }
 0x83b   : > { %v3257_v25 = vpop.xlane.xlu1 %3256  ;;  %v3254_v6 = vpop.xlane.xlu0 %3253 }
 0x83c   : > { %v7896_v46 = vmax.f32 %v7623_v39, %v3257_v25  ;;  %v7899_v27 = vmax.f32 %v7607_v14, %v3254_v6 }
 0x83e   : > { %v7909_v3 = vsel %vm4036_vm5, %v4084_v29, %v7896_v46  ;;  %v7913_v11 = vsel %vm4036_vm5, %v4083_v2, %v7899_v27  ;;  %3313 = vperm.xlu1 %5956, %v7875_v52   ;;  %v4085_v29 = vsel %vm4027_vm6, %v7605_v19, %v7672_v17 }
 0x83f   : > { %v3263_v6 = vpop.xlane.xlu1 %3262  ;;  %v3260_v25 = vpop.xlane.xlu0 %3259 }
 0x840   : > { %v7917_v44 = vmax.f32 %v7614_v59, %v3263_v6  ;;  %v7920_v5 = vmax.f32 %v7600_v20, %v3260_v25  ;;  %v9573_v25 = vld [vmem:[#allocation28_spill] sm:$0xff] }
 0x842   : > { %v7930_v2 = vsel %vm4036_vm5, %v4086_v48, %v7917_v44  ;;  %3328 = vperm.xlu0 %5955, %v7920_v5   ;;  %v7935_v6 = vsel %vm4036_vm5, %v4085_v29, %v7920_v5  ;;  %3303 = vperm.xlu1 %5956, %v7864_v63   ;;  %v9571_v48 = vmov 0   ;;  %v2416_v29 = vsub.f32 %v7607_v14, %v7612_v16 }
 0x846   : > { %3318 = vperm.xlu0 %5955, %v7899_v27   ;;  %3364 = vrot.lane.b32.xlu1 %v7628_v57, %s6420_s19 }
 0x84a   : > { %3589 = vrot.lane.b32.xlu0 %v7333_v35, %s6421_s12  ;;  %3366 = vrot.lane.b32.xlu1 %v7625_v54, %s6420_s19  ;;  %v2589_v35 = vsel %vm2379_vm4, %v7708_v4, 0.0  ;;  %v2592_v4 = vsel %vm2379_vm4, %v7711_v56, 0.0 }
 0x84b   : > { %5958 = vset.pattern.permute.xlu0 %v9571_v48 }
 0x84e   : > { %3593 = vrot.lane.b32.xlu0 %v7349_v30, %s6421_s12  ;;  %3368 = vrot.lane.b32.xlu1 %v7651_v34, %s6420_s19  ;;  %v2595_v30 = vsel %vm2379_vm4, %v7714_v62, 0.0 }
 0x852   : > { %3581 = vrot.lane.b32.xlu0 %v7368_v12, %s6421_s12  ;;  %3370 = vrot.lane.b32.xlu1 %v7646_v15, %s6420_s19  ;;  %v2413_v12 = vsub.f32 %v7589_v9, %v7595_v55  ;;  %v2607_v9 = vsel %vm2379_vm4, %v9573_v25, 0.0 }
 0x856   : > { %3585 = vrot.lane.b32.xlu0 %v7380_v43, %s6421_s12  ;;  %3323 = vperm.xlu1 %5956, %v7896_v46   ;;  %v2415_v43 = vsub.f32 %v7591_v7, %v7598_v50  ;;  %v2414_v7 = vsub.f32 %v7583_v23, %v7587_v13 }
 0x858   : > { %v2426_v62 = vmul.f32 1.442695, %v2415_v43  ;;  %v2424_v56 = vmul.f32 1.442695, %v2414_v7 }
 0x85a   : > { %3333 = vperm.xlu1 %5956, %v7917_v44  }
 0x85e   : > { %3591 = vrot.lane.b32.xlu1 %v7331_v8, %s6421_s12  ;;  %v2598_v8 = vsel %vm2379_vm4, %v7720_v33, 0.0  ;;  %v9572_v33 = vld [vmem:[#allocation29_spill] sm:$0xff] }
 0x85f   : > { %5957 = vset.pattern.permute.xlu1 %v9571_v48 }
 0x862   : > { %3595 = vrot.lane.b32.xlu1 %v7347_v42, %s6421_s12  ;;  %v2604_v42 = vsel %vm2379_vm4, %v7735_v22, 0.0  ;;  %v2601_v22 = vsel %vm2379_vm4, %v9572_v33, 0.0 }
 0x866   : > { %3583 = vrot.lane.b32.xlu1 %v7366_v28, %s6421_s12  ;;  %v2610_v28 = vsel %vm2379_vm4, %v7729_v60, 0.0  ;;  %v2412_v60 = vsub.f32 %v7578_v37, %v7581_v41  ;;  %v2417_v37 = vsub.f32 %v7623_v39, %v7631_v0  ;;  %v2428_v41 = vmul.f32 1.442695, %v2416_v29 }
 0x868   : > { %v2420_v55 = vmul.f32 1.442695, %v2412_v60  ;;  %v2430_v23 = vmul.f32 1.442695, %v2417_v37 }
 0x86a   : > { %3587 = vrot.lane.b32.xlu1 %v7378_v24, %s6421_s12  ;;  %v2422_v24 = vmul.f32 1.442695, %v2413_v12 }
 0x86c   : > { %6110 = vpow2.f32 %v2422_v24 }
 0x86d   : > { %6112 = vpow2.f32 %v2426_v62 }
 0x86e   : > { %6114 = vpow2.f32 %v2420_v55 }
 0x86f   : > { %6116 = vpow2.f32 %v2424_v56 }
 0x870   : > { %6118 = vpow2.f32 %v2428_v41 }
 0x871   : > { %6120 = vpow2.f32 %v2430_v23 }
 0x875   : > { %2590 = vadd.xlane.f32.xlu0 %v2589_v35 }
 0x876   : > { %v7991_v50 = vpop.eup %6110 }
 0x877   : > { %9574 = vst [vmem:[#allocation29_spill] sm:$0xff] %v7991_v50  ;;  %v7996_v48 = vpop.eup %6112 }
 0x878   : > { %v8001_v13 = vpop.eup %6114 }
 0x879   : > { %2596 = vadd.xlane.f32.xlu0 %v2595_v30  ;;  %v8004_v35 = vpop.eup %6116 }
 0x87a   : > { %v8007_v14 = vpop.eup %6118 }
 0x87b   : > { %9575 = vst [vmem:[#allocation28_spill] sm:$0xff] %v8007_v14  ;;  %v8010_v16 = vpop.eup %6120 }
 0x87d   : > { %2599 = vadd.xlane.f32.xlu0 %v2598_v8 }
 0x881   : > { %2605 = vadd.xlane.f32.xlu0 %v2604_v42 }
 0x885   : > { %2611 = vadd.xlane.f32.xlu0 %v2610_v28 }
 0x88e   : > { %2593 = vadd.xlane.f32.xlu1 %v2592_v4 }
 0x892   : > { %2602 = vadd.xlane.f32.xlu1 %v2601_v22 }
 0x896   : > { %2608 = vadd.xlane.f32.xlu1 %v2607_v9 }
 0x89b   : > { %2628 = vperm.xlu0 %5958, %v7991_v50  }
 0x89f   : > { %2638 = vperm.xlu0 %5958, %v7996_v48  }
 0x8a7   : > { %2623 = vperm.xlu1 %5957, %v8001_v13  }
 0x8ab   : > { %2633 = vperm.xlu1 %5957, %v8004_v35  }
 0x8af   : > { %2643 = vperm.xlu1 %5957, %v8007_v14  }
 0x8b3   : > { %2648 = vperm.xlu1 %5957, %v8010_v16   ;;  %v3299_v0 = vpop.permute.xlu0 %3298 }
 0x8b4   : > { %v3336_v8 = vsub.f32 %v7823_v10, %v3299_v0 }
 0x8b6   : > { %v3344_v43 = vmul.f32 1.442695, %v3336_v8 }
 0x8b9   : > { %v3309_v39 = vpop.permute.xlu1 %3308 }
 0x8ba   : > { %v3338_v30 = vsub.f32 %v7821_v47, %v3309_v39 }
 0x8bc   : > { %v3348_v42 = vmul.f32 1.442695, %v3338_v30 }
 0x8bd   : > { %v3314_v28 = vpop.permute.xlu1 %3313 }
 0x8be   : > { %v3339_v12 = vsub.f32 %v7825_v26, %v3314_v28  ;;  %6122 = vpow2.f32 %v3348_v42 }
 0x8c0   : > { %v3350_v24 = vmul.f32 1.442695, %v3339_v12 }
 0x8c1   : > { %v3304_v4 = vpop.permute.xlu1 %3303  ;;  %v3329_v60 = vpop.permute.xlu0 %3328 }
 0x8c2   : > { %6124 = vpow2.f32 %v3350_v24  ;;  %v3337_v62 = vsub.f32 %v7829_v40, %v3304_v4  ;;  %v3342_v23 = vsub.f32 %v7835_v21, %v3329_v60 }
 0x8c3   : > { %6126 = vpow2.f32 %v3344_v43 }
 0x8c4   : > { %v3346_v33 = vmul.f32 1.442695, %v3337_v62  ;;  %v3356_v8 = vmul.f32 1.442695, %v3342_v23 }
 0x8c5   : > { %v3365_v22 = vpop.permute.xlu1 %3364  ;;  %v3319_v9 = vpop.permute.xlu0 %3318 }
 0x8c6   : > { %6128 = vpow2.f32 %v3346_v33  ;;  %5733 = vmatprep.subr.bf16.mxu1 %v3365_v22  ;;  %v3340_v56 = vsub.f32 %v7839_v18, %v3319_v9 }
 0x8c7   : > { %5734 = vmatpush3.bf16.msra.mxu1 %v3365_v22 }
 0x8c8   : > { %v8017_v10 = vpop.eup %6122  ;;  %v3352_v39 = vmul.f32 1.442695, %v3340_v56 }
 0x8c9   : > { %v3367_v47 = vpop.permute.xlu1 %3366  ;;  %v3590_v41 = vpop.permute.xlu0 %3589 }
 0x8ca   : > { %5735 = vmatprep.subr.bf16.mxu1 %v3367_v47  ;;  %6130 = vpow2.f32 %v3352_v39  ;;  %v3610_v12 = vsel %vm2289_vm1, %v3590_v41, 0 }
 0x8cb   : > { %5736 = vmatpush3.bf16.msra.mxu1 %v3367_v47 }
 0x8cc   : > { %v8019_v26 = vpop.eup %6124 }
 0x8cd   : > { %v3361_v25 = vpack.c.bf16 %v8019_v26, %v8017_v10  ;;  %v3369_v7 = vpop.permute.xlu1 %3368  ;;  %v8023_v40 = vpop.eup %6126 }
 0x8ce   : > { %5737 = vmatprep.subr.bf16.mxu1 %v3369_v7  ;;  %v3594_v62 = vpop.permute.xlu0 %3593 }
 0x8cf   : > { %5738 = vmatpush3.bf16.msra.mxu1 %v3369_v7  ;;  %v3616_v47 = vsel %vm2289_vm1, %v3594_v62, 0 }
 0x8d0   : > { %v8025_v55 = vpop.eup %6128 }
 0x8d1   : > { %v3371_v29 = vpop.permute.xlu1 %3370  ;;  %v3360_v37 = vpack.c.bf16 %v8025_v55, %v8023_v40 }
 0x8d2   : > { %5739 = vmatprep.subr.bf16.mxu1 %v3371_v29 }
 0x8d3   : > { %5740 = vmatpush3.bf16.msra.mxu1 %v3371_v29  ;;  %5741 = vmatprep.mubr.msk.bf16.mxu1 %vm2379_vm4, %v3360_v37 }
 0x8d4   : > { %5833 = vmatprep.subr.msk.bf16.mxu1 %vm2289_vm1, %v3590_v41  ;;  %v8038_v21 = vpop.eup %6130 }
 0x8d5   : > { %v3324_v0 = vpop.permute.xlu1 %3323 }
 0x8d6   : > { %v3341_v30 = vsub.f32 %v7843_v53, %v3324_v0  ;;  %5742 = vmatmul.mubr.msk.bf16.vlgmr.msra.gmra.mrb[32].mxu1 %vm2379_vm4, %v3361_v25  ;;  %v3582_v25 = vpop.permute.xlu0 %3581 }
 0x8d8   : > { %v3354_v18 = vmul.f32 1.442695, %v3341_v30 }
 0x8d9   : > { %v3334_v42 = vpop.permute.xlu1 %3333 }
 0x8da   : > { %6132 = vpow2.f32 %v3354_v18  ;;  %v3343_v28 = vsub.f32 %v7841_v49, %v3334_v42  ;;  %v3586_v29 = vpop.permute.xlu0 %3585  ;;  %v8071_v18 = vld [vmem:[#allocation4 + $0x8] sm:$0xff] }
 0x8db   : > { %6134 = vpow2.f32 %v3356_v8 }
 0x8dc   : > { %v3358_v24 = vmul.f32 1.442695, %v3343_v28  ;;  %5750 = vmatpush3.bf16.xpose.msra.mxu1 %v3610_v12 }
 0x8dd   : > { %v3592_v43 = vpop.permute.xlu1 %3591 }
 0x8de   : > { %6136 = vpow2.f32 %v3358_v24  ;;  %5834 = vmatprep.subr.msk.bf16.mxu1 %vm2289_vm1, %v3592_v43  ;;  %v3613_v53 = vsel %vm2289_vm1, %v3592_v43, 0 }
 0x8e1   : > { %v3596_v9 = vpop.permute.xlu1 %3595 }
 0x8e2   : > { %v3619_v7 = vsel %vm2289_vm1, %v3596_v9, 0 }
 0x8e4   : > { %v8041_v4 = vpop.eup %6132  ;;  %5752 = vmatpush3.bf16.xpose.msra.mxu1 %v3613_v53 }
 0x8e5   : > { %5835 = vmatprep.subr.msk.bf16.mxu1 %vm2289_vm1, %v3594_v62  ;;  %v3362_v49 = vpack.c.bf16 %v8041_v4, %v8038_v21  ;;  %v8046_v33 = vpop.eup %6134  ;;  %v3584_v56 = vpop.permute.xlu1 %3583 }
 0x8e7   : > { %5745 = vmatprep.mubr.msk.bf16.mxu1 %vm2379_vm4, %v3362_v49 }
 0x8e8   : > { %v8049_v22 = vpop.eup %6136 }
 0x8e9   : > { %v3363_v60 = vpack.c.bf16 %v8049_v22, %v8046_v33  ;;  %v3588_v41 = vpop.permute.xlu1 %3587 }
 0x8eb   : > { %5746 = vmatmul.mubr.msk.bf16.gmra.mrb[36].mxu1 %vm2379_vm4, %v3363_v60 }
 0x8ec   : > { %5754 = vmatpush3.bf16.xpose.msra.mxu1 %v3616_v47  ;;  %5757 = vmatprep.mubr.msk.bf16.mxu1 %vm2289_vm1, %v3582_v25 }
 0x8ed   : > { %5836 = vmatprep.subr.msk.bf16.mxu1 %vm2289_vm1, %v3596_v9 }
 0x8f4   : > { %5756 = vmatpush3.bf16.xpose.msra.mxu1 %v3619_v7 }
 0x8fb   : > { %5758 = vmatmul.mubr.msk.bf16.vlgmr.msra.gmra.mrb[40].mxu1 %vm2289_vm1, %v3584_v56 }
 0x8fc   : > { %5761 = vmatprep.mubr.msk.bf16.mxu1 %vm2289_vm1, %v3586_v29 }
 0x902   : > { %v8060_v37 = vpop.xlane.xlu0 %2590 }
 0x903   : > { %5762 = vmatmul.mubr.msk.bf16.gmra.mrb[44].mxu1 %vm2289_vm1, %v3588_v41 }
 0x906   : > { %v8063_v23 = vpop.xlane.xlu0 %2596 }
 0x90a   : > { %v8065_v39 = vpop.xlane.xlu0 %2599 }
 0x90e   : > { %v8067_v0 = vpop.xlane.xlu0 %2605 }
 0x912   : > { %v8069_v30 = vpop.xlane.xlu0 %2611 }
 0x91a   : > { %v2629_v8 = vpop.permute.xlu0 %2628 }
 0x91b   : > { %v2662_v42 = vmul.f32 %v2629_v8, %v8071_v18  ;;  %v2418_v8 = vsub.f32 %v7600_v20, %v7605_v19 }
 0x91d   : > { %v8075_v28 = vadd.f32 %v2662_v42, %v7795_v38  ;;  %v2419_v42 = vsub.f32 %v7614_v59, %v7621_v36  ;;  %v9583_v59 = vmov 1   ;;  %v9584_v36 = vmov 3  }
 0x91f   : > { %9576 = vst [vmem:[#allocation53_spill] sm:$0xff] %v8075_v28 }
 0x9a9   : > { %v8077_v12 = vpop.f32.mrb[32].mxu1 }
 0x9aa   : > { %v8079_v24 = vpop.f32.mrb[33].mxu1 }
 0x9ab   : > { %9577 = vst [vmem:[#allocation54_spill] sm:$0xff] %v8079_v24  ;;  %v8081_v43 = vpop.f32.mrb[34].mxu1 }
 0x9ac   : > { %9578 = vst [vmem:[#allocation55_spill] sm:$0xff] %v8081_v43  ;;  %v8083_v53 = vpop.f32.mrb[35].mxu1 }
 0x9ad   : > { %9579 = vst [vmem:[#allocation56_spill] sm:$0xff] %v8083_v53  ;;  %v9604_v53 = vld [vmem:[#allocation36_spill] sm:$0xff] }
 0x9be   : > { %v8085_v62 = vpop.f32.mrb[36].mxu1 }
 0x9bf   : > { %v8087_v49 = vpop.f32.mrb[37].mxu1 }
 0x9c0   : > { %v8089_v60 = vpop.f32.mrb[38].mxu1 }
 0x9c1   : > { %9580 = vst [vmem:[#allocation57_spill] sm:$0xff] %v8089_v60  ;;  %v8091_v47 = vpop.f32.mrb[39].mxu1 }
 0x9c2   : > { %9581 = vst [vmem:[#allocation58_spill] sm:$0xff] %v8091_v47 }
 0x9ce   : > { %v8093_v25 = vpop.f32.mrb[40].mxu1 }
 0x9cf   : > { %v8095_v38 = vpop.f32.mrb[41].mxu1  ;;  %v3692_v9 = vsel %vm2379_vm4, %v8093_v25, -inf }
 0x9d0   : > { %3693 = vmax.xlane.f32.xlu1 %v3692_v9  ;;  %v8099_v7 = vpop.f32.mrb[42].mxu1  ;;  %v3686_v41 = vsel %vm2379_vm4, %v8095_v38, -inf }
 0x9d1   : > { %v8101_v56 = vpop.f32.mrb[43].mxu1  ;;  %v3695_v14 = vsel %vm2379_vm4, %v8099_v7, -inf }
 0x9d2   : > { %v3689_v29 = vsel %vm2379_vm4, %v8101_v56, -inf }
 0x9d3   : > { %3690 = vmax.xlane.f32.xlu0 %v3689_v29  ;;  %v2432_v29 = vmul.f32 1.442695, %v2418_v8  ;;  %v3018_v8 = vsel %vm2379_vm4, %v7753_v32, 0.0  ;;  %v3024_v32 = vsel %vm2379_vm4, %v7747_v51, 0.0  ;;  %v9589_v51 = vld [vmem:[#allocation31_spill] sm:$0xff] }
 0x9d4   : > { %3687 = vmax.xlane.f32.xlu1 %v3686_v41  ;;  %v2434_v41 = vmul.f32 1.442695, %v2419_v42  ;;  %v3030_v42 = vsel %vm2379_vm4, %v7770_v61, 0.0 }
 0x9d5   : > { %6138 = vpow2.f32 %v2432_v29 }
 0x9d6   : > { %v8111_v50 = vpop.f32.mrb[44].mxu1  ;;  %6140 = vpow2.f32 %v2434_v41  ;;  %v3021_v41 = vsel %vm2379_vm4, %v7745_v45, 0.0 }
 0x9d7   : > { %v8113_v9 = vpop.f32.mrb[45].mxu1 }
 0x9d8   : > { %3696 = vmax.xlane.f32.xlu1 %v3695_v14  ;;  %v8117_v60 = vpop.f32.mrb[46].mxu1  ;;  %v3015_v14 = vsel %vm2379_vm4, %v7751_v1, 0.0 }
 0x9d9   : > { %v8119_v47 = vpop.f32.mrb[47].mxu1 }
 0x9da   : > { %v3701_v1 = vsel %vm2379_vm4, %v8119_v47, -inf }
 0x9df   : > { %v8121_v20 = vpop.eup %6138 }
 0x9e0   : > { %9582 = vst [vmem:[#allocation59_spill] sm:$0xff] %v8121_v20  ;;  %v8123_v19 = vpop.eup %6140 }
 0x9e9   : > { %2658 = vperm.xlu1 %5957, %v8123_v19   ;;  %2653 = vperm.xlu0 %5958, %v8121_v20   ;;  %v9597_v20 = vmov 2  }
 0x9ed   : > { %3812 = vrot.lane.b32.xlu1 %v7625_v54, %s6421_s12  ;;  %5960 = vset.pattern.permute.xlu0 %v9583_v59  ;;  %v3704_v54 = vsel %vm2379_vm4, %v8111_v50, -inf }
 0x9ee   : > { %5959 = vset.pattern.permute.xlu1 %v9584_v36 }
 0x9f1   : > { %3814 = vrot.lane.b32.xlu1 %v7651_v34, %s6421_s12  ;;  %v3698_v34 = vsel %vm2379_vm4, %v8113_v9, -inf }
 0x9f5   : > { %3816 = vrot.lane.b32.xlu1 %v7646_v15, %s6421_s12  ;;  %v3707_v15 = vsel %vm2379_vm4, %v8117_v60, -inf }
 0xa08   : > { %3016 = vadd.xlane.f32.xlu0 %v3015_v14  ;;  %v9587_v14 = vld [vmem:[#allocation30_spill] sm:$0xff] }
 0xa19   : > { %3019 = vadd.xlane.f32.xlu1 %v3018_v8  ;;  %v3027_v8 = vsel %vm2379_vm4, %v9587_v14, 0.0 }
 0xa1d   : > { %3705 = vmax.xlane.f32.xlu1 %v3704_v54 }
 0xa1e   : > { %3810 = vrot.lane.b32.xlu0 %v7628_v57, %s6421_s12  ;;  %v8153_v57 = vpop.xlane.xlu1 %2593 }
 0xa1f   : > { %9585 = vst [vmem:[#allocation60_spill] sm:$0xff] %v8153_v57  ;;  %v8177_v57 = vpop.permute.xlu0 %2638 }
 0xa20   : > { %9595 = vst [vmem:[#allocation64_spill] sm:$0xff] %v8177_v57 }
 0xa21   : > { %3699 = vmax.xlane.f32.xlu1 %v3698_v34  ;;  %v3033_v34 = vsel %vm2379_vm4, %v9589_v51, 0.0 }
 0xa22   : > { %v8155_v29 = vpop.xlane.xlu1 %2602 }
 0xa23   : > { %9586 = vst [vmem:[#allocation61_spill] sm:$0xff] %v8155_v29  ;;  %v8192_v29 = vld [vmem:[#allocation2 + $0x8] sm:$0xff] }
 0xa25   : > { %3708 = vmax.xlane.f32.xlu1 %v3707_v15  ;;  %v8167_v15 = vld [vmem:[#allocation2] sm:$0xff] }
 0xa26   : > { %v8161_v54 = vpop.xlane.xlu1 %2608 }
 0xa27   : > { %9588 = vst [vmem:[#allocation30_spill] sm:$0xff] %v8161_v54 }
 0xa29   : > { %3702 = vmax.xlane.f32.xlu1 %v3701_v1  ;;  %v9591_v1 = vld [vmem:[#allocation23_spill] sm:$0xff] }
 0xa2a   : > { %v8165_v61 = vpop.permute.xlu1 %2623 }
 0xa2b   : > { %9590 = vst [vmem:[#allocation31_spill] sm:$0xff] %v8165_v61  ;;  %v9599_v61 = vld [vmem:[#allocation42_spill] sm:$0xff] }
 0xa2d   : > { %3025 = vadd.xlane.f32.xlu1 %v3024_v32  ;;  %v2822_v32 = vsub.f32 %v8167_v15, %v9591_v1  ;;  %v9596_v1 = vld [vmem:[#allocation43_spill] sm:$0xff] }
 0xa2e   : > { %v8171_v45 = vpop.permute.xlu1 %2633 }
 0xa2f   : > { %9592 = vst [vmem:[#allocation23_spill] sm:$0xff] %v8171_v45 }
 0xa31   : > { %3031 = vadd.xlane.f32.xlu1 %v3030_v42  ;;  %v2830_v42 = vmul.f32 1.442695, %v2822_v32 }
 0xa33   : > { %6142 = vpow2.f32 %v2830_v42 }
 0xa3d   : > { %3022 = vadd.xlane.f32.xlu0 %v3021_v41  ;;  %v8173_v41 = vpop.permute.xlu1 %2643 }
 0xa3e   : > { %9593 = vst [vmem:[#allocation62_spill] sm:$0xff] %v8173_v41 }
 0xa41   : > { %3028 = vadd.xlane.f32.xlu0 %v3027_v8  ;;  %v8175_v14 = vpop.permute.xlu1 %2648  ;;  %v6143_v8 = vpop.eup %6142 }
 0xa42   : > { %9594 = vst [vmem:[#allocation63_spill] sm:$0xff] %v8175_v14 }
 0xa45   : > { %3034 = vadd.xlane.f32.xlu0 %v3033_v34  ;;  %v8179_v34 = vld [vmem:[#allocation2 + $0x10] sm:$0xff] }
 0xa5b   : > { %3049 = vperm.xlu0 %5960, %v6143_v8  }
 0xa5d   : > { %v3694_v51 = vpop.xlane.xlu1 %3693 }
 0xa5e   : > { %v8182_v54 = vmax.f32 %v8179_v34, %v3694_v51 }
 0xa5f   : > { %3105 = vrot.lane.b32.xlu0 %v9596_v1, %s6421_s12  ;;  %v9598_v1 = vld [vmem:[#allocation50_spill] sm:$0xff] }
 0xa60   : > { %v4097_v32 = vsel %vm4045_vm7, %v7892_v31, %v8182_v54  ;;  %3754 = vperm.xlu1 %5959, %v8182_v54   ;;  %v3691_v42 = vpop.xlane.xlu0 %3690  ;;  %5963 = vset.pattern.permute.xlu0 %v9597_v20 }
 0xa61   : > { %4106 = vst.msk [vmem:[#allocation2 + $0x10] sm:$0xff] %vm4103_vm8, %v4097_v32  ;;  %v8195_v41 = vmax.f32 %v8192_v29, %v3691_v42  ;;  %v3688_v51 = vpop.xlane.xlu1 %3687  ;;  %v9600_v32 = vld [vmem:[#allocation49_spill] sm:$0xff] }
 0xa62   : > { %v8198_v45 = vmax.f32 %v8167_v15, %v3688_v51  ;;  %v8211_v51 = vld [vmem:[#allocation2 + $0x18] sm:$0xff] }
 0xa63   : > { %v4096_v31 = vsel %vm4045_vm7, %v9598_v1, %v8195_v41  ;;  %3109 = vrot.lane.b32.xlu0 %v9599_v61, %s6421_s12  ;;  %v8216_v1 = vld [vmem:[#allocation4 + $0x30] sm:$0xff]  ;;  %v9602_v61 = vld [vmem:[#allocation47_spill] sm:$0xff] }
 0xa64   : > { %4105 = vst.msk [vmem:[#allocation2 + $0x8] sm:$0xff] %vm4103_vm8, %v4096_v31  ;;  %v4095_v14 = vsel %vm4045_vm7, %v9600_v32, %v8198_v45  ;;  %3744 = vperm.xlu1 %5959, %v8198_v45   ;;  %9601 = vst [vmem:[#allocation43_spill] sm:$0xff] %v8216_v1  ;;  %v9603_v31 = vld [vmem:[#allocation51_spill] sm:$0xff] }
 0xa65   : > { %4104 = vst.msk [vmem:[#allocation2] sm:$0xff] %vm4103_vm8, %v4095_v14  ;;  %v3697_v42 = vpop.xlane.xlu1 %3696 }
 0xa66   : > { %v8214_v43 = vmax.f32 %v8211_v51, %v3697_v42  ;;  %v9606_v42 = vld [vmem:[#allocation46_spill] sm:$0xff] }
 0xa67   : > { %3113 = vrot.lane.b32.xlu0 %v9602_v61, %s6421_s12  ;;  %v3464_v61 = vsel %vm2379_vm4, %v8025_v55, 0.0  ;;  %v3476_v55 = vsel %vm2379_vm4, %v8041_v4, 0.0  ;;  %v3273_v4 = vsub.f32 %v8192_v29, %v7864_v63 }
 0xa68   : > { %v4098_v57 = vsel %vm4045_vm7, %v9603_v31, %v8214_v43  ;;  %3759 = vperm.xlu1 %5959, %v8214_v43   ;;  %v2654_v32 = vpop.permute.xlu0 %2653  ;;  %v3467_v31 = vsel %vm2379_vm4, %v8017_v10, 0.0 }
 0xa69   : > { %4107 = vst.msk [vmem:[#allocation2 + $0x18] sm:$0xff] %vm4103_vm8, %v4098_v57  ;;  %v2667_v14 = vmul.f32 %v2654_v32, %v8216_v1  ;;  %v8236_v24 = vpop.permute.xlu1 %2658  ;;  %v8238_v57 = vld [vmem:[#allocation3] sm:$0xff] }
 0xa6a   : > { %v2581_v32 = vmul.f32 %v8001_v13, %v8238_v57 }
 0xa6b   : > { %v8227_v28 = vadd.f32 %v9604_v53, %v2667_v14  ;;  %3117 = vrot.lane.b32.xlu0 %v9606_v42, %s6421_s12  ;;  %v3470_v53 = vsel %vm2379_vm4, %v8019_v26, 0.0  ;;  %v3007_v14 = vmul.f32 %v6143_v8, %v8238_v57  ;;  %v3482_v26 = vsel %vm2379_vm4, %v8049_v22, 0.0  ;;  %v8257_v22 = vld [vmem:[#allocation2 + $0x30] sm:$0xff] }
 0xa6c   : > { %3749 = vperm.xlu1 %5959, %v8195_v41   ;;  %v2613_v10 = vadd.f32 %v8060_v37, %v2581_v32  ;;  %v3282_v37 = vmul.f32 1.442695, %v3273_v4  ;;  %v9610_v4 = vld [vmem:[#allocation22_spill] sm:$0xff] }
 0xa6d   : > { %9605 = vst [vmem:[#allocation50_spill] sm:$0xff] %v8227_v28 }
 0xa6e   : > { %6144 = vpow2.f32 %v3282_v37  ;;  %v2824_v37 = vsub.f32 %v8179_v34, %v9610_v4 }
 0xa8a   : > { %3465 = vadd.xlane.f32.xlu0 %v3464_v61  ;;  %v3813_v61 = vpop.permute.xlu1 %3812 }
 0xa8e   : > { %3468 = vadd.xlane.f32.xlu0 %v3467_v31  ;;  %v3815_v13 = vpop.permute.xlu1 %3814 }
 0xa92   : > { %3471 = vadd.xlane.f32.xlu0 %v3470_v53  ;;  %v3817_v8 = vpop.permute.xlu1 %3816 }
 0xa95   : > { %v3017_v42 = vpop.xlane.xlu0 %3016 }
 0xa96   : > { %v3039_v31 = vadd.f32 %v3017_v42, %v3007_v14  ;;  %3477 = vadd.xlane.f32.xlu0 %v3476_v55  ;;  %v3719_v14 = vsub.f32 %v8192_v29, %v8195_v41  ;;  %v8269_v55 = vpop.eup %6144 }
 0xa97   : > { %9609 = vst [vmem:[#allocation47_spill] sm:$0xff] %v8269_v55 }
 0xa98   : > { %v8249_v28 = vsel %vm4027_vm6, %v2613_v10, %v3039_v31  ;;  %v8271_v10 = vld [vmem:[#allocation2 + $0x20] sm:$0xff]  ;;  %v3728_v31 = vmul.f32 1.442695, %v3719_v14 }
 0xa99   : > { %9607 = vst [vmem:[#allocation42_spill] sm:$0xff] %v8249_v28  ;;  %v3811_v1 = vpop.permute.xlu0 %3810 }
 0xa9a   : > { %3483 = vadd.xlane.f32.xlu0 %v3482_v26  ;;  %5765 = vmatprep.subr.bf16.mxu0 %v3811_v1  ;;  %v8282_v26 = vld [vmem:[#allocation2 + $0x38] sm:$0xff]  ;;  %6146 = vpow2.f32 %v3728_v31 }
 0xa9b   : > { %5766 = vmatpush3.bf16.msra.mxu0 %v3811_v1 }
 0xa9c   : > { %5767 = vmatprep.subr.bf16.mxu0 %v3813_v61 }
 0xa9f   : > { %5768 = vmatpush3.bf16.msra.mxu0 %v3813_v61 }
 0xaa0   : > { %5769 = vmatprep.subr.bf16.mxu0 %v3815_v13 }
 0xaa3   : > { %5770 = vmatpush3.bf16.msra.mxu0 %v3815_v13 }
 0xaa4   : > { %5771 = vmatprep.subr.bf16.mxu0 %v3817_v8 }
 0xaa6   : > { %v8255_v53 = vpop.xlane.xlu1 %3019 }
 0xaa7   : > { %9608 = vst [vmem:[#allocation49_spill] sm:$0xff] %v8255_v53  ;;  %5772 = vmatpush3.bf16.msra.mxu0 %v3817_v8 }
 0xaaa   : > { %v3706_v32 = vpop.xlane.xlu1 %3705 }
 0xaab   : > { %v8260_v1 = vmax.f32 %v8257_v22, %v3706_v32  ;;  %v8297_v32 = vld [vmem:[#allocation2 + $0x28] sm:$0xff] }
 0xaad   : > { %v4101_v63 = vsel %vm4045_vm7, %v7935_v6, %v8260_v1  ;;  %3774 = vperm.xlu1 %5959, %v8260_v1  }
 0xaae   : > { %4110 = vst.msk [vmem:[#allocation2 + $0x30] sm:$0xff] %vm4103_vm8, %v4101_v63  ;;  %v3700_v42 = vpop.xlane.xlu1 %3699  ;;  %v2834_v63 = vmul.f32 1.442695, %v2824_v37  ;;  %v9612_v37 = vld [vmem:[#allocation25_spill] sm:$0xff] }
 0xaaf   : > { %v8274_v61 = vmax.f32 %v8271_v10, %v3700_v42 }
 0xab0   : > { %3500 = vperm.xlu0 %5963, %v8269_v55   ;;  %6148 = vpow2.f32 %v2834_v63  ;;  %v9613_v63 = vld [vmem:[#allocation32_spill] sm:$0xff] }
 0xab1   : > { %v4099_v41 = vsel %vm4045_vm7, %v7913_v11, %v8274_v61  ;;  %3764 = vperm.xlu1 %5959, %v8274_v61  }
 0xab2   : > { %4108 = vst.msk [vmem:[#allocation2 + $0x20] sm:$0xff] %vm4103_vm8, %v4099_v41  ;;  %v3709_v6 = vpop.xlane.xlu1 %3708 }
 0xab3   : > { %v8285_v13 = vmax.f32 %v8282_v26, %v3709_v6 }
 0xab4   : > { %3553 = vrot.lane.b32.xlu0 %v8077_v12, %s6420_s19  ;;  %v8312_v12 = vpop.eup %6146 }
 0xab5   : > { %v4102_v11 = vsel %vm4045_vm7, %v7930_v2, %v8285_v13  ;;  %3779 = vperm.xlu1 %5959, %v8285_v13   ;;  %5965 = vset.pattern.permute.xlu0 %v9584_v36  ;;  %9611 = vst [vmem:[#allocation51_spill] sm:$0xff] %v8312_v12 }
 0xab6   : > { %4111 = vst.msk [vmem:[#allocation2 + $0x38] sm:$0xff] %vm4103_vm8, %v4102_v11  ;;  %v3703_v8 = vpop.xlane.xlu1 %3702  ;;  %v2823_v11 = vsub.f32 %v8192_v29, %v9612_v37  ;;  %v9615_v37 = vld [vmem:[#allocation26_spill] sm:$0xff] }
 0xab7   : > { %v8300_v14 = vmax.f32 %v8297_v32, %v3703_v8  ;;  %v2826_v55 = vsub.f32 %v8271_v10, %v9615_v37 }
 0xab8   : > { %3557 = vrot.lane.b32.xlu0 %v8087_v49, %s6420_s19  ;;  %v8315_v49 = vld [vmem:[#allocation3 + $0x10] sm:$0xff] }
 0xab9   : > { %v4100_v2 = vsel %vm4045_vm7, %v7909_v3, %v8300_v14  ;;  %3769 = vperm.xlu1 %5959, %v8300_v14   ;;  %v2583_v3 = vmul.f32 %v8004_v35, %v8315_v49  ;;  %v2832_v35 = vmul.f32 1.442695, %v2823_v11 }
 0xaba   : > { %4109 = vst.msk [vmem:[#allocation2 + $0x28] sm:$0xff] %vm4103_vm8, %v4100_v2  ;;  %v6149_v42 = vpop.eup %6148  ;;  %v3036_v2 = vsel %vm2379_vm4, %v9613_v63, 0.0 }
 0xabb   : > { %v3009_v31 = vmul.f32 %v6149_v42, %v8315_v49  ;;  %v2615_v6 = vadd.f32 %v8063_v23, %v2583_v3  ;;  %6150 = vpow2.f32 %v2832_v35  ;;  %v9614_v3 = vld [vmem:[#allocation24_spill] sm:$0xff] }
 0xabc   : > { %3561 = vrot.lane.b32.xlu0 %v8085_v62, %s6420_s19 }
 0xabd   : > { %5961 = vset.pattern.permute.xlu1 %v9583_v59  ;;  %v8324_v59 = vpop.xlane.xlu1 %3025 }
 0xac0   : > { %3946 = vperm.xlu0 %5965, %v8312_v12  }
 0xac1   : > { %v8328_v8 = vpop.xlane.xlu1 %3031 }
 0xaca   : > { %v3023_v41 = vpop.xlane.xlu0 %3022 }
 0xacb   : > { %v3041_v4 = vadd.f32 %v3023_v41, %v3009_v31  ;;  %v2825_v31 = vsub.f32 %v8211_v51, %v9614_v3 }
 0xacd   : > { %v8322_v62 = vsel %vm4027_vm6, %v2615_v6, %v3041_v4  ;;  %v2836_v4 = vmul.f32 1.442695, %v2825_v31 }
 0xadd   : > { %3037 = vadd.xlane.f32.xlu1 %v3036_v2 }
 0xadf   : > { %v3755_v12 = vpop.permute.xlu1 %3754 }
 0xae0   : > { %v3784_v53 = vsub.f32 %v8093_v25, %v3755_v12  ;;  %v2838_v25 = vmul.f32 1.442695, %v2826_v55 }
 0xae2   : > { %v3794_v23 = vmul.f32 1.442695, %v3784_v53  ;;  %v9616_v53 = vld [vmem:[#allocation27_spill] sm:$0xff] }
 0xae3   : > { %v3745_v41 = vpop.permute.xlu1 %3744  ;;  %v2827_v12 = vsub.f32 %v8297_v32, %v9616_v53 }
 0xae4   : > { %6152 = vpow2.f32 %v3794_v23  ;;  %v3782_v6 = vsub.f32 %v8095_v38, %v3745_v41  ;;  %v8342_v38 = vpop.eup %6150  ;;  %v2828_v41 = vsub.f32 %v8257_v22, %v7672_v17 }
 0xae5   : > { %9617 = vst [vmem:[#allocation36_spill] sm:$0xff] %v8342_v38 }
 0xae6   : > { %v3790_v29 = vmul.f32 1.442695, %v3782_v6  ;;  %v8348_v6 = vpop.xlane.xlu0 %3028 }
 0xae7   : > { %v3760_v63 = vpop.permute.xlu1 %3759 }
 0xae8   : > { %6154 = vpow2.f32 %v3790_v29  ;;  %v3785_v11 = vsub.f32 %v8099_v7, %v3760_v63  ;;  %v2840_v7 = vmul.f32 1.442695, %v2827_v12 }
 0xae9   : > { %6156 = vpow2.f32 %v2836_v4  ;;  %v2829_v4 = vsub.f32 %v8282_v26, %v7687_v58 }
 0xaea   : > { %v3796_v2 = vmul.f32 1.442695, %v3785_v11 }
 0xaeb   : > { %v3750_v35 = vpop.permute.xlu1 %3749  ;;  %v2844_v11 = vmul.f32 1.442695, %v2829_v4 }
 0xaec   : > { %6158 = vpow2.f32 %v3796_v2  ;;  %v3783_v23 = vsub.f32 %v8101_v56, %v3750_v35  ;;  %v2842_v56 = vmul.f32 1.442695, %v2828_v41  ;;  %v8353_v2 = vpop.xlane.xlu0 %3034 }
 0xaed   : > { %6160 = vpow2.f32 %v2838_v25  ;;  %9618 = vst [vmem:[#allocation46_spill] sm:$0xff] %v8353_v2 }
 0xaee   : > { %v6153_v3 = vpop.eup %6152  ;;  %v3792_v31 = vmul.f32 1.442695, %v3783_v23  ;;  %3054 = vperm.xlu1 %5961, %v8342_v38  }
 0xaef   : > { %v3913_v55 = vsel %vm2379_vm4, %v6153_v3, 0.0 }
 0xaf0   : > { %6162 = vpow2.f32 %v3792_v31  ;;  %3914 = vadd.xlane.f32.xlu0 %v3913_v55  ;;  %v8361_v58 = vpop.permute.xlu0 %3049 }
 0xaf1   : > { %6164 = vpow2.f32 %v2840_v7  ;;  %v9620_v7 = vld [vmem:[#allocation52_spill] sm:$0xff] }
 0xaf2   : > { %v6155_v29 = vpop.eup %6154  ;;  %3059 = vperm.xlu1 %5961, %v6149_v42   ;;  %6166 = vpow2.f32 %v2842_v56  ;;  %v3274_v55 = vsub.f32 %v8179_v34, %v9620_v7  ;;  %v3275_v56 = vsub.f32 %v8211_v51, %v7875_v52  ;;  %v9623_v52 = vld [vmem:[#allocation45_spill] sm:$0xff] }
 0xaf3   : > { %v3907_v37 = vsel %vm2379_vm4, %v6155_v29, 0.0  ;;  %v6157_v63 = vpop.eup %6156  ;;  %6168 = vpow2.f32 %v2844_v11  ;;  %v3277_v11 = vsub.f32 %v8297_v32, %v7896_v46  ;;  %v8399_v46 = vld [vmem:[#allocation3 + $0x18] sm:$0xff] }
 0xaf4   : > { %3908 = vadd.xlane.f32.xlu0 %v3907_v37  ;;  %v8368_v31 = vpop.permute.xlu0 %3105  ;;  %v3284_v4 = vmul.f32 1.442695, %v3274_v55  ;;  %v9621_v37 = vld [vmem:[#allocation41_spill] sm:$0xff] }
 0xaf6   : > { %v6159_v17 = vpop.eup %6158  ;;  %3064 = vperm.xlu1 %5961, %v6157_v63   ;;  %6170 = vpow2.f32 %v3284_v4 }
 0xaf7   : > { %v3807_v25 = vpack.c.bf16 %v6159_v17, %v6153_v3  ;;  %v3916_v53 = vsel %vm2379_vm4, %v6159_v17, 0.0  ;;  %v8356_v42 = vpop.eup %6160  ;;  %v3286_v17 = vmul.f32 1.442695, %v3275_v56 }
 0xaf8   : > { %3917 = vadd.xlane.f32.xlu0 %v3916_v53  ;;  %v9622_v53 = vld [vmem:[#allocation40_spill] sm:$0xff] }
 0xaf9   : > { %6172 = vpow2.f32 %v3286_v17  ;;  %v3010_v17 = vmul.f32 %v6157_v63, %v8399_v46 }
 0xafa   : > { %v8358_v12 = vpop.eup %6162  ;;  %3069 = vperm.xlu1 %5961, %v8356_v42  }
 0xafb   : > { %v3806_v35 = vpack.c.bf16 %v8358_v12, %v6155_v29  ;;  %v6165_v23 = vpop.eup %6164  ;;  %v8376_v29 = vpop.permute.xlu0 %3109 }
 0xafc   : > { %v8366_v3 = vpop.eup %6166 }
 0xafd   : > { %5773 = vmatprep.mubr.msk.bf16.mxu0 %vm2379_vm4, %v3806_v35  ;;  %9619 = vst [vmem:[#allocation22_spill] sm:$0xff] %v8366_v3  ;;  %v8371_v41 = vpop.eup %6168  ;;  %v3290_v35 = vmul.f32 1.442695, %v3277_v11 }
 0xafe   : > { %3074 = vperm.xlu1 %5961, %v6165_v23   ;;  %5774 = vmatmul.mubr.msk.bf16.vlgmr.msra.gmra.mrb[48].mxu0 %vm2379_vm4, %v3807_v25 }
 0xaff   : > { %v8385_v25 = vpop.permute.xlu0 %3113  ;;  %6174 = vpow2.f32 %v3290_v35  ;;  %v2584_v35 = vmul.f32 %v7996_v48, %v8399_v46 }
 0xb00   : > { %v8395_v55 = vpop.eup %6170 }
 0xb01   : > { %v3455_v4 = vmul.f32 %v8395_v55, %v8315_v49  ;;  %v2616_v63 = vadd.f32 %v8065_v39, %v2584_v35 }
 0xb02   : > { %3079 = vperm.xlu1 %5961, %v8366_v3  }
 0xb03   : > { %v8391_v7 = vpop.permute.xlu0 %3117 }
 0xb06   : > { %3084 = vperm.xlu1 %5961, %v8371_v41  }
 0xb0a   : > { %3103 = vrot.lane.b32.xlu1 %v9621_v37, %s6421_s12  ;;  %v8403_v37 = vpop.eup %6172 }
 0xb0b   : > { %5962 = vset.pattern.permute.xlu1 %v9597_v20  ;;  %v9624_v20 = vld [vmem:[#allocation44_spill] sm:$0xff]  ;;  %v3456_v38 = vmul.f32 %v8403_v37, %v8399_v46  ;;  %v8417_v2 = vpop.eup %6174 }
 0xb0e   : > { %3107 = vrot.lane.b32.xlu1 %v9622_v53, %s6421_s12 }
 0xb12   : > { %3111 = vrot.lane.b32.xlu1 %v9623_v52, %s6421_s12  ;;  %v3042_v52 = vadd.f32 %v8324_v59, %v3010_v17 }
 0xb14   : > { %v4031_v59 = vsel %vm4027_vm6, %v2616_v63, %v3042_v52 }
 0xb16   : > { %3115 = vrot.lane.b32.xlu1 %v9624_v20, %s6421_s12  ;;  %v8409_v20 = vld [vmem:[#allocation3 + $0x28] sm:$0xff] }
 0xb17   : > { %v8397_v56 = vpop.xlane.xlu0 %3465  ;;  %v2586_v48 = vmul.f32 %v8010_v16, %v8409_v20 }
 0xb18   : > { %9625 = vst [vmem:[#allocation25_spill] sm:$0xff] %v8397_v56 }
 0xb19   : > { %v2618_v28 = vadd.f32 %v8067_v0, %v2586_v48 }
 0xb1b   : > { %v3469_v11 = vpop.xlane.xlu0 %3468 }
 0xb1c   : > { %v3487_v53 = vadd.f32 %v3469_v11, %v3455_v4  ;;  %v3012_v4 = vmul.f32 %v6165_v23, %v8409_v20 }
 0xb1e   : > { %v8413_v56 = vsel %vm4036_vm5, %v8322_v62, %v3487_v53  ;;  %v3044_v17 = vadd.f32 %v8328_v8, %v3012_v4  ;;  %v3458_v53 = vmul.f32 %v8417_v2, %v8409_v20 }
 0xb1f   : > { %v3472_v11 = vpop.xlane.xlu0 %3471 }
 0xb20   : > { %v3488_v3 = vadd.f32 %v3472_v11, %v3456_v38  ;;  %v4033_v23 = vsel %vm4027_vm6, %v2618_v28, %v3044_v17  ;;  %v3461_v17 = vsel %vm2379_vm4, %v8023_v40, 0.0 }
 0xb22   : > { %v8426_v62 = vsel %vm4036_vm5, %v4031_v59, %v3488_v3 }
 0xb23   : > { %v3478_v39 = vpop.xlane.xlu0 %3477 }
 0xb24   : > { %v3490_v35 = vadd.f32 %v3478_v39, %v3458_v53  ;;  %v3479_v39 = vsel %vm2379_vm4, %v8046_v33, 0.0  ;;  %v3276_v33 = vsub.f32 %v8271_v10, %v7899_v27 }
 0xb26   : > { %v8433_v38 = vsel %vm4036_vm5, %v4033_v23, %v3490_v35 }
 0xb27   : > { %v3484_v27 = vpop.xlane.xlu0 %3483 }
 0xb2c   : > { %v3775_v16 = vpop.permute.xlu1 %3774 }
 0xb2d   : > { %v3788_v52 = vsub.f32 %v8111_v50, %v3775_v16  ;;  %v3473_v50 = vsel %vm2379_vm4, %v8038_v21, 0.0 }
 0xb2f   : > { %v3802_v8 = vmul.f32 1.442695, %v3788_v52 }
 0xb30   : > { %v3765_v63 = vpop.permute.xlu1 %3764 }
 0xb31   : > { %v3786_v3 = vsub.f32 %v8113_v9, %v3765_v63  ;;  %6176 = vpow2.f32 %v3802_v8  ;;  %v9626_v9 = vld [vmem:[#allocation48_spill] sm:$0xff] }
 0xb33   : > { %v3798_v0 = vmul.f32 1.442695, %v3786_v3  ;;  %v3288_v3 = vmul.f32 1.442695, %v3276_v33 }
 0xb34   : > { %v3780_v4 = vpop.permute.xlu1 %3779 }
 0xb35   : > { %v3789_v11 = vsub.f32 %v8117_v60, %v3780_v4  ;;  %v3272_v60 = vsub.f32 %v8167_v15, %v9626_v9 }
 0xb37   : > { %v3804_v59 = vmul.f32 1.442695, %v3789_v11  ;;  %v3280_v23 = vmul.f32 1.442695, %v3272_v60  ;;  %v3278_v11 = vsub.f32 %v8257_v22, %v7920_v5 }
 0xb38   : > { %v3770_v48 = vpop.permute.xlu1 %3769 }
 0xb39   : > { %6178 = vpow2.f32 %v3804_v59  ;;  %v3787_v28 = vsub.f32 %v8119_v47, %v3770_v48  ;;  %v3279_v59 = vsub.f32 %v8282_v26, %v7917_v44  ;;  %v8476_v44 = vld [vmem:[#allocation3 + $0x38] sm:$0xff] }
 0xb3a   : > { %3462 = vadd.xlane.f32.xlu1 %v3461_v17  ;;  %6180 = vpow2.f32 %v3798_v0  ;;  %v3292_v0 = vmul.f32 1.442695, %v3278_v11  ;;  %v8471_v17 = vpop.permute.xlu0 %3500  ;;  %v3014_v9 = vmul.f32 %v8371_v41, %v8476_v44 }
 0xb3b   : > { %v3800_v53 = vmul.f32 1.442695, %v3787_v28  ;;  %v8447_v35 = vpop.eup %6176  ;;  %v3294_v48 = vmul.f32 1.442695, %v3279_v59  ;;  %v9628_v59 = vld [vmem:[#allocation53_spill] sm:$0xff] }
 0xb3d   : > { %6182 = vpow2.f32 %v3800_v53  ;;  %v3720_v53 = vsub.f32 %v8179_v34, %v8182_v54 }
 0xb3e   : > { %3474 = vadd.xlane.f32.xlu1 %v3473_v50  ;;  %6184 = vpow2.f32 %v3280_v23  ;;  %v2588_v50 = vmul.f32 %v8123_v19, %v8476_v44  ;;  %v3718_v23 = vsub.f32 %v8167_v15, %v8198_v45  ;;  %v9627_v15 = vld [vmem:[#allocation54_spill] sm:$0xff] }
 0xb3f   : > { %6186 = vpow2.f32 %v3288_v3 }
 0xb40   : > { %6188 = vpow2.f32 %v3292_v0  ;;  %v3726_v41 = vmul.f32 1.442695, %v3718_v23  ;;  %v3724_v23 = vsub.f32 %v8257_v22, %v8260_v1 }
 0xb41   : > { %6190 = vpow2.f32 %v3294_v48  ;;  %v9631_v48 = vld [vmem:[#allocation55_spill] sm:$0xff] }
 0xb42   : > { %3480 = vadd.xlane.f32.xlu1 %v3479_v39  ;;  %v2620_v39 = vadd.f32 %v8069_v30, %v2588_v50  ;;  %v3721_v30 = vsub.f32 %v8211_v51, %v8214_v43  ;;  %v9630_v51 = vld [vmem:[#allocation64_spill] sm:$0xff] }
 0xb43   : > { %v6179_v47 = vpop.eup %6178 }
 0xb44   : > { %v3928_v40 = vsel %vm2379_vm4, %v6179_v47, 0.0  ;;  %v3809_v16 = vpack.c.bf16 %v6179_v47, %v8447_v35  ;;  %v8451_v52 = vpop.eup %6180  ;;  %v3730_v47 = vmul.f32 1.442695, %v3720_v53  ;;  %v3732_v3 = vmul.f32 1.442695, %v3721_v30 }
 0xb45   : > { %3929 = vadd.xlane.f32.xlu0 %v3928_v40 }
 0xb46   : > { %6192 = vpow2.f32 %v3730_v47  ;;  %v9633_v47 = vld [vmem:[#allocation58_spill] sm:$0xff] }
 0xb47   : > { %v6183_v21 = vpop.eup %6182  ;;  %6194 = vpow2.f32 %v3726_v41 }
 0xb48   : > { %v3922_v63 = vsel %vm2379_vm4, %v6183_v21, 0.0  ;;  %v3808_v8 = vpack.c.bf16 %v6183_v21, %v8451_v52  ;;  %v8459_v4 = vpop.eup %6184  ;;  %6196 = vpow2.f32 %v3732_v3  ;;  %v3722_v3 = vsub.f32 %v8271_v10, %v8274_v61 }
 0xb49   : > { %3923 = vadd.xlane.f32.xlu0 %v3922_v63  ;;  %v8468_v28 = vpop.eup %6186 }
 0xb4a   : > { %5777 = vmatprep.mubr.msk.bf16.mxu0 %vm2379_vm4, %v3808_v8  ;;  %v8474_v5 = vpop.eup %6188  ;;  %v8504_v8 = vld [vmem:[#allocation4 + $0x18] sm:$0xff] }
 0xb4b   : > { %5778 = vmatmul.mubr.msk.bf16.gmra.mrb[52].mxu0 %vm2379_vm4, %v3809_v16 }
 0xb53   : > { %3495 = vperm.xlu1 %5962, %v8459_v4  }
 0xb57   : > { %3505 = vperm.xlu1 %5962, %v8395_v55   ;;  %v6191_v55 = vpop.eup %6190 }
 0xb5b   : > { %3510 = vperm.xlu1 %5962, %v8403_v37   ;;  %v8480_v37 = vpop.permute.xlu0 %3553 }
 0xb5f   : > { %3515 = vperm.xlu1 %5962, %v8468_v28   ;;  %v8491_v40 = vpop.permute.xlu0 %3557 }
 0xb63   : > { %3520 = vperm.xlu1 %5962, %v8417_v2   ;;  %v3460_v2 = vmul.f32 %v6191_v55, %v8476_v44  ;;  %v8508_v11 = vpop.permute.xlu0 %3561 }
 0xb65   : > { %v3492_v34 = vadd.f32 %v3484_v27, %v3460_v2  ;;  %v6193_v27 = vpop.eup %6192  ;;  %v8525_v2 = vld [vmem:[#allocation4 + $0x28] sm:$0xff] }
 0xb67   : > { %3525 = vperm.xlu1 %5962, %v8474_v5   ;;  %v8522_v50 = vpop.permute.xlu0 %3946 }
 0xb6a   : > { %v3038_v60 = vpop.xlane.xlu1 %3037 }
 0xb6b   : > { %v3046_v54 = vadd.f32 %v3038_v60, %v3014_v9  ;;  %3530 = vperm.xlu1 %5962, %v6191_v55   ;;  %v9632_v55 = vld [vmem:[#allocation35_spill] sm:$0xff] }
 0xb6d   : > { %v4035_v16 = vsel %vm4027_vm6, %v2620_v39, %v3046_v54  ;;  %v3901_v54 = vmul.f32 %v6193_v27, %v8315_v49 }
 0xb6e   : > { %v3055_v19 = vpop.permute.xlu1 %3054  ;;  %v8495_v21 = vsel %vm4036_vm5, %v4035_v16, %v3492_v34  ;;  %v6195_v34 = vpop.eup %6194  ;;  %v9634_v16 = vld [vmem:[#allocation63_spill] sm:$0xff] }
 0xb6f   : > { %v3088_v63 = vmul.f32 %v3055_v19, %v8071_v18  ;;  %3549 = vrot.lane.b32.xlu1 %v9627_v15, %s6420_s19  ;;  %v9629_v18 = vld [vmem:[#allocation56_spill] sm:$0xff]  ;;  %v2666_v19 = vmul.f32 %v9634_v16, %v8525_v2  ;;  %v9635_v15 = vld [vmem:[#allocation57_spill] sm:$0xff]  ;;  %v3899_v1 = vmul.f32 %v6195_v34, %v8238_v57  ;;  %v6197_v49 = vpop.eup %6196 }
 0xb70   : > { %5964 = vset.pattern.permute.xlu1 %v9584_v36  ;;  %v2664_v36 = vmul.f32 %v9630_v51, %v8504_v8 }
 0xb71   : > { %v3128_v45 = vadd.f32 %v8368_v31, %v3088_v63 }
 0xb72   : > { %v8506_v33 = vpop.permute.xlu1 %3059  ;;  %v2672_v53 = vadd.f32 %v9632_v55, %v2664_v36  ;;  %v3725_v55 = vsub.f32 %v8282_v26, %v8285_v13  ;;  %v3723_v26 = vsub.f32 %v8297_v32, %v8300_v14 }
 0xb73   : > { %v8512_v43 = vsel %vm2289_vm1, %v9628_v59, %v3128_v45  ;;  %3551 = vrot.lane.b32.xlu1 %v9629_v18, %s6420_s19  ;;  %v3738_v45 = vmul.f32 1.442695, %v3724_v23  ;;  %v9636_v59 = vld [vmem:[#allocation39_spill] sm:$0xff] }
 0xb74   : > { %v2674_v18 = vadd.f32 %v2666_v19, %v9636_v59  ;;  %v8570_v19 = vld [vmem:[#allocation4 + $0x10] sm:$0xff] }
 0xb75   : > { %6198 = vpow2.f32 %v3738_v45  ;;  %v9640_v45 = vld [vmem:[#allocation23_spill] sm:$0xff] }
 0xb76   : > { %v3065_v0 = vpop.permute.xlu1 %3064  ;;  %v2663_v32 = vmul.f32 %v9640_v45, %v8570_v19  ;;  %v3453_v45 = vmul.f32 %v8459_v4, %v8238_v57  ;;  %v9648_v57 = vld [vmem:[#allocation61_spill] sm:$0xff] }
 0xb77   : > { %v3090_v31 = vmul.f32 %v3065_v0, %v8504_v8  ;;  %3555 = vrot.lane.b32.xlu1 %v9631_v48, %s6420_s19  ;;  %v8553_v0 = vld [vmem:[#allocation4 + $0x38] sm:$0xff]  ;;  %v3734_v48 = vmul.f32 1.442695, %v3722_v3  ;;  %v8590_v3 = vld [vmem:[#allocation4 + $0x20] sm:$0xff] }
 0xb79   : > { %v3130_v9 = vadd.f32 %v8376_v29, %v3090_v31  ;;  %6200 = vpow2.f32 %v3734_v48  ;;  %v9642_v48 = vld [vmem:[#allocation62_spill] sm:$0xff] }
 0xb7a   : > { %v8527_v60 = vpop.permute.xlu1 %3069 }
 0xb7b   : > { %v8530_v39 = vsel %vm2289_vm1, %v2672_v53, %v3130_v9  ;;  %3559 = vrot.lane.b32.xlu1 %v9633_v47, %s6420_s19  ;;  %v3902_v53 = vmul.f32 %v6197_v49, %v8399_v46 }
 0xb7d   : > { %v3915_v29 = vpop.xlane.xlu0 %3914 }
 0xb7e   : > { %v3933_v41 = vadd.f32 %v3915_v29, %v3901_v54  ;;  %v3075_v30 = vpop.permute.xlu1 %3074  ;;  %v9637_v54 = vld [vmem:[#allocation31_spill] sm:$0xff]  ;;  %v3740_v29 = vmul.f32 1.442695, %v3725_v55  ;;  %v2665_v55 = vmul.f32 %v9642_v48, %v8590_v3 }
 0xb7f   : > { %v3092_v63 = vmul.f32 %v3075_v30, %v8525_v2  ;;  %3563 = vrot.lane.b32.xlu1 %v9635_v15, %s6420_s19  ;;  %v8597_v59 = vpop.eup %6198  ;;  %s9661_s19 = sld [smem:[#allocation70_spill]] (!%p5385_p1) }
 0xb80   : > { %v8546_v22 = vsel %vm4045_vm7, %v8413_v56, %v3933_v41  ;;  %v8560_v56 = vld [vmem:[#allocation4] sm:$0xff]  ;;  %6202 = vpow2.f32 %v3740_v29 }
 0xb81   : > { %4114 = vst.msk [vmem:[#allocation3 + $0x10] sm:$0xff] %vm4103_vm8, %v8546_v22  ;;  %v3132_v51 = vadd.f32 %v8385_v25, %v3092_v63  ;;  %v3909_v36 = vpop.xlane.xlu0 %3908  ;;  %v2668_v25 = vmul.f32 %v8236_v24, %v8553_v0  ;;  %v2661_v16 = vmul.f32 %v9637_v54, %v8560_v56  ;;  %v9638_v24 = vld [vmem:[#allocation38_spill] sm:$0xff]  ;;  %v3087_v41 = vmul.f32 %v8361_v58, %v8560_v56 }
 0xb82   : > { %v8555_v31 = vadd.f32 %v3909_v36, %v3899_v1  ;;  %v3080_v10 = vpop.permute.xlu1 %3079  ;;  %v9639_v63 = vld [vmem:[#allocation34_spill] sm:$0xff]  ;;  %v3736_v58 = vmul.f32 1.442695, %v3723_v26  ;;  %v3089_v1 = vmul.f32 %v8506_v33, %v8570_v19 }
 0xb83   : > { %v8558_v61 = vsel %vm2289_vm1, %v2674_v18, %v3132_v51  ;;  %3951 = vperm.xlu1 %5964, %v6193_v27   ;;  %v2676_v46 = vadd.f32 %v9638_v24, %v2668_v25  ;;  %v2669_v15 = vadd.f32 %v2661_v16, %v9639_v63  ;;  %v9641_v51 = vld [vmem:[#allocation33_spill] sm:$0xff]  ;;  %v8608_v25 = vpop.eup %6200  ;;  %v9644_v16 = vld [vmem:[#allocation43_spill] sm:$0xff]  ;;  %v8624_v63 = vld [vmem:[#allocation3 + $0x20] sm:$0xff] }
 0xb84   : > { %v2671_v36 = vadd.f32 %v9641_v51, %v2663_v32  ;;  %6204 = vpow2.f32 %v3736_v58  ;;  %v3011_v32 = vmul.f32 %v8356_v42, %v8624_v63  ;;  %v9647_v51 = vld [vmem:[#allocation42_spill] sm:$0xff] }
 0xb85   : > { %v3918_v9 = vpop.xlane.xlu0 %3917  ;;  %v9649_v42 = vld [vmem:[#allocation22_spill] sm:$0xff] }
 0xb86   : > { %v3934_v47 = vadd.f32 %v3918_v9, %v3902_v53  ;;  %v3085_v23 = vpop.permute.xlu1 %3084 }
 0xb87   : > { %v3094_v27 = vmul.f32 %v3085_v23, %v8553_v0  ;;  %3941 = vperm.xlu1 %5964, %v6195_v34  }
 0xb88   : > { %v8576_v13 = vsel %vm4045_vm7, %v8426_v62, %v3934_v47  ;;  %v9643_v47 = vld [vmem:[#allocation37_spill] sm:$0xff] }
 0xb89   : > { %4115 = vst.msk [vmem:[#allocation3 + $0x18] sm:$0xff] %vm4103_vm8, %v8576_v13  ;;  %v3134_v34 = vadd.f32 %v8391_v7, %v3094_v27  ;;  %v2673_v23 = vadd.f32 %v2665_v55, %v9643_v47  ;;  %v3093_v27 = vmul.f32 %v3080_v10, %v9644_v16  ;;  %v3925_v10 = vsel %vm2379_vm4, %v8447_v35, 0.0 }
 0xb8a   : > { %v3104_v30 = vpop.permute.xlu1 %3103  ;;  %v6203_v26 = vpop.eup %6202  ;;  %v3043_v35 = vadd.f32 %v8348_v6, %v3011_v32 }
 0xb8b   : > { %v8588_v14 = vsel %vm2289_vm1, %v2676_v46, %v3134_v34  ;;  %v3127_v62 = vadd.f32 %v3104_v30, %v3087_v41  ;;  %3956 = vperm.xlu1 %5964, %v6197_v49   ;;  %v3091_v49 = vmul.f32 %v8527_v60, %v8590_v3  ;;  %v9645_v60 = vld [vmem:[#allocation50_spill] sm:$0xff]  ;;  %v3910_v30 = vsel %vm2379_vm4, %v8358_v12, 0.0  ;;  %v9646_v12 = vld [vmem:[#allocation28_spill] sm:$0xff] }
 0xb8d   : > { %v8595_v7 = vsel %vm2289_vm1, %v2669_v15, %v3127_v62  ;;  %v3919_v15 = vsel %vm2379_vm4, %v8451_v52, 0.0  ;;  %v3457_v52 = vmul.f32 %v8468_v28, %v8624_v63  ;;  %v9651_v28 = vld [vmem:[#allocation46_spill] sm:$0xff] }
 0xb8e   : > { %v3108_v18 = vpop.permute.xlu1 %3107  ;;  %v6205_v34 = vpop.eup %6204 }
 0xb8f   : > { %v3129_v53 = vadd.f32 %v3108_v18, %v3089_v1  ;;  %3971 = vperm.xlu1 %5964, %v8597_v59   ;;  %v2585_v1 = vmul.f32 %v9646_v12, %v8624_v63  ;;  %v8635_v18 = vld [vmem:[#allocation3 + $0x30] sm:$0xff] }
 0xb90   : > { %v3013_v48 = vmul.f32 %v9649_v42, %v8635_v18 }
 0xb91   : > { %v8606_v33 = vsel %vm2289_vm1, %v2671_v36, %v3129_v53  ;;  %v2617_v4 = vadd.f32 %v9648_v57, %v2585_v1 }
 0xb92   : > { %v3112_v9 = vpop.permute.xlu1 %3111 }
 0xb93   : > { %v3131_v54 = vadd.f32 %v3112_v9, %v3091_v49  ;;  %3961 = vperm.xlu1 %5964, %v8608_v25   ;;  %v9650_v49 = vld [vmem:[#allocation59_spill] sm:$0xff]  ;;  %v4032_v47 = vsel %vm4027_vm6, %v2617_v4, %v3043_v35 }
 0xb94   : > { %v2587_v9 = vmul.f32 %v9650_v49, %v8635_v18 }
 0xb95   : > { %v8614_v29 = vsel %vm2289_vm1, %v2673_v23, %v3131_v54  ;;  %v3045_v23 = vadd.f32 %v9651_v28, %v3013_v48 }
 0xb96   : > { %v3116_v24 = vpop.permute.xlu1 %3115 }
 0xb97   : > { %v3133_v46 = vadd.f32 %v3116_v24, %v3093_v27  ;;  %3976 = vperm.xlu1 %5964, %v6203_v26   ;;  %v3459_v27 = vmul.f32 %v8474_v5, %v8635_v18 }
 0xb99   : > { %v8618_v41 = vsel %vm2289_vm1, %v9645_v60, %v3133_v46 }
 0xb9b   : > { %3966 = vperm.xlu1 %5964, %v6205_v34  }
 0xbbf   : > { %3911 = vadd.xlane.f32.xlu1 %v3910_v30 }
 0xbc3   : > { %3926 = vadd.xlane.f32.xlu1 %v3925_v10 }
 0xbc7   : > { %3920 = vadd.xlane.f32.xlu1 %v3919_v15  ;;  %v3463_v62 = vpop.xlane.xlu1 %3462  ;;  %v3906_v15 = vmul.f32 %v6203_v26, %v8476_v44 }
 0xbc8   : > { %v3485_v58 = vadd.f32 %v3463_v62, %v3453_v45 }
 0xbca   : > { %v4037_v36 = vsel %vm4036_vm5, %v9647_v51, %v3485_v58  ;;  %v3904_v51 = vmul.f32 %v6205_v34, %v8409_v20 }
 0xbcb   : > { %v8646_v55 = vsel %vm4045_vm7, %v4037_v36, %v8555_v31  ;;  %v3475_v53 = vpop.xlane.xlu1 %3474  ;;  %v9652_v31 = vld [vmem:[#allocation30_spill] sm:$0xff] }
 0xbcc   : > { %4112 = vst.msk [vmem:[#allocation3] sm:$0xff] %vm4103_vm8, %v8646_v55  ;;  %v3489_v6 = vadd.f32 %v3475_v53, %v3457_v52  ;;  %v2619_v24 = vadd.f32 %v9652_v31, %v2587_v9 }
 0xbce   : > { %v8655_v54 = vsel %vm4036_vm5, %v4032_v47, %v3489_v6  ;;  %v4034_v30 = vsel %vm4027_vm6, %v2619_v24, %v3045_v23 }
 0xbcf   : > { %v3481_v46 = vpop.xlane.xlu1 %3480 }
 0xbd0   : > { %v3491_v60 = vadd.f32 %v3481_v46, %v3459_v27 }
 0xbd1   : > { %v5775_v10 = vpop.f32.mrb[48].mxu0 }
 0xbd2   : > { %v8663_v45 = vsel %vm4036_vm5, %v4034_v30, %v3491_v60  ;;  %3999 = vrot.lane.b32.xlu0 %v5775_v10, %s6419_s26  ;;  %v3868_v32 = vpop.f32.mrb[49].mxu0  ;;  %v3930_v62 = vpop.xlane.xlu0 %3929 }
 0xbd3   : > { %v3938_v58 = vadd.f32 %v3930_v62, %v3906_v15  ;;  %v3496_v12 = vpop.permute.xlu1 %3495  ;;  %v5776_v1 = vpop.f32.mrb[50].mxu0 }
 0xbd4   : > { %v3871_v5 = vpop.f32.mrb[51].mxu0  ;;  %v3533_v9 = vmul.f32 %v3496_v12, %v8560_v56 }
 0xbd5   : > { %v8668_v35 = vsel %vm4045_vm7, %v8495_v21, %v3938_v58 }
 0xbd6   : > { %4119 = vst.msk [vmem:[#allocation3 + $0x38] sm:$0xff] %vm4103_vm8, %v8668_v35  ;;  %v3924_v44 = vpop.xlane.xlu0 %3923 }
 0xbd7   : > { %v3936_v26 = vadd.f32 %v3924_v44, %v3904_v51  ;;  %v3506_v36 = vpop.permute.xlu1 %3505 }
 0xbd8   : > { %3995 = vrot.lane.b32.xlu1 %v3868_v32, %s6419_s26 }
 0xbd9   : > { %v8676_v52 = vsel %vm4045_vm7, %v8433_v38, %v3936_v26 }
 0xbda   : > { %4117 = vst.msk [vmem:[#allocation3 + $0x28] sm:$0xff] %vm4103_vm8, %v8676_v52 }
 0xbdb   : > { %v3511_v57 = vpop.permute.xlu1 %3510 }
 0xbdc   : > { %4001 = vrot.lane.b32.xlu1 %v5776_v1, %s6419_s26  ;;  %v3536_v27 = vmul.f32 %v3511_v57, %v8504_v8 }
 0xbdf   : > { %v3516_v21 = vpop.permute.xlu1 %3515 }
 0xbe0   : > { %v3537_v20 = vmul.f32 %v3516_v21, %v8590_v3  ;;  %3997 = vrot.lane.b32.xlu1 %v3871_v5, %s6419_s26 }
 0xbe2   : > { %v3577_v34 = vadd.f32 %v8491_v40, %v3537_v20  ;;  %v8695_v40 = vld [vmem:[#allocation4 + $0x8] sm:$0xff] }
 0xbe3   : > { %v3521_v4 = vpop.permute.xlu1 %3520 }
 0xbe4   : > { %v8686_v42 = vsel %vm2379_vm4, %v8614_v29, %v3577_v34  ;;  %v3534_v29 = vmul.f32 %v8695_v40, %v8471_v17  ;;  %v3538_v46 = vmul.f32 %v3521_v4, %v8525_v2  ;;  %v2274_v4 = vld [vmem:[#allocation3 + $0x8] sm:$0xff] }
 0xbe7   : > { %v3526_v38 = vpop.permute.xlu1 %3525 }
 0xbe8   : > { %v3539_v48 = vmul.f32 %v3526_v38, %v9644_v16 }
 0xbea   : > { %v3579_v53 = vadd.f32 %v8508_v11, %v3539_v48  ;;  %v9653_v48 = vld [vmem:[#allocation36_spill] sm:$0xff] }
 0xbeb   : > { %v3531_v6 = vpop.permute.xlu1 %3530 }
 0xbec   : > { %v8692_v49 = vsel %vm2379_vm4, %v8618_v41, %v3579_v53  ;;  %v3008_v53 = vmul.f32 %v9653_v48, %v2274_v4 }
 0xbef   : > { %v3550_v47 = vpop.permute.xlu1 %3549 }
 0xbf0   : > { %v3573_v28 = vadd.f32 %v3550_v47, %v3533_v9  ;;  %v9654_v9 = vld [vmem:[#allocation47_spill] sm:$0xff] }
 0xbf1   : > { %v3454_v47 = vmul.f32 %v9654_v9, %v2274_v4 }
 0xbf2   : > { %v8701_v23 = vsel %vm2379_vm4, %v8595_v7, %v3573_v28  ;;  %v3540_v7 = vmul.f32 %v3531_v6, %v8553_v0 }
 0xbf3   : > { %v3552_v16 = vpop.permute.xlu1 %3551 }
 0xbf4   : > { %v3574_v11 = vadd.f32 %v3552_v16, %v3534_v29  ;;  %v9657_v16 = vld [vmem:[#allocation25_spill] sm:$0xff] }
 0xbf6   : > { %v8706_v41 = vsel %vm2379_vm4, %v8512_v43, %v3574_v11  ;;  %v3486_v11 = vadd.f32 %v9657_v16, %v3454_v47 }
 0xbf7   : > { %v3556_v31 = vpop.permute.xlu1 %3555 }
 0xbf8   : > { %v3576_v24 = vadd.f32 %v3556_v31, %v3536_v27  ;;  %v9658_v27 = vld [vmem:[#allocation60_spill] sm:$0xff] }
 0xbfa   : > { %v8711_v60 = vsel %vm2379_vm4, %v8530_v39, %v3576_v24  ;;  %v9659_v24 = vld [vmem:[#allocation51_spill] sm:$0xff] }
 0xbfb   : > { %v3560_v17 = vpop.permute.xlu1 %3559 }
 0xbfc   : > { %v3578_v30 = vadd.f32 %v3560_v17, %v3538_v46 }
 0xbfe   : > { %v8716_v10 = vsel %vm2379_vm4, %v8558_v61, %v3578_v30 }
 0xbff   : > { %v3564_v15 = vpop.permute.xlu1 %3563 }
 0xc00   : > { %v3580_v32 = vadd.f32 %v3564_v15, %v3540_v7 }
 0xc02   : > { %v8720_v43 = vsel %vm2379_vm4, %v8588_v14, %v3580_v32  ;;  %v3535_v14 = vmul.f32 %v3506_v36, %v8570_v19  ;;  %v3905_v32 = vmul.f32 %v8597_v59, %v8635_v18 }
 0xc03   : > { %v3952_v1 = vpop.permute.xlu1 %3951 }
 0xc04   : > { %v3575_v26 = vadd.f32 %v8480_v37, %v3535_v14  ;;  %v3981_v21 = vmul.f32 %v3952_v1, %v8570_v19  ;;  %v9655_v37 = vld [vmem:[#allocation29_spill] sm:$0xff] }
 0xc05   : > { %v2582_v28 = vmul.f32 %v9655_v37, %v2274_v4  ;;  %v9656_v19 = vld [vmem:[#allocation49_spill] sm:$0xff] }
 0xc06   : > { %v4064_v38 = vsel %vm2379_vm4, %v8606_v33, %v3575_v26  ;;  %v3040_v29 = vadd.f32 %v9656_v19, %v3008_v53  ;;  %v3900_v33 = vmul.f32 %v9659_v24, %v2274_v4  ;;  %v4334_v19 = vld [vmem:[%s9660_s13 + $0x10] sm:$0xff] (!%p5385_p1)  ;;  %v4339_v24 = vld [vmem:[%s9660_s13 + $0x38] sm:$0xff] (!%p5385_p1) }
 0xc07   : > { %v3942_v61 = vpop.permute.xlu1 %3941  ;;  %v2614_v31 = vadd.f32 %v9658_v27, %v2582_v28 }
 0xc08   : > { %v3979_v26 = vmul.f32 %v3942_v61, %v8560_v56  ;;  %v3980_v56 = vmul.f32 %v8695_v40, %v8522_v50 }
 0xc09   : > { %v4029_v17 = vsel %vm4027_vm6, %v2614_v31, %v3040_v29  ;;  %v4335_v29 = vld [vmem:[%s9660_s13 + $0x18] sm:$0xff] (!%p5385_p1)  ;;  %v4338_v31 = vld [vmem:[%s9660_s13 + $0x30] sm:$0xff] (!%p5385_p1) }
 0xc0a   : > { %v4038_v7 = vsel %vm4036_vm5, %v4029_v17, %v3486_v11  ;;  %v4353_v16 = vpack.c.bf16 (!%p5385_p1), %v4335_v29, %v4334_v19  ;;  %v4337_v11 = vld [vmem:[%s9660_s13 + $0x28] sm:$0xff] (!%p5385_p1)  ;;  %v4340_v17 = vld [vmem:[%s9660_s13 + $0x40] sm:$0xff] (!%p5385_p1) }
 0xc0b   : > { %v3957_v5 = vpop.permute.xlu1 %3956 }
 0xc0f   : > { %v3972_v51 = vpop.permute.xlu1 %3971 }
 0xc13   : > { %v3962_v44 = vpop.permute.xlu1 %3961 }
 0xc17   : > { %v3977_v57 = vpop.permute.xlu1 %3976 }
 0xc18   : > { %v3986_v9 = vmul.f32 %v3977_v57, %v8553_v0  ;;  %v6422_v0 = vmov (!%p5385_p1), 2  }
 0xc19   : > { %6224 = vset.pattern.permute.xlu0 (!%p5385_p1), %v6422_v0 }
 0xc1b   : > { %v3967_v36 = vpop.permute.xlu1 %3966 }
 0xc1c   : > { %v3984_v4 = vmul.f32 %v3967_v36, %v8525_v2  ;;  %v6425_v36 = vmov (!%p5385_p1), 3  }
 0xc1e   : > { %v5779_v62 = vpop.f32.mrb[52].mxu0 }
 0xc1f   : > { %v3884_v58 = vpop.f32.mrb[53].mxu0 }
 0xc20   : > { %4003 = vrot.lane.b32.xlu0 %v3884_v58, %s6419_s26  ;;  %v5780_v39 = vpop.f32.mrb[54].mxu0 }
 0xc21   : > { %v3887_v12 = vpop.f32.mrb[55].mxu0 }
 0xc22   : > { %4005 = vrot.lane.b32.xlu1 %v3887_v12, %s6419_s26  ;;  %v3903_v12 = vmul.f32 %v8608_v25, %v8624_v63 }
 0xc24   : > { %4007 = vrot.lane.b32.xlu0 %v5779_v62, %s6419_s26 }
 0xc26   : > { %4009 = vrot.lane.b32.xlu1 %v5780_v39, %s6419_s26  ;;  %s9662_s26 = sld [smem:[#allocation67_spill]] (!%p5385_p1) }
 0xc2c   : > { %s9663_s14 = smov (!%p5385_p1), %s9662_s26 }
 0xc44   : > { %v4000_v20 = vpop.permute.xlu0 %3999 }
 0xc45   : > { %v4021_v34 = vadd.f32 %v4000_v20, %v3981_v21  ;;  %v3982_v21 = vmul.f32 %v3957_v5, %v8504_v8 }
 0xc47   : > { %v8733_v6 = vsel %vm4070_vm9, %v4064_v38, %v4021_v34  ;;  %v6219_v38 = vld [vmem:[#allocation4 + $0x30] sm:$0xff] }
 0xc48   : > { %4122 = vst [vmem:[#allocation4 + $0x10] sm:$0xff] %v8733_v6 }
 0xc4c   : > { %v3912_v46 = vpop.xlane.xlu1 %3911 }
 0xc4d   : > { %v3932_v30 = vadd.f32 %v3912_v46, %v3900_v33  ;;  %v4355_v33 = vpack.c.bf16 (!%p5385_p1), %v4339_v24, %v4338_v31 }
 0xc4f   : > { %v4047_v15 = vsel %vm4045_vm7, %v4038_v7, %v3932_v30  ;;  %v4341_v30 = vld [vmem:[%s9660_s13 + $0x48] sm:$0xff] (!%p5385_p1) }
 0xc50   : > { %4113 = vst.msk [vmem:[#allocation3 + $0x8] sm:$0xff] %vm4103_vm8, %v4047_v15  ;;  %v3927_v62 = vpop.xlane.xlu1 %3926  ;;  %6237 = vrcp.f32 (!%p5385_p1), %v4047_v15  ;;  %v4356_v7 = vpack.c.bf16 (!%p5385_p1), %v4341_v30, %v4340_v17 }
 0xc51   : > { %v3937_v58 = vadd.f32 %v3927_v62, %v3905_v32  ;;  %6239 = vrcp.f32 (!%p5385_p1), %v8646_v55  ;;  %v4332_v55 = vld [vmem:[%s9660_s13] sm:$0xff] (!%p5385_p1)  ;;  %v4342_v32 = vld [vmem:[%s9660_s13 + $0x50] sm:$0xff] (!%p5385_p1)  ;;  %v4343_v62 = vld [vmem:[%s9660_s13 + $0x58] sm:$0xff] (!%p5385_p1) }
 0xc52   : > { %6241 = vrcp.f32 (!%p5385_p1), %v8576_v13  ;;  %v4333_v13 = vld [vmem:[%s9660_s13 + $0x8] sm:$0xff] (!%p5385_p1) }
 0xc53   : > { %v8750_v39 = vsel %vm4045_vm7, %v8663_v45, %v3937_v58  ;;  %6243 = vrcp.f32 (!%p5385_p1), %v8546_v22  ;;  %v4352_v28 = vpack.c.bf16 (!%p5385_p1), %v4333_v13, %v4332_v55  ;;  %v4336_v22 = vld [vmem:[%s9660_s13 + $0x20] sm:$0xff] (!%p5385_p1)  ;;  %v4357_v58 = vpack.c.bf16 (!%p5385_p1), %v4343_v62, %v4342_v32 }
 0xc54   : > { %4118 = vst.msk [vmem:[#allocation3 + $0x30] sm:$0xff] %vm4103_vm8, %v8750_v39  ;;  %v3921_v1 = vpop.xlane.xlu1 %3920  ;;  %6245 = vrcp.f32 (!%p5385_p1), %v8676_v52  ;;  %v4354_v27 = vpack.c.bf16 (!%p5385_p1), %v4337_v11, %v4336_v22 }
 0xc55   : > { %v3935_v14 = vadd.f32 %v3921_v1, %v3903_v12  ;;  %5781 = vmatprep.subr.bf16.mxu0 (!%p5385_p1), %v4352_v28  ;;  %6247 = vrcp.f32 (!%p5385_p1), %v8750_v39  ;;  %v4344_v39 = vld [vmem:[%s9660_s13 + $0x60] sm:$0xff] (!%p5385_p1)  ;;  %v4345_v12 = vld [vmem:[%s9660_s13 + $0x68] sm:$0xff] (!%p5385_p1) }
 0xc56   : > { %5782 = vmatpush3.bf16.msra.mxu0 (!%p5385_p1), %v4352_v28  ;;  %v4358_v1 = vpack.c.bf16 (!%p5385_p1), %v4345_v12, %v4344_v39 }
 0xc57   : > { %v8759_v59 = vsel %vm4045_vm7, %v8655_v54, %v3935_v14  ;;  %5783 = vmatprep.subr.bf16.mxu0 (!%p5385_p1), %v4353_v16  ;;  %v4346_v14 = vld [vmem:[%s9660_s13 + $0x70] sm:$0xff] (!%p5385_p1) }
 0xc58   : > { %4116 = vst.msk [vmem:[#allocation3 + $0x20] sm:$0xff] %vm4103_vm8, %v8759_v59  ;;  %v3996_v18 = vpop.permute.xlu1 %3995  ;;  %6249 = vrcp.f32 (!%p5385_p1), %v8759_v59 }
 0xc59   : > { %v4019_v45 = vadd.f32 %v3996_v18, %v3979_v26  ;;  %v4347_v26 = vld [vmem:[%s9660_s13 + $0x78] sm:$0xff] (!%p5385_p1)  ;;  %6251 = vrcp.f32 (!%p5385_p1), %v8668_v35 }
 0xc5a   : > { %5784 = vmatpush3.bf16.msra.mxu0 (!%p5385_p1), %v4353_v16  ;;  %v4359_v59 = vpack.c.bf16 (!%p5385_p1), %v4347_v26, %v4346_v14 }
 0xc5b   : > { %v8766_v25 = vsel %vm4070_vm9, %v8701_v23, %v4019_v45  ;;  %v3983_v23 = vmul.f32 %v3962_v44, %v8590_v3  ;;  %5785 = vmatprep.subr.bf16.mxu0 (!%p5385_p1), %v4354_v27 }
 0xc5c   : > { %4120 = vst [vmem:[#allocation4] sm:$0xff] %v8766_v25  ;;  %v4002_v63 = vpop.permute.xlu1 %4001 }
 0xc5d   : > { %v4022_v20 = vadd.f32 %v4002_v63, %v3982_v21 }
 0xc5e   : > { %5786 = vmatpush3.bf16.msra.mxu0 (!%p5385_p1), %v4354_v27 }
 0xc5f   : > { %v8773_v54 = vsel %vm4070_vm9, %v8711_v60, %v4022_v20  ;;  %v3985_v60 = vmul.f32 %v6219_v38, %v3972_v51  ;;  %5787 = vmatprep.subr.bf16.mxu0 (!%p5385_p1), %v4355_v33 }
 0xc60   : > { %4123 = vst [vmem:[#allocation4 + $0x18] sm:$0xff] %v8773_v54  ;;  %v3998_v61 = vpop.permute.xlu1 %3997 }
 0xc61   : > { %v4020_v34 = vadd.f32 %v3998_v61, %v3980_v56 }
 0xc62   : > { %5788 = vmatpush3.bf16.msra.mxu0 (!%p5385_p1), %v4355_v33 }
 0xc63   : > { %v8778_v8 = vsel %vm4070_vm9, %v8706_v41, %v4020_v34  ;;  %5789 = vmatprep.subr.bf16.mxu0 (!%p5385_p1), %v4356_v7 }
 0xc64   : > { %4121 = vst [vmem:[#allocation4 + $0x8] sm:$0xff] %v8778_v8 }
 0xc66   : > { %5790 = vmatpush3.bf16.msra.mxu0 (!%p5385_p1), %v4356_v7 }
 0xc67   : > { %5791 = vmatprep.subr.bf16.mxu0 (!%p5385_p1), %v4357_v58 }
 0xc6a   : > { %5792 = vmatpush3.bf16.msra.mxu0 (!%p5385_p1), %v4357_v58 }
 0xc6b   : > { %5793 = vmatprep.subr.bf16.mxu0 (!%p5385_p1), %v4358_v1 }
 0xc6e   : > { %5794 = vmatpush3.bf16.msra.mxu0 (!%p5385_p1), %v4358_v1 }
 0xc6f   : > { %5795 = vmatprep.subr.bf16.mxu0 (!%p5385_p1), %v4359_v59 }
 0xc72   : > { %5796 = vmatpush3.bf16.msra.mxu0 (!%p5385_p1), %v4359_v59 }
 0xc92   : > { %v4004_v5 = vpop.permute.xlu0 %4003 }
 0xc93   : > { %v4023_v50 = vadd.f32 %v4004_v5, %v3983_v23 }
 0xc94   : > { %v4006_v40 = vpop.permute.xlu1 %4005 }
 0xc95   : > { %v8785_v48 = vsel %vm4070_vm9, %v8686_v42, %v4023_v50  ;;  %v4024_v53 = vadd.f32 %v4006_v40, %v3984_v4 }
 0xc96   : > { %4124 = vst [vmem:[#allocation4 + $0x20] sm:$0xff] %v8785_v48  ;;  %v4008_v41 = vpop.permute.xlu0 %4007  ;;  %4131 = sbr.rel (%p5385_p1) target bundleno = 4762 (0x129a), region = 92 }
 0xc97   : > { %v8791_v3 = vsel %vm4070_vm9, %v8716_v10, %v4024_v53  ;;  %v4025_v44 = vadd.f32 %v4008_v41, %v3985_v60  ;;  %v6423_v10 = vmov (!%p5385_p1), 1  }
 0xc98   : > { %4125 = vst [vmem:[#allocation4 + $0x28] sm:$0xff] %v8791_v3  ;;  %v4010_v2 = vpop.permute.xlu1 %4009  ;;  %6220 = vset.pattern.permute.xlu1 (!%p5385_p1), %v6423_v10 }
 0xc99   : > { %v8796_v51 = vsel %vm4070_vm9, %v8692_v49, %v4025_v44  ;;  %v4026_v42 = vadd.f32 %v4010_v2, %v3986_v9  ;;  %v6424_v49 = vmov (!%p5385_p1), 0  }
 0xc9a   : > { %4126 = vst [vmem:[#allocation4 + $0x30] sm:$0xff] %v8796_v51  ;;  %4656 = vmatprep.mubr.bf16.mxu1 (!%p5385_p1), %v6424_v49 }
 0xc9b   : > { %v8801_v47 = vsel %vm4070_vm9, %v8720_v43, %v4026_v42  ;;  %v8810_v43 = vpop.eup (!%p5385_p1), %6237 }
 0xc9c   : > { %4127 = vst [vmem:[#allocation4 + $0x38] sm:$0xff] %v8801_v47  ;;  %v6240_v57 = vpop.eup (!%p5385_p1), %6239  ;;  %4233 = vperm.xlu0 (!%p5385_p1), %6224, %v8810_v43  }
 0xc9d   : > { %4189 = vperm.xlu1 %6220, %v6240_v57   ;;  %v6242_v37 = vpop.eup %6241 }
 0xc9e   : > { %v6244_v52 = vpop.eup %6243 }
 0xc9f   : > { %v6246_v46 = vpop.eup %6245 }
 0xca0   : > { %6225 = vset.pattern.permute.xlu0 %v6425_v36  ;;  %v6248_v15 = vpop.eup %6247 }
 0xca1   : > { %4193 = vperm.xlu1 %6220, %v8810_v43   ;;  %4269 = vperm.xlu0 %6225, %v6240_v57   ;;  %v6250_v18 = vpop.eup %6249 }
 0xca2   : > { %v6252_v45 = vpop.eup %6251 }
 0xca5   : > { %6221 = vset.pattern.permute.xlu1 %v6424_v49  ;;  %4281 = vperm.xlu0 %6225, %v6242_v37  }
 0xca6   : > { %4157 = vperm.xlu1 %6221, %v6242_v37  }
 0xca9   : > { %6227 = vset.pattern.permute.xlu0 %v6424_v49 }
 0xcaa   : > { %6222 = vset.pattern.permute.xlu1 %v6423_v10  ;;  %4142 = vperm.xlu0 %6227, %v6240_v57  }
 0xcab   : > { %4201 = vperm.xlu1 %6222, %v6242_v37  }
 0xcae   : > { %4147 = vperm.xlu0 %6227, %v8810_v43  }
 0xcaf   : > { %6223 = vset.pattern.permute.xlu1 %v6422_v0 }
 0xcb0   : > { %4229 = vperm.xlu1 %6223, %v6240_v57  }
 0xcb2   : > { %4152 = vperm.xlu0 %6227, %v6244_v52  }
 0xcb4   : > { %4237 = vperm.xlu1 %6223, %v6244_v52  }
 0xcb6   : > { %4167 = vperm.xlu0 %6227, %v6246_v46  }
 0xcb8   : > { %4241 = vperm.xlu1 %6223, %v6242_v37  }
 0xcba   : > { %4172 = vperm.xlu0 %6227, %v6248_v15  }
 0xcbc   : > { %6226 = vset.pattern.permute.xlu1 %v6425_v36 }
 0xcbd   : > { %4273 = vperm.xlu1 %6226, %v8810_v43  }
 0xcbe   : > { %6230 = vset.pattern.permute.xlu0 %v6423_v10 }
 0xcbf   : > { %4197 = vperm.xlu0 %6230, %v6244_v52  }
 0xcc1   : > { %4277 = vperm.xlu1 %6226, %v6244_v52  }
 0xcc3   : > { %4213 = vperm.xlu0 %6230, %v6248_v15  }
 0xcc5   : > { %6228 = vset.pattern.permute.xlu1 %v6424_v49 }
 0xcc6   : > { %4162 = vperm.xlu1 %6228, %v6250_v18  }
 0xcc7   : > { %6234 = vset.pattern.permute.xlu0 %v6422_v0 }
 0xcc8   : > { %4249 = vperm.xlu0 %6234, %v6246_v46  }
 0xcca   : > { %6229 = vset.pattern.permute.xlu1 %v6423_v10 }
 0xccb   : > { %4205 = vperm.xlu1 %6229, %v6250_v18  }
 0xccc   : > { %6235 = vset.pattern.permute.xlu0 %v6425_v36 }
 0xccd   : > { %4285 = vperm.xlu0 %6235, %v6250_v18  }
 0xccf   : > { %4209 = vperm.xlu1 %6229, %v6246_v46  }
 0xcd1   : > { %4297 = vperm.xlu0 %6235, %v6252_v45  }
 0xcd3   : > { %6231 = vset.pattern.permute.xlu1 %v6424_v49 }
 0xcd4   : > { %4177 = vperm.xlu1 %6231, %v6252_v45  }
 0xcd8   : > { %6232 = vset.pattern.permute.xlu1 %v6423_v10 }
 0xcd9   : > { %4217 = vperm.xlu1 %6232, %v6252_v45  }
 0xcdd   : > { %6233 = vset.pattern.permute.xlu1 %v6422_v0 }
 0xcde   : > { %4245 = vperm.xlu1 %6233, %v6250_v18  }
 0xce2   : > { %4253 = vperm.xlu1 %6233, %v6248_v15  }
 0xce6   : > { %4257 = vperm.xlu1 %6233, %v6252_v45  }
 0xcea   : > { %6236 = vset.pattern.permute.xlu1 %v6425_v36 }
 0xceb   : > { %4289 = vperm.xlu1 %6236, %v6246_v46  }
 0xcef   : > { %4293 = vperm.xlu1 %6236, %v6248_v15  }
 0xd1b   : > { %v4234_v35 = vpop.permute.xlu0 %4233 }
 0xd1c   : > { %v4190_v21 = vpop.permute.xlu1 %4189  ;;  %v4261_v0 = vmul.f32 %v4234_v35, %v8778_v8 }
 0xd1d   : > { %v4220_v44 = vmul.f32 %v4190_v21, %v8766_v25 }
 0xd20   : > { %v4194_v63 = vpop.permute.xlu1 %4193  ;;  %v4270_v20 = vpop.permute.xlu0 %4269 }
 0xd21   : > { %v4221_v2 = vmul.f32 %v4194_v63, %v8778_v8  ;;  %v4300_v10 = vmul.f32 %v4270_v20, %v8766_v25 }
 0xd24   : > { %v4282_v56 = vpop.permute.xlu0 %4281 }
 0xd25   : > { %v4158_v61 = vpop.permute.xlu1 %4157  ;;  %v4303_v16 = vmul.f32 %v4282_v56, %v8773_v54 }
 0xd26   : > { %v4183_v28 = vmul.f32 %v4158_v61, %v8773_v54 }
 0xd29   : > { %v4143_v34 = vpop.permute.xlu0 %4142 }
 0xd2a   : > { %v4202_v23 = vpop.permute.xlu1 %4201  ;;  %v4180_v60 = vmul.f32 %v4143_v34, %v8766_v25 }
 0xd2b   : > { %v4223_v57 = vmul.f32 %v4202_v23, %v8773_v54 }
 0xd2c   : > { %v4308_v43 = vsel %vm2289_vm1, %v4180_v60, %v4220_v44 }
 0xd2d   : > { %v4148_v5 = vpop.permute.xlu0 %4147  ;;  %v4311_v11 = vsel %vm2289_vm1, %v4183_v28, %v4223_v57 }
 0xd2e   : > { %v4181_v53 = vmul.f32 %v4148_v5, %v8778_v8 }
 0xd2f   : > { %v4230_v4 = vpop.permute.xlu1 %4229 }
 0xd30   : > { %v4260_v9 = vmul.f32 %v4230_v4, %v8766_v25  ;;  %v4309_v36 = vsel %vm2289_vm1, %v4181_v53, %v4221_v2 }
 0xd31   : > { %v4153_v50 = vpop.permute.xlu0 %4152  ;;  %v4317_v22 = vsel %vm2379_vm4, %v4309_v36, %v4261_v0 }
 0xd32   : > { %v4316_v13 = vsel %vm2379_vm4, %v4308_v43, %v4260_v9  ;;  %v4182_v19 = vmul.f32 %v4153_v50, %v8733_v6 }
 0xd33   : > { %v4238_v40 = vpop.permute.xlu1 %4237  ;;  %v4324_v52 = vsel %vm4070_vm9, %v4316_v13, %v4300_v10 }
 0xd34   : > { %v4262_v24 = vmul.f32 %v4238_v40, %v8733_v6 }
 0xd35   : > { %v4168_v38 = vpop.permute.xlu0 %4167 }
 0xd36   : > { %v4185_v20 = vmul.f32 %v4168_v38, %v8791_v3 }
 0xd37   : > { %v4242_v41 = vpop.permute.xlu1 %4241 }
 0xd38   : > { %v4263_v37 = vmul.f32 %v4242_v41, %v8773_v54 }
 0xd39   : > { %v4173_v42 = vpop.permute.xlu0 %4172 }
 0xd3a   : > { %v4319_v33 = vsel %vm2379_vm4, %v4311_v11, %v4263_v37  ;;  %v4186_v38 = vmul.f32 %v4173_v42, %v8796_v51 }
 0xd3b   : > { %v4327_v7 = vsel %vm4070_vm9, %v4319_v33, %v4303_v16 }
 0xd3c   : > { %v4274_v55 = vpop.permute.xlu1 %4273 }
 0xd3d   : > { %v4301_v29 = vmul.f32 %v4274_v55, %v8778_v8 }
 0xd3e   : > { %v4198_v25 = vpop.permute.xlu0 %4197 }
 0xd3f   : > { %v4222_v27 = vmul.f32 %v4198_v25, %v8733_v6  ;;  %v4325_v31 = vsel %vm4070_vm9, %v4317_v22, %v4301_v29  ;;  %v5386_v29 = vld [vmem:[%s9661_s19] ss:$0 sm:$0xff] }
 0xd40   : > { %v4278_v46 = vpop.permute.xlu1 %4277  ;;  %v4348_v17 = vpack.c.bf16 %v4325_v31, %v4324_v52  ;;  %v4430_v22 = vld [vmem:[%s6609_s27] sm:$0xff]  ;;  %v4431_v52 = vld [vmem:[%s6609_s27 + $0x8] sm:$0xff] }
 0xd41   : > { %v4310_v8 = vsel %vm2289_vm1, %v4182_v19, %v4222_v27  ;;  %v4302_v54 = vmul.f32 %v4278_v46, %v8733_v6  ;;  %v4433_v46 = vld [vmem:[%s6609_s27 + $0x18] sm:$0xff] }
 0xd42   : > { %v4318_v30 = vsel %vm2379_vm4, %v4310_v8, %v4262_v24  ;;  %5797 = vmatprep.mubr.bf16.mxu0 %v4348_v17  ;;  %v4214_v26 = vpop.permute.xlu0 %4213 }
 0xd43   : > { %v4326_v15 = vsel %vm4070_vm9, %v4318_v30, %v4302_v54  ;;  %v4226_v41 = vmul.f32 %v4214_v26, %v8796_v51  ;;  %v4432_v54 = vld [vmem:[%s6609_s27 + $0x10] sm:$0xff] }
 0xd44   : > { %v4349_v32 = vpack.c.bf16 %v4327_v7, %v4326_v15 }
 0xd45   : > { %v4163_v62 = vpop.permute.xlu1 %4162 }
 0xd46   : > { %5798 = vmatmul.mubr.bf16.vlgmr.msra.gmra.mrb[0].mxu0 %v4349_v32  ;;  %v4184_v56 = vmul.f32 %v4163_v62, %v8785_v48  ;;  %v4434_v62 = vld [vmem:[%s6609_s27 + $0x20] sm:$0xff] }
 0xd47   : > { %v4250_v18 = vpop.permute.xlu0 %4249 }
 0xd48   : > { %v4265_v61 = vmul.f32 %v4250_v18, %v8791_v3  ;;  %v4436_v18 = vld [vmem:[%s6609_s27 + $0x30] sm:$0xff] }
 0xd4a   : > { %v4206_v58 = vpop.permute.xlu1 %4205 }
 0xd4b   : > { %v4224_v6 = vmul.f32 %v4206_v58, %v8785_v48 }
 0xd4c   : > { %v4286_v63 = vpop.permute.xlu0 %4285 }
 0xd4d   : > { %v4312_v34 = vsel %vm2289_vm1, %v4184_v56, %v4224_v6  ;;  %v4304_v4 = vmul.f32 %v4286_v63, %v8785_v48  ;;  %v4563_v56 = vld [vmem:[%s9663_s14 + $0x18] sm:$0xff] }
 0xd4e   : > { %v4210_v39 = vpop.permute.xlu1 %4209 }
 0xd4f   : > { %v4225_v45 = vmul.f32 %v4210_v39, %v8791_v3 }
 0xd50   : > { %v4298_v60 = vpop.permute.xlu0 %4297 }
 0xd51   : > { %v4313_v23 = vsel %vm2289_vm1, %v4185_v20, %v4225_v45  ;;  %v4307_v43 = vmul.f32 %v4298_v60, %v8801_v47  ;;  %v4561_v20 = vld [vmem:[%s9662_s26 + $0x8] sm:$0xff]  ;;  %v4564_v60 = vld [vmem:[%s9663_s14 + $0x20] sm:$0xff] }
 0xd52   : > { %v4321_v2 = vsel %vm2379_vm4, %v4313_v23, %v4265_v61  ;;  %v4560_v61 = vld [vmem:[%s9663_s14] sm:$0xff]  ;;  %v4562_v23 = vld [vmem:[%s9663_s14 + $0x10] sm:$0xff] }
 0xd53   : > { %v4178_v12 = vpop.permute.xlu1 %4177 }
 0xd54   : > { %v4187_v9 = vmul.f32 %v4178_v12, %v8801_v47 }
 0xd58   : > { %v4218_v1 = vpop.permute.xlu1 %4217 }
 0xd59   : > { %v4227_v5 = vmul.f32 %v4218_v1, %v8801_v47  ;;  %v4435_v1 = vld [vmem:[%s6609_s27 + $0x28] sm:$0xff] }
 0xd5d   : > { %v4246_v14 = vpop.permute.xlu1 %4245 }
 0xd5e   : > { %v4264_v21 = vmul.f32 %v4246_v14, %v8785_v48  ;;  %v4315_v48 = vsel %vm2289_vm1, %v4187_v9, %v4227_v5  ;;  %v4565_v5 = vld [vmem:[%s9663_s14 + $0x28] sm:$0xff] }
 0xd60   : > { %v4320_v50 = vsel %vm2379_vm4, %v4312_v34, %v4264_v21  ;;  %v4597_v34 = vpack.c.bf16 %v4563_v56, %v4561_v20 }
 0xd61   : > { %v4254_v59 = vpop.permute.xlu1 %4253  ;;  %v4328_v10 = vsel %vm4070_vm9, %v4320_v50, %v4304_v4  ;;  %v4567_v4 = vld [vmem:[%s9663_s14 + $0x38] sm:$0xff]  ;;  %v4596_v50 = vpack.c.bf16 %v4562_v23, %v4560_v61  ;;  %v4588_v61 = vld [vmem:[%s9663_s14 + $0xe0] sm:$0xff] }
 0xd62   : > { %v4266_v0 = vmul.f32 %v4254_v59, %v8796_v51  ;;  %4624 = vmatprep.subr.bf16.mxu1 %v4597_v34  ;;  %v4590_v34 = vld [vmem:[%s9663_s14 + $0xf0] sm:$0xff] }
 0xd63   : > { %4625 = vmatpush1.bf16.msra.mxu1 %v4596_v50  ;;  %v4610_v23 = vpack.c.bf16 %v4590_v34, %v4588_v61 }
 0xd65   : > { %v4258_v35 = vpop.permute.xlu1 %4257 }
 0xd66   : > { %v4267_v40 = vmul.f32 %v4258_v35, %v8801_v47  ;;  %v4437_v35 = vld [vmem:[%s6609_s27 + $0x38] sm:$0xff] }
 0xd68   : > { %v4323_v42 = vsel %vm2379_vm4, %v4315_v48, %v4267_v40  ;;  %v4599_v40 = vpack.c.bf16 %v4567_v4, %v4565_v5 }
 0xd69   : > { %v4331_v28 = vsel %vm4070_vm9, %v4323_v42, %v4307_v43 }
 0xd6a   : > { %v4290_v53 = vpop.permute.xlu1 %4289  ;;  %4626 = vmatprep.subr.bf16.mxu1 %v4599_v40 }
 0xd6b   : > { %v4305_v44 = vmul.f32 %v4290_v53, %v8791_v3  ;;  %v4314_v3 = vsel %vm2289_vm1, %v4186_v38, %v4226_v41  ;;  %v4566_v53 = vld [vmem:[%s9663_s14 + $0x30] sm:$0xff] }
 0xd6c   : > { %v4322_v13 = vsel %vm2379_vm4, %v4314_v3, %v4266_v0  ;;  %v4598_v38 = vpack.c.bf16 %v4566_v53, %v4564_v60 }
 0xd6d   : > { %v4329_v57 = vsel %vm4070_vm9, %v4321_v2, %v4305_v44 }
 0xd6e   : > { %v4350_v36 = vpack.c.bf16 %v4329_v57, %v4328_v10  ;;  %v4294_v37 = vpop.permute.xlu1 %4293  ;;  %4627 = vmatpush1.bf16.msra.mxu1 %v4598_v38 }
 0xd6f   : > { %v4306_v55 = vmul.f32 %v4294_v37, %v8796_v51 }
 0xd70   : > { %5801 = vmatprep.mubr.bf16.mxu0 %v4350_v36 }
 0xd71   : > { %v4330_v47 = vsel %vm4070_vm9, %v4322_v13, %v4306_v55 }
 0xd72   : > { %v4351_v19 = vpack.c.bf16 %v4331_v28, %v4330_v47  ;;  %v4569_v47 = vld [vmem:[%s9663_s14 + $0x48] sm:$0xff] }
 0xd74   : > { %5802 = vmatmul.mubr.bf16.gmra.mrb[4].mxu0 %v4351_v19  ;;  %v4571_v19 = vld [vmem:[%s9663_s14 + $0x58] sm:$0xff] }
 0xe19   : > { %v5799_v16 = vpop.f32.mrb[0].mxu0 }
 0xe1a   : > { %v4399_v25 = vpop.f32.mrb[1].mxu0  ;;  %v4408_v17 = vadd.f32 %v5799_v16, %v5386_v29  ;;  %v4568_v16 = vld [vmem:[%s9663_s14 + $0x40] sm:$0xff] }
 0xe1b   : > { %v4400_v11 = vadd.f32 %v5386_v29, %v4399_v25  ;;  %v5800_v51 = vpop.f32.mrb[2].mxu0  ;;  %v4570_v25 = vld [vmem:[%s9663_s14 + $0x50] sm:$0xff] }
 0xe1c   : > { %v4402_v27 = vpop.f32.mrb[3].mxu0  ;;  %v4411_v31 = vadd.f32 %v5800_v51, %v5386_v29  ;;  %v4440_v7 = vadd.f32 %v4432_v54, %v4408_v17  ;;  %v4575_v51 = vld [vmem:[%s9663_s14 + $0x78] sm:$0xff]  ;;  %v4578_v54 = vld [vmem:[%s9663_s14 + $0x90] sm:$0xff] }
 0xe1d   : > { %v4403_v24 = vadd.f32 %v5386_v29, %v4402_v27  ;;  %v4438_v33 = vadd.f32 %v4430_v22, %v4400_v11  ;;  %v4600_v22 = vpack.c.bf16 %v4570_v25, %v4568_v16  ;;  %v4573_v11 = vld [vmem:[%s9663_s14 + $0x68] sm:$0xff] }
 0xe1e   : > { %v4441_v30 = vadd.f32 %v4433_v46, %v4411_v31  ;;  %v4603_v27 = vpack.c.bf16 %v4575_v51, %v4573_v11  ;;  %v4574_v31 = vld [vmem:[%s9663_s14 + $0x70] sm:$0xff]  ;;  %v4579_v46 = vld [vmem:[%s9663_s14 + $0x98] sm:$0xff]  ;;  %v5387_v11 = vld [vmem:[%s9661_s19 + $0x1] ss:$0 sm:$0xff] }
 0xe1f   : > { %4448 = vadd.xlane.f32.xlu1 %v4438_v33  ;;  %v4439_v8 = vadd.f32 %v4431_v52, %v4403_v24  ;;  %v4572_v52 = vld [vmem:[%s9663_s14 + $0x60] sm:$0xff] }
 0xe20   : > { %v4602_v24 = vpack.c.bf16 %v4574_v31, %v4572_v52 }
 0xe21   : > { %4450 = vadd.xlane.f32.xlu0 %v4439_v8 }
 0xe23   : > { %4454 = vadd.xlane.f32.xlu1 %v4441_v30 }
 0xe25   : > { %4452 = vadd.xlane.f32.xlu0 %v4440_v7 }
 0xe47   : > { %v5803_v15 = vpop.f32.mrb[4].mxu0 }
 0xe48   : > { %v4415_v32 = vpop.f32.mrb[5].mxu0  ;;  %v4424_v14 = vadd.f32 %v5803_v15, %v5386_v29  ;;  %v4583_v15 = vld [vmem:[%s9663_s14 + $0xb8] sm:$0xff] }
 0xe49   : > { %v4416_v58 = vadd.f32 %v5386_v29, %v4415_v32  ;;  %v5804_v39 = vpop.f32.mrb[6].mxu0  ;;  %v4580_v32 = vld [vmem:[%s9663_s14 + $0xa0] sm:$0xff] }
 0xe4a   : > { %v4418_v12 = vpop.f32.mrb[7].mxu0  ;;  %v4427_v6 = vadd.f32 %v5804_v39, %v5386_v29  ;;  %v8957_v21 = vadd.f32 %v4436_v18, %v4424_v14  ;;  %v4585_v39 = vld [vmem:[%s9663_s14 + $0xc8] sm:$0xff]  ;;  %v4586_v18 = vld [vmem:[%s9663_s14 + $0xd0] sm:$0xff] }
 0xe4b   : > { %v4419_v26 = vadd.f32 %v5386_v29, %v4418_v12  ;;  %v8949_v59 = vadd.f32 %v4434_v62, %v4416_v58  ;;  %v4601_v29 = vpack.c.bf16 %v4571_v19, %v4569_v47  ;;  %v4582_v58 = vld [vmem:[%s9663_s14 + $0xb0] sm:$0xff]  ;;  %v4587_v12 = vld [vmem:[%s9663_s14 + $0xd8] sm:$0xff] }
 0xe4c   : > { %v8960_v63 = vadd.f32 %v4437_v35, %v4427_v6  ;;  %v4609_v14 = vpack.c.bf16 %v4587_v12, %v4585_v39  ;;  %v4589_v6 = vld [vmem:[%s9663_s14 + $0xe8] sm:$0xff]  ;;  %v4591_v35 = vld [vmem:[%s9663_s14 + $0xf8] sm:$0xff] }
 0xe4d   : > { %4456 = vadd.xlane.f32.xlu0 %v8949_v59  ;;  %v8953_v45 = vadd.f32 %v4435_v1, %v4419_v26  ;;  %4628 = vmatprep.subr.bf16.mxu1 %v4601_v29  ;;  %v4606_v1 = vpack.c.bf16 %v4582_v58, %v4580_v32  ;;  %v4584_v26 = vld [vmem:[%s9663_s14 + $0xc0] sm:$0xff]  ;;  %v4611_v56 = vpack.c.bf16 %v4591_v35, %v4589_v6 }
 0xe4e   : > { %4629 = vmatpush1.bf16.msra.mxu1 %v4600_v22  ;;  %v4608_v20 = vpack.c.bf16 %v4586_v18, %v4584_v26 }
 0xe4f   : > { %4458 = vadd.xlane.f32.xlu1 %v8953_v45  ;;  %4630 = vmatprep.subr.bf16.mxu1 %v4603_v27 }
 0xe51   : > { %4460 = vadd.xlane.f32.xlu0 %v8957_v21 }
 0xe52   : > { %4631 = vmatpush1.bf16.msra.mxu1 %v4602_v24  ;;  %v5388_v24 = vld [vmem:[%s9661_s19 + $0x2] ss:$0 sm:$0xff] }
 0xe53   : > { %4462 = vadd.xlane.f32.xlu1 %v8960_v63 }
 0xeac   : > { %v4449_v41 = vpop.xlane.xlu1 %4448 }
 0xead   : > { %v4464_v9 = vmul.f32 0.0078125, %v4449_v41 }
 0xeae   : > { %v4451_v44 = vpop.xlane.xlu0 %4450 }
 0xeaf   : > { %v8987_v2 = vsub.f32 %v4438_v33, %v4464_v9  ;;  %v4465_v0 = vmul.f32 0.0078125, %v4451_v44  ;;  %v4577_v33 = vld [vmem:[%s9663_s14 + $0x88] sm:$0xff] }
 0xeb0   : > { %v4455_v48 = vpop.xlane.xlu1 %4454  ;;  %v4605_v17 = vpack.c.bf16 %v4579_v46, %v4577_v33 }
 0xeb1   : > { %v8989_v10 = vsub.f32 %v4439_v8, %v4465_v0  ;;  %v4467_v43 = vmul.f32 0.0078125, %v4455_v48  ;;  %v4480_v57 = vmul.f32 %v8987_v2, %v8987_v2  ;;  %v4576_v8 = vld [vmem:[%s9663_s14 + $0x80] sm:$0xff] }
 0xeb2   : > { %v4453_v42 = vpop.xlane.xlu0 %4452  ;;  %4632 = vmatprep.subr.bf16.mxu1 %v4605_v17 }
 0xeb3   : > { %v8993_v36 = vsub.f32 %v4441_v30, %v4467_v43  ;;  %v4466_v37 = vmul.f32 0.0078125, %v4453_v42  ;;  %4488 = vadd.xlane.f32.xlu0 %v4480_v57  ;;  %v4481_v3 = vmul.f32 %v8989_v10, %v8989_v10  ;;  %v4604_v30 = vpack.c.bf16 %v4578_v54, %v4576_v8 }
 0xeb5   : > { %v8997_v55 = vsub.f32 %v4440_v7, %v4466_v37  ;;  %4490 = vadd.xlane.f32.xlu1 %v4481_v3  ;;  %v4483_v28 = vmul.f32 %v8993_v36, %v8993_v36  ;;  %4633 = vmatpush1.bf16.msra.mxu1 %v4604_v30  ;;  %v4581_v7 = vld [vmem:[%s9663_s14 + $0xa8] sm:$0xff] }
 0xeb6   : > { %v4607_v62 = vpack.c.bf16 %v4583_v15, %v4581_v7 }
 0xeb7   : > { %v4482_v13 = vmul.f32 %v8997_v55, %v8997_v55 }
 0xeb8   : > { %4634 = vmatprep.subr.bf16.mxu1 %v4607_v62 }
 0xeb9   : > { %4492 = vadd.xlane.f32.xlu0 %v4482_v13  ;;  %4494 = vadd.xlane.f32.xlu1 %v4483_v28 }
 0xeba   : > { %4635 = vmatpush1.bf16.msra.mxu1 %v4606_v1 }
 0xebb   : > { %4636 = vmatprep.subr.bf16.mxu1 %v4609_v14 }
 0xebe   : > { %4637 = vmatpush1.bf16.msra.mxu1 %v4608_v20 }
 0xebf   : > { %4638 = vmatprep.subr.bf16.mxu1 %v4611_v56 }
 0xec2   : > { %4639 = vmatpush1.bf16.msra.mxu1 %v4610_v23 }
 0xeda   : > { %v4457_v5 = vpop.xlane.xlu0 %4456 }
 0xedb   : > { %v4468_v4 = vmul.f32 0.0078125, %v4457_v5 }
 0xedc   : > { %v4459_v50 = vpop.xlane.xlu1 %4458 }
 0xedd   : > { %v9076_v40 = vsub.f32 %v8949_v59, %v4468_v4  ;;  %v4469_v60 = vmul.f32 0.0078125, %v4459_v50 }
 0xede   : > { %v4461_v53 = vpop.xlane.xlu0 %4460 }
 0xedf   : > { %v9079_v38 = vsub.f32 %v8953_v45, %v4469_v60  ;;  %v4470_v41 = vmul.f32 0.0078125, %v4461_v53  ;;  %v4484_v9 = vmul.f32 %v9076_v40, %v9076_v40 }
 0xee0   : > { %v4463_v44 = vpop.xlane.xlu1 %4462 }
 0xee1   : > { %v9084_v0 = vsub.f32 %v8957_v21, %v4470_v41  ;;  %v4471_v48 = vmul.f32 0.0078125, %v4463_v44  ;;  %4496 = vadd.xlane.f32.xlu0 %v4484_v9  ;;  %v4485_v43 = vmul.f32 %v9079_v38, %v9079_v38 }
 0xee3   : > { %v9089_v59 = vsub.f32 %v8960_v63, %v4471_v48  ;;  %4498 = vadd.xlane.f32.xlu1 %v4485_v43  ;;  %v4486_v45 = vmul.f32 %v9084_v0, %v9084_v0 }
 0xee5   : > { %4500 = vadd.xlane.f32.xlu0 %v4486_v45  ;;  %v4487_v57 = vmul.f32 %v9089_v59, %v9089_v59 }
 0xee7   : > { %4502 = vadd.xlane.f32.xlu1 %v4487_v57 }
 0xf40   : > { %v4489_v42 = vpop.xlane.xlu0 %4488 }
 0xf41   : > { %v4504_v21 = vmul.f32 0.0078125, %v4489_v42 }
 0xf42   : > { %v4491_v37 = vpop.xlane.xlu1 %4490 }
 0xf43   : > { %v4512_v3 = vadd.f32 1e-05, %v4504_v21  ;;  %v4505_v13 = vmul.f32 0.0078125, %v4491_v37  ;;  %v4842_v37 = vld [vmem:[%s9664_s15 + $0x8] sm:$0xff] }
 0xf45   : > { %6253 = vrsqrt.f32 %v4512_v3  ;;  %v4513_v28 = vadd.f32 1e-05, %v4505_v13  ;;  %v4859_v13 = vld [vmem:[%s9664_s15 + $0x90] sm:$0xff] }
 0xf46   : > { %v4493_v47 = vpop.xlane.xlu0 %4492  ;;  %v4495_v19 = vpop.xlane.xlu1 %4494 }
 0xf47   : > { %6255 = vrsqrt.f32 %v4513_v28  ;;  %v4506_v63 = vmul.f32 0.0078125, %v4493_v47  ;;  %v4507_v29 = vmul.f32 0.0078125, %v4495_v19  ;;  %v4860_v28 = vld [vmem:[%s9664_s15 + $0x98] sm:$0xff]  ;;  %v4843_v19 = vld [vmem:[%s9664_s15 + $0x10] sm:$0xff] }
 0xf48   : > { %v4890_v47 = vpack.c.bf16 %v4860_v28, %v4859_v13 }
 0xf49   : > { %v4514_v16 = vadd.f32 1e-05, %v4506_v63  ;;  %v4515_v25 = vadd.f32 1e-05, %v4507_v29  ;;  %v4844_v63 = vld [vmem:[%s9664_s15 + $0x18] sm:$0xff] }
 0xf4a   : > { %v4882_v29 = vpack.c.bf16 %v4844_v63, %v4843_v19 }
 0xf4b   : > { %6257 = vrsqrt.f32 %v4514_v16  ;;  %v4861_v16 = vld [vmem:[%s9664_s15 + $0xa0] sm:$0xff] }
 0xf4c   : > { %6259 = vrsqrt.f32 %v4515_v25  ;;  %v4862_v25 = vld [vmem:[%s9664_s15 + $0xa8] sm:$0xff] }
 0xf4f   : > { %v6254_v22 = vpop.eup %6253 }
 0xf50   : > { %v4528_v51 = vmul.f32 %v6254_v22, %v8987_v2  ;;  %v4891_v22 = vpack.c.bf16 %v4862_v25, %v4861_v16 }
 0xf51   : > { %v6256_v27 = vpop.eup %6255 }
 0xf52   : > { %v4529_v52 = vmul.f32 %v6256_v27, %v8989_v10  ;;  %v4540_v31 = vmul.f32 %v5387_v11, %v4528_v51  ;;  %v4846_v51 = vld [vmem:[%s9664_s15 + $0x28] sm:$0xff] }
 0xf54   : > { %v4541_v33 = vmul.f32 %v5387_v11, %v4529_v52  ;;  %v9103_v8 = vadd.f32 %v5388_v24, %v4540_v31  ;;  %v4863_v52 = vld [vmem:[%s9664_s15 + $0xb0] sm:$0xff]  ;;  %v4864_v31 = vld [vmem:[%s9664_s15 + $0xb8] sm:$0xff] }
 0xf55   : > { %v6258_v46 = vpop.eup %6257 }
 0xf56   : > { %v6260_v17 = vpop.eup %6259  ;;  %v9105_v54 = vadd.f32 %v5388_v24, %v4541_v33  ;;  %v4530_v30 = vmul.f32 %v6258_v46, %v8997_v55  ;;  %v4847_v33 = vld [vmem:[%s9664_s15 + $0x30] sm:$0xff]  ;;  %v4848_v46 = vld [vmem:[%s9664_s15 + $0x38] sm:$0xff] }
 0xf57   : > { %v4531_v7 = vmul.f32 %v6260_v17, %v8993_v36  ;;  %v4884_v17 = vpack.c.bf16 %v4848_v46, %v4847_v33 }
 0xf58   : > { %v4592_v2 = vpack.c.bf16 %v9105_v54, %v9103_v8  ;;  %v4542_v10 = vmul.f32 %v5387_v11, %v4530_v30  ;;  %v4865_v30 = vld [vmem:[%s9664_s15 + $0xc0] sm:$0xff] }
 0xf59   : > { %v4543_v15 = vmul.f32 %v5387_v11, %v4531_v7  ;;  %v4866_v7 = vld [vmem:[%s9664_s15 + $0xc8] sm:$0xff] }
 0xf5a   : > { %4657 = vmatmul.mubr.bf16.vlgmr.msra.gmra.mrb[0].mxu1 %v4592_v2  ;;  %v9112_v32 = vadd.f32 %v5388_v24, %v4542_v10  ;;  %v4893_v2 = vpack.c.bf16 %v4866_v7, %v4865_v30  ;;  %v4849_v10 = vld [vmem:[%s9664_s15 + $0x40] sm:$0xff] }
 0xf5b   : > { %4666 = vmatprep.mubr.bf16.mxu1 %v6424_v49  ;;  %v9114_v62 = vadd.f32 %v5388_v24, %v4543_v15  ;;  %v4850_v15 = vld [vmem:[%s9664_s15 + $0x48] sm:$0xff] }
 0xf5d   : > { %v4593_v58 = vpack.c.bf16 %v9114_v62, %v9112_v32 }
 0xf62   : > { %4667 = vmatmul.mubr.bf16.gmra.mrb[4].mxu1 %v4593_v58  ;;  %v4885_v58 = vpack.c.bf16 %v4850_v15, %v4849_v10 }
 0xf63   : > { %4676 = vmatprep.mubr.bf16.mxu1 %v6424_v49 }
 0xf6e   : > { %v4497_v55 = vpop.xlane.xlu0 %4496 }
 0xf6f   : > { %v4508_v36 = vmul.f32 0.0078125, %v4497_v55  ;;  %v4867_v55 = vld [vmem:[%s9664_s15 + $0xd0] sm:$0xff] }
 0xf70   : > { %v4499_v39 = vpop.xlane.xlu1 %4498 }
 0xf71   : > { %v4516_v12 = vadd.f32 1e-05, %v4508_v36  ;;  %v4509_v1 = vmul.f32 0.0078125, %v4499_v39  ;;  %v4868_v36 = vld [vmem:[%s9664_s15 + $0xd8] sm:$0xff]  ;;  %v4851_v39 = vld [vmem:[%s9664_s15 + $0x50] sm:$0xff] }
 0xf72   : > { %v4501_v14 = vpop.xlane.xlu0 %4500 }
 0xf73   : > { %6261 = vrsqrt.f32 %v4516_v12  ;;  %v4517_v26 = vadd.f32 1e-05, %v4509_v1  ;;  %v4510_v18 = vmul.f32 0.0078125, %v4501_v14  ;;  %v4894_v12 = vpack.c.bf16 %v4868_v36, %v4867_v55  ;;  %v4852_v1 = vld [vmem:[%s9664_s15 + $0x58] sm:$0xff]  ;;  %v4869_v14 = vld [vmem:[%s9664_s15 + $0xe0] sm:$0xff] }
 0xf74   : > { %v4503_v6 = vpop.xlane.xlu1 %4502 }
 0xf75   : > { %6263 = vrsqrt.f32 %v4517_v26  ;;  %v4518_v35 = vadd.f32 1e-05, %v4510_v18  ;;  %v4511_v20 = vmul.f32 0.0078125, %v4503_v6  ;;  %v4870_v26 = vld [vmem:[%s9664_s15 + $0xe8] sm:$0xff]  ;;  %v4886_v18 = vpack.c.bf16 %v4852_v1, %v4851_v39 }
 0xf76   : > { %v4895_v6 = vpack.c.bf16 %v4870_v26, %v4869_v14 }
 0xf77   : > { %6265 = vrsqrt.f32 %v4518_v35  ;;  %v4519_v56 = vadd.f32 1e-05, %v4511_v20  ;;  %v4853_v35 = vld [vmem:[%s9664_s15 + $0x60] sm:$0xff]  ;;  %v4854_v20 = vld [vmem:[%s9664_s15 + $0x68] sm:$0xff] }
 0xf79   : > { %6267 = vrsqrt.f32 %v4519_v56  ;;  %v4871_v56 = vld [vmem:[%s9664_s15 + $0xf0] sm:$0xff] }
 0xf7d   : > { %v6262_v61 = vpop.eup %6261 }
 0xf7e   : > { %v4532_v34 = vmul.f32 %v6262_v61, %v9076_v40  ;;  %v4872_v61 = vld [vmem:[%s9664_s15 + $0xf8] sm:$0xff] }
 0xf7f   : > { %v6264_v23 = vpop.eup %6263 }
 0xf80   : > { %v4533_v5 = vmul.f32 %v6264_v23, %v9079_v38  ;;  %v4544_v4 = vmul.f32 %v5387_v11, %v4532_v34  ;;  %v4887_v34 = vpack.c.bf16 %v4854_v20, %v4853_v35  ;;  %v4896_v23 = vpack.c.bf16 %v4872_v61, %v4871_v56 }
 0xf81   : > { %v6266_v50 = vpop.eup %6265 }
 0xf82   : > { %v4545_v60 = vmul.f32 %v5387_v11, %v4533_v5  ;;  %v9121_v41 = vadd.f32 %v5388_v24, %v4544_v4  ;;  %v4534_v44 = vmul.f32 %v6266_v50, %v9084_v0  ;;  %v4857_v0 = vld [vmem:[%s9664_s15 + $0x80] sm:$0xff]  ;;  %v4855_v5 = vld [vmem:[%s9664_s15 + $0x70] sm:$0xff]  ;;  %v4856_v4 = vld [vmem:[%s9664_s15 + $0x78] sm:$0xff] }
 0xf83   : > { %v6268_v53 = vpop.eup %6267  ;;  %v4888_v50 = vpack.c.bf16 %v4856_v4, %v4855_v5 }
 0xf84   : > { %v9123_v9 = vadd.f32 %v5388_v24, %v4545_v60  ;;  %v4535_v48 = vmul.f32 %v6268_v53, %v9089_v59  ;;  %v4546_v40 = vmul.f32 %v5387_v11, %v4534_v44  ;;  %v4858_v59 = vld [vmem:[%s9664_s15 + $0x88] sm:$0xff]  ;;  %v4612_v60 = vld [vmem:[%s9665_s16] sm:$0x3] }
 0xf85   : > { %v4889_v21 = vpack.c.bf16 %v4858_v59, %v4857_v0  ;;  %v9666_v53 = vld [vmem:[#allocation20_spill] sm:$0xff] }
 0xf86   : > { %v4594_v43 = vpack.c.bf16 %v9123_v9, %v9121_v41  ;;  %v4547_v45 = vmul.f32 %v5387_v11, %v4535_v48  ;;  %v9132_v57 = vadd.f32 %v5388_v24, %v4546_v40  ;;  %v4845_v11 = vld [vmem:[%s9664_s15 + $0x20] sm:$0xff]  ;;  %v9236_v44 = vrot.slane %v4612_v60, %v9666_v53  ;;  %v9667_v48 = vld [vmem:[#allocation21_spill] sm:$0xff] }
 0xf87   : > { %5521 = vmatprep.subr.bf16.mxu0 %v4889_v21  ;;  %5805 = vmatprep.subr.bf16.mxu1 %v4889_v21  ;;  %v4883_v27 = vpack.c.bf16 %v4846_v51, %v4845_v11 }
 0xf88   : > { %4677 = vmatmul.mubr.bf16.gmra.mrb[8].mxu1 %v4594_v43  ;;  %v9130_v38 = vadd.f32 %v5388_v24, %v4547_v45  ;;  %v4892_v24 = vpack.c.bf16 %v4864_v31, %v4863_v52  ;;  %v9239_v43 = vrot.slane %v4612_v60, %v9667_v48 }
 0xf89   : > { %4686 = vmatprep.mubr.bf16.mxu1 %v6424_v49  ;;  %v4841_v49 = vld [vmem:[%s9664_s15] sm:$0xff] }
 0xf8a   : > { %v4595_v42 = vpack.c.bf16 %v9130_v38, %v9132_v57  ;;  %v4881_v3 = vpack.c.bf16 %v4842_v37, %v4841_v49 }
 0xf8c   : > { %5522 = vmatpush3.bf16.msra.mxu0 %v4881_v3  ;;  %5813 = vmatpush3.bf16.msra.mxu1 %v4881_v3 }
 0xf8d   : > { %5523 = vmatprep.subr.bf16.mxu0 %v4890_v47  ;;  %5806 = vmatprep.subr.bf16.mxu1 %v4890_v47 }
 0xf90   : > { %4687 = vmatmul.mubr.bf16.gmra.mrb[12].mxu1 %v4595_v42  ;;  %5524 = vmatpush3.bf16.msra.mxu0 %v4882_v29 }
 0xf91   : > { %5814 = vmatpush3.bf16.msra.mxu1 %v4882_v29  ;;  %5525 = vmatprep.subr.bf16.mxu0 %v4891_v22 }
 0xf92   : > { %5807 = vmatprep.subr.bf16.mxu1 %v4891_v22 }
 0xf94   : > { %5526 = vmatpush3.bf16.msra.mxu0 %v4883_v27 }
 0xf95   : > { %5815 = vmatpush3.bf16.msra.mxu1 %v4883_v27  ;;  %5527 = vmatprep.subr.bf16.mxu0 %v4892_v24 }
 0xf96   : > { %5808 = vmatprep.subr.bf16.mxu1 %v4892_v24 }
 0xf98   : > { %5528 = vmatpush3.bf16.msra.mxu0 %v4884_v17 }
 0xf99   : > { %5816 = vmatpush3.bf16.msra.mxu1 %v4884_v17  ;;  %5529 = vmatprep.subr.bf16.mxu0 %v4893_v2 }
 0xf9a   : > { %5809 = vmatprep.subr.bf16.mxu1 %v4893_v2 }
 0xf9c   : > { %5530 = vmatpush3.bf16.msra.mxu0 %v4885_v58 }
 0xf9d   : > { %5817 = vmatpush3.bf16.msra.mxu1 %v4885_v58  ;;  %5531 = vmatprep.subr.bf16.mxu0 %v4894_v12 }
 0xf9e   : > { %5810 = vmatprep.subr.bf16.mxu1 %v4894_v12 }
 0xfa0   : > { %5532 = vmatpush3.bf16.msra.mxu0 %v4886_v18 }
 0xfa1   : > { %5818 = vmatpush3.bf16.msra.mxu1 %v4886_v18  ;;  %5533 = vmatprep.subr.bf16.mxu0 %v4895_v6 }
 0xfa2   : > { %5811 = vmatprep.subr.bf16.mxu1 %v4895_v6 }
 0xfa4   : > { %5534 = vmatpush3.bf16.msra.mxu0 %v4887_v34 }
 0xfa5   : > { %5819 = vmatpush3.bf16.msra.mxu1 %v4887_v34  ;;  %5535 = vmatprep.subr.bf16.mxu0 %v4896_v23 }
 0xfa6   : > { %5812 = vmatprep.subr.bf16.mxu1 %v4896_v23 }
 0xfa8   : > { %5536 = vmatpush3.bf16.msra.mxu0 %v4888_v50 }
 0xfa9   : > { %5820 = vmatpush3.bf16.msra.mxu1 %v4888_v50 }
0x102d   : > { %v4658_v45 = vpop.f32.mrb[0].mxu1 }
0x102e   : > { %v9242_v40 = vadd.f32 %v4658_v45, %v9236_v44  ;;  %v4660_v42 = vpop.f32.mrb[1].mxu1 }
0x102f   : > { %v9245_v0 = vadd.f32 %v4660_v42, %v9239_v43  ;;  %v4662_v59 = vpop.f32.mrb[2].mxu1 }
0x1030   : > { %v4713_v21 = vmul.f32 0.044715, %v9242_v40  ;;  %v9249_v49 = vadd.f32 %v4662_v59, %v9236_v44  ;;  %v4664_v37 = vpop.f32.mrb[3].mxu1 }
0x1031   : > { %v4714_v3 = vmul.f32 0.044715, %v9245_v0  ;;  %v9253_v13 = vadd.f32 %v4664_v37, %v9239_v43 }
0x1032   : > { %v4729_v28 = vmul.f32 %v4713_v21, %v9242_v40  ;;  %v4715_v47 = vmul.f32 0.044715, %v9249_v49 }
0x1033   : > { %v4730_v19 = vmul.f32 %v4714_v3, %v9245_v0  ;;  %v4716_v63 = vmul.f32 0.044715, %v9253_v13 }
0x1034   : > { %v4745_v29 = vmul.f32 %v4729_v28, %v9242_v40  ;;  %v4731_v16 = vmul.f32 %v4715_v47, %v9249_v49 }
0x1035   : > { %v4746_v25 = vmul.f32 %v4730_v19, %v9245_v0  ;;  %v4732_v22 = vmul.f32 %v4716_v63, %v9253_v13  ;;  %v4668_v11 = vpop.f32.mrb[4].mxu1  ;;  %v4697_v19 = vmul.f32 0.5, %v9242_v40  ;;  %v4699_v63 = vmul.f32 0.5, %v9249_v49 }
0x1036   : > { %v4761_v51 = vadd.f32 %v4745_v29, %v9242_v40  ;;  %v4747_v27 = vmul.f32 %v4731_v16, %v9249_v49  ;;  %v9266_v52 = vadd.f32 %v4668_v11, %v9236_v44  ;;  %v4670_v31 = vpop.f32.mrb[5].mxu1  ;;  %v4698_v16 = vmul.f32 0.5, %v9245_v0 }
0x1037   : > { %v4748_v24 = vmul.f32 %v4732_v22, %v9253_v13  ;;  %v9270_v33 = vadd.f32 %v4670_v31, %v9239_v43  ;;  %v4672_v46 = vpop.f32.mrb[6].mxu1  ;;  %v4762_v17 = vadd.f32 %v4746_v25, %v9245_v0  ;;  %v4700_v25 = vmul.f32 0.5, %v9253_v13 }
0x1038   : > { %v4777_v30 = vmul.f32 0.7978846, %v4761_v51  ;;  %v4763_v7 = vadd.f32 %v4747_v27, %v9249_v49  ;;  %v4717_v2 = vmul.f32 0.044715, %v9266_v52  ;;  %v4673_v10 = vadd.f32 %v4672_v46, %v9236_v44  ;;  %v4674_v15 = vpop.f32.mrb[7].mxu1 }
0x1039   : > { %v4718_v58 = vmul.f32 0.044715, %v9270_v33  ;;  %v4675_v55 = vadd.f32 %v4674_v15, %v9239_v43  ;;  %v4764_v36 = vadd.f32 %v4748_v24, %v9253_v13  ;;  %v4778_v39 = vmul.f32 0.7978846, %v4762_v17 }
0x103a   : > { %6269 = vtanh.f32 %v4777_v30  ;;  %v4779_v12 = vmul.f32 0.7978846, %v4763_v7  ;;  %v4733_v1 = vmul.f32 %v4717_v2, %v9266_v52  ;;  %v4719_v14 = vmul.f32 0.044715, %v4673_v10 }
0x103b   : > { %v4734_v26 = vmul.f32 %v4718_v58, %v9270_v33  ;;  %v4720_v18 = vmul.f32 0.044715, %v4675_v55  ;;  %v4780_v6 = vmul.f32 0.7978846, %v4764_v36  ;;  %6271 = vtanh.f32 %v4778_v39 }
0x103c   : > { %6273 = vtanh.f32 %v4779_v12  ;;  %v4749_v35 = vmul.f32 %v4733_v1, %v9266_v52  ;;  %v4735_v20 = vmul.f32 %v4719_v14, %v4673_v10  ;;  %v4701_v49 = vmul.f32 0.5, %v9266_v52 }
0x103d   : > { %v4750_v56 = vmul.f32 %v4734_v26, %v9270_v33  ;;  %v4736_v61 = vmul.f32 %v4720_v18, %v4675_v55  ;;  %6275 = vtanh.f32 %v4780_v6  ;;  %v4703_v0 = vmul.f32 0.5, %v4673_v10 }
0x103e   : > { %v4751_v34 = vmul.f32 %v4735_v20, %v4673_v10  ;;  %v4765_v23 = vadd.f32 %v4749_v35, %v9266_v52  ;;  %v4702_v13 = vmul.f32 0.5, %v9270_v33  ;;  %v4704_v36 = vmul.f32 0.5, %v4675_v55 }
0x103f   : > { %v4752_v5 = vmul.f32 %v4736_v61, %v4675_v55  ;;  %v4766_v4 = vadd.f32 %v4750_v56, %v9270_v33 }
0x1040   : > { %v4767_v50 = vadd.f32 %v4751_v34, %v4673_v10  ;;  %v4781_v60 = vmul.f32 0.7978846, %v4765_v23 }
0x1041   : > { %v4768_v53 = vadd.f32 %v4752_v5, %v4675_v55  ;;  %v4782_v48 = vmul.f32 0.7978846, %v4766_v4 }
0x1042   : > { %v4783_v45 = vmul.f32 0.7978846, %v4767_v50  ;;  %6277 = vtanh.f32 %v4781_v60 }
0x1043   : > { %v4784_v42 = vmul.f32 0.7978846, %v4768_v53  ;;  %6279 = vtanh.f32 %v4782_v48 }
0x1044   : > { %v6270_v59 = vpop.eup %6269  ;;  %6281 = vtanh.f32 %v4783_v45 }
0x1045   : > { %v6272_v21 = vpop.eup %6271  ;;  %v4809_v37 = vadd.f32 1.0, %v6270_v59  ;;  %6283 = vtanh.f32 %v4784_v42 }
0x1046   : > { %v6274_v3 = vpop.eup %6273  ;;  %v4810_v28 = vadd.f32 1.0, %v6272_v21 }
0x1047   : > { %v6276_v47 = vpop.eup %6275  ;;  %v4811_v29 = vadd.f32 1.0, %v6274_v3  ;;  %v4825_v11 = vmul.f32 %v4809_v37, %v4697_v19 }
0x1048   : > { %v4812_v22 = vadd.f32 1.0, %v6276_v47  ;;  %v4826_v27 = vmul.f32 %v4810_v28, %v4698_v16 }
0x1049   : > { %v4827_v51 = vmul.f32 %v4811_v29, %v4699_v63 }
0x104a   : > { %v4828_v31 = vmul.f32 %v4812_v22, %v4700_v25 }
0x104b   : > { %v4873_v24 = vpack.c.bf16 %v4827_v51, %v4825_v11 }
0x104c   : > { %v6278_v46 = vpop.eup %6277  ;;  %v4874_v17 = vpack.c.bf16 %v4828_v31, %v4826_v27 }
0x104d   : > { %v6280_v30 = vpop.eup %6279  ;;  %v4813_v7 = vadd.f32 1.0, %v6278_v46 }
0x104e   : > { %v6282_v2 = vpop.eup %6281  ;;  %4929 = vmatprep.mubr.bf16.mxu0 %v4874_v17  ;;  %v4814_v40 = vadd.f32 1.0, %v6280_v30 }
0x104f   : > { %v6284_v15 = vpop.eup %6283  ;;  %4930 = vmatmul.mubr.bf16.vlgmr.msra.gmra.mrb[8].mxu0 %v4873_v24  ;;  %v4815_v58 = vadd.f32 1.0, %v6282_v2  ;;  %v4829_v12 = vmul.f32 %v4813_v7, %v4701_v49 }
0x1050   : > { %v4816_v39 = vadd.f32 1.0, %v6284_v15  ;;  %v4830_v14 = vmul.f32 %v4814_v40, %v4702_v13 }
0x1051   : > { %v4831_v1 = vmul.f32 %v4815_v58, %v4703_v0 }
0x1052   : > { %v4832_v26 = vmul.f32 %v4816_v39, %v4704_v36 }
0x1053   : > { %v4875_v18 = vpack.c.bf16 %v4831_v1, %v4829_v12 }
0x1054   : > { %v4876_v6 = vpack.c.bf16 %v4832_v26, %v4830_v14 }
0x1056   : > { %4937 = vmatprep.mubr.bf16.mxu0 %v4876_v6 }
0x1057   : > { %4938 = vmatmul.mubr.bf16.gmra.mrb[12].mxu0 %v4875_v18 }
0x105b   : > { %v4678_v35 = vpop.f32.mrb[8].mxu1 }
0x105c   : > { %v9292_v20 = vadd.f32 %v4678_v35, %v9236_v44  ;;  %v4680_v56 = vpop.f32.mrb[9].mxu1 }
0x105d   : > { %v9295_v52 = vadd.f32 %v4680_v56, %v9239_v43  ;;  %v4682_v10 = vpop.f32.mrb[10].mxu1 }
0x105e   : > { %v4721_v33 = vmul.f32 0.044715, %v9292_v20  ;;  %v9299_v55 = vadd.f32 %v4682_v10, %v9236_v44  ;;  %v4684_v61 = vpop.f32.mrb[11].mxu1 }
0x105f   : > { %v4722_v34 = vmul.f32 0.044715, %v9295_v52  ;;  %v9303_v23 = vadd.f32 %v4684_v61, %v9239_v43 }
0x1060   : > { %v4737_v5 = vmul.f32 %v4721_v33, %v9292_v20  ;;  %v4723_v4 = vmul.f32 0.044715, %v9299_v55 }
0x1061   : > { %v4738_v50 = vmul.f32 %v4722_v34, %v9295_v52  ;;  %v4724_v60 = vmul.f32 0.044715, %v9303_v23 }
0x1062   : > { %v4753_v53 = vmul.f32 %v4737_v5, %v9292_v20  ;;  %v4739_v48 = vmul.f32 %v4723_v4, %v9299_v55  ;;  %v4705_v5 = vmul.f32 0.5, %v9292_v20  ;;  %v4707_v4 = vmul.f32 0.5, %v9299_v55 }
0x1063   : > { %v4754_v45 = vmul.f32 %v4738_v50, %v9295_v52  ;;  %v4740_v42 = vmul.f32 %v4724_v60, %v9303_v23  ;;  %v4688_v59 = vpop.f32.mrb[12].mxu1  ;;  %v4706_v60 = vmul.f32 0.5, %v9295_v52 }
0x1064   : > { %v4769_v21 = vadd.f32 %v4753_v53, %v9292_v20  ;;  %v4755_v37 = vmul.f32 %v4739_v48, %v9299_v55  ;;  %v9316_v3 = vadd.f32 %v4688_v59, %v9236_v44  ;;  %v4690_v28 = vpop.f32.mrb[13].mxu1  ;;  %v4708_v53 = vmul.f32 0.5, %v9303_v23 }
0x1065   : > { %v4756_v47 = vmul.f32 %v4740_v42, %v9303_v23  ;;  %v9320_v19 = vadd.f32 %v4690_v28, %v9239_v43  ;;  %v4692_v63 = vpop.f32.mrb[14].mxu1  ;;  %v4770_v29 = vadd.f32 %v4754_v45, %v9295_v52 }
0x1066   : > { %v4785_v16 = vmul.f32 0.7978846, %v4769_v21  ;;  %v4771_v25 = vadd.f32 %v4755_v37, %v9299_v55  ;;  %v4725_v22 = vmul.f32 0.044715, %v9316_v3  ;;  %v4693_v11 = vadd.f32 %v4692_v63, %v9236_v44  ;;  %v4694_v51 = vpop.f32.mrb[15].mxu1 }
0x1067   : > { %v4726_v27 = vmul.f32 0.044715, %v9320_v19  ;;  %v4695_v31 = vadd.f32 %v4694_v51, %v9239_v43  ;;  %v4772_v24 = vadd.f32 %v4756_v47, %v9303_v23  ;;  %v4786_v46 = vmul.f32 0.7978846, %v4770_v29 }
0x1068   : > { %6285 = vtanh.f32 %v4785_v16  ;;  %v4787_v17 = vmul.f32 0.7978846, %v4771_v25  ;;  %v4741_v30 = vmul.f32 %v4725_v22, %v9316_v3  ;;  %v4727_v7 = vmul.f32 0.044715, %v4693_v11 }
0x1069   : > { %v4742_v2 = vmul.f32 %v4726_v27, %v9320_v19  ;;  %v4728_v40 = vmul.f32 0.044715, %v4695_v31  ;;  %v4788_v15 = vmul.f32 0.7978846, %v4772_v24  ;;  %6287 = vtanh.f32 %v4786_v46 }
0x106a   : > { %6289 = vtanh.f32 %v4787_v17  ;;  %v4757_v44 = vmul.f32 %v4741_v30, %v9316_v3  ;;  %v4743_v49 = vmul.f32 %v4727_v7, %v4693_v11  ;;  %v4709_v55 = vmul.f32 0.5, %v9316_v3 }
0x106b   : > { %v4758_v0 = vmul.f32 %v4742_v2, %v9320_v19  ;;  %v4744_v43 = vmul.f32 %v4728_v40, %v4695_v31  ;;  %6291 = vtanh.f32 %v4788_v15  ;;  %v4711_v52 = vmul.f32 0.5, %v4693_v11 }
0x106c   : > { %v4759_v58 = vmul.f32 %v4743_v49, %v4693_v11  ;;  %v4773_v13 = vadd.f32 %v4757_v44, %v9316_v3  ;;  %v4710_v23 = vmul.f32 0.5, %v9320_v19  ;;  %v4712_v51 = vmul.f32 0.5, %v4695_v31  ;;  %v5389_v3 = vld [vmem:[%s9661_s19 + $0x3] ss:$0 sm:$0xff] }
0x106d   : > { %v4760_v36 = vmul.f32 %v4744_v43, %v4695_v31  ;;  %v4774_v39 = vadd.f32 %v4758_v0, %v9320_v19 }
0x106e   : > { %v4775_v12 = vadd.f32 %v4759_v58, %v4693_v11  ;;  %v4789_v1 = vmul.f32 0.7978846, %v4773_v13 }
0x106f   : > { %v4776_v14 = vadd.f32 %v4760_v36, %v4695_v31  ;;  %v4790_v26 = vmul.f32 0.7978846, %v4774_v39 }
0x1070   : > { %v4791_v18 = vmul.f32 0.7978846, %v4775_v12  ;;  %6293 = vtanh.f32 %v4789_v1 }
0x1071   : > { %v4792_v6 = vmul.f32 0.7978846, %v4776_v14  ;;  %6295 = vtanh.f32 %v4790_v26 }
0x1072   : > { %v6286_v35 = vpop.eup %6285  ;;  %6297 = vtanh.f32 %v4791_v18 }
0x1073   : > { %v6288_v56 = vpop.eup %6287  ;;  %v4817_v10 = vadd.f32 1.0, %v6286_v35  ;;  %6299 = vtanh.f32 %v4792_v6 }
0x1074   : > { %v6290_v33 = vpop.eup %6289  ;;  %v4818_v61 = vadd.f32 1.0, %v6288_v56 }
0x1075   : > { %v6292_v34 = vpop.eup %6291  ;;  %v4819_v50 = vadd.f32 1.0, %v6290_v33  ;;  %v4833_v45 = vmul.f32 %v4817_v10, %v4705_v5 }
0x1076   : > { %v4820_v48 = vadd.f32 1.0, %v6292_v34  ;;  %v4834_v59 = vmul.f32 %v4818_v61, %v4706_v60 }
0x1077   : > { %v4835_v42 = vmul.f32 %v4819_v50, %v4707_v4 }
0x1078   : > { %v4836_v21 = vmul.f32 %v4820_v48, %v4708_v53 }
0x1079   : > { %v4877_v37 = vpack.c.bf16 %v4835_v42, %v4833_v45 }
0x107a   : > { %v6294_v28 = vpop.eup %6293  ;;  %v4878_v47 = vpack.c.bf16 %v4836_v21, %v4834_v59 }
0x107b   : > { %v6296_v63 = vpop.eup %6295  ;;  %v4821_v29 = vadd.f32 1.0, %v6294_v28 }
0x107c   : > { %v6298_v16 = vpop.eup %6297  ;;  %4945 = vmatprep.mubr.bf16.mxu1 %v4878_v47  ;;  %v4822_v20 = vadd.f32 1.0, %v6296_v63 }
0x107d   : > { %v6300_v25 = vpop.eup %6299  ;;  %4946 = vmatmul.mubr.bf16.vlgmr.msra.gmra.mrb[16].mxu1 %v4877_v37  ;;  %v4823_v22 = vadd.f32 1.0, %v6298_v16  ;;  %v4837_v24 = vmul.f32 %v4821_v29, %v4709_v55 }
0x107e   : > { %v4824_v27 = vadd.f32 1.0, %v6300_v25  ;;  %v4838_v17 = vmul.f32 %v4822_v20, %v4710_v23 }
0x107f   : > { %v4839_v46 = vmul.f32 %v4823_v22, %v4711_v52 }
0x1080   : > { %v4840_v30 = vmul.f32 %v4824_v27, %v4712_v51 }
0x1081   : > { %v4879_v7 = vpack.c.bf16 %v4839_v46, %v4837_v24 }
0x1082   : > { %v4880_v2 = vpack.c.bf16 %v4840_v30, %v4838_v17 }
0x1084   : > { %4953 = vmatprep.mubr.bf16.mxu1 %v4880_v2 }
0x1085   : > { %4954 = vmatmul.mubr.bf16.gmra.mrb[20].mxu1 %v4879_v7 }
0x1122   : > { %v5537_v40 = vpop.f32.mrb[8].mxu0 }
0x1123   : > { %v5538_v15 = vpop.f32.mrb[9].mxu0 }
0x1124   : > { %v5539_v44 = vadd.f32 %v5538_v15, %v5537_v40  ;;  %v5540_v49 = vpop.f32.mrb[10].mxu0 }
0x1125   : > { %v5541_v0 = vpop.f32.mrb[11].mxu0 }
0x1126   : > { %v4962_v19 = vadd.f32 %v5539_v44, %v9103_v8  ;;  %v5542_v11 = vadd.f32 %v5541_v0, %v5540_v49 }
0x1128   : > { %v4963_v31 = vadd.f32 %v5542_v11, %v9105_v54  ;;  %v4975_v43 = vadd.f32 %v5389_v3, %v4962_v19 }
0x112a   : > { %4985 = vadd.xlane.f32.xlu0 %v4975_v43  ;;  %v5543_v58 = vpop.f32.mrb[12].mxu0  ;;  %v4976_v13 = vadd.f32 %v5389_v3, %v4963_v31 }
0x112b   : > { %v5544_v36 = vpop.f32.mrb[13].mxu0 }
0x112c   : > { %v5545_v39 = vadd.f32 %v5544_v36, %v5543_v58  ;;  %4987 = vadd.xlane.f32.xlu1 %v4976_v13  ;;  %v5546_v12 = vpop.f32.mrb[14].mxu0 }
0x112d   : > { %v5547_v1 = vpop.f32.mrb[15].mxu0 }
0x112e   : > { %v4964_v14 = vadd.f32 %v5545_v39, %v9112_v32  ;;  %v5548_v26 = vadd.f32 %v5547_v1, %v5546_v12 }
0x1130   : > { %v4965_v18 = vadd.f32 %v5548_v26, %v9114_v62  ;;  %v4977_v6 = vadd.f32 %v5389_v3, %v4964_v14 }
0x1132   : > { %4989 = vadd.xlane.f32.xlu0 %v4977_v6  ;;  %v4978_v8 = vadd.f32 %v5389_v3, %v4965_v18 }
0x1134   : > { %4991 = vadd.xlane.f32.xlu1 %v4978_v8 }
0x1150   : > { %v5549_v35 = vpop.f32.mrb[16].mxu1 }
0x1151   : > { %v5550_v54 = vpop.f32.mrb[17].mxu1 }
0x1152   : > { %v5551_v56 = vadd.f32 %v5550_v54, %v5549_v35  ;;  %v5552_v10 = vpop.f32.mrb[18].mxu1  ;;  %v5390_v54 = vld [vmem:[%s9661_s19 + $0x4] ss:$0 sm:$0xff] }
0x1153   : > { %v5553_v33 = vpop.f32.mrb[19].mxu1 }
0x1154   : > { %v4966_v61 = vadd.f32 %v5551_v56, %v9121_v41  ;;  %v5554_v34 = vadd.f32 %v5553_v33, %v5552_v10  ;;  %v5391_v33 = vld [vmem:[%s9661_s19 + $0x5] ss:$0 sm:$0xff] }
0x1156   : > { %v4967_v5 = vadd.f32 %v5554_v34, %v9123_v9  ;;  %v4979_v4 = vadd.f32 %v5389_v3, %v4966_v61 }
0x1158   : > { %4993 = vadd.xlane.f32.xlu0 %v4979_v4  ;;  %v5555_v32 = vpop.f32.mrb[20].mxu1  ;;  %v4980_v50 = vadd.f32 %v5389_v3, %v4967_v5 }
0x1159   : > { %v5556_v60 = vpop.f32.mrb[21].mxu1 }
0x115a   : > { %v5557_v62 = vadd.f32 %v5556_v60, %v5555_v32  ;;  %4995 = vadd.xlane.f32.xlu1 %v4980_v50  ;;  %v5558_v53 = vpop.f32.mrb[22].mxu1 }
0x115b   : > { %v5559_v48 = vpop.f32.mrb[23].mxu1 }
0x115c   : > { %v4968_v45 = vadd.f32 %v5557_v62, %v9132_v57  ;;  %v5560_v42 = vadd.f32 %v5559_v48, %v5558_v53 }
0x115e   : > { %v4969_v59 = vadd.f32 %v5560_v42, %v9130_v38  ;;  %v4981_v21 = vadd.f32 %v5389_v3, %v4968_v45 }
0x1160   : > { %4997 = vadd.xlane.f32.xlu0 %v4981_v21  ;;  %v4982_v41 = vadd.f32 %v5389_v3, %v4969_v59 }
0x1162   : > { %4999 = vadd.xlane.f32.xlu1 %v4982_v41 }
0x11b7   : > { %v4986_v37 = vpop.xlane.xlu0 %4985 }
0x11b8   : > { %v5001_v9 = vmul.f32 0.0078125, %v4986_v37 }
0x11b9   : > { %v4988_v28 = vpop.xlane.xlu1 %4987 }
0x11ba   : > { %v5009_v47 = vsub.f32 %v4975_v43, %v5001_v9  ;;  %v5002_v63 = vmul.f32 0.0078125, %v4988_v28 }
0x11bc   : > { %v5010_v29 = vsub.f32 %v4976_v13, %v5002_v63  ;;  %v5017_v16 = vmul.f32 %v5009_v47, %v5009_v47 }
0x11be   : > { %5025 = vadd.xlane.f32.xlu0 %v5017_v16  ;;  %v5018_v20 = vmul.f32 %v5010_v29, %v5010_v29 }
0x11bf   : > { %v4990_v25 = vpop.xlane.xlu0 %4989 }
0x11c0   : > { %v5003_v55 = vmul.f32 0.0078125, %v4990_v25  ;;  %5027 = vadd.xlane.f32.xlu1 %v5018_v20 }
0x11c1   : > { %v4992_v57 = vpop.xlane.xlu1 %4991 }
0x11c2   : > { %v5011_v52 = vsub.f32 %v4977_v6, %v5003_v55  ;;  %v5004_v22 = vmul.f32 0.0078125, %v4992_v57 }
0x11c4   : > { %v5012_v38 = vsub.f32 %v4978_v8, %v5004_v22  ;;  %v5019_v23 = vmul.f32 %v5011_v52, %v5011_v52 }
0x11c6   : > { %5029 = vadd.xlane.f32.xlu0 %v5019_v23  ;;  %v5020_v51 = vmul.f32 %v5012_v38, %v5012_v38 }
0x11c8   : > { %5031 = vadd.xlane.f32.xlu1 %v5020_v51 }
0x11e5   : > { %v4994_v27 = vpop.xlane.xlu0 %4993 }
0x11e6   : > { %v5005_v24 = vmul.f32 0.0078125, %v4994_v27 }
0x11e7   : > { %v4996_v46 = vpop.xlane.xlu1 %4995 }
0x11e8   : > { %v9352_v17 = vsub.f32 %v4979_v4, %v5005_v24  ;;  %v5006_v30 = vmul.f32 0.0078125, %v4996_v46 }
0x11ea   : > { %v9354_v7 = vsub.f32 %v4980_v50, %v5006_v30  ;;  %v5021_v2 = vmul.f32 %v9352_v17, %v9352_v17 }
0x11ec   : > { %5033 = vadd.xlane.f32.xlu0 %v5021_v2  ;;  %v5022_v40 = vmul.f32 %v9354_v7, %v9354_v7 }
0x11ed   : > { %v4998_v15 = vpop.xlane.xlu0 %4997 }
0x11ee   : > { %v5007_v44 = vmul.f32 0.0078125, %v4998_v15  ;;  %5035 = vadd.xlane.f32.xlu1 %v5022_v40 }
0x11ef   : > { %v5000_v49 = vpop.xlane.xlu1 %4999 }
0x11f0   : > { %v9360_v0 = vsub.f32 %v4981_v21, %v5007_v44  ;;  %v5008_v3 = vmul.f32 0.0078125, %v5000_v49 }
0x11f2   : > { %v9362_v19 = vsub.f32 %v4982_v41, %v5008_v3  ;;  %v5023_v11 = vmul.f32 %v9360_v0, %v9360_v0 }
0x11f4   : > { %5037 = vadd.xlane.f32.xlu0 %v5023_v11  ;;  %v5024_v31 = vmul.f32 %v9362_v19, %v9362_v19 }
0x11f6   : > { %5039 = vadd.xlane.f32.xlu1 %v5024_v31 }
0x124b   : > { %v5026_v43 = vpop.xlane.xlu0 %5025 }
0x124c   : > { %v5041_v58 = vmul.f32 0.0078125, %v5026_v43 }
0x124d   : > { %v5028_v13 = vpop.xlane.xlu1 %5027 }
0x124e   : > { %v5049_v36 = vadd.f32 1e-05, %v5041_v58  ;;  %v5042_v39 = vmul.f32 0.0078125, %v5028_v13 }
0x1250   : > { %6301 = vrsqrt.f32 %v5049_v36  ;;  %v5050_v12 = vadd.f32 1e-05, %v5042_v39 }
0x1252   : > { %6303 = vrsqrt.f32 %v5050_v12 }
0x1253   : > { %v5030_v1 = vpop.xlane.xlu0 %5029 }
0x1254   : > { %v5043_v14 = vmul.f32 0.0078125, %v5030_v1 }
0x1255   : > { %v5032_v26 = vpop.xlane.xlu1 %5031 }
0x1256   : > { %v5051_v18 = vadd.f32 1e-05, %v5043_v14  ;;  %v5044_v6 = vmul.f32 0.0078125, %v5032_v26 }
0x1258   : > { %6305 = vrsqrt.f32 %v5051_v18  ;;  %v5052_v8 = vadd.f32 1e-05, %v5044_v6 }
0x125a   : > { %v6302_v35 = vpop.eup %6301  ;;  %6307 = vrsqrt.f32 %v5052_v8 }
0x125b   : > { %v5065_v56 = vmul.f32 %v6302_v35, %v5009_v47 }
0x125c   : > { %v6304_v10 = vpop.eup %6303 }
0x125d   : > { %v5077_v61 = vmul.f32 %v5390_v54, %v5065_v56  ;;  %v5066_v34 = vmul.f32 %v6304_v10, %v5010_v29 }
0x125f   : > { %v5089_v5 = vadd.f32 %v5391_v33, %v5077_v61  ;;  %v5078_v4 = vmul.f32 %v5390_v54, %v5066_v34 }
0x1261   : > { %5097 = vst [vmem:[%s6611_s28] sm:$0xff] %v5089_v5  ;;  %v5090_v32 = vadd.f32 %v5391_v33, %v5078_v4 }
0x1262   : > { %v6306_v50 = vpop.eup %6305 }
0x1263   : > { %5098 = vst [vmem:[%s6611_s28 + $0x8] sm:$0xff] %v5090_v32  ;;  %v5067_v60 = vmul.f32 %v6306_v50, %v5011_v52 }
0x1264   : > { %v6308_v62 = vpop.eup %6307 }
0x1265   : > { %v5079_v53 = vmul.f32 %v5390_v54, %v5067_v60  ;;  %v5068_v48 = vmul.f32 %v6308_v62, %v5012_v38 }
0x1267   : > { %v5091_v45 = vadd.f32 %v5391_v33, %v5079_v53  ;;  %v5080_v42 = vmul.f32 %v5390_v54, %v5068_v48 }
0x1269   : > { %5099 = vst [vmem:[%s6611_s28 + $0x10] sm:$0xff] %v5091_v45  ;;  %v5092_v59 = vadd.f32 %v5391_v33, %v5080_v42 }
0x126b   : > { %5100 = vst [vmem:[%s6611_s28 + $0x18] sm:$0xff] %v5092_v59 }
0x1279   : > { %v5034_v21 = vpop.xlane.xlu0 %5033 }
0x127a   : > { %v5045_v41 = vmul.f32 0.0078125, %v5034_v21 }
0x127b   : > { %v5036_v37 = vpop.xlane.xlu1 %5035 }
0x127c   : > { %v5053_v9 = vadd.f32 1e-05, %v5045_v41  ;;  %v5046_v28 = vmul.f32 0.0078125, %v5036_v37 }
0x127e   : > { %6309 = vrsqrt.f32 %v5053_v9  ;;  %v5054_v47 = vadd.f32 1e-05, %v5046_v28 }
0x1280   : > { %6311 = vrsqrt.f32 %v5054_v47 }
0x1281   : > { %v5038_v63 = vpop.xlane.xlu0 %5037 }
0x1282   : > { %v5047_v29 = vmul.f32 0.0078125, %v5038_v63 }
0x1283   : > { %v5040_v16 = vpop.xlane.xlu1 %5039 }
0x1284   : > { %v5055_v20 = vadd.f32 1e-05, %v5047_v29  ;;  %v5048_v25 = vmul.f32 0.0078125, %v5040_v16 }
0x1286   : > { %6313 = vrsqrt.f32 %v5055_v20  ;;  %v5056_v55 = vadd.f32 1e-05, %v5048_v25 }
0x1288   : > { %v6310_v57 = vpop.eup %6309  ;;  %6315 = vrsqrt.f32 %v5056_v55 }
0x1289   : > { %v5069_v52 = vmul.f32 %v6310_v57, %v9352_v17 }
0x128a   : > { %v6312_v22 = vpop.eup %6311 }
0x128b   : > { %v5081_v38 = vmul.f32 %v5390_v54, %v5069_v52  ;;  %v5070_v23 = vmul.f32 %v6312_v22, %v9354_v7 }
0x128d   : > { %v5093_v51 = vadd.f32 %v5391_v33, %v5081_v38  ;;  %v5082_v27 = vmul.f32 %v5390_v54, %v5070_v23 }
0x128f   : > { %5101 = vst [vmem:[%s6611_s28 + $0x20] sm:$0xff] %v5093_v51  ;;  %v5094_v24 = vadd.f32 %v5391_v33, %v5082_v27 }
0x1290   : > { %v6314_v46 = vpop.eup %6313 }
0x1291   : > { %5102 = vst [vmem:[%s6611_s28 + $0x28] sm:$0xff] %v5094_v24  ;;  %v5071_v30 = vmul.f32 %v6314_v46, %v9360_v0 }
0x1292   : > { %v6316_v2 = vpop.eup %6315 }
0x1293   : > { %v5083_v40 = vmul.f32 %v5390_v54, %v5071_v30  ;;  %v5072_v15 = vmul.f32 %v6316_v2, %v9362_v19 }
0x1295   : > { %v5095_v44 = vadd.f32 %v5391_v33, %v5083_v40  ;;  %v5084_v17 = vmul.f32 %v5390_v54, %v5072_v15 }
0x1297   : > { %5103 = vst [vmem:[%s6611_s28 + $0x30] sm:$0xff] %v5095_v44  ;;  %v5096_v49 = vadd.f32 %v5391_v33, %v5084_v17 }
0x1299   : > { %5104 = vst [vmem:[%s6611_s28 + $0x38] sm:$0xff] %v5096_v49 }
0x129a PF: > { %s9668_s0 = sld [smem:[#allocation11_spill]]  ;;  %s9671_s12 = sld [smem:[#allocation71_spill]] }
0x129b   : > { %s9669_s18 = sld [smem:[#allocation9_spill]]  ;;  %s5121_s26 = sshll.u32 %s6611_s28, 4  ;;  %s9393_s26 = int_to_ptr.vmem [resolvable:$true] %s5121_s26 }
0x129c   : > { %s6317_s27 = scalar_lea.vmem %s9393_s26, 1024  ;;  %s6426_s22 = smov [#allocation5]  }
0x129d   : > { %p6318_p2 = scmp.ne.s32.totalorder %s9393_s26, %s6317_s27  ;;  %s6321_s23 = sshll.u32 %s6426_s22, 4  ;;  %s6322_s23 = int_to_ptr.vmem [resolvable:$false] %s6321_s23 }
0x129e   : > { %s6323_s11 = scalar_lea.vmem %s6322_s23, 2048  ;;  %p6324_p6 = scmp.lt.s32.totalorder %s9393_s26, %s6322_s23 }
0x129f   : > { %p6319_p4 = pnand %p6318_p2, %p6563_p3  ;;  %p6325_p7 = scmp.lt.s32.totalorder %s6323_s11, %s6317_s27 }
0x12a0   : > { %s5398_s20 = sshll.u32 %s9668_s0, 10 }
0x12a1   : > { %s9390_s24 = scalar_lea.hbm %s9671_s12, %s5398_s20  ;;  %s9672_s16 = sand.u32 1, %s9669_s18  }
0x12a2   : > { %s9397_s21 = scalar_lea.sflag [#allocation6], %s9672_s16  ;;  %p6320_p5 = pneg %p6319_p4 }
0x12a3   : > { %p6326_p8 = por %p6325_p7, %p6324_p6 }
0x12a5   : > { %p6327_p10 = pnand %p6326_p8, %p6320_p5 }
0x12a7   : > { %6330 = shalt.err (!%p6327_p10)
}
0x12a8   : > { %s6331_s28 = scalar_lea.hbm %s9390_s24, 1024  ;;  %s6335_s18 = scalar_lea.hbm %s9671_s12, 2048 }
0x12a9   : > { %p6332_p11 = scmp.ne.s32.totalorder %s9390_s24, %s6331_s28  ;;  %p6336_p0 = scmp.lt.u32.totalorder %s9390_s24, %s9671_s12 }
0x12aa   : > { %p6337_p1 = scmp.lt.u32.totalorder %s6335_s18, %s6331_s28  ;;  %p6339_p4 = scmp.lt.u32.totalorder %s6331_s28, %s9390_s24 }
0x12ab   : > { %p6333_p12 = pnand %p6332_p11, %p6563_p3 }
0x12ac   : > { %p6338_p2 = por %p6337_p1, %p6336_p0 }
0x12ad   : > { %p6334_p13 = pneg %p6333_p12 }
0x12ae   : > { %p6340_p5 = por %p6339_p4, %p6338_p2 }
0x12b0   : > { %p6341_p6 = pnand %p6340_p5, %p6334_p13 }
0x12b2   : > { %6344 = shalt.err (!%p6341_p6)
}
0x12b3   : > { %s6427_s17 = smov 128   ;;  %s6428_s16 = smov 8  }
0x12b4   : > { %5837 = dma.vmem_to_hbm [thread:$0]  (%p6563_p3), %s9393_s26, 1024, %s9390_s24, %s9397_s21, %s6427_s17, %s6427_s17, %s6428_s16  }
0x12b5 PF: > { %s9673_s27 = sld [smem:[#allocation14_spill]]  ;;  %s9674_s22 = sld [smem:[#allocation8_spill]] }
0x12bb   : > { %p5843_p7 = scmp.ge.s32.totalorder %s9673_s27, 2  ;;  %s5136_s11 = sand.u32 1, %s9674_s22  }
0x12bc   : > { %s5137_s28 = scalar_lea.sflag [#allocation6], %s5136_s11 }
0x12bd   : > { %p5840_p8 = pnand %p5843_p7, %p6573_p9 }
0x12bf   : > { %6378 = dma.done.wait (!%p5840_p8), %s5137_s28, 1024  }
0x12c0   : > { %6380 = vsyncadd (!%p5840_p8), %s5137_s28, 4294966272  ;;  %s29_s28 = sadd.s32 1, %s9673_s27   ;;  %s9676_s21 = sld [smem:[#allocation9_spill]] }
0x12c1   : > { %p26_p10 = scmp.ge.s32.totalorder %s29_s28, 6   ;;  %s9677_s22 = sld [smem:[#allocation10_spill]] }
0x12c2   : > { %s9678_s23 = sld [smem:[#allocation19_spill]]  ;;  %s9679_s24 = sld [smem:[#allocation12_spill]] }
0x12c3   : > { %s9680_s25 = sld [smem:[#allocation13_spill]]  ;;  %s9681_s26 = sld [smem:[#allocation15_spill]] }
0x12c4   : > { %s9682_s27 = sld [smem:[#allocation17_spill]]  ;;  %28 = sbr.rel (!%p26_p10) target bundleno = 13 (0xd), region = 144 }
0x12cb   :  { %5142 = vsyncpa [#allocation6], 1 }
0x12cc   :  { %5144 = vsyncpa [#allocation6 + $0x1], 1 }

</bundles_post_ra>
